<compile_context>
chip_gen: v6e
topology: v6e:2x2x1
jax: 0.10.0
libtpu: 0.0.40
codegen_flags: <defaults>
</compile_context>

<pallas_src>
import numpy as np
import jax
import jax.numpy as jnp
from jax.experimental import pallas as pl
from jax.experimental.pallas import tpu as pltpu

B, CH, FEAT, N = 2, 4, 8, 16          # batch, image channels, dnn hidden feats, H=W=N
LANES_X = B * CH * N                  # 128 : lane layout (b, c, w) for CH-channel slabs
LANES_H = B * FEAT * N                # 256 : lane layout (b, f, w) for FEAT-channel slabs
GAMMA_INTI = 0.8                      # config['gamma_inti']
TAU_INTI = 0.5                        # config['tau_inti']


def _mm(a, b):
    return jnp.dot(a, b, precision=jax.lax.Precision.HIGHEST,
                   preferred_element_type=jnp.float32)


def _vshift(x, d):
    """Rows: out[r] = x[r + d], zero padded at the boundary (d in {-1, +1})."""
    if d == 0:
        return x
    zero = jnp.zeros((abs(d), x.shape[1]), x.dtype)
    if d > 0:
        return jnp.concatenate([x[d:], zero], axis=0)
    return jnp.concatenate([zero, x[:d]], axis=0)


def ured_kernel(gamma_ref, tau_ref, fsm_ref, lm_ref, m1_ref, b1_ref, m2_ref, b2_ref,
                xr_ref, xi_ref, dgr_ref, dgi_ref, outr_ref, outi_ref):
    gamma = gamma_ref[0]
    tau = tau_ref[0]
    fr = fsm_ref[0]                 # (16, 16)  cos
    fi = fsm_ref[1]                 # (16, 16) -sin
    bdr = lm_ref[0]                 # (128, 128) kron(I_8, fr)
    bdi = lm_ref[1]                 # (128, 128) kron(I_8, fi)
    gsel = lm_ref[2]                # (128, 128) per-16-lane-group pick/broadcast
    xr = xr_ref[...]                # (16, 128) = (H, B*CH*W)
    xi = xi_ref[...]

    # ---- Re(ifft2(x)) up to a positive scale (min/max norm is scale invariant)
    tr = _mm(fr, xr) + _mm(fi, xi)              # H-axis transform by conj(F)
    ti = _mm(fr, xi) - _mm(fi, xr)
    yr = _mm(tr, bdr) + _mm(ti, bdi)            # W-axis transform, = N^2*Re(ifft2)

    # ---- tensor_normlize: per-(b,c) min/max over the 16x16 image --------------
    red = jnp.concatenate([jnp.max(yr, axis=0, keepdims=True),
                           -jnp.min(yr, axis=0, keepdims=True)], axis=0)   # (2,128)
    for s in (1, 2, 4, 8):                       # lane max-scan over 16-lane groups
        red = jnp.maximum(red, jnp.roll(red, -s, axis=1))
    stats = _mm(red, gsel)                       # broadcast group value to its lanes
    mx = stats[0:1, :]
    mn = -stats[1:2, :]
    nrm = (yr - mn) / (mx - mn)                  # same NaN behaviour as reference

    # ---- dnn stand-in: conv3x3 (CH->FEAT) + ReLU + conv3x3 (FEAT->CH) ---------
    # TODO(synk): the external `dnn` module is not provided; this deterministic
    # 2-layer conv denoiser stands in for it.
    h = (_mm(_vshift(nrm, -1), m1_ref[0]) + _mm(nrm, m1_ref[1])
         + _mm(_vshift(nrm, 1), m1_ref[2]))
    h = jnp.maximum(h + b1_ref[...], 0.0)        # (16, 256) = (H, B*FEAT*W)
    d = (_mm(_vshift(h, -1), m2_ref[0]) + _mm(h, m2_ref[1])
         + _mm(_vshift(h, 1), m2_ref[2]))
    d = d + b2_ref[...]                          # (16, 128)

    # ---- D = fft2(denoiser);  xnext = x - gamma * (delta_g + tau * (x - D)) ---
    ur = _mm(fr, d)
    ui = _mm(fi, d)
    dre = _mm(ur, bdr) - _mm(ui, bdi)
    dim = _mm(ur, bdi) + _mm(ui, bdr)
    outr_ref[...] = xr - gamma * (dgr_ref[...] + tau * (xr - dre))
    outi_ref[...] = xi - gamma * (dgi_ref[...] + tau * (xi - dim))


def _conv_lane_mats(w, cin, cout):
    """Fold the channel + width mixing of a 3x3 'SAME' conv into 3 banded lane
    matrices: m[ky][(b,cin,w), (b,cout,w')] = w[ky, w-w'+1, cin, cout]."""
    widx = jnp.arange(N)
    band = (widx[None, :, None] - widx[None, None, :] + 1
            == jnp.arange(3)[:, None, None]).astype(jnp.float32)        # (3, N, N)
    eye_b = jnp.eye(B, dtype=jnp.float32)
    m = jnp.einsum('ab,yxcf,xwv->yacwbfv', eye_b, w, band,
                   precision=jax.lax.Precision.HIGHEST)
    return m.reshape(3, B * cin * N, B * cout * N)


def _to_l1(a):       # (B, CH, H, W) -> (H, B*CH*W)
    return jnp.transpose(a, (2, 0, 1, 3)).reshape(N, -1)


def _from_l1(a):     # (H, B*CH*W) -> (B, CH, H, W)
    return jnp.transpose(a.reshape(N, B, CH, N), (1, 2, 0, 3))


def ured_forward(n_ipt, delta_g, w1, b1, w2, b2, gamma, tau):
    xr, xi = n_ipt[..., 0], n_ipt[..., 1]
    dgr, dgi = delta_g[..., 0], delta_g[..., 1]

    # DFT matrices as compile-time constants, stacked into two VMEM inputs.
    k = np.arange(N)
    ang = 2.0 * np.pi * np.outer(k, k) / N
    fr = np.cos(ang).astype(np.float32)
    fi = (-np.sin(ang)).astype(np.float32)
    fsmall = jnp.asarray(np.stack([fr, fi]))                      # (2, 16, 16)
    pick = np.zeros((N, N), np.float32)
    pick[0, :] = 1.0                                              # group start -> group
    eye_g = np.eye(B * CH, dtype=np.float32)
    lane_mats = jnp.asarray(np.stack([np.kron(eye_g, fr),
                                      np.kron(eye_g, fi),
                                      np.kron(eye_g, pick)]))     # (3, 128, 128)

    m1 = _conv_lane_mats(w1, CH, FEAT)                            # (3, 128, 256)
    m2 = _conv_lane_mats(w2, FEAT, CH)                            # (3, 256, 128)
    b1row = jnp.tile(jnp.repeat(b1, N), B)[None, :]               # (1, 256)  (b,f,w)
    b2row = jnp.tile(jnp.repeat(b2, N), B)[None, :]               # (1, 128)  (b,c,w)

    smem = lambda: pl.BlockSpec(memory_space=pltpu.MemorySpace.SMEM)
    vmem = lambda: pl.BlockSpec(memory_space=pltpu.MemorySpace.VMEM)

    outr, outi = pl.pallas_call(
        ured_kernel,
        out_shape=(jax.ShapeDtypeStruct((N, LANES_X), jnp.float32),
                   jax.ShapeDtypeStruct((N, LANES_X), jnp.float32)),
        in_specs=[smem(), smem(), vmem(), vmem(), vmem(), vmem(), vmem(), vmem(),
                  vmem(), vmem(), vmem(), vmem()],
        out_specs=(vmem(), vmem()),
    )(gamma, tau, fsmall, lane_mats, m1, b1row, m2, b2row,
      _to_l1(xr), _to_l1(xi), _to_l1(dgr), _to_l1(dgi))

    return jnp.stack([_from_l1(outr), _from_l1(outi)], axis=-1)


def ured_reference(n_ipt, delta_g, w1, b1, w2, b2, gamma, tau):
    x = n_ipt[..., 0].astype(jnp.complex64) + 1j * n_ipt[..., 1].astype(jnp.complex64)
    dg = delta_g[..., 0].astype(jnp.complex64) + 1j * delta_g[..., 1].astype(jnp.complex64)
    n_real = jnp.real(jnp.fft.ifft2(x, axes=(-2, -1))).astype(jnp.float32)
    mx = jnp.max(n_real, axis=(-2, -1), keepdims=True)
    mn = jnp.min(n_real, axis=(-2, -1), keepdims=True)
    nrm = (n_real - mn) / (mx - mn)
    w1_oihw = jnp.transpose(w1, (3, 2, 0, 1))
    w2_oihw = jnp.transpose(w2, (3, 2, 0, 1))
    h = jax.lax.conv_general_dilated(nrm, w1_oihw, (1, 1), "SAME",
                                     dimension_numbers=("NCHW", "OIHW", "NCHW"),
                                     precision=jax.lax.Precision.HIGHEST)
    h = jnp.maximum(h + b1[None, :, None, None], 0.0)
    d = jax.lax.conv_general_dilated(h, w2_oihw, (1, 1), "SAME",
                                     dimension_numbers=("NCHW", "OIHW", "NCHW"),
                                     precision=jax.lax.Precision.HIGHEST)
    d = d + b2[None, :, None, None]
    D = jnp.fft.fft2(d.astype(jnp.complex64), axes=(-2, -1))
    xsub = tau * (x - D)
    xnext = x - gamma * (dg + xsub)
    return jnp.stack([jnp.real(xnext), jnp.imag(xnext)], axis=-1)


if __name__ == "__main__":
    key = jax.random.PRNGKey(0)
    ks = jax.random.split(key, 6)
    n_ipt = jax.random.normal(ks[0], (B, CH, N, N, 2), jnp.float32)
    # TODO(synk): IDTClass.fgrad_SGD (IDT physics data-fidelity gradient) is not
    # defined in the provided source; delta_g is supplied as a precomputed input.
    delta_g = jax.random.normal(ks[1], (B, CH, N, N, 2), jnp.float32)
    # Deterministic stand-in dnn parameters (shapes: (3,3,Cin,Cout) / (Cout,)).
    w1 = 0.1 * jax.random.normal(ks[2], (3, 3, CH, FEAT), jnp.float32)
    b1 = 0.05 * jax.random.normal(ks[3], (FEAT,), jnp.float32)
    w2 = 0.1 * jax.random.normal(ks[4], (3, 3, FEAT, CH), jnp.float32)
    b2 = 0.05 * jax.random.normal(ks[5], (CH,), jnp.float32)
    gamma = jnp.array([GAMMA_INTI], jnp.float32)
    tau = jnp.array([TAU_INTI], jnp.float32)

    out = ured_forward(n_ipt, delta_g, w1, b1, w2, b2, gamma, tau)
    out = jax.block_until_ready(out)

    ref = ured_reference(n_ipt, delta_g, w1, b1, w2, b2, GAMMA_INTI, TAU_INTI)
    np.testing.assert_allclose(np.asarray(out), np.asarray(ref), rtol=2e-3, atol=2e-2)
    print("KERNEL_OK")
</pallas_src>

<mosaic_0001>
module attributes {stable_mosaic.version = 11 : i64} {
  func.func @ured_kernel(%arg0: memref<1xf32, #tpu.memory_space<smem>>, %arg1: memref<1xf32, #tpu.memory_space<smem>>, %arg2: memref<2x16x16xf32, #tpu.memory_space<vmem>>, %arg3: memref<3x128x128xf32, #tpu.memory_space<vmem>>, %arg4: memref<3x128x256xf32, #tpu.memory_space<vmem>>, %arg5: memref<1x256xf32, #tpu.memory_space<vmem>>, %arg6: memref<3x256x128xf32, #tpu.memory_space<vmem>>, %arg7: memref<1x128xf32, #tpu.memory_space<vmem>>, %arg8: memref<16x128xf32, #tpu.memory_space<vmem>>, %arg9: memref<16x128xf32, #tpu.memory_space<vmem>>, %arg10: memref<16x128xf32, #tpu.memory_space<vmem>>, %arg11: memref<16x128xf32, #tpu.memory_space<vmem>>, %arg12: memref<16x128xf32, #tpu.memory_space<vmem>>, %arg13: memref<16x128xf32, #tpu.memory_space<vmem>>) attributes {dimension_semantics = [], scalar_prefetch = 0 : i64, scratch_operands = 0 : i64, tpu.core_type = #tpu.core_type<tc>} {
    %c0 = arith.constant 0 : index
    %0 = memref.load %arg0[%c0] : memref<1xf32, #tpu.memory_space<smem>>
    %c0_0 = arith.constant 0 : index
    %1 = memref.load %arg1[%c0_0] : memref<1xf32, #tpu.memory_space<smem>>
    %c0_1 = arith.constant 0 : index
    %c0_2 = arith.constant 0 : index
    %c0_3 = arith.constant 0 : index
    %2 = vector.load %arg2[%c0_1, %c0_2, %c0_3] : memref<2x16x16xf32, #tpu.memory_space<vmem>>, vector<1x16x16xf32>
    %3 = vector.shape_cast %2 : vector<1x16x16xf32> to vector<16x16xf32>
    %c1 = arith.constant 1 : index
    %c0_4 = arith.constant 0 : index
    %c0_5 = arith.constant 0 : index
    %4 = vector.load %arg2[%c1, %c0_4, %c0_5] : memref<2x16x16xf32, #tpu.memory_space<vmem>>, vector<1x16x16xf32>
    %5 = vector.shape_cast %4 : vector<1x16x16xf32> to vector<16x16xf32>
    %c0_6 = arith.constant 0 : index
    %c0_7 = arith.constant 0 : index
    %c0_8 = arith.constant 0 : index
    %6 = vector.load %arg3[%c0_6, %c0_7, %c0_8] : memref<3x128x128xf32, #tpu.memory_space<vmem>>, vector<1x128x128xf32>
    %7 = vector.shape_cast %6 : vector<1x128x128xf32> to vector<128x128xf32>
    %c1_9 = arith.constant 1 : index
    %c0_10 = arith.constant 0 : index
    %c0_11 = arith.constant 0 : index
    %8 = vector.load %arg3[%c1_9, %c0_10, %c0_11] : memref<3x128x128xf32, #tpu.memory_space<vmem>>, vector<1x128x128xf32>
    %9 = vector.shape_cast %8 : vector<1x128x128xf32> to vector<128x128xf32>
    %c2 = arith.constant 2 : index
    %c0_12 = arith.constant 0 : index
    %c0_13 = arith.constant 0 : index
    %10 = vector.load %arg3[%c2, %c0_12, %c0_13] : memref<3x128x128xf32, #tpu.memory_space<vmem>>, vector<1x128x128xf32>
    %11 = vector.shape_cast %10 : vector<1x128x128xf32> to vector<128x128xf32>
    %c0_14 = arith.constant 0 : index
    %c0_15 = arith.constant 0 : index
    %12 = vector.load %arg8[%c0_14, %c0_15] : memref<16x128xf32, #tpu.memory_space<vmem>>, vector<16x128xf32>
    %c0_16 = arith.constant 0 : index
    %c0_17 = arith.constant 0 : index
    %13 = vector.load %arg9[%c0_16, %c0_17] : memref<16x128xf32, #tpu.memory_space<vmem>>, vector<16x128xf32>
    %cst = arith.constant dense<0.000000e+00> : vector<16x128xf32>
    %14 = tpu.matmul %3, %12, %cst {dimension_numbers = #tpu.dot_dimension_numbers<[1], [0], [0], [1], [0, 0, 1, 1], [], []>, precision = #tpu.contract_precision<fp32>} : vector<16x16xf32>, vector<16x128xf32>, vector<16x128xf32> -> vector<16x128xf32>
    %cst_18 = arith.constant dense<0.000000e+00> : vector<16x128xf32>
    %15 = tpu.matmul %5, %13, %cst_18 {dimension_numbers = #tpu.dot_dimension_numbers<[1], [0], [0], [1], [0, 0, 1, 1], [], []>, precision = #tpu.contract_precision<fp32>} : vector<16x16xf32>, vector<16x128xf32>, vector<16x128xf32> -> vector<16x128xf32>
    %16 = arith.addf %14, %15 : vector<16x128xf32>
    %cst_19 = arith.constant dense<0.000000e+00> : vector<16x128xf32>
    %17 = tpu.matmul %3, %13, %cst_19 {dimension_numbers = #tpu.dot_dimension_numbers<[1], [0], [0], [1], [0, 0, 1, 1], [], []>, precision = #tpu.contract_precision<fp32>} : vector<16x16xf32>, vector<16x128xf32>, vector<16x128xf32> -> vector<16x128xf32>
    %cst_20 = arith.constant dense<0.000000e+00> : vector<16x128xf32>
    %18 = tpu.matmul %5, %12, %cst_20 {dimension_numbers = #tpu.dot_dimension_numbers<[1], [0], [0], [1], [0, 0, 1, 1], [], []>, precision = #tpu.contract_precision<fp32>} : vector<16x16xf32>, vector<16x128xf32>, vector<16x128xf32> -> vector<16x128xf32>
    %19 = arith.subf %17, %18 : vector<16x128xf32>
    %cst_21 = arith.constant dense<0.000000e+00> : vector<16x128xf32>
    %20 = tpu.matmul %16, %7, %cst_21 {dimension_numbers = #tpu.dot_dimension_numbers<[1], [0], [0], [1], [0, 0, 1, 1], [], []>, precision = #tpu.contract_precision<fp32>} : vector<16x128xf32>, vector<128x128xf32>, vector<16x128xf32> -> vector<16x128xf32>
    %cst_22 = arith.constant dense<0.000000e+00> : vector<16x128xf32>
    %21 = tpu.matmul %19, %9, %cst_22 {dimension_numbers = #tpu.dot_dimension_numbers<[1], [0], [0], [1], [0, 0, 1, 1], [], []>, precision = #tpu.contract_precision<fp32>} : vector<16x128xf32>, vector<128x128xf32>, vector<16x128xf32> -> vector<16x128xf32>
    %22 = arith.addf %20, %21 : vector<16x128xf32>
    %cst_23 = arith.constant dense<0xFF800000> : vector<128xf32>
    %23 = vector.multi_reduction <maximumf>, %22, %cst_23 [0] : vector<16x128xf32> to vector<128xf32>
    %24 = vector.shape_cast %23 : vector<128xf32> to vector<1x128xf32>
    %cst_24 = arith.constant dense<0x7F800000> : vector<128xf32>
    %25 = vector.multi_reduction <minimumf>, %22, %cst_24 [0] : vector<16x128xf32> to vector<128xf32>
    %26 = vector.shape_cast %25 : vector<128xf32> to vector<1x128xf32>
    %cst_25 = arith.constant 0.000000e+00 : f32
    %27 = vector.broadcast %cst_25 : f32 to vector<1x128xf32>
    %28 = arith.subf %27, %26 : vector<1x128xf32>
    %29 = tpu.concatenate %24, %28 in 0 : vector<1x128xf32>, vector<1x128xf32> -> vector<2x128xf32>
    %30 = vector.extract_strided_slice %29 {offsets = [0, 1], sizes = [2, 127], strides = [1, 1]} : vector<2x128xf32> to vector<2x127xf32>
    %31 = vector.extract_strided_slice %29 {offsets = [0, 0], sizes = [2, 1], strides = [1, 1]} : vector<2x128xf32> to vector<2x1xf32>
    %32 = tpu.concatenate %30, %31 in 1 : vector<2x127xf32>, vector<2x1xf32> -> vector<2x128xf32>
    %33 = arith.maximumf %29, %32 : vector<2x128xf32>
    %34 = vector.extract_strided_slice %33 {offsets = [0, 2], sizes = [2, 126], strides = [1, 1]} : vector<2x128xf32> to vector<2x126xf32>
    %35 = vector.extract_strided_slice %33 {offsets = [0, 0], sizes = [2, 2], strides = [1, 1]} : vector<2x128xf32> to vector<2x2xf32>
    %36 = tpu.concatenate %34, %35 in 1 : vector<2x126xf32>, vector<2x2xf32> -> vector<2x128xf32>
    %37 = arith.maximumf %33, %36 : vector<2x128xf32>
    %38 = vector.extract_strided_slice %37 {offsets = [0, 4], sizes = [2, 124], strides = [1, 1]} : vector<2x128xf32> to vector<2x124xf32>
    %39 = vector.extract_strided_slice %37 {offsets = [0, 0], sizes = [2, 4], strides = [1, 1]} : vector<2x128xf32> to vector<2x4xf32>
    %40 = tpu.concatenate %38, %39 in 1 : vector<2x124xf32>, vector<2x4xf32> -> vector<2x128xf32>
    %41 = arith.maximumf %37, %40 : vector<2x128xf32>
    %42 = vector.extract_strided_slice %41 {offsets = [0, 8], sizes = [2, 120], strides = [1, 1]} : vector<2x128xf32> to vector<2x120xf32>
    %43 = vector.extract_strided_slice %41 {offsets = [0, 0], sizes = [2, 8], strides = [1, 1]} : vector<2x128xf32> to vector<2x8xf32>
    %44 = tpu.concatenate %42, %43 in 1 : vector<2x120xf32>, vector<2x8xf32> -> vector<2x128xf32>
    %45 = arith.maximumf %41, %44 : vector<2x128xf32>
    %cst_26 = arith.constant dense<0.000000e+00> : vector<2x128xf32>
    %46 = tpu.matmul %45, %11, %cst_26 {dimension_numbers = #tpu.dot_dimension_numbers<[1], [0], [0], [1], [0, 0, 1, 1], [], []>, precision = #tpu.contract_precision<fp32>} : vector<2x128xf32>, vector<128x128xf32>, vector<2x128xf32> -> vector<2x128xf32>
    %47 = vector.extract_strided_slice %46 {offsets = [0, 0], sizes = [1, 128], strides = [1, 1]} : vector<2x128xf32> to vector<1x128xf32>
    %48 = vector.extract_strided_slice %46 {offsets = [1, 0], sizes = [1, 128], strides = [1, 1]} : vector<2x128xf32> to vector<1x128xf32>
    %cst_27 = arith.constant 0.000000e+00 : f32
    %49 = vector.broadcast %cst_27 : f32 to vector<1x128xf32>
    %50 = arith.subf %49, %48 : vector<1x128xf32>
    %51 = vector.broadcast %50 : vector<1x128xf32> to vector<16x128xf32>
    %52 = arith.subf %22, %51 : vector<16x128xf32>
    %53 = arith.subf %47, %50 : vector<1x128xf32>
    %54 = vector.broadcast %53 : vector<1x128xf32> to vector<16x128xf32>
    %55 = arith.divf %52, %54 : vector<16x128xf32>
    %cst_28 = arith.constant 0.000000e+00 : f32
    %56 = vector.broadcast %cst_28 : f32 to vector<1x128xf32>
    %57 = vector.extract_strided_slice %55 {offsets = [0, 0], sizes = [15, 128], strides = [1, 1]} : vector<16x128xf32> to vector<15x128xf32>
    %58 = tpu.concatenate %56, %57 in 0 : vector<1x128xf32>, vector<15x128xf32> -> vector<16x128xf32>
    %c0_29 = arith.constant 0 : index
    %c0_30 = arith.constant 0 : index
    %c0_31 = arith.constant 0 : index
    %59 = vector.load %arg4[%c0_29, %c0_30, %c0_31] : memref<3x128x256xf32, #tpu.memory_space<vmem>>, vector<1x128x256xf32>
    %60 = vector.shape_cast %59 : vector<1x128x256xf32> to vector<128x256xf32>
    %cst_32 = arith.constant dense<0.000000e+00> : vector<16x256xf32>
    %61 = tpu.matmul %58, %60, %cst_32 {dimension_numbers = #tpu.dot_dimension_numbers<[1], [0], [0], [1], [0, 0, 1, 1], [], []>, precision = #tpu.contract_precision<fp32>} : vector<16x128xf32>, vector<128x256xf32>, vector<16x256xf32> -> vector<16x256xf32>
    %c1_33 = arith.constant 1 : index
    %c0_34 = arith.constant 0 : index
    %c0_35 = arith.constant 0 : index
    %62 = vector.load %arg4[%c1_33, %c0_34, %c0_35] : memref<3x128x256xf32, #tpu.memory_space<vmem>>, vector<1x128x256xf32>
    %63 = vector.shape_cast %62 : vector<1x128x256xf32> to vector<128x256xf32>
    %cst_36 = arith.constant dense<0.000000e+00> : vector<16x256xf32>
    %64 = tpu.matmul %55, %63, %cst_36 {dimension_numbers = #tpu.dot_dimension_numbers<[1], [0], [0], [1], [0, 0, 1, 1], [], []>, precision = #tpu.contract_precision<fp32>} : vector<16x128xf32>, vector<128x256xf32>, vector<16x256xf32> -> vector<16x256xf32>
    %65 = arith.addf %61, %64 : vector<16x256xf32>
    %cst_37 = arith.constant 0.000000e+00 : f32
    %66 = vector.broadcast %cst_37 : f32 to vector<1x128xf32>
    %67 = vector.extract_strided_slice %55 {offsets = [1, 0], sizes = [15, 128], strides = [1, 1]} : vector<16x128xf32> to vector<15x128xf32>
    %68 = tpu.concatenate %67, %66 in 0 : vector<15x128xf32>, vector<1x128xf32> -> vector<16x128xf32>
    %c2_38 = arith.constant 2 : index
    %c0_39 = arith.constant 0 : index
    %c0_40 = arith.constant 0 : index
    %69 = vector.load %arg4[%c2_38, %c0_39, %c0_40] : memref<3x128x256xf32, #tpu.memory_space<vmem>>, vector<1x128x256xf32>
    %70 = vector.shape_cast %69 : vector<1x128x256xf32> to vector<128x256xf32>
    %cst_41 = arith.constant dense<0.000000e+00> : vector<16x256xf32>
    %71 = tpu.matmul %68, %70, %cst_41 {dimension_numbers = #tpu.dot_dimension_numbers<[1], [0], [0], [1], [0, 0, 1, 1], [], []>, precision = #tpu.contract_precision<fp32>} : vector<16x128xf32>, vector<128x256xf32>, vector<16x256xf32> -> vector<16x256xf32>
    %72 = arith.addf %65, %71 : vector<16x256xf32>
    %c0_42 = arith.constant 0 : index
    %c0_43 = arith.constant 0 : index
    %73 = vector.load %arg5[%c0_42, %c0_43] : memref<1x256xf32, #tpu.memory_space<vmem>>, vector<1x256xf32>
    %74 = vector.broadcast %73 : vector<1x256xf32> to vector<16x256xf32>
    %75 = arith.addf %72, %74 : vector<16x256xf32>
    %cst_44 = arith.constant 0.000000e+00 : f32
    %76 = vector.broadcast %cst_44 : f32 to vector<16x256xf32>
    %77 = arith.maximumf %75, %76 : vector<16x256xf32>
    %cst_45 = arith.constant 0.000000e+00 : f32
    %78 = vector.broadcast %cst_45 : f32 to vector<1x256xf32>
    %79 = vector.extract_strided_slice %77 {offsets = [0, 0], sizes = [15, 256], strides = [1, 1]} : vector<16x256xf32> to vector<15x256xf32>
    %80 = tpu.concatenate %78, %79 in 0 : vector<1x256xf32>, vector<15x256xf32> -> vector<16x256xf32>
    %c0_46 = arith.constant 0 : index
    %c0_47 = arith.constant 0 : index
    %c0_48 = arith.constant 0 : index
    %81 = vector.load %arg6[%c0_46, %c0_47, %c0_48] : memref<3x256x128xf32, #tpu.memory_space<vmem>>, vector<1x256x128xf32>
    %82 = vector.shape_cast %81 : vector<1x256x128xf32> to vector<256x128xf32>
    %cst_49 = arith.constant dense<0.000000e+00> : vector<16x128xf32>
    %83 = tpu.matmul %80, %82, %cst_49 {dimension_numbers = #tpu.dot_dimension_numbers<[1], [0], [0], [1], [0, 0, 1, 1], [], []>, precision = #tpu.contract_precision<fp32>} : vector<16x256xf32>, vector<256x128xf32>, vector<16x128xf32> -> vector<16x128xf32>
    %c1_50 = arith.constant 1 : index
    %c0_51 = arith.constant 0 : index
    %c0_52 = arith.constant 0 : index
    %84 = vector.load %arg6[%c1_50, %c0_51, %c0_52] : memref<3x256x128xf32, #tpu.memory_space<vmem>>, vector<1x256x128xf32>
    %85 = vector.shape_cast %84 : vector<1x256x128xf32> to vector<256x128xf32>
    %cst_53 = arith.constant dense<0.000000e+00> : vector<16x128xf32>
    %86 = tpu.matmul %77, %85, %cst_53 {dimension_numbers = #tpu.dot_dimension_numbers<[1], [0], [0], [1], [0, 0, 1, 1], [], []>, precision = #tpu.contract_precision<fp32>} : vector<16x256xf32>, vector<256x128xf32>, vector<16x128xf32> -> vector<16x128xf32>
    %87 = arith.addf %83, %86 : vector<16x128xf32>
    %cst_54 = arith.constant 0.000000e+00 : f32
    %88 = vector.broadcast %cst_54 : f32 to vector<1x256xf32>
    %89 = vector.extract_strided_slice %77 {offsets = [1, 0], sizes = [15, 256], strides = [1, 1]} : vector<16x256xf32> to vector<15x256xf32>
    %90 = tpu.concatenate %89, %88 in 0 : vector<15x256xf32>, vector<1x256xf32> -> vector<16x256xf32>
    %c2_55 = arith.constant 2 : index
    %c0_56 = arith.constant 0 : index
    %c0_57 = arith.constant 0 : index
    %91 = vector.load %arg6[%c2_55, %c0_56, %c0_57] : memref<3x256x128xf32, #tpu.memory_space<vmem>>, vector<1x256x128xf32>
    %92 = vector.shape_cast %91 : vector<1x256x128xf32> to vector<256x128xf32>
    %cst_58 = arith.constant dense<0.000000e+00> : vector<16x128xf32>
    %93 = tpu.matmul %90, %92, %cst_58 {dimension_numbers = #tpu.dot_dimension_numbers<[1], [0], [0], [1], [0, 0, 1, 1], [], []>, precision = #tpu.contract_precision<fp32>} : vector<16x256xf32>, vector<256x128xf32>, vector<16x128xf32> -> vector<16x128xf32>
    %94 = arith.addf %87, %93 : vector<16x128xf32>
    %c0_59 = arith.constant 0 : index
    %c0_60 = arith.constant 0 : index
    %95 = vector.load %arg7[%c0_59, %c0_60] : memref<1x128xf32, #tpu.memory_space<vmem>>, vector<1x128xf32>
    %96 = vector.broadcast %95 : vector<1x128xf32> to vector<16x128xf32>
    %97 = arith.addf %94, %96 : vector<16x128xf32>
    %cst_61 = arith.constant dense<0.000000e+00> : vector<16x128xf32>
    %98 = tpu.matmul %3, %97, %cst_61 {dimension_numbers = #tpu.dot_dimension_numbers<[1], [0], [0], [1], [0, 0, 1, 1], [], []>, precision = #tpu.contract_precision<fp32>} : vector<16x16xf32>, vector<16x128xf32>, vector<16x128xf32> -> vector<16x128xf32>
    %cst_62 = arith.constant dense<0.000000e+00> : vector<16x128xf32>
    %99 = tpu.matmul %5, %97, %cst_62 {dimension_numbers = #tpu.dot_dimension_numbers<[1], [0], [0], [1], [0, 0, 1, 1], [], []>, precision = #tpu.contract_precision<fp32>} : vector<16x16xf32>, vector<16x128xf32>, vector<16x128xf32> -> vector<16x128xf32>
    %cst_63 = arith.constant dense<0.000000e+00> : vector<16x128xf32>
    %100 = tpu.matmul %98, %7, %cst_63 {dimension_numbers = #tpu.dot_dimension_numbers<[1], [0], [0], [1], [0, 0, 1, 1], [], []>, precision = #tpu.contract_precision<fp32>} : vector<16x128xf32>, vector<128x128xf32>, vector<16x128xf32> -> vector<16x128xf32>
    %cst_64 = arith.constant dense<0.000000e+00> : vector<16x128xf32>
    %101 = tpu.matmul %99, %9, %cst_64 {dimension_numbers = #tpu.dot_dimension_numbers<[1], [0], [0], [1], [0, 0, 1, 1], [], []>, precision = #tpu.contract_precision<fp32>} : vector<16x128xf32>, vector<128x128xf32>, vector<16x128xf32> -> vector<16x128xf32>
    %102 = arith.subf %100, %101 : vector<16x128xf32>
    %cst_65 = arith.constant dense<0.000000e+00> : vector<16x128xf32>
    %103 = tpu.matmul %98, %9, %cst_65 {dimension_numbers = #tpu.dot_dimension_numbers<[1], [0], [0], [1], [0, 0, 1, 1], [], []>, precision = #tpu.contract_precision<fp32>} : vector<16x128xf32>, vector<128x128xf32>, vector<16x128xf32> -> vector<16x128xf32>
    %cst_66 = arith.constant dense<0.000000e+00> : vector<16x128xf32>
    %104 = tpu.matmul %99, %7, %cst_66 {dimension_numbers = #tpu.dot_dimension_numbers<[1], [0], [0], [1], [0, 0, 1, 1], [], []>, precision = #tpu.contract_precision<fp32>} : vector<16x128xf32>, vector<128x128xf32>, vector<16x128xf32> -> vector<16x128xf32>
    %105 = arith.addf %103, %104 : vector<16x128xf32>
    %c0_67 = arith.constant 0 : index
    %c0_68 = arith.constant 0 : index
    %106 = vector.load %arg10[%c0_67, %c0_68] : memref<16x128xf32, #tpu.memory_space<vmem>>, vector<16x128xf32>
    %107 = arith.subf %12, %102 : vector<16x128xf32>
    %108 = vector.broadcast %1 : f32 to vector<16x128xf32>
    %109 = arith.mulf %108, %107 : vector<16x128xf32>
    %110 = arith.addf %106, %109 : vector<16x128xf32>
    %111 = vector.broadcast %0 : f32 to vector<16x128xf32>
    %112 = arith.mulf %111, %110 : vector<16x128xf32>
    %113 = arith.subf %12, %112 : vector<16x128xf32>
    %c0_69 = arith.constant 0 : index
    %c0_70 = arith.constant 0 : index
    %114 = vector.load %arg12[%c0_69, %c0_70] : memref<16x128xf32, #tpu.memory_space<vmem>>, vector<16x128xf32>
    tpu.vector_store %arg12[%c0_69, %c0_70], %113 {strides = array<i32>} : memref<16x128xf32, #tpu.memory_space<vmem>>, vector<16x128xf32>,
    %c0_71 = arith.constant 0 : index
    %c0_72 = arith.constant 0 : index
    %115 = vector.load %arg11[%c0_71, %c0_72] : memref<16x128xf32, #tpu.memory_space<vmem>>, vector<16x128xf32>
    %116 = arith.subf %13, %105 : vector<16x128xf32>
    %117 = vector.broadcast %1 : f32 to vector<16x128xf32>
    %118 = arith.mulf %117, %116 : vector<16x128xf32>
    %119 = arith.addf %115, %118 : vector<16x128xf32>
    %120 = vector.broadcast %0 : f32 to vector<16x128xf32>
    %121 = arith.mulf %120, %119 : vector<16x128xf32>
    %122 = arith.subf %13, %121 : vector<16x128xf32>
    %c0_73 = arith.constant 0 : index
    %c0_74 = arith.constant 0 : index
    %123 = vector.load %arg13[%c0_73, %c0_74] : memref<16x128xf32, #tpu.memory_space<vmem>>, vector<16x128xf32>
    tpu.vector_store %arg13[%c0_73, %c0_74], %122 {strides = array<i32>} : memref<16x128xf32, #tpu.memory_space<vmem>>, vector<16x128xf32>,
    return
  }
}

</mosaic_0001>

<bundles_post_ra>
// kernel: tpu_custom_call.1
= control target key start
LH: loop header
LB: loop body
LE: loop exit
PB: predicated region body
PF: predicated region fallthrough
CT: control target
= control target key end

     0   :  { %21 = vsyncpa [#allocation5], 0  ;;  %s23545_s0 = inlined_call_operand.<no memory space> [shape: f32[1], index: 0, kind: input, shape index: {}]   ;;  %s23546_s1 = inlined_call_operand.<no memory space> [shape: f32[1], index: 1, kind: input, shape index: {}]   ;;  %s23547_s2 = inlined_call_operand.hbm [shape: f32[2,16,16], index: 2, kind: input, shape index: {}]   ;;  %s23548_s3 = inlined_call_operand.hbm [shape: f32[3,128,128], index: 3, kind: input, shape index: {}]   ;;  %s23549_s4 = inlined_call_operand.hbm [shape: f32[3,128,256], index: 4, kind: input, shape index: {}]   ;;  %s23550_s5 = inlined_call_operand.hbm [shape: f32[1,256], index: 5, kind: input, shape index: {}]   ;;  %s23551_s6 = inlined_call_operand.hbm [shape: f32[3,256,128], index: 6, kind: input, shape index: {}]   ;;  %s23552_s7 = inlined_call_operand.hbm [shape: f32[1,128], index: 7, kind: input, shape index: {}]   ;;  %s23553_s8 = inlined_call_operand.hbm [shape: f32[16,128], index: 8, kind: input, shape index: {}]   ;;  %s23554_s9 = inlined_call_operand.vmem [shape: f32[16,128], index: 9, kind: input, shape index: {}]   ;;  %s23555_s10 = inlined_call_operand.hbm [shape: f32[16,128], index: 10, kind: input, shape index: {}]   ;;  %s23556_s11 = inlined_call_operand.hbm [shape: f32[16,128], index: 11, kind: input, shape index: {}]   ;;  %s23557_s12 = inlined_call_operand.hbm [shape: f32[16,128], index: 12, kind: output, shape index: {0}]   ;;  %s23558_s13 = inlined_call_operand.hbm [shape: f32[16,128], index: 13, kind: output, shape index: {1}]  }
   0x1   :  { %22 = vsyncpa [#allocation8], 0 }
   0x2   :  { %23 = vsyncpa [#allocation11], 0 }
   0x3   :  { %24 = vsyncpa [#allocation14], 0 }
   0x4   :  { %25 = vsyncpa [#allocation17], 0 }
   0x5   :  { %26 = vsyncpa [#allocation6], 0 }
   0x6   :  { %27 = vsyncpa [#allocation21], 0  ;;  %s17424_s25 = smov [#allocation7]   ;;  %s17425_s27 = smov [#allocation10]  }
   0x7   :  { %s49_s26 = sshll.u32 %s17424_s25, 4  ;;  %s74_s28 = sshll.u32 %s17425_s27, 4  ;;  %s50_s26 = int_to_ptr.vmem [resolvable:$true] %s49_s26  ;;  %s75_s28 = int_to_ptr.vmem [resolvable:$true] %s74_s28 }
   0x8   :  { %s17198_s29 = scalar_lea.vmem %s50_s26, 6144  ;;  %p17203_p1 = scmp.lt.s32.totalorder %s50_s26, %s50_s26 }
   0x9   :  { %p17199_p0 = scmp.ne.s32.totalorder %s50_s26, %s17198_s29  ;;  %p17204_p2 = scmp.lt.s32.totalorder %s17198_s29, %s17198_s29 }
   0xb   :  { %p17205_p3 = por %p17204_p2, %p17203_p1 }
   0xd   :  { %p17206_p4 = pnand %p17205_p3, %p17199_p0 }
   0xf   :  { %17209 = shalt.err (!%p17206_p4)
}
  0x10   :  { %s17426_s30 = smov 128   ;;  %s17427_s14 = smov 8  }
  0x11   :  { %55 = dma.hbm_to_vmem [thread:$0]  %s23548_s3, 6144, %s50_s26, [#allocation8], %s17426_s30, %s17426_s30, %s17427_s14  }
  0x12   :  { %s17218_s17 = scalar_lea.vmem %s75_s28, 32  ;;  %p17223_p6 = scmp.lt.s32.totalorder %s75_s28, %s75_s28 }
  0x13   :  { %p17219_p5 = scmp.ne.s32.totalorder %s75_s28, %s17218_s17  ;;  %p17224_p7 = scmp.lt.s32.totalorder %s17218_s17, %s17218_s17 }
  0x15   :  { %p17225_p8 = por %p17224_p7, %p17223_p6 }
  0x17   :  { %p17226_p9 = pnand %p17225_p8, %p17219_p5 }
  0x19   :  { %17229 = shalt.err (!%p17226_p9)
}
  0x1a   :  { %77 = dma.hbm_to_vmem [thread:$0]  %s23550_s5, 32, %s75_s28, [#allocation11]  }
  0x1b   :  { %s17428_s20 = smov [#allocation13]   ;;  %s17429_s22 = smov [#allocation16]  }
  0x1c   :  { %s96_s21 = sshll.u32 %s17428_s20, 4  ;;  %s119_s23 = sshll.u32 %s17429_s22, 4  ;;  %s97_s21 = int_to_ptr.vmem [resolvable:$true] %s96_s21  ;;  %s120_s23 = int_to_ptr.vmem [resolvable:$true] %s119_s23 }
  0x1d   :  { %s17238_s24 = scalar_lea.vmem %s97_s21, 16  ;;  %s17242_s3 = scalar_lea.vmem %s97_s21, 32 }
  0x1e   :  { %p17239_p10 = scmp.ne.s32.totalorder %s97_s21, %s17238_s24  ;;  %p17243_p11 = scmp.lt.s32.totalorder %s97_s21, %s97_s21 }
  0x1f   :  { %p17244_p12 = scmp.lt.s32.totalorder %s17242_s3, %s17238_s24 }
  0x21   :  { %p17245_p13 = por %p17244_p12, %p17243_p11 }
  0x23   :  { %p17246_p0 = pnand %p17245_p13, %p17239_p10 }
  0x25   :  { %17249 = shalt.err (!%p17246_p0)
}
  0x26   :  { %99 = dma.hbm_to_vmem [thread:$0]  %s23552_s7, 16, %s97_s21, [#allocation14]  }
  0x27   :  { %s17258_s27 = scalar_lea.vmem %s120_s23, 256  ;;  %p17263_p2 = scmp.lt.s32.totalorder %s120_s23, %s120_s23 }
  0x28   :  { %p17259_p1 = scmp.ne.s32.totalorder %s120_s23, %s17258_s27  ;;  %p17264_p3 = scmp.lt.s32.totalorder %s17258_s27, %s17258_s27 }
  0x2a   :  { %p17265_p4 = por %p17264_p3, %p17263_p2 }
  0x2c   :  { %p17266_p5 = pnand %p17265_p4, %p17259_p1 }
  0x2e   :  { %17269 = shalt.err (!%p17266_p5)
}
  0x2f   :  { %125 = dma.hbm_to_vmem [thread:$0]  %s23555_s10, 256, %s120_s23, [#allocation17], %s17426_s30, %s17426_s30, %s17427_s14  }
  0x30   :  { %s17430_s29 = smov [#allocation4]   ;;  %s17431_s16 = smov [#allocation9]  }
  0x31   :  { %s37_s15 = sshll.u32 %s17430_s29, 4  ;;  %s61_s17 = sshll.u32 %s17431_s16, 4  ;;  %s38_s15 = int_to_ptr.vmem [resolvable:$true] %s37_s15  ;;  %s62_s17 = int_to_ptr.vmem [resolvable:$true] %s61_s17 }
  0x32   :  { %s17278_s7 = scalar_lea.vmem %s38_s15, 512  ;;  %p17283_p7 = scmp.lt.s32.totalorder %s38_s15, %s38_s15 }
  0x33   :  { %p17279_p6 = scmp.ne.s32.totalorder %s38_s15, %s17278_s7  ;;  %p17284_p8 = scmp.lt.s32.totalorder %s17278_s7, %s17278_s7 }
  0x35   :  { %p17285_p9 = por %p17284_p8, %p17283_p7 }
  0x37   :  { %p17286_p10 = pnand %p17285_p9, %p17279_p6 }
  0x39   :  { %17289 = shalt.err (!%p17286_p10)
}
  0x3a   :  { %43 = dma.hbm_to_vmem [thread:$0]  %s23547_s2, 512, %s38_s15, [#allocation5], %s17426_s30, %s17426_s30, %s17427_s14  }
  0x3b   :  { %s17298_s10 = scalar_lea.vmem %s62_s17, 12288  ;;  %p17303_p12 = scmp.lt.s32.totalorder %s62_s17, %s62_s17 }
  0x3c   :  { %p17299_p11 = scmp.ne.s32.totalorder %s62_s17, %s17298_s10  ;;  %p17304_p13 = scmp.lt.s32.totalorder %s17298_s10, %s17298_s10 }
  0x3e   :  { %p17305_p0 = por %p17304_p13, %p17303_p12 }
  0x40   :  { %p17306_p1 = pnand %p17305_p0, %p17299_p11 }
  0x42   :  { %17309 = shalt.err (!%p17306_p1)
}
  0x43   :  { %s17432_s20 = smov 256   ;;  %s17433_s21 = smov 16  }
  0x44   :  { %67 = dma.hbm_to_vmem [thread:$0]  %s23549_s4, 12288, %s62_s17, [#allocation8], %s17432_s20, %s17432_s20, %s17433_s21  }
  0x45   :  { %s17434_s24 = smov [#allocation12]   ;;  %s17435_s25 = smov [#allocation15]  }
  0x46   :  { %s83_s3 = sshll.u32 %s17434_s24, 4  ;;  %s105_s26 = sshll.u32 %s17435_s25, 4  ;;  %s84_s3 = int_to_ptr.vmem [resolvable:$true] %s83_s3  ;;  %s106_s26 = int_to_ptr.vmem [resolvable:$true] %s105_s26 }
  0x47   :  { %s17318_s2 = scalar_lea.vmem %s84_s3, 12288  ;;  %p17323_p3 = scmp.lt.s32.totalorder %s84_s3, %s84_s3 }
  0x48   :  { %p17319_p2 = scmp.ne.s32.totalorder %s84_s3, %s17318_s2  ;;  %p17324_p4 = scmp.lt.s32.totalorder %s17318_s2, %s17318_s2 }
  0x4a   :  { %p17325_p5 = por %p17324_p4, %p17323_p3 }
  0x4c   :  { %p17326_p6 = pnand %p17325_p5, %p17319_p2 }
  0x4e   :  { %17329 = shalt.err (!%p17326_p6)
}
  0x4f   :  { %89 = dma.hbm_to_vmem [thread:$0]  %s23551_s6, 12288, %s84_s3, [#allocation11], %s17426_s30, %s17426_s30, %s17427_s14  }
  0x50   :  { %s17338_s4 = scalar_lea.vmem %s106_s26, 256  ;;  %p17343_p8 = scmp.lt.s32.totalorder %s106_s26, %s106_s26 }
  0x51   :  { %p17339_p7 = scmp.ne.s32.totalorder %s106_s26, %s17338_s4  ;;  %p17344_p9 = scmp.lt.s32.totalorder %s17338_s4, %s17338_s4 }
  0x53   :  { %p17345_p10 = por %p17344_p9, %p17343_p8 }
  0x55   :  { %p17346_p11 = pnand %p17345_p10, %p17339_p7 }
  0x57   :  { %17349 = shalt.err (!%p17346_p11)
}
  0x58   :  { %111 = dma.hbm_to_vmem [thread:$0]  %s23553_s8, 256, %s106_s26, [#allocation14], %s17426_s30, %s17426_s30, %s17427_s14  }
  0x59   :  { %s17436_s15 = smov [#allocation18]  }
  0x5a   :  { %s131_s16 = sshll.u32 %s17436_s15, 4  ;;  %s132_s16 = int_to_ptr.vmem [resolvable:$true] %s131_s16 }
  0x5b   :  { %s17358_s17 = scalar_lea.vmem %s132_s16, 256  ;;  %p17363_p13 = scmp.lt.s32.totalorder %s132_s16, %s132_s16 }
  0x5c   :  { %p17359_p12 = scmp.ne.s32.totalorder %s132_s16, %s17358_s17  ;;  %p17364_p0 = scmp.lt.s32.totalorder %s17358_s17, %s17358_s17 }
  0x5e   :  { %p17365_p1 = por %p17364_p0, %p17363_p13 }
  0x60   :  { %p17366_p2 = pnand %p17365_p1, %p17359_p12 }
  0x62   :  { %17369 = shalt.err (!%p17366_p2)
}
  0x63   :  { %137 = dma.hbm_to_vmem [thread:$0]  %s23556_s11, 256, %s132_s16, [#allocation17], %s17426_s30, %s17426_s30, %s17427_s14  }
  0x64   :  { %17410 = dma.done.wait [#allocation5], 512  }
  0x65   :  { %17411 = vsyncadd [#allocation5], 4294966784 }
  0x66   :  { %17412 = dma.done.wait [#allocation8], 18432  }
  0x67   :  { %17413 = vsyncadd [#allocation8], 4294948864 }
  0x68   :  { %17414 = dma.done.wait [#allocation11], 12320  }
  0x69   :  { %17415 = vsyncadd [#allocation11], 4294954976 }
  0x6a   :  { %17416 = dma.done.wait [#allocation14], 272  }
  0x6b   :  { %17417 = vsyncadd [#allocation14], 4294967024 }
  0x6c   :  { %17418 = dma.done.wait [#allocation17], 512  }
  0x6d   :  { %17419 = vsyncadd [#allocation17], 4294966784  ;;  %vm226_vm0 = vcmask 130048   ;;  %v225_v0 = vld [vmem:[%s23554_s9 + $0x8] sm:$0xff]  ;;  %v224_v1 = vld [vmem:[%s23554_s9] sm:$0xff]  ;;  %vm3632_vm1 = vcmask 1040384  }
  0x6e   :  { %v170_v2 = vld [vmem:[#allocation4 + $0x10] sm:$0xff]  ;;  %v17566_v3 = vand.u32 4294901760, %v225_v0  ;;  %v17568_v4 = vand.u32 4294901760, %v224_v1  ;;  %v171_v6 = vld [vmem:[#allocation4 + $0x18] sm:$0xff]  ;;  %v167_v12 = vld [vmem:[#allocation4] sm:$0xff]  ;;  %s17437_s11 = smov 127  }
  0x6f   :  { %v228_v5 = vsel %vm226_vm0, %v170_v2, 0  ;;  %v231_v8 = vsel %vm226_vm0, %v171_v6, 0  ;;  %v168_v14 = vld [vmem:[#allocation4 + $0x8] sm:$0xff]  ;;  %v736_v20 = vsel %vm226_vm0, %v167_v12, 0  ;;  %v204_v52 = vld [vmem:[#allocation7 + $0xf8] sm:$0xff]  ;;  %v203_v54 = vld [vmem:[#allocation7 + $0xf0] sm:$0xff] }
  0x70   :  { %v17571_v7 = vand.u32 4294901760, %v228_v5  ;;  %15441 = vmatprep.subr.mxu0 %v17566_v3  ;;  %v17576_v9 = vsub.f32 %v225_v0, %v17566_v3  ;;  %v17578_v10 = vand.u32 4294901760, %v231_v8  ;;  %v17581_v11 = vsub.f32 %v224_v1, %v17568_v4  ;;  %v223_v18 = vld [vmem:[#allocation15 + $0x8] sm:$0xff]  ;;  %v222_v24 = vld [vmem:[#allocation15] sm:$0xff]  ;;  %v200_v2 = vld [vmem:[#allocation7 + $0xd8] sm:$0xff]  ;;  %s17438_s20 = smov 126  }
  0x71   :  { %15442 = vmatpush3.msra.mxu0 %v17566_v3  ;;  %v739_v25 = vsel %vm226_vm0, %v168_v14, 0  ;;  %v17614_v27 = vand.u32 4294901760, %v223_v18  ;;  %v17622_v31 = vand.u32 4294901760, %v736_v20  ;;  %v17626_v33 = vand.u32 4294901760, %v222_v24  ;;  %v202_v57 = vld [vmem:[#allocation7 + $0xe8] sm:$0xff]  ;;  %v201_v61 = vld [vmem:[#allocation7 + $0xe0] sm:$0xff] }
  0x72   :  { %24461 = vst [vmem:[#allocation29_spill] sm:$0xff] %v17571_v7  ;;  %24462 = vst [vmem:[#allocation30_spill] sm:$0xff] %v17578_v10  ;;  %v17585_v13 = vsub.f32 %v228_v5, %v17571_v7  ;;  %15452 = vmatprep.mubr.f32.mxu1 %v17571_v7  ;;  %15443 = vmatprep.subr.mxu0 %v17568_v4  ;;  %v17590_v15 = vand.u32 4294901760, %v17576_v9  ;;  %v17593_v16 = vsub.f32 %v231_v8, %v17578_v10  ;;  %s17440_s21 = smov 124   ;;  %vm17441_vm2 = vmmov 0   ;;  %s17442_s22 = smov 120  }
  0x73   :  { %v17596_v17 = vand.u32 4294901760, %v17581_v11  ;;  %15444 = vmatpush3.msra.mxu0 %v17568_v4  ;;  %24467 = vst [vmem:[#allocation35_spill] sm:$0xff] %v17622_v31  ;;  %v17628_v34 = vand.u32 4294901760, %v739_v25  ;;  %v17636_v36 = vsub.f32 %v223_v18, %v17614_v27  ;;  %v17641_v37 = vsub.f32 %v736_v20, %v17622_v31  ;;  %v198_v18 = vld [vmem:[#allocation7 + $0xc8] sm:$0xff]  ;;  %s17443_s25 = smov [#allocation19]  }
  0x74   :  { %24463 = vst [vmem:[#allocation31_spill] sm:$0xff] %v17585_v13  ;;  %24464 = vst [vmem:[#allocation32_spill] sm:$0xff] %v17593_v16  ;;  %v17600_v19 = vand.u32 4294901760, %v17585_v13  ;;  %v352_v21 = vsub.f32 %v17576_v9, %v17590_v15  ;;  %v17606_v22 = vand.u32 4294901760, %v17593_v16  ;;  %15455 = vmatprep.subr.mxu0 %v17576_v9  ;;  %v17649_v39 = vsub.f32 %v222_v24, %v17626_v33  ;;  %s13830_s26 = sshll.u32 %s17443_s25, 4  ;;  %s13831_s26 = int_to_ptr.vmem [resolvable:$true] %s13830_s26 }
  0x75   :  { %v359_v23 = vsub.f32 %v17581_v11, %v17596_v17  ;;  %24469 = vst [vmem:[#allocation37_spill] sm:$0xff] %v17628_v34  ;;  %24471 = vst [vmem:[#allocation39_spill] sm:$0xff] %v17641_v37  ;;  %v17646_v38 = vsub.f32 %v739_v25, %v17628_v34  ;;  %v17656_v40 = vand.u32 4294901760, %v17636_v36  ;;  %v17661_v41 = vand.u32 4294901760, %v17641_v37  ;;  %s17370_s2 = scalar_lea.vmem %s13831_s26, 256  ;;  %p17375_p4 = scmp.lt.s32.totalorder %s13831_s26, %s13831_s26 }
  0x76   :  { %24465 = vst [vmem:[#allocation33_spill] sm:$0xff] %v17600_v19  ;;  %24466 = vst [vmem:[#allocation34_spill] sm:$0xff] %v17606_v22  ;;  %v303_v26 = vsub.f32 %v17585_v13, %v17600_v19  ;;  %v17616_v28 = vand.u32 4294901760, %v352_v21  ;;  %v313_v29 = vsub.f32 %v17593_v16, %v17606_v22  ;;  %v17669_v43 = vand.u32 4294901760, %v17649_v39  ;;  %p17371_p3 = scmp.ne.s32.totalorder %s13831_s26, %s17370_s2  ;;  %p17376_p5 = scmp.lt.s32.totalorder %s17370_s2, %s17370_s2 }
  0x77   :  { %v17620_v30 = vand.u32 4294901760, %v359_v23  ;;  %24472 = vst [vmem:[#allocation40_spill] sm:$0xff] %v17646_v38  ;;  %24473 = vst [vmem:[#allocation41_spill] sm:$0xff] %v17661_v41  ;;  %v17666_v42 = vand.u32 4294901760, %v17646_v38  ;;  %v860_v44 = vsub.f32 %v17636_v36, %v17656_v40  ;;  %v811_v45 = vsub.f32 %v17641_v37, %v17661_v41 }
  0x78   :  { %v17624_v32 = vand.u32 4294901760, %v303_v26  ;;  %15448 = vmatprep.subr.mxu1 %v17616_v28  ;;  %v17631_v35 = vand.u32 4294901760, %v313_v29  ;;  %v867_v47 = vsub.f32 %v17649_v39, %v17669_v43  ;;  %v17810_v53 = vand.u32 4294901760, %v204_v52  ;;  %v197_v26 = vld [vmem:[#allocation7 + $0xc0] sm:$0xff]  ;;  %p17377_p6 = por %p17376_p5, %p17375_p4 }
  0x79   :  { %15449 = vmatpush3.msra.mxu1 %v17616_v28  ;;  %24474 = vst [vmem:[#allocation42_spill] sm:$0xff] %v17666_v42  ;;  %v821_v46 = vsub.f32 %v17646_v38, %v17666_v42  ;;  %v17691_v48 = vand.u32 4294901760, %v860_v44  ;;  %v17695_v49 = vand.u32 4294901760, %v811_v45  ;;  %v17815_v56 = vand.u32 4294901760, %v203_v54 }
  0x7a   :  { %24468 = vst [vmem:[#allocation36_spill] sm:$0xff] %v17624_v32  ;;  %24470 = vst [vmem:[#allocation38_spill] sm:$0xff] %v17631_v35  ;;  %15445 = vmatprep.mubr.f32.mxu0 %v17624_v32  ;;  %15450 = vmatprep.subr.mxu1 %v17620_v30  ;;  %v17701_v51 = vand.u32 4294901760, %v867_v47  ;;  %v17813_v55 = vsub.f32 %v204_v52, %v17810_v53  ;;  %v17825_v60 = vand.u32 4294901760, %v202_v57  ;;  %v17837_v1 = vand.u32 4294901760, %v201_v61  ;;  %p17378_p7 = pnand %p17377_p6, %p17371_p3 }
  0x7b   :  { %15446 = vmatmul.mubr.f32.vlgmr.msra.gmra.mxu0 %v17631_v35  ;;  %15451 = vmatpush3.msra.mxu1 %v17620_v30  ;;  %24475 = vst [vmem:[#allocation43_spill] sm:$0xff] %v17695_v49  ;;  %v17699_v50 = vand.u32 4294901760, %v821_v46  ;;  %24477 = vst [vmem:[#allocation45_spill] sm:$0xff] %v17810_v53  ;;  %v17823_v59 = vsub.f32 %v203_v54, %v17815_v56  ;;  %v17852_v8 = vand.u32 4294901760, %v200_v2  ;;  %v17878_v24 = vand.u32 4294901760, %v198_v18  ;;  %v195_v46 = vld [vmem:[#allocation7 + $0xb0] sm:$0xff] }
  0x7c   :  { %15456 = vmatpush3.msra.mxu0 %v17576_v9  ;;  %15453 = vmatmul.mubr.f32.vlgmr.msra.gmra.mxu1 %v17578_v10  ;;  %24478 = vst [vmem:[#allocation46_spill] sm:$0xff] %v17813_v55  ;;  %24479 = vst [vmem:[#allocation47_spill] sm:$0xff] %v17815_v56  ;;  %v17820_v58 = vand.u32 4294901760, %v17813_v55  ;;  %v17835_v0 = vsub.f32 %v202_v57, %v17825_v60  ;;  %v17849_v6 = vsub.f32 %v201_v61, %v17837_v1  ;;  %v194_v57 = vld [vmem:[#allocation7 + $0xa8] sm:$0xff]  ;;  %vm6194_vm3 = vcmask 1046528  }
  0x7d   :  { %15457 = vmatprep.subr.mxu0 %v17581_v11  ;;  %15462 = vmatprep.subr.mxu1 %v17566_v3  ;;  %24476 = vst [vmem:[#allocation44_spill] sm:$0xff] %v17699_v50  ;;  %24481 = vst [vmem:[#allocation49_spill] sm:$0xff] %v17823_v59  ;;  %v17832_v63 = vand.u32 4294901760, %v17823_v59  ;;  %v17893_v29 = vsub.f32 %v198_v18, %v17878_v24  ;;  %v17930_v54 = vand.u32 4294901760, %v195_v46 }
  0x7e   :  { %15458 = vmatpush3.msra.mxu0 %v17581_v11  ;;  %15459 = vmatprep.mubr.f32.mxu0 %v17585_v13  ;;  %24480 = vst [vmem:[#allocation48_spill] sm:$0xff] %v17820_v58  ;;  %24482 = vst [vmem:[#allocation50_spill] sm:$0xff] %v17825_v60  ;;  %v2354_v62 = vsub.f32 %v17813_v55, %v17820_v58  ;;  %v17846_v5 = vand.u32 4294901760, %v17835_v0  ;;  %v17861_v14 = vand.u32 4294901760, %v17849_v6 }
  0x7f   :  { %15463 = vmatpush3.msra.mxu1 %v17566_v3  ;;  %15460 = vmatmul.mubr.f32.vlgmr.msra.gmra.mxu0 %v17593_v16  ;;  %24483 = vst [vmem:[#allocation51_spill] sm:$0xff] %v17832_v63  ;;  %24484 = vst [vmem:[#allocation52_spill] sm:$0xff] %v17835_v0 }
  0x80   :  { %15464 = vmatprep.subr.mxu1 %v17568_v4  ;;  %15469 = vmatprep.subr.mxu0 %v17590_v15  ;;  %24485 = vst [vmem:[#allocation53_spill] sm:$0xff] %v17837_v1  ;;  %24487 = vst [vmem:[#allocation55_spill] sm:$0xff] %v17846_v5  ;;  %v2368_v12 = vsub.f32 %v17835_v0, %v17846_v5  ;;  %v2375_v21 = vsub.f32 %v17849_v6, %v17861_v14 }
  0x81   :  { %15465 = vmatpush3.msra.mxu1 %v17568_v4  ;;  %15466 = vmatprep.mubr.f32.mxu1 %v17600_v19  ;;  %24488 = vst [vmem:[#allocation56_spill] sm:$0xff] %v17849_v6  ;;  %24489 = vst [vmem:[#allocation57_spill] sm:$0xff] %v17852_v8 }
  0x82   :  { %15470 = vmatpush3.msra.mxu0 %v17590_v15  ;;  %15467 = vmatmul.mubr.f32.vlgmr.msra.gmra.mxu1 %v17606_v22  ;;  %24491 = vst [vmem:[#allocation59_spill] sm:$0xff] %v17861_v14  ;;  %v17871_v20 = vand.u32 4294901760, %v2368_v12  ;;  %24496 = vst [vmem:[#allocation64_spill] sm:$0xff] %v17878_v24  ;;  %v193_v12 = vld [vmem:[#allocation7 + $0xa0] sm:$0xff] }
  0x83   :  { %15471 = vmatprep.subr.mxu0 %v17596_v17  ;;  %15476 = vmatprep.subr.mxu1 %v17566_v3  ;;  %24500 = vst [vmem:[#allocation68_spill] sm:$0xff] %v17893_v29  ;;  %24509 = vst [vmem:[#allocation77_spill] sm:$0xff] %v17930_v54 }
  0x84   :  { %15472 = vmatpush3.msra.mxu0 %v17596_v17  ;;  %15473 = vmatprep.mubr.f32.mxu0 %v17571_v7  ;;  %24494 = vst [vmem:[#allocation62_spill] sm:$0xff] %v17871_v20 }
  0x85   :  { %15477 = vmatpush3.msra.mxu1 %v17566_v3  ;;  %15474 = vmatmul.mubr.f32.vlgmr.msra.gmra.mxu0 %v17578_v10 }
  0x86   :  { %15478 = vmatprep.subr.mxu1 %v17568_v4  ;;  %15483 = vmatprep.subr.mxu0 %v17614_v27 }
  0x87   :  { %15479 = vmatpush3.msra.mxu1 %v17568_v4  ;;  %15480 = vmatprep.mubr.f32.mxu1 %v17571_v7 }
  0x88   :  { %15484 = vmatpush3.msra.mxu0 %v17614_v27  ;;  %15481 = vmatmul.mubr.f32.vlgmr.msra.gmra.mxu1 %v17578_v10 }
  0x89   :  { %15485 = vmatprep.subr.mxu0 %v17626_v33  ;;  %15490 = vmatprep.subr.mxu1 %v17691_v48 }
  0x8a   :  { %15486 = vmatpush3.msra.mxu0 %v17626_v33  ;;  %15487 = vmatprep.mubr.f32.mxu0 %v17695_v49 }
  0x8b   :  { %15491 = vmatpush3.msra.mxu1 %v17691_v48  ;;  %15488 = vmatmul.mubr.f32.vlgmr.msra.gmra.mxu0 %v17699_v50 }
  0x8c   :  { %15492 = vmatprep.subr.mxu1 %v17701_v51  ;;  %15497 = vmatprep.subr.mxu0 %v17636_v36 }
  0x8d   :  { %15493 = vmatpush3.msra.mxu1 %v17701_v51  ;;  %15494 = vmatprep.mubr.f32.mxu1 %v17622_v31 }
  0x8e   :  { %15498 = vmatpush3.msra.mxu0 %v17636_v36  ;;  %15495 = vmatmul.mubr.f32.vlgmr.msra.gmra.mxu1 %v17628_v34 }
  0x8f   :  { %15499 = vmatprep.subr.mxu0 %v17649_v39  ;;  %15504 = vmatprep.subr.mxu1 %v17614_v27 }
  0x90   :  { %15500 = vmatpush3.msra.mxu0 %v17649_v39  ;;  %15501 = vmatprep.mubr.f32.mxu0 %v17641_v37 }
  0x91   :  { %15505 = vmatpush3.msra.mxu1 %v17614_v27  ;;  %15502 = vmatmul.mubr.f32.vlgmr.msra.gmra.mxu0 %v17646_v38 }
  0x92   :  { %15506 = vmatprep.subr.mxu1 %v17626_v33  ;;  %15511 = vmatprep.subr.mxu0 %v17656_v40 }
  0x93   :  { %15507 = vmatpush3.msra.mxu1 %v17626_v33  ;;  %15508 = vmatprep.mubr.f32.mxu1 %v17661_v41 }
  0x94   :  { %15512 = vmatpush3.msra.mxu0 %v17656_v40  ;;  %15509 = vmatmul.mubr.f32.vlgmr.msra.gmra.mxu1 %v17666_v42 }
  0x95   :  { %15513 = vmatprep.subr.mxu0 %v17669_v43  ;;  %15518 = vmatprep.subr.mxu1 %v17614_v27 }
  0x96   :  { %15514 = vmatpush3.msra.mxu0 %v17669_v43  ;;  %15515 = vmatprep.mubr.f32.mxu0 %v17622_v31 }
  0x97   :  { %15519 = vmatpush3.msra.mxu1 %v17614_v27  ;;  %15516 = vmatmul.mubr.f32.vlgmr.msra.gmra.mxu0 %v17628_v34 }
  0x98   :  { %15520 = vmatprep.subr.mxu1 %v17626_v33  ;;  %15525 = vmatprep.subr.mxu0 %v17566_v3 }
  0x99   :  { %15521 = vmatpush3.msra.mxu1 %v17626_v33  ;;  %15522 = vmatprep.mubr.f32.mxu1 %v17622_v31 }
  0x9a   :  { %15526 = vmatpush3.msra.mxu0 %v17566_v3  ;;  %15523 = vmatmul.mubr.f32.vlgmr.msra.gmra.mxu1 %v17628_v34 }
  0x9b   :  { %15527 = vmatprep.subr.mxu0 %v17568_v4  ;;  %15532 = vmatprep.subr.mxu1 %v17616_v28 }
  0x9c   :  { %15528 = vmatpush3.msra.mxu0 %v17568_v4  ;;  %15529 = vmatprep.mubr.f32.mxu0 %v17695_v49 }
  0x9d   :  { %15533 = vmatpush3.msra.mxu1 %v17616_v28  ;;  %15530 = vmatmul.mubr.f32.vlgmr.msra.gmra.mxu0 %v17699_v50 }
  0x9e   :  { %15534 = vmatprep.subr.mxu1 %v17620_v30  ;;  %15539 = vmatprep.subr.mxu0 %v17576_v9 }
  0x9f   :  { %15535 = vmatpush3.msra.mxu1 %v17620_v30  ;;  %15536 = vmatprep.mubr.f32.mxu1 %v17622_v31  ;;  %v17895_v30 = vand.u32 4294901760, %v197_v26 }
  0xa0   :  { %15540 = vmatpush3.msra.mxu0 %v17576_v9  ;;  %15537 = vmatmul.mubr.f32.vlgmr.msra.gmra.mxu1 %v17628_v34  ;;  %v199_v9 = vld [vmem:[#allocation7 + $0xd0] sm:$0xff] }
  0xa1   :  { %15541 = vmatprep.subr.mxu0 %v17581_v11  ;;  %15546 = vmatprep.subr.mxu1 %v17566_v3  ;;  %24501 = vst [vmem:[#allocation69_spill] sm:$0xff] %v17895_v30 }
  0xa2   :  { %15542 = vmatpush3.msra.mxu0 %v17581_v11  ;;  %15543 = vmatprep.mubr.f32.mxu0 %v17641_v37 }
  0xa3   :  { %15547 = vmatpush3.msra.mxu1 %v17566_v3  ;;  %15544 = vmatmul.mubr.f32.vlgmr.msra.gmra.mxu0 %v17646_v38 }
  0xa4   :  { %15548 = vmatprep.subr.mxu1 %v17568_v4  ;;  %15553 = vmatprep.subr.mxu0 %v17590_v15 }
  0xa5   :  { %15549 = vmatpush3.msra.mxu1 %v17568_v4  ;;  %15550 = vmatprep.mubr.f32.mxu1 %v17661_v41 }
  0xa6   :  { %15554 = vmatpush3.msra.mxu0 %v17590_v15  ;;  %15551 = vmatmul.mubr.f32.vlgmr.msra.gmra.mxu1 %v17666_v42  ;;  %v17863_v15 = vand.u32 4294901760, %v199_v9 }
  0xa7   :  { %15555 = vmatprep.subr.mxu0 %v17596_v17  ;;  %15560 = vmatprep.subr.mxu1 %v17566_v3 }
  0xa8   :  { %15556 = vmatpush3.msra.mxu0 %v17596_v17  ;;  %15557 = vmatprep.mubr.f32.mxu0 %v17622_v31  ;;  %24492 = vst [vmem:[#allocation60_spill] sm:$0xff] %v17863_v15  ;;  %v17867_v17 = vsub.f32 %v200_v2, %v17852_v8  ;;  %v17876_v23 = vsub.f32 %v199_v9, %v17863_v15 }
  0xa9   :  { %15561 = vmatpush3.msra.mxu1 %v17566_v3  ;;  %15558 = vmatmul.mubr.f32.vlgmr.msra.gmra.mxu0 %v17628_v34  ;;  %v17841_v3 = vand.u32 4294901760, %v2354_v62  ;;  %v17946_v9 = vsub.f32 %v195_v46, %v17930_v54 }
  0xaa   :  { %15562 = vmatprep.subr.mxu1 %v17568_v4  ;;  %15567 = vmatprep.subr.mxu0 %v17614_v27  ;;  %24493 = vst [vmem:[#allocation61_spill] sm:$0xff] %v17867_v17  ;;  %24495 = vst [vmem:[#allocation63_spill] sm:$0xff] %v17876_v23  ;;  %v17883_v25 = vand.u32 4294901760, %v17867_v17  ;;  %v17890_v28 = vand.u32 4294901760, %v17876_v23 }
  0xab   :  { %15563 = vmatpush3.msra.mxu1 %v17568_v4  ;;  %15564 = vmatprep.mubr.f32.mxu1 %v17622_v31  ;;  %24486 = vst [vmem:[#allocation54_spill] sm:$0xff] %v17841_v3  ;;  %v2361_v4 = vsub.f32 %v17823_v59, %v17832_v63  ;;  %24513 = vst [vmem:[#allocation81_spill] sm:$0xff] %v17946_v9 }
  0xac   :  { %15568 = vmatpush3.msra.mxu0 %v17614_v27  ;;  %15565 = vmatmul.mubr.f32.vlgmr.msra.gmra.mxu1 %v17628_v34  ;;  %24497 = vst [vmem:[#allocation65_spill] sm:$0xff] %v17883_v25  ;;  %24499 = vst [vmem:[#allocation67_spill] sm:$0xff] %v17890_v28 }
  0xad   :  { %15569 = vmatprep.subr.mxu0 %v17626_v33  ;;  %15574 = vmatprep.subr.mxu1 %v17691_v48  ;;  %v17856_v11 = vand.u32 4294901760, %v2361_v4  ;;  %v17941_v4 = vand.u32 4294901760, %v194_v57 }
  0xae   :  { %15570 = vmatpush3.msra.mxu0 %v17626_v33  ;;  %15571 = vmatprep.mubr.f32.mxu0 %v17624_v32 }
  0xaf   :  { %15575 = vmatpush3.msra.mxu1 %v17691_v48  ;;  %15572 = vmatmul.mubr.f32.vlgmr.msra.gmra.mxu0 %v17631_v35  ;;  %24490 = vst [vmem:[#allocation58_spill] sm:$0xff] %v17856_v11  ;;  %24512 = vst [vmem:[#allocation80_spill] sm:$0xff] %v17941_v4 }
  0xb0   :  { %15576 = vmatprep.subr.mxu1 %v17701_v51  ;;  %15581 = vmatprep.subr.mxu0 %v17636_v36 }
  0xb1   :  { %15577 = vmatpush3.msra.mxu1 %v17701_v51  ;;  %15578 = vmatprep.mubr.f32.mxu1 %v17571_v7 }
  0xb2   :  { %15582 = vmatpush3.msra.mxu0 %v17636_v36  ;;  %15579 = vmatmul.mubr.f32.vlgmr.msra.gmra.mxu1 %v17578_v10  ;;  %v196_v36 = vld [vmem:[#allocation7 + $0xb8] sm:$0xff] }
  0xb3   :  { %15583 = vmatprep.subr.mxu0 %v17649_v39  ;;  %15588 = vmatprep.subr.mxu1 %v17614_v27  ;;  %v17911_v44 = vand.u32 4294901760, %v196_v36 }
  0xb4   :  { %15584 = vmatpush3.msra.mxu0 %v17649_v39  ;;  %15585 = vmatprep.mubr.f32.mxu0 %v17585_v13  ;;  %v2389_v39 = vsub.f32 %v17876_v23, %v17890_v28 }
  0xb5   :  { %15589 = vmatpush3.msra.mxu1 %v17614_v27  ;;  %15586 = vmatmul.mubr.f32.vlgmr.msra.gmra.mxu0 %v17593_v16  ;;  %24504 = vst [vmem:[#allocation72_spill] sm:$0xff] %v17911_v44  ;;  %v17926_v52 = vsub.f32 %v196_v36, %v17911_v44  ;;  %v17962_v36 = vand.u32 4294901760, %v17946_v9 }
  0xb6   :  { %15590 = vmatprep.subr.mxu1 %v17626_v33  ;;  %15595 = vmatprep.subr.mxu0 %v17656_v40  ;;  %v17918_v47 = vand.u32 4294901760, %v2389_v39  ;;  %v192_v39 = vld [vmem:[#allocation7 + $0x98] sm:$0xff] }
  0xb7   :  { %15591 = vmatpush3.msra.mxu1 %v17626_v33  ;;  %15592 = vmatprep.mubr.f32.mxu1 %v17600_v19  ;;  %24508 = vst [vmem:[#allocation76_spill] sm:$0xff] %v17926_v52  ;;  %v17939_v2 = vand.u32 4294901760, %v17926_v52  ;;  %24517 = vst [vmem:[#allocation85_spill] sm:$0xff] %v17962_v36  ;;  %v189_v19 = vld [vmem:[#allocation7 + $0x80] sm:$0xff] }
  0xb8   :  { %15596 = vmatpush3.msra.mxu0 %v17656_v40  ;;  %15593 = vmatmul.mubr.f32.vlgmr.msra.gmra.mxu1 %v17606_v22  ;;  %v17906_v40 = vand.u32 4294901760, %v17893_v29  ;;  %24506 = vst [vmem:[#allocation74_spill] sm:$0xff] %v17918_v47 }
  0xb9   :  { %15597 = vmatprep.subr.mxu0 %v17669_v43  ;;  %15602 = vmatprep.subr.mxu1 %v17614_v27  ;;  %24511 = vst [vmem:[#allocation79_spill] sm:$0xff] %v17939_v2 }
  0xba   :  { %15598 = vmatpush3.msra.mxu0 %v17669_v43  ;;  %15599 = vmatprep.mubr.f32.mxu0 %v17571_v7  ;;  %24502 = vst [vmem:[#allocation70_spill] sm:$0xff] %v17906_v40  ;;  %v17909_v43 = vsub.f32 %v197_v26, %v17895_v30  ;;  %v2396_v48 = vsub.f32 %v17893_v29, %v17906_v40 }
  0xbb   :  { %15603 = vmatpush3.msra.mxu1 %v17614_v27  ;;  %15600 = vmatmul.mubr.f32.vlgmr.msra.gmra.mxu0 %v17578_v10  ;;  %v17887_v27 = vand.u32 4294901760, %v2375_v21  ;;  %v2410_v21 = vsub.f32 %v17926_v52, %v17939_v2  ;;  %v17955_v26 = vsub.f32 %v194_v57, %v17941_v4 }
  0xbc   :  { %15604 = vmatprep.subr.mxu1 %v17626_v33  ;;  %15606 = vmatprep.mubr.f32.mxu1 %v17571_v7  ;;  %24503 = vst [vmem:[#allocation71_spill] sm:$0xff] %v17909_v43  ;;  %v17923_v51 = vand.u32 4294901760, %v17909_v43  ;;  %v17934_v61 = vand.u32 4294901760, %v2396_v48 }
  0xbd   :  { %15605 = vmatpush3.msra.mxu1 %v17626_v33  ;;  %15609 = vmatprep.subr.mxu0 %v17810_v53  ;;  %24498 = vst [vmem:[#allocation66_spill] sm:$0xff] %v17887_v27  ;;  %v2382_v33 = vsub.f32 %v17867_v17, %v17883_v25  ;;  %24515 = vst [vmem:[#allocation83_spill] sm:$0xff] %v17955_v26  ;;  %v17966_v46 = vand.u32 4294901760, %v2410_v21  ;;  %v17969_v48 = vand.u32 4294901760, %v17955_v26 }
  0xbe   :  { %15607 = vmatmul.mubr.f32.vlgmr.msra.gmra.mxu1 %v17578_v10  ;;  %15610 = vmatpush3.msra.mxu0 %v17810_v53  ;;  %24507 = vst [vmem:[#allocation75_spill] sm:$0xff] %v17923_v51  ;;  %24510 = vst [vmem:[#allocation78_spill] sm:$0xff] %v17934_v61  ;;  %v2403_v62 = vsub.f32 %v17909_v43, %v17923_v51 }
  0xbf   :  { %15611 = vmatprep.subr.mxu0 %v17815_v56  ;;  %15644 = vmatprep.subr.mxu1 %v17841_v3  ;;  %v17915_v45 = vand.u32 4294901760, %v2382_v33  ;;  %v17957_v33 = vand.u32 4294901760, %v193_v12  ;;  %24518 = vst [vmem:[#allocation86_spill] sm:$0xff] %v17966_v46  ;;  %24519 = vst [vmem:[#allocation87_spill] sm:$0xff] %v17969_v48  ;;  %v2424_v21 = vsub.f32 %v17955_v26, %v17969_v48 }
  0xc0   :  { %15612 = vmatpush3.msra.mxu0 %v17815_v56  ;;  %15645 = vmatpush3.msra.mxu1 %v17841_v3  ;;  %v17950_v18 = vand.u32 4294901760, %v2403_v62  ;;  %v17974_v62 = vand.u32 4294901760, %v192_v39 }
  0xc1   :  { %15613 = vmatprep.subr.mxu0 %v17825_v60  ;;  %15646 = vmatprep.subr.mxu1 %v17856_v11  ;;  %24505 = vst [vmem:[#allocation73_spill] sm:$0xff] %v17915_v45  ;;  %24516 = vst [vmem:[#allocation84_spill] sm:$0xff] %v17957_v33  ;;  %v17972_v57 = vsub.f32 %v193_v12, %v17957_v33 }
  0xc2   :  { %15614 = vmatpush3.msra.mxu0 %v17825_v60  ;;  %15647 = vmatpush3.msra.mxu1 %v17856_v11  ;;  %24514 = vst [vmem:[#allocation82_spill] sm:$0xff] %v17950_v18  ;;  %24521 = vst [vmem:[#allocation89_spill] sm:$0xff] %v17974_v62  ;;  %v190_v11 = vld [vmem:[#allocation7 + $0x88] sm:$0xff] }
  0xc3   :  { %15615 = vmatprep.subr.mxu0 %v17837_v1  ;;  %15648 = vmatprep.subr.mxu1 %v17871_v20  ;;  %24520 = vst [vmem:[#allocation88_spill] sm:$0xff] %v17972_v57  ;;  %v17985_v12 = vand.u32 4294901760, %v17972_v57 }
  0xc4   :  { %15616 = vmatpush3.msra.mxu0 %v17837_v1  ;;  %15649 = vmatpush3.msra.mxu1 %v17871_v20 }
  0xc5   :  { %15617 = vmatprep.subr.mxu0 %v17852_v8  ;;  %15650 = vmatprep.subr.mxu1 %v17887_v27  ;;  %24522 = vst [vmem:[#allocation90_spill] sm:$0xff] %v17985_v12  ;;  %v2431_v3 = vsub.f32 %v17972_v57, %v17985_v12 }
  0xc6   :  { %15618 = vmatpush3.msra.mxu0 %v17852_v8  ;;  %15651 = vmatpush3.msra.mxu1 %v17887_v27 }
  0xc7   :  { %15619 = vmatprep.subr.mxu0 %v17863_v15  ;;  %15652 = vmatprep.subr.mxu1 %v17915_v45 }
  0xc8   :  { %15620 = vmatpush3.msra.mxu0 %v17863_v15  ;;  %15653 = vmatpush3.msra.mxu1 %v17915_v45  ;;  %v191_v45 = vld [vmem:[#allocation7 + $0x90] sm:$0xff] }
  0xc9   :  { %15621 = vmatprep.subr.mxu0 %v17878_v24  ;;  %15654 = vmatprep.subr.mxu1 %v17918_v47  ;;  %v17990_v27 = vand.u32 4294901760, %v191_v45 }
  0xca   :  { %15622 = vmatpush3.msra.mxu0 %v17878_v24  ;;  %15655 = vmatpush3.msra.mxu1 %v17918_v47  ;;  %v2417_v47 = vsub.f32 %v17946_v9, %v17962_v36 }
  0xcb   :  { %15623 = vmatprep.subr.mxu0 %v17895_v30  ;;  %15656 = vmatprep.subr.mxu1 %v17934_v61  ;;  %24524 = vst [vmem:[#allocation92_spill] sm:$0xff] %v17990_v27  ;;  %v18006_v22 = vsub.f32 %v191_v45, %v17990_v27  ;;  %v18021_v45 = vand.u32 4294901760, %v189_v19 }
  0xcc   :  { %15624 = vmatpush3.msra.mxu0 %v17895_v30  ;;  %15657 = vmatpush3.msra.mxu1 %v17934_v61  ;;  %v17988_v61 = vsub.f32 %v192_v39, %v17974_v62  ;;  %v17994_v20 = vand.u32 4294901760, %v2417_v47  ;;  %v18010_v47 = vand.u32 4294901760, %v190_v11 }
  0xcd   :  { %15625 = vmatprep.subr.mxu0 %v17911_v44  ;;  %15658 = vmatprep.subr.mxu1 %v17950_v18  ;;  %24528 = vst [vmem:[#allocation96_spill] sm:$0xff] %v18006_v22  ;;  %v18019_v10 = vand.u32 4294901760, %v18006_v22  ;;  %24532 = vst [vmem:[#allocation100_spill] sm:$0xff] %v18021_v45  ;;  %v18035_v16 = vsub.f32 %v189_v19, %v18021_v45 }
  0xce   :  { %15626 = vmatpush3.msra.mxu0 %v17911_v44  ;;  %15659 = vmatpush3.msra.mxu1 %v17950_v18  ;;  %24523 = vst [vmem:[#allocation91_spill] sm:$0xff] %v17988_v61  ;;  %24525 = vst [vmem:[#allocation93_spill] sm:$0xff] %v17994_v20  ;;  %v17998_v18 = vand.u32 4294901760, %v2424_v21  ;;  %v18003_v39 = vand.u32 4294901760, %v17988_v61  ;;  %v18014_v21 = vand.u32 4294901760, %v2431_v3  ;;  %v18026_v7 = vsub.f32 %v190_v11, %v18010_v47 }
  0xcf   :  { %15627 = vmatprep.subr.mxu0 %v17930_v54  ;;  %15660 = vmatprep.subr.mxu1 %v17966_v46  ;;  %24529 = vst [vmem:[#allocation97_spill] sm:$0xff] %v18010_v47  ;;  %24531 = vst [vmem:[#allocation99_spill] sm:$0xff] %v18019_v10 }
  0xd0   :  { %15628 = vmatpush3.msra.mxu0 %v17930_v54  ;;  %15661 = vmatpush3.msra.mxu1 %v17966_v46  ;;  %24526 = vst [vmem:[#allocation94_spill] sm:$0xff] %v17998_v18  ;;  %24527 = vst [vmem:[#allocation95_spill] sm:$0xff] %v18003_v39  ;;  %v2438_v46 = vsub.f32 %v17988_v61, %v18003_v39  ;;  %v18040_v13 = vand.u32 4294901760, %v18026_v7 }
  0xd1   :  { %15629 = vmatprep.subr.mxu0 %v17941_v4  ;;  %15662 = vmatprep.subr.mxu1 %v17994_v20  ;;  %24530 = vst [vmem:[#allocation98_spill] sm:$0xff] %v18014_v21  ;;  %24533 = vst [vmem:[#allocation101_spill] sm:$0xff] %v18026_v7 }
  0xd2   :  { %15630 = vmatpush3.msra.mxu0 %v17941_v4  ;;  %15663 = vmatpush3.msra.mxu1 %v17994_v20  ;;  %v18030_v3 = vand.u32 4294901760, %v2438_v46  ;;  %v2445_v20 = vsub.f32 %v18006_v22, %v18019_v10  ;;  %24535 = vst [vmem:[#allocation103_spill] sm:$0xff] %v18035_v16  ;;  %24536 = vst [vmem:[#allocation104_spill] sm:$0xff] %v18040_v13  ;;  %v18047_v46 = vand.u32 4294901760, %v18035_v16 }
  0xd3   :  { %15631 = vmatprep.subr.mxu0 %v17957_v33  ;;  %15664 = vmatprep.subr.mxu1 %v17998_v18  ;;  %v2452_v19 = vsub.f32 %v18026_v7, %v18040_v13 }
  0xd4   :  { %15632 = vmatpush3.msra.mxu0 %v17957_v33  ;;  %15665 = vmatpush3.msra.mxu1 %v17998_v18  ;;  %24534 = vst [vmem:[#allocation102_spill] sm:$0xff] %v18030_v3  ;;  %v18044_v11 = vand.u32 4294901760, %v2445_v20  ;;  %24538 = vst [vmem:[#allocation106_spill] sm:$0xff] %v18047_v46  ;;  %v2459_v18 = vsub.f32 %v18035_v16, %v18047_v46 }
  0xd5   :  { %15633 = vmatprep.subr.mxu0 %v17974_v62  ;;  %15666 = vmatprep.subr.mxu1 %v18014_v21  ;;  %v18058_v20 = vand.u32 4294901760, %v2452_v19 }
  0xd6   :  { %15634 = vmatpush3.msra.mxu0 %v17974_v62  ;;  %15667 = vmatpush3.msra.mxu1 %v18014_v21  ;;  %24537 = vst [vmem:[#allocation105_spill] sm:$0xff] %v18044_v11  ;;  %v18061_v21 = vand.u32 4294901760, %v2459_v18 }
  0xd7   :  { %15635 = vmatprep.subr.mxu0 %v17990_v27  ;;  %15668 = vmatprep.subr.mxu1 %v18030_v3  ;;  %24539 = vst [vmem:[#allocation107_spill] sm:$0xff] %v18058_v20 }
  0xd8   :  { %15636 = vmatpush3.msra.mxu0 %v17990_v27  ;;  %15669 = vmatpush3.msra.mxu1 %v18030_v3  ;;  %24540 = vst [vmem:[#allocation108_spill] sm:$0xff] %v18061_v21 }
  0xd9   :  { %15637 = vmatprep.subr.mxu0 %v18010_v47  ;;  %15670 = vmatprep.subr.mxu1 %v18044_v11 }
  0xda   :  { %15638 = vmatpush3.msra.mxu0 %v18010_v47  ;;  %15671 = vmatpush3.msra.mxu1 %v18044_v11 }
  0xdb   :  { %15639 = vmatprep.subr.mxu0 %v18021_v45  ;;  %15672 = vmatprep.subr.mxu1 %v18058_v20 }
  0xdc   :  { %15640 = vmatpush3.msra.mxu0 %v18021_v45  ;;  %15673 = vmatpush3.msra.mxu1 %v18058_v20 }
  0xdd   :  { %15679 = vmatprep.subr.mxu0 %v17813_v55  ;;  %15674 = vmatprep.subr.mxu1 %v18061_v21 }
  0xde   :  { %15675 = vmatpush3.msra.mxu1 %v18061_v21 }
  0xdf   :  { %15714 = vmatprep.subr.mxu1 %v17810_v53 }
 0x13b   :  { %v15447_v3 = vpop.f32.mrf.mxu0 }
 0x13c   :  { %v15454_v32 = vpop.f32.mrf.mxu1 }
 0x13d   :  { %v18068_v35 = vpop.f32.mrf.mxu0  ;;  %v404_v19 = vadd.f32 %v15454_v32, %v15447_v3 }
 0x13e   :  { %v18070_v42 = vpop.f32.mrf.mxu1 }
 0x13f   :  { %v15461_v11 = vpop.f32.mrf.mxu0 }
 0x140   :  { %v487_v18 = vadd.f32 %v15461_v11, %v404_v19 }
 0x141   :  { %v18072_v41 = vpop.f32.mrf.mxu0 }
 0x142   :  { %v15468_v34 = vpop.f32.mrf.mxu1 }
 0x143   :  { %v570_v38 = vadd.f32 %v15468_v34, %v487_v18 }
 0x144   :  { %v18074_v20 = vpop.f32.mrf.mxu1 }
 0x145   :  { %v15475_v37 = vpop.f32.mrf.mxu0 }
 0x146   :  { %v653_v50 = vadd.f32 %v15475_v37, %v570_v38 }
 0x147   :  { %v18076_v21 = vpop.f32.mrf.mxu0 }
 0x148   :  { %v15482_v49 = vpop.f32.mrf.mxu1 }
 0x149   :  { %v732_v31 = vadd.f32 %v15482_v49, %v653_v50 }
 0x14a   :  { %v18078_v46 = vpop.f32.mrf.mxu1 }
 0x14b   :  { %24541 = vst [vmem:[#allocation109_spill] sm:$0xff] %v18078_v46  ;;  %v15489_v13 = vpop.f32.mrf.mxu0 }
 0x14c   :  { %v825_v32 = vadd.f32 %v15489_v13, %v732_v31 }
 0x14d   :  { %v18080_v3 = vpop.f32.mrf.mxu0 }
 0x14e   :  { %24542 = vst [vmem:[#allocation110_spill] sm:$0xff] %v18080_v3  ;;  %v15496_v10 = vpop.f32.mrf.mxu1 }
 0x14f   :  { %v912_v11 = vadd.f32 %v15496_v10, %v825_v32 }
 0x150   :  { %v18082_v19 = vpop.f32.mrf.mxu1 }
 0x151   :  { %24543 = vst [vmem:[#allocation111_spill] sm:$0xff] %v18082_v19  ;;  %v15503_v39 = vpop.f32.mrf.mxu0 }
 0x152   :  { %v995_v34 = vadd.f32 %v15503_v39, %v912_v11 }
 0x153   :  { %v18084_v18 = vpop.f32.mrf.mxu0 }
 0x154   :  { %24544 = vst [vmem:[#allocation112_spill] sm:$0xff] %v18084_v18  ;;  %v15510_v12 = vpop.f32.mrf.mxu1 }
 0x155   :  { %v1078_v37 = vadd.f32 %v15510_v12, %v995_v34 }
 0x156   :  { %v18086_v38 = vpop.f32.mrf.mxu1 }
 0x157   :  { %24545 = vst [vmem:[#allocation113_spill] sm:$0xff] %v18086_v38  ;;  %v15517_v48 = vpop.f32.mrf.mxu0 }
 0x158   :  { %v1161_v49 = vadd.f32 %v15517_v48, %v1078_v37 }
 0x159   :  { %v18088_v50 = vpop.f32.mrf.mxu0 }
 0x15a   :  { %24546 = vst [vmem:[#allocation114_spill] sm:$0xff] %v18088_v50  ;;  %v15524_v36 = vpop.f32.mrf.mxu1 }
 0x15b   :  { %v18090_v13 = vadd.f32 %v15524_v36, %v1161_v49 }
 0x15c   :  { %v18092_v31 = vpop.f32.mrf.mxu1 }
 0x15d   :  { %24547 = vst [vmem:[#allocation115_spill] sm:$0xff] %v18090_v13  ;;  %24548 = vst [vmem:[#allocation116_spill] sm:$0xff] %v18092_v31  ;;  %v15531_v10 = vpop.f32.mrf.mxu0 }
 0x15f   :  { %v1316_v32 = vpop.f32.mrf.mxu0 }
 0x160   :  { %v15538_v2 = vpop.f32.mrf.mxu1 }
 0x161   :  { %v1414_v14 = vadd.f32 %v15538_v2, %v15531_v10 }
 0x162   :  { %v1407_v51 = vpop.f32.mrf.mxu1 }
 0x163   :  { %v15545_v39 = vpop.f32.mrf.mxu0  ;;  %v1408_v50 = vadd.f32 %v1407_v51, %v1316_v32 }
 0x164   :  { %v1497_v36 = vadd.f32 %v15545_v39, %v1414_v14 }
 0x165   :  { %v1489_v11 = vpop.f32.mrf.mxu0 }
 0x166   :  { %v15552_v40 = vpop.f32.mrf.mxu1  ;;  %v1490_v31 = vadd.f32 %v1489_v11, %v1408_v50 }
 0x167   :  { %v1580_v58 = vadd.f32 %v15552_v40, %v1497_v36  ;;  %v24554_v36 = vld [vmem:[#allocation101_spill] sm:$0xff] }
 0x168   :  { %v1571_v28 = vpop.f32.mrf.mxu1 }
 0x169   :  { %v15559_v12 = vpop.f32.mrf.mxu0  ;;  %v1572_v7 = vadd.f32 %v1571_v28, %v1490_v31  ;;  %v24550_v31 = vld [vmem:[#allocation100_spill] sm:$0xff] }
 0x16a   :  { %v1663_v45 = vadd.f32 %v15559_v12, %v1580_v58  ;;  %v24552_v12 = vld [vmem:[#allocation110_spill] sm:$0xff] }
 0x16b   :  { %v1656_v34 = vpop.f32.mrf.mxu0 }
 0x16c   :  { %v15566_v25 = vpop.f32.mrf.mxu1  ;;  %v1657_v51 = vadd.f32 %v1656_v34, %v1572_v7 }
 0x16e   :  { %v1735_v48 = vpop.f32.mrf.mxu1 }
 0x16f   :  { %v15573_v37 = vpop.f32.mrf.mxu0 }
 0x171   :  { %v1818_v38 = vpop.f32.mrf.mxu0 }
 0x172   :  { %v15580_v49 = vpop.f32.mrf.mxu1 }
 0x173   :  { %v1916_v13 = vadd.f32 %v15580_v49, %v15573_v37  ;;  %v1742_v37 = vadd.f32 %v15566_v25, %v1663_v45  ;;  %v24555_v49 = vld [vmem:[#allocation111_spill] sm:$0xff] }
 0x174   :  { %v1909_v5 = vpop.f32.mrf.mxu1 }
 0x175   :  { %v1910_v63 = vadd.f32 %v1909_v5, %v1818_v38  ;;  %v15587_v18 = vpop.f32.mrf.mxu0  ;;  %v1736_v38 = vadd.f32 %v1735_v48, %v1657_v51  ;;  %v24553_v48 = vld [vmem:[#allocation96_spill] sm:$0xff] }
 0x176   :  { %v1999_v16 = vadd.f32 %v15587_v18, %v1916_v13  ;;  %v24557_v51 = vld [vmem:[#allocation48_spill] sm:$0xff] }
 0x177   :  { %v1991_v19 = vpop.f32.mrf.mxu0 }
 0x178   :  { %v1992_v22 = vadd.f32 %v1991_v19, %v1910_v63  ;;  %v15594_v3 = vpop.f32.mrf.mxu1 }
 0x179   :  { %v2082_v61 = vadd.f32 %v15594_v3, %v1999_v16  ;;  %v398_v3 = vadd.f32 %v18070_v42, %v18068_v35  ;;  %v24549_v42 = vld [vmem:[#allocation109_spill] sm:$0xff] }
 0x17a   :  { %v2073_v2 = vpop.f32.mrf.mxu1 }
 0x17b   :  { %v2074_v10 = vadd.f32 %v2073_v2, %v1992_v22  ;;  %v15601_v46 = vpop.f32.mrf.mxu0  ;;  %v480_v19 = vadd.f32 %v18072_v41, %v398_v3  ;;  %v24570_v3 = vld [vmem:[#allocation70_spill] sm:$0xff] }
 0x17c   :  { %v2165_v32 = vadd.f32 %v15601_v46, %v2082_v61 }
 0x17d   :  { %v2158_v14 = vpop.f32.mrf.mxu0  ;;  %v562_v35 = vadd.f32 %v18074_v20, %v480_v19 }
 0x17e   :  { %v15608_v39 = vpop.f32.mrf.mxu1  ;;  %v2159_v50 = vadd.f32 %v2158_v14, %v2074_v10  ;;  %v24556_v10 = vld [vmem:[#allocation103_spill] sm:$0xff] }
 0x17f   :  { %v2244_v11 = vadd.f32 %v15608_v39, %v2165_v32  ;;  %v647_v41 = vadd.f32 %v18076_v21, %v562_v35  ;;  %v24551_v21 = vld [vmem:[#allocation91_spill] sm:$0xff]  ;;  %v24558_v32 = vld [vmem:[#allocation112_spill] sm:$0xff] }
 0x180   :  { %v2237_v5 = vpop.f32.mrf.mxu1  ;;  %v24559_v39 = vld [vmem:[#allocation51_spill] sm:$0xff] }
 0x181   :  { %v2248_v40 = vsub.f32 %v1742_v37, %v2244_v11  ;;  %v2238_v18 = vadd.f32 %v2237_v5, %v2159_v50  ;;  %v726_v20 = vadd.f32 %v24549_v42, %v647_v41  ;;  %v187_v37 = vld [vmem:[#allocation7 + $0x78] sm:$0xff]  ;;  %v24560_v50 = vld [vmem:[#allocation55_spill] sm:$0xff]  ;;  %v24573_v41 = vld [vmem:[#allocation116_spill] sm:$0xff] }
 0x182   :  { %v24561_v11 = vld [vmem:[#allocation113_spill] sm:$0xff] }
 0x183   :  { %v18094_v13 = vand.u32 4294901760, %v2248_v40  ;;  %v2247_v63 = vsub.f32 %v1736_v38, %v2238_v18  ;;  %v815_v34 = vadd.f32 %v24552_v12, %v726_v20  ;;  %v18204_v38 = vand.u32 4294901760, %v187_v37  ;;  %v24563_v18 = vld [vmem:[#allocation59_spill] sm:$0xff]  ;;  %v182_v12 = vld [vmem:[#allocation7 + $0x50] sm:$0xff] }
 0x185   :  { %v18097_v16 = vsub.f32 %v2248_v40, %v18094_v13  ;;  %v18099_v58 = vand.u32 4294901760, %v2247_v63  ;;  %v906_v2 = vadd.f32 %v24555_v49, %v815_v34  ;;  %24562 = vst [vmem:[#allocation109_spill] sm:$0xff] %v18204_v38  ;;  %v186_v40 = vld [vmem:[#allocation7 + $0x70] sm:$0xff]  ;;  %v24575_v34 = vld [vmem:[#allocation75_spill] sm:$0xff] }
 0x187   :  { %v2342_v7 = vand.u32 4294901760, %v18097_v16  ;;  %v2331_v22 = vsub.f32 %v2247_v63, %v18099_v58  ;;  %15676 = vmatprep.mubr.f32.mxu1 %v18099_v58  ;;  %v988_v14 = vadd.f32 %v24558_v32, %v906_v2  ;;  %v185_v63 = vld [vmem:[#allocation7 + $0x68] sm:$0xff] }
 0x188   :  { %15677 = vmatmul.mubr.f32.vlgmr.msra.gmra.mxu1 %v18094_v13  ;;  %v181_v32 = vld [vmem:[#allocation7 + $0x48] sm:$0xff] }
 0x189   :  { %15715 = vmatpush3.msra.mxu1 %v17810_v53  ;;  %v2332_v25 = vand.u32 4294901760, %v2331_v22  ;;  %v2343_v28 = vsub.f32 %v18097_v16, %v2342_v7  ;;  %v1070_v5 = vadd.f32 %v24561_v11, %v988_v14  ;;  %v24578_v14 = vld [vmem:[#allocation79_spill] sm:$0xff] }
 0x18a   :  { %15716 = vmatprep.subr.mxu1 %v17815_v56 }
 0x18b   :  { %15717 = vmatpush3.msra.mxu1 %v17815_v56  ;;  %15746 = vmatprep.mubr.f32.mxu1 %v2332_v25  ;;  %v2333_v61 = vsub.f32 %v2331_v22, %v2332_v25  ;;  %v2344_v46 = vand.u32 4294901760, %v2343_v28  ;;  %v18218_v25 = vsub.f32 %v187_v37, %v18204_v38  ;;  %v184_v28 = vld [vmem:[#allocation7 + $0x60] sm:$0xff] }
 0x18c   :  { %15718 = vmatprep.subr.mxu1 %v17825_v60  ;;  %v18231_v35 = vand.u32 4294901760, %v184_v28 }
 0x18d   :  { %15719 = vmatpush3.msra.mxu1 %v17825_v60  ;;  %v2334_v45 = vand.u32 4294901760, %v2333_v61  ;;  %24567 = vst [vmem:[#allocation111_spill] sm:$0xff] %v18218_v25  ;;  %v24568_v61 = vld [vmem:[#allocation67_spill] sm:$0xff]  ;;  %v18237_v20 = vand.u32 4294901760, %v18218_v25 }
 0x18e   :  { %15720 = vmatprep.subr.mxu1 %v17837_v1  ;;  %v18254_v11 = vsub.f32 %v184_v28, %v18231_v35 }
 0x18f   :  { %15721 = vmatpush3.msra.mxu1 %v17837_v1  ;;  %15641 = vmatprep.mubr.f32.mxu0 %v2334_v45  ;;  %v18222_v45 = vand.u32 4294901760, %v185_v63  ;;  %24574 = vst [vmem:[#allocation116_spill] sm:$0xff] %v18237_v20 }
 0x190   :  { %15722 = vmatprep.subr.mxu1 %v17852_v8  ;;  %15642 = vmatmul.mubr.f32.vlgmr.msra.gmra.mxu0 %v2344_v46  ;;  %v183_v46 = vld [vmem:[#allocation7 + $0x58] sm:$0xff]  ;;  %24580 = vst [vmem:[#allocation120_spill] sm:$0xff] %v18254_v11 }
 0x191   :  { %15680 = vmatpush3.msra.mxu0 %v17813_v55  ;;  %15723 = vmatpush3.msra.mxu1 %v17852_v8  ;;  %24569 = vst [vmem:[#allocation112_spill] sm:$0xff] %v18222_v45  ;;  %v18242_v49 = vsub.f32 %v185_v63, %v18222_v45  ;;  %v18244_v2 = vand.u32 4294901760, %v183_v46  ;;  %v3038_v63 = vsub.f32 %v18218_v25, %v18237_v20 }
 0x192   :  { %15681 = vmatprep.subr.mxu0 %v17823_v59  ;;  %15711 = vmatprep.mubr.f32.mxu0 %v2331_v22 }
 0x193   :  { %15724 = vmatprep.subr.mxu1 %v17863_v15  ;;  %15682 = vmatpush3.msra.mxu0 %v17823_v59  ;;  %24576 = vst [vmem:[#allocation117_spill] sm:$0xff] %v18242_v49  ;;  %24577 = vst [vmem:[#allocation118_spill] sm:$0xff] %v18244_v2  ;;  %v18270_v28 = vsub.f32 %v183_v46, %v18244_v2 }
 0x194   :  { %15725 = vmatpush3.msra.mxu1 %v17863_v15  ;;  %15683 = vmatprep.subr.mxu0 %v17835_v0 }
 0x195   :  { %15726 = vmatprep.subr.mxu1 %v17878_v24  ;;  %15684 = vmatpush3.msra.mxu0 %v17835_v0  ;;  %24584 = vst [vmem:[#allocation123_spill] sm:$0xff] %v18270_v28 }
 0x196   :  { %15727 = vmatpush3.msra.mxu1 %v17878_v24  ;;  %15685 = vmatprep.subr.mxu0 %v17849_v6 }
 0x197   :  { %15728 = vmatprep.subr.mxu1 %v17895_v30  ;;  %15686 = vmatpush3.msra.mxu0 %v17849_v6  ;;  %v24607_v6 = vld [vmem:[#allocation104_spill] sm:$0xff] }
 0x198   :  { %15729 = vmatpush3.msra.mxu1 %v17895_v30  ;;  %15687 = vmatprep.subr.mxu0 %v17867_v17 }
 0x199   :  { %15730 = vmatprep.subr.mxu1 %v17911_v44  ;;  %15688 = vmatpush3.msra.mxu0 %v17867_v17  ;;  %v175_v17 = vld [vmem:[#allocation7 + $0x18] sm:$0xff] }
 0x19a   :  { %15731 = vmatpush3.msra.mxu1 %v17911_v44  ;;  %15689 = vmatprep.subr.mxu0 %v17876_v23 }
 0x19b   :  { %15732 = vmatprep.subr.mxu1 %v17930_v54  ;;  %15690 = vmatpush3.msra.mxu0 %v17876_v23 }
 0x19c   :  { %15733 = vmatpush3.msra.mxu1 %v17930_v54  ;;  %15691 = vmatprep.subr.mxu0 %v17893_v29 }
 0x19d   :  { %15734 = vmatprep.subr.mxu1 %v17941_v4  ;;  %15692 = vmatpush3.msra.mxu0 %v17893_v29 }
 0x19e   :  { %15735 = vmatpush3.msra.mxu1 %v17941_v4  ;;  %15693 = vmatprep.subr.mxu0 %v17909_v43 }
 0x19f   :  { %15736 = vmatprep.subr.mxu1 %v17957_v33  ;;  %15694 = vmatpush3.msra.mxu0 %v17909_v43  ;;  %v24602_v43 = vld [vmem:[#allocation99_spill] sm:$0xff] }
 0x1a0   :  { %15737 = vmatpush3.msra.mxu1 %v17957_v33  ;;  %15695 = vmatprep.subr.mxu0 %v17926_v52 }
 0x1a1   :  { %15738 = vmatprep.subr.mxu1 %v17974_v62  ;;  %15696 = vmatpush3.msra.mxu0 %v17926_v52  ;;  %v176_v52 = vld [vmem:[#allocation7 + $0x20] sm:$0xff] }
 0x1a2   :  { %15739 = vmatpush3.msra.mxu1 %v17974_v62  ;;  %15697 = vmatprep.subr.mxu0 %v17946_v9 }
 0x1a3   :  { %15740 = vmatprep.subr.mxu1 %v17990_v27  ;;  %15698 = vmatpush3.msra.mxu0 %v17946_v9 }
 0x1a4   :  { %15741 = vmatpush3.msra.mxu1 %v17990_v27  ;;  %15699 = vmatprep.subr.mxu0 %v17955_v26 }
 0x1a5   :  { %15742 = vmatprep.subr.mxu1 %v18010_v47  ;;  %15700 = vmatpush3.msra.mxu0 %v17955_v26 }
 0x1a6   :  { %15743 = vmatpush3.msra.mxu1 %v18010_v47  ;;  %15701 = vmatprep.subr.mxu0 %v17972_v57 }
 0x1a7   :  { %15744 = vmatprep.subr.mxu1 %v24550_v31  ;;  %15702 = vmatpush3.msra.mxu0 %v17972_v57  ;;  %v177_v57 = vld [vmem:[#allocation7 + $0x28] sm:$0xff] }
 0x1a8   :  { %15745 = vmatpush3.msra.mxu1 %v24550_v31  ;;  %15703 = vmatprep.subr.mxu0 %v24551_v21  ;;  %v18340_v29 = vand.u32 4294901760, %v177_v57 }
 0x1a9   :  { %15747 = vmatmul.mubr.f32.vlgmr.msra.gmra.mxu1 %v2342_v7  ;;  %15784 = vmatprep.subr.mxu1 %v17810_v53  ;;  %v24566_v7 = vld [vmem:[#allocation114_spill] sm:$0xff] }
 0x1aa   :  { %15704 = vmatpush3.msra.mxu0 %v24551_v21  ;;  %15785 = vmatpush3.msra.mxu1 %v17810_v53  ;;  %v1155_v22 = vadd.f32 %v24566_v7, %v1070_v5  ;;  %24572 = vst [vmem:[#allocation114_spill] sm:$0xff] %v18231_v35  ;;  %v18256_v5 = vand.u32 4294901760, %v182_v12  ;;  %v180_v7 = vld [vmem:[#allocation7 + $0x40] sm:$0xff]  ;;  %24604 = vst [vmem:[#allocation139_spill] sm:$0xff] %v18340_v29 }
 0x1ab   :  { %15816 = vmatprep.mubr.f32.mxu1 %v18099_v58  ;;  %15705 = vmatprep.subr.mxu0 %v24553_v48  ;;  %v18286_v46 = vand.u32 4294901760, %v180_v7 }
 0x1ac   :  { %15786 = vmatprep.subr.mxu1 %v17815_v56  ;;  %15706 = vmatpush3.msra.mxu0 %v24553_v48  ;;  %v1234_v42 = vadd.f32 %v24573_v41, %v1155_v22  ;;  %24581 = vst [vmem:[#allocation121_spill] sm:$0xff] %v18256_v5  ;;  %v24582_v22 = vld [vmem:[#allocation85_spill] sm:$0xff]  ;;  %v18267_v41 = vand.u32 4294901760, %v18242_v49 }
 0x1ad   :  { %15787 = vmatpush3.msra.mxu1 %v17815_v56  ;;  %15707 = vmatprep.subr.mxu0 %v24554_v36  ;;  %24589 = vst [vmem:[#allocation127_spill] sm:$0xff] %v18286_v46 }
 0x1ae   :  { %15788 = vmatprep.subr.mxu1 %v17825_v60  ;;  %15708 = vmatpush3.msra.mxu0 %v24554_v36  ;;  %24583 = vst [vmem:[#allocation122_spill] sm:$0xff] %v18267_v41 }
 0x1af   :  { %15789 = vmatpush3.msra.mxu1 %v17825_v60  ;;  %15709 = vmatprep.subr.mxu0 %v24556_v10 }
 0x1b0   :  { %15790 = vmatprep.subr.mxu1 %v17837_v1  ;;  %15710 = vmatpush3.msra.mxu0 %v24556_v10 }
 0x1b1   :  { %15791 = vmatpush3.msra.mxu1 %v17837_v1  ;;  %15712 = vmatmul.mubr.f32.vlgmr.msra.gmra.mxu0 %v18097_v16  ;;  %v24564_v16 = vld [vmem:[#allocation65_spill] sm:$0xff] }
 0x1b2   :  { %15749 = vmatprep.subr.mxu0 %v24557_v51  ;;  %15792 = vmatprep.subr.mxu1 %v17852_v8 }
 0x1b3   :  { %15750 = vmatpush3.msra.mxu0 %v24557_v51  ;;  %15781 = vmatprep.mubr.f32.mxu0 %v18099_v58  ;;  %v18212_v58 = vand.u32 4294901760, %v186_v40  ;;  %v18300_v51 = vand.u32 4294901760, %v18270_v28 }
 0x1b4   :  { %15793 = vmatpush3.msra.mxu1 %v17852_v8  ;;  %15751 = vmatprep.subr.mxu0 %v24559_v39 }
 0x1b5   :  { %15794 = vmatprep.subr.mxu1 %v17863_v15  ;;  %15752 = vmatpush3.msra.mxu0 %v24559_v39  ;;  %24565 = vst [vmem:[#allocation110_spill] sm:$0xff] %v18212_v58  ;;  %v18229_v19 = vsub.f32 %v186_v40, %v18212_v58  ;;  %v18258_v40 = vand.u32 4294901760, %v1234_v42  ;;  %v24591_v39 = vld [vmem:[#allocation90_spill] sm:$0xff]  ;;  %24592 = vst [vmem:[#allocation129_spill] sm:$0xff] %v18300_v51  ;;  %v3066_v9 = vsub.f32 %v18270_v28, %v18300_v51 }
 0x1b6   :  { %15795 = vmatpush3.msra.mxu1 %v17863_v15  ;;  %15753 = vmatprep.subr.mxu0 %v24560_v50 }
 0x1b7   :  { %15796 = vmatprep.subr.mxu1 %v17878_v24  ;;  %15754 = vmatpush3.msra.mxu0 %v24560_v50  ;;  %24571 = vst [vmem:[#allocation113_spill] sm:$0xff] %v18229_v19  ;;  %v18251_v37 = vand.u32 4294901760, %v18229_v19  ;;  %v18289_v50 = vsub.f32 %v1234_v42, %v18258_v40  ;;  %v178_v42 = vld [vmem:[#allocation7 + $0x30] sm:$0xff] }
 0x1b8   :  { %15797 = vmatpush3.msra.mxu1 %v17878_v24  ;;  %15755 = vmatprep.subr.mxu0 %v24563_v18  ;;  %v18324_v26 = vand.u32 4294901760, %v178_v42 }
 0x1b9   :  { %15798 = vmatprep.subr.mxu1 %v17895_v30  ;;  %15756 = vmatpush3.msra.mxu0 %v24563_v18  ;;  %24579 = vst [vmem:[#allocation119_spill] sm:$0xff] %v18251_v37  ;;  %v179_v18 = vld [vmem:[#allocation7 + $0x38] sm:$0xff] }
 0x1ba   :  { %15799 = vmatpush3.msra.mxu1 %v17895_v30  ;;  %15757 = vmatprep.subr.mxu0 %v24564_v16  ;;  %24599 = vst [vmem:[#allocation135_spill] sm:$0xff] %v18324_v26  ;;  %v18357_v59 = vsub.f32 %v178_v42, %v18324_v26  ;;  %v18373_v42 = vsub.f32 %v177_v57, %v18340_v29 }
 0x1bb   :  { %15800 = vmatprep.subr.mxu1 %v17911_v44  ;;  %15758 = vmatpush3.msra.mxu0 %v24564_v16  ;;  %v18284_v16 = vsub.f32 %v182_v12, %v18256_v5  ;;  %v3052_v12 = vsub.f32 %v18242_v49, %v18267_v41 }
 0x1bc   :  { %15801 = vmatpush3.msra.mxu1 %v17911_v44  ;;  %15759 = vmatprep.subr.mxu0 %v24568_v61  ;;  %24609 = vst [vmem:[#allocation142_spill] sm:$0xff] %v18357_v59  ;;  %24614 = vst [vmem:[#allocation146_spill] sm:$0xff] %v18373_v42  ;;  %v18386_v57 = vand.u32 4294901760, %v18357_v59 }
 0x1bd   :  { %15802 = vmatprep.subr.mxu1 %v17930_v54  ;;  %15760 = vmatpush3.msra.mxu0 %v24568_v61  ;;  %v18281_v61 = vand.u32 4294901760, %v18254_v11  ;;  %24588 = vst [vmem:[#allocation126_spill] sm:$0xff] %v18284_v16  ;;  %v18316_v21 = vand.u32 4294901760, %v18284_v16 }
 0x1be   :  { %15803 = vmatpush3.msra.mxu1 %v17930_v54  ;;  %15761 = vmatprep.subr.mxu0 %v24570_v3  ;;  %24617 = vst [vmem:[#allocation149_spill] sm:$0xff] %v18386_v57 }
 0x1bf   :  { %15804 = vmatprep.subr.mxu1 %v17941_v4  ;;  %15762 = vmatpush3.msra.mxu0 %v24570_v3  ;;  %v3045_v3 = vsub.f32 %v18229_v19, %v18251_v37  ;;  %24587 = vst [vmem:[#allocation125_spill] sm:$0xff] %v18281_v61  ;;  %v3059_v48 = vsub.f32 %v18254_v11, %v18281_v61  ;;  %24597 = vst [vmem:[#allocation133_spill] sm:$0xff] %v18316_v21 }
 0x1c0   :  { %15805 = vmatpush3.msra.mxu1 %v17941_v4  ;;  %15763 = vmatprep.subr.mxu0 %v24575_v34 }
 0x1c1   :  { %15806 = vmatprep.subr.mxu1 %v17957_v33  ;;  %15764 = vmatpush3.msra.mxu0 %v24575_v34  ;;  %v18272_v34 = vand.u32 4294901760, %v181_v32  ;;  %v18311_v36 = vand.u32 4294901760, %v3045_v3  ;;  %v18328_v3 = vand.u32 4294901760, %v3052_v12  ;;  %v18344_v12 = vand.u32 4294901760, %v3059_v48 }
 0x1c2   :  { %15807 = vmatpush3.msra.mxu1 %v17957_v33  ;;  %15765 = vmatprep.subr.mxu0 %v24578_v14  ;;  %v18359_v48 = vand.u32 4294901760, %v176_v52 }
 0x1c3   :  { %15808 = vmatprep.subr.mxu1 %v17974_v62  ;;  %15766 = vmatpush3.msra.mxu0 %v24578_v14  ;;  %24585 = vst [vmem:[#allocation124_spill] sm:$0xff] %v18272_v34  ;;  %v24586_v14 = vld [vmem:[#allocation87_spill] sm:$0xff]  ;;  %v18303_v10 = vsub.f32 %v181_v32, %v18272_v34  ;;  %24596 = vst [vmem:[#allocation132_spill] sm:$0xff] %v18311_v36  ;;  %v18319_v32 = vsub.f32 %v180_v7, %v18286_v46 }
 0x1c4   :  { %15809 = vmatpush3.msra.mxu1 %v17974_v62  ;;  %15767 = vmatprep.subr.mxu0 %v24582_v22  ;;  %24600 = vst [vmem:[#allocation136_spill] sm:$0xff] %v18328_v3  ;;  %24605 = vst [vmem:[#allocation140_spill] sm:$0xff] %v18344_v12  ;;  %v173_v62 = vld [vmem:[#allocation7 + $0x8] sm:$0xff]  ;;  %v18389_v4 = vsub.f32 %v176_v52, %v18359_v48 }
 0x1c5   :  { %15810 = vmatprep.subr.mxu1 %v17990_v27  ;;  %15768 = vmatpush3.msra.mxu0 %v24582_v22  ;;  %v18293_v22 = vand.u32 4294901760, %v3038_v63  ;;  %24593 = vst [vmem:[#allocation130_spill] sm:$0xff] %v18303_v10  ;;  %v18307_v63 = vand.u32 4294901760, %v179_v18  ;;  %24598 = vst [vmem:[#allocation134_spill] sm:$0xff] %v18319_v32  ;;  %v18333_v7 = vand.u32 4294901760, %v18303_v10  ;;  %v18349_v23 = vand.u32 4294901760, %v18319_v32 }
 0x1c6   :  { %15811 = vmatpush3.msra.mxu1 %v17990_v27  ;;  %15769 = vmatprep.subr.mxu0 %v24586_v14  ;;  %24610 = vst [vmem:[#allocation143_spill] sm:$0xff] %v18359_v48  ;;  %v18375_v27 = vand.u32 4294901760, %v175_v17  ;;  %24618 = vst [vmem:[#allocation150_spill] sm:$0xff] %v18389_v4  ;;  %v18406_v44 = vand.u32 4294901760, %v173_v62  ;;  %v18417_v30 = vand.u32 4294901760, %v18389_v4 }
 0x1c7   :  { %15812 = vmatprep.subr.mxu1 %v18010_v47  ;;  %15770 = vmatpush3.msra.mxu0 %v24586_v14  ;;  %24590 = vst [vmem:[#allocation128_spill] sm:$0xff] %v18293_v22  ;;  %24594 = vst [vmem:[#allocation131_spill] sm:$0xff] %v18307_v63  ;;  %v24595_v14 = vld [vmem:[#allocation95_spill] sm:$0xff]  ;;  %v3080_v55 = vsub.f32 %v18303_v10, %v18333_v7 }
 0x1c8   :  { %15813 = vmatpush3.msra.mxu1 %v18010_v47  ;;  %15771 = vmatprep.subr.mxu0 %v24591_v39  ;;  %24601 = vst [vmem:[#allocation137_spill] sm:$0xff] %v18333_v7  ;;  %24606 = vst [vmem:[#allocation141_spill] sm:$0xff] %v18349_v23  ;;  %v24612_v47 = vld [vmem:[#allocation106_spill] sm:$0xff]  ;;  %v18404_v52 = vsub.f32 %v175_v17, %v18375_v27 }
 0x1c9   :  { %15814 = vmatprep.subr.mxu1 %v24550_v31  ;;  %15772 = vmatpush3.msra.mxu0 %v24591_v39  ;;  %v18338_v39 = vsub.f32 %v179_v18, %v18307_v63  ;;  %v24608_v18 = vand.u32 4294901760, %v18289_v50  ;;  %24615 = vst [vmem:[#allocation147_spill] sm:$0xff] %v18375_v27  ;;  %24623 = vst [vmem:[#allocation155_spill] sm:$0xff] %v18406_v44 }
 0x1ca   :  { %15815 = vmatpush3.msra.mxu1 %v24550_v31  ;;  %15773 = vmatprep.subr.mxu0 %v24595_v14  ;;  %v174_v31 = vld [vmem:[#allocation7 + $0x10] sm:$0xff]  ;;  %24622 = vst [vmem:[#allocation154_spill] sm:$0xff] %v18404_v52  ;;  %24625 = vst [vmem:[#allocation157_spill] sm:$0xff] %v18417_v30  ;;  %v18433_v8 = vand.u32 4294901760, %v18404_v52 }
 0x1cb   :  { %15817 = vmatmul.mubr.f32.vlgmr.msra.gmra.mxu1 %v18094_v13  ;;  %15854 = vmatprep.subr.mxu1 %v18293_v22  ;;  %24603 = vst [vmem:[#allocation138_spill] sm:$0xff] %v18338_v39  ;;  %v3017_v0 = vsub.f32 %v18289_v50, %v24608_v18  ;;  %v18370_v18 = vand.u32 4294901760, %v18338_v39  ;;  %v18391_v54 = vand.u32 4294901760, %v174_v31 }
 0x1cc   :  { %15774 = vmatpush3.msra.mxu0 %v24595_v14  ;;  %15855 = vmatpush3.msra.mxu1 %v18293_v22  ;;  %v3073_v14 = vsub.f32 %v18284_v16, %v18316_v21  ;;  %24629 = vst [vmem:[#allocation161_spill] sm:$0xff] %v18433_v8 }
 0x1cd   :  { %15886 = vmatprep.mubr.f32.mxu1 %v18258_v40  ;;  %15775 = vmatprep.subr.mxu0 %v24602_v43  ;;  %24613 = vst [vmem:[#allocation145_spill] sm:$0xff] %v18370_v18  ;;  %v3018_v33 = vand.u32 4294901760, %v3017_v0  ;;  %24619 = vst [vmem:[#allocation151_spill] sm:$0xff] %v18391_v54  ;;  %v3094_v0 = vsub.f32 %v18338_v39, %v18370_v18  ;;  %v18420_v17 = vsub.f32 %v174_v31, %v18391_v54 }
 0x1ce   :  { %15856 = vmatprep.subr.mxu1 %v18311_v36  ;;  %15776 = vmatpush3.msra.mxu0 %v24602_v43  ;;  %v18363_v43 = vand.u32 4294901760, %v3066_v9  ;;  %v18379_v9 = vand.u32 4294901760, %v3073_v14  ;;  %v18395_v14 = vand.u32 4294901760, %v3080_v55  ;;  %v18436_v31 = vsub.f32 %v173_v62, %v18406_v44 }
 0x1cf   :  { %15857 = vmatpush3.msra.mxu1 %v18311_v36  ;;  %15777 = vmatprep.subr.mxu0 %v24607_v6  ;;  %24626 = vst [vmem:[#allocation158_spill] sm:$0xff] %v18420_v17  ;;  %v18447_v60 = vand.u32 4294901760, %v18420_v17 }
 0x1d0   :  { %15858 = vmatprep.subr.mxu1 %v18328_v3  ;;  %15778 = vmatpush3.msra.mxu0 %v24607_v6  ;;  %24611 = vst [vmem:[#allocation144_spill] sm:$0xff] %v18363_v43  ;;  %24616 = vst [vmem:[#allocation148_spill] sm:$0xff] %v18379_v9  ;;  %v3087_v6 = vsub.f32 %v18319_v32, %v18349_v23  ;;  %v18461_v53 = vand.u32 4294901760, %v18436_v31 }
 0x1d1   :  { %15859 = vmatpush3.msra.mxu1 %v18328_v3  ;;  %15779 = vmatprep.subr.mxu0 %v24612_v47  ;;  %24620 = vst [vmem:[#allocation152_spill] sm:$0xff] %v18395_v14  ;;  %24630 = vst [vmem:[#allocation162_spill] sm:$0xff] %v18436_v31 }
 0x1d2   :  { %15860 = vmatprep.subr.mxu1 %v18344_v12  ;;  %15780 = vmatpush3.msra.mxu0 %v24612_v47  ;;  %v172_v47 = vld [vmem:[#allocation7] sm:$0xff]  ;;  %v18410_v55 = vand.u32 4294901760, %v3087_v6  ;;  %v18428_v6 = vand.u32 4294901760, %v3094_v0  ;;  %v3115_v0 = vsub.f32 %v18389_v4, %v18417_v30  ;;  %24632 = vst [vmem:[#allocation164_spill] sm:$0xff] %v18447_v60  ;;  %24635 = vst [vmem:[#allocation167_spill] sm:$0xff] %v18461_v53 }
 0x1d3   :  { %15861 = vmatpush3.msra.mxu1 %v18344_v12  ;;  %15782 = vmatmul.mubr.f32.vlgmr.msra.gmra.mxu0 %v18094_v13  ;;  %v18401_v13 = vand.u32 4294901760, %v18373_v42  ;;  %v18422_v24 = vand.u32 4294901760, %v172_v47 }
 0x1d4   :  { %15819 = vmatprep.subr.mxu0 %v18204_v38  ;;  %15862 = vmatprep.subr.mxu1 %v18363_v43  ;;  %24624 = vst [vmem:[#allocation156_spill] sm:$0xff] %v18410_v55  ;;  %24628 = vst [vmem:[#allocation160_spill] sm:$0xff] %v18428_v6 }
 0x1d5   :  { %15820 = vmatpush3.msra.mxu0 %v18204_v38  ;;  %15851 = vmatprep.mubr.f32.mxu0 %v3018_v33  ;;  %24621 = vst [vmem:[#allocation153_spill] sm:$0xff] %v18401_v13  ;;  %v3101_v33 = vsub.f32 %v18357_v59, %v18386_v57  ;;  %24627 = vst [vmem:[#allocation159_spill] sm:$0xff] %v18422_v24  ;;  %v3108_v15 = vsub.f32 %v18373_v42, %v18401_v13 }
 0x1d6   :  { %15863 = vmatpush3.msra.mxu1 %v18363_v43  ;;  %15821 = vmatprep.subr.mxu0 %v18212_v58  ;;  %v18450_v56 = vsub.f32 %v172_v47, %v18422_v24  ;;  %v18467_v47 = vand.u32 4294901760, %v3115_v0  ;;  %v3136_v0 = vsub.f32 %v18436_v31, %v18461_v53 }
 0x1d7   :  { %15864 = vmatprep.subr.mxu1 %v18379_v9  ;;  %15822 = vmatpush3.msra.mxu0 %v18212_v58  ;;  %v18442_v1 = vand.u32 4294901760, %v3101_v33  ;;  %v18456_v62 = vand.u32 4294901760, %v3108_v15  ;;  %v3122_v33 = vsub.f32 %v18404_v52, %v18433_v8  ;;  %v3129_v15 = vsub.f32 %v18420_v17, %v18447_v60 }
 0x1d8   :  { %15865 = vmatpush3.msra.mxu1 %v18379_v9  ;;  %15823 = vmatprep.subr.mxu0 %v18222_v45  ;;  %24633 = vst [vmem:[#allocation165_spill] sm:$0xff] %v18450_v56  ;;  %24636 = vst [vmem:[#allocation168_spill] sm:$0xff] %v18467_v47 }
 0x1d9   :  { %15866 = vmatprep.subr.mxu1 %v18395_v14  ;;  %15824 = vmatpush3.msra.mxu0 %v18222_v45  ;;  %24631 = vst [vmem:[#allocation163_spill] sm:$0xff] %v18442_v1  ;;  %24634 = vst [vmem:[#allocation166_spill] sm:$0xff] %v18456_v62 }
 0x1da   :  { %15867 = vmatpush3.msra.mxu1 %v18395_v14  ;;  %15825 = vmatprep.subr.mxu0 %v18231_v35  ;;  %v24639_v14 = vld [vmem:[#allocation115_spill] sm:$0xff] }
 0x1db   :  { %15868 = vmatprep.subr.mxu1 %v18410_v55  ;;  %15826 = vmatpush3.msra.mxu0 %v18231_v35  ;;  %v18485_v9 = vand.u32 4294901760, %v24639_v14 }
 0x1dc   :  { %15869 = vmatpush3.msra.mxu1 %v18410_v55  ;;  %15827 = vmatprep.subr.mxu0 %v18244_v2  ;;  %v18472_v55 = vand.u32 4294901760, %v18450_v56 }
 0x1dd   :  { %15870 = vmatprep.subr.mxu1 %v18428_v6  ;;  %15828 = vmatpush3.msra.mxu0 %v18244_v2 }
 0x1de   :  { %15871 = vmatpush3.msra.mxu1 %v18428_v6  ;;  %15829 = vmatprep.subr.mxu0 %v18256_v5  ;;  %24637 = vst [vmem:[#allocation169_spill] sm:$0xff] %v18472_v55  ;;  %v18478_v6 = vand.u32 4294901760, %v3122_v33  ;;  %v3143_v33 = vsub.f32 %v18450_v56, %v18472_v55 }
 0x1df   :  { %15872 = vmatprep.subr.mxu1 %v18442_v1  ;;  %15830 = vmatpush3.msra.mxu0 %v18256_v5 }
 0x1e0   :  { %15873 = vmatpush3.msra.mxu1 %v18442_v1  ;;  %15831 = vmatprep.subr.mxu0 %v18272_v34  ;;  %24638 = vst [vmem:[#allocation170_spill] sm:$0xff] %v18478_v6  ;;  %v18489_v1 = vand.u32 4294901760, %v3129_v15  ;;  %v18503_v15 = vsub.f32 %v24639_v14, %v18485_v9 }
 0x1e1   :  { %15874 = vmatprep.subr.mxu1 %v18456_v62  ;;  %15832 = vmatpush3.msra.mxu0 %v18272_v34 }
 0x1e2   :  { %15875 = vmatpush3.msra.mxu1 %v18456_v62  ;;  %15833 = vmatprep.subr.mxu0 %v18286_v46  ;;  %24640 = vst [vmem:[#allocation115_spill] sm:$0xff] %v18489_v1  ;;  %v18497_v62 = vand.u32 4294901760, %v3136_v0  ;;  %v23743_v14 = vand.u32 4294901760, %v18503_v15 }
 0x1e3   :  { %15876 = vmatprep.subr.mxu1 %v18467_v47  ;;  %15834 = vmatpush3.msra.mxu0 %v18286_v46 }
 0x1e4   :  { %15877 = vmatpush3.msra.mxu1 %v18467_v47  ;;  %15835 = vmatprep.subr.mxu0 %v18307_v63  ;;  %24641 = vst [vmem:[#allocation171_spill] sm:$0xff] %v18497_v62  ;;  %v18507_v47 = vand.u32 4294901760, %v3143_v33  ;;  %v3027_v0 = vsub.f32 %v18503_v15, %v23743_v14  ;;  %v24643_v33 = vand.u32 4294901760, %v18289_v50 }
 0x1e5   :  { %15878 = vmatprep.subr.mxu1 %v18478_v6  ;;  %15836 = vmatpush3.msra.mxu0 %v18307_v63 }
 0x1e6   :  { %15879 = vmatpush3.msra.mxu1 %v18478_v6  ;;  %15837 = vmatprep.subr.mxu0 %v18324_v26  ;;  %24642 = vst [vmem:[#allocation172_spill] sm:$0xff] %v18507_v47  ;;  %v3028_v14 = vand.u32 4294901760, %v3027_v0 }
 0x1e7   :  { %15880 = vmatprep.subr.mxu1 %v18489_v1  ;;  %15838 = vmatpush3.msra.mxu0 %v18324_v26 }
 0x1e8   :  { %15881 = vmatpush3.msra.mxu1 %v18489_v1  ;;  %15839 = vmatprep.subr.mxu0 %v18340_v29 }
 0x1e9   :  { %15882 = vmatprep.subr.mxu1 %v18497_v62  ;;  %15840 = vmatpush3.msra.mxu0 %v18340_v29 }
 0x1ea   :  { %15883 = vmatpush3.msra.mxu1 %v18497_v62  ;;  %15841 = vmatprep.subr.mxu0 %v18359_v48 }
 0x1eb   :  { %15884 = vmatprep.subr.mxu1 %v18507_v47  ;;  %15842 = vmatpush3.msra.mxu0 %v18359_v48 }
 0x1ec   :  { %15885 = vmatpush3.msra.mxu1 %v18507_v47  ;;  %15843 = vmatprep.subr.mxu0 %v18375_v27 }
 0x1ed   :  { %15887 = vmatmul.mubr.f32.vlgmr.msra.gmra.mxu1 %v18485_v9  ;;  %15924 = vmatprep.subr.mxu1 %v18204_v38 }
 0x1ee   :  { %15844 = vmatpush3.msra.mxu0 %v18375_v27  ;;  %15925 = vmatpush3.msra.mxu1 %v18204_v38 }
 0x1ef   :  { %15956 = vmatprep.mubr.f32.mxu1 %v24643_v33  ;;  %15845 = vmatprep.subr.mxu0 %v18391_v54 }
 0x1f0   :  { %15926 = vmatprep.subr.mxu1 %v18212_v58  ;;  %15846 = vmatpush3.msra.mxu0 %v18391_v54 }
 0x1f1   :  { %15927 = vmatpush3.msra.mxu1 %v18212_v58  ;;  %15847 = vmatprep.subr.mxu0 %v18406_v44 }
 0x1f2   :  { %15928 = vmatprep.subr.mxu1 %v18222_v45  ;;  %15848 = vmatpush3.msra.mxu0 %v18406_v44 }
 0x1f3   :  { %15929 = vmatpush3.msra.mxu1 %v18222_v45  ;;  %15849 = vmatprep.subr.mxu0 %v18422_v24 }
 0x1f4   :  { %15930 = vmatprep.subr.mxu1 %v18231_v35  ;;  %15850 = vmatpush3.msra.mxu0 %v18422_v24 }
 0x1f5   :  { %15931 = vmatpush3.msra.mxu1 %v18231_v35  ;;  %15852 = vmatmul.mubr.f32.vlgmr.msra.gmra.mxu0 %v3028_v14 }
 0x1f6   :  { %15889 = vmatprep.subr.mxu0 %v18218_v25  ;;  %15932 = vmatprep.subr.mxu1 %v18244_v2 }
 0x1f7   :  { %15890 = vmatpush3.msra.mxu0 %v18218_v25  ;;  %15921 = vmatprep.mubr.f32.mxu0 %v18289_v50  ;;  %v24644_v50 = vand.u32 4294901760, %v18503_v15 }
 0x1f8   :  { %15933 = vmatpush3.msra.mxu1 %v18244_v2  ;;  %15891 = vmatprep.subr.mxu0 %v18229_v19 }
 0x1f9   :  { %15934 = vmatprep.subr.mxu1 %v18256_v5  ;;  %15892 = vmatpush3.msra.mxu0 %v18229_v19 }
 0x1fa   :  { %15935 = vmatpush3.msra.mxu1 %v18256_v5  ;;  %15893 = vmatprep.subr.mxu0 %v18242_v49 }
 0x1fb   :  { %15936 = vmatprep.subr.mxu1 %v18272_v34  ;;  %15894 = vmatpush3.msra.mxu0 %v18242_v49  ;;  %v209_v49 = vld [vmem:[#allocation7 + $0x118] sm:$0xff] }
 0x1fc   :  { %15937 = vmatpush3.msra.mxu1 %v18272_v34  ;;  %15895 = vmatprep.subr.mxu0 %v18254_v11  ;;  %v18784_v47 = vand.u32 4294901760, %v209_v49 }
 0x1fd   :  { %15938 = vmatprep.subr.mxu1 %v18286_v46  ;;  %15896 = vmatpush3.msra.mxu0 %v18254_v11  ;;  %v210_v11 = vld [vmem:[#allocation7 + $0x120] sm:$0xff] }
 0x1fe   :  { %15939 = vmatpush3.msra.mxu1 %v18286_v46  ;;  %15897 = vmatprep.subr.mxu0 %v18270_v28  ;;  %v18772_v25 = vand.u32 4294901760, %v210_v11 }
 0x1ff   :  { %15940 = vmatprep.subr.mxu1 %v18307_v63  ;;  %15898 = vmatpush3.msra.mxu0 %v18270_v28  ;;  %v24647_v28 = vmov 0.0  }
 0x200   :  { %15941 = vmatpush3.msra.mxu1 %v18307_v63  ;;  %15899 = vmatprep.subr.mxu0 %v18284_v16 }
 0x201   :  { %15942 = vmatprep.subr.mxu1 %v18324_v26  ;;  %15900 = vmatpush3.msra.mxu0 %v18284_v16 }
 0x202   :  { %15943 = vmatpush3.msra.mxu1 %v18324_v26  ;;  %15901 = vmatprep.subr.mxu0 %v18303_v10 }
 0x203   :  { %15944 = vmatprep.subr.mxu1 %v18340_v29  ;;  %15902 = vmatpush3.msra.mxu0 %v18303_v10 }
 0x204   :  { %15945 = vmatpush3.msra.mxu1 %v18340_v29  ;;  %15903 = vmatprep.subr.mxu0 %v18319_v32 }
 0x205   :  { %15946 = vmatprep.subr.mxu1 %v18359_v48  ;;  %15904 = vmatpush3.msra.mxu0 %v18319_v32 }
 0x206   :  { %15947 = vmatpush3.msra.mxu1 %v18359_v48  ;;  %15905 = vmatprep.subr.mxu0 %v18338_v39 }
 0x207   :  { %15948 = vmatprep.subr.mxu1 %v18375_v27  ;;  %15906 = vmatpush3.msra.mxu0 %v18338_v39  ;;  %v211_v39 = vld [vmem:[#allocation7 + $0x128] sm:$0xff] }
 0x208   :  { %15949 = vmatpush3.msra.mxu1 %v18375_v27  ;;  %15907 = vmatprep.subr.mxu0 %v18357_v59 }
 0x209   :  { %15950 = vmatprep.subr.mxu1 %v18391_v54  ;;  %15908 = vmatpush3.msra.mxu0 %v18357_v59  ;;  %v213_v59 = vld [vmem:[#allocation7 + $0x138] sm:$0xff] }
 0x20a   :  { %15951 = vmatpush3.msra.mxu1 %v18391_v54  ;;  %15909 = vmatprep.subr.mxu0 %v18373_v42 }
 0x20b   :  { %15952 = vmatprep.subr.mxu1 %v18406_v44  ;;  %15910 = vmatpush3.msra.mxu0 %v18373_v42 }
 0x20c   :  { %15953 = vmatpush3.msra.mxu1 %v18406_v44  ;;  %15911 = vmatprep.subr.mxu0 %v18389_v4 }
 0x20d   :  { %15954 = vmatprep.subr.mxu1 %v18422_v24  ;;  %15912 = vmatpush3.msra.mxu0 %v18389_v4 }
 0x20e   :  { %15955 = vmatpush3.msra.mxu1 %v18422_v24  ;;  %15913 = vmatprep.subr.mxu0 %v18404_v52 }
 0x20f   :  { %15957 = vmatmul.mubr.f32.vlgmr.msra.gmra.mxu1 %v24644_v50  ;;  %15994 = vmatprep.subr.mxu1 %v18204_v38 }
 0x210   :  { %15914 = vmatpush3.msra.mxu0 %v18404_v52  ;;  %15995 = vmatpush3.msra.mxu1 %v18204_v38 }
 0x211   :  { %16026 = vmatprep.mubr.f32.mxu1 %v18258_v40  ;;  %15915 = vmatprep.subr.mxu0 %v18420_v17 }
 0x212   :  { %15996 = vmatprep.subr.mxu1 %v18212_v58  ;;  %15916 = vmatpush3.msra.mxu0 %v18420_v17 }
 0x213   :  { %15997 = vmatpush3.msra.mxu1 %v18212_v58  ;;  %15917 = vmatprep.subr.mxu0 %v18436_v31 }
 0x214   :  { %15998 = vmatprep.subr.mxu1 %v18222_v45  ;;  %15918 = vmatpush3.msra.mxu0 %v18436_v31 }
 0x215   :  { %15999 = vmatpush3.msra.mxu1 %v18222_v45  ;;  %15919 = vmatprep.subr.mxu0 %v18450_v56 }
 0x216   :  { %16000 = vmatprep.subr.mxu1 %v18231_v35  ;;  %15920 = vmatpush3.msra.mxu0 %v18450_v56 }
 0x217   :  { %16001 = vmatpush3.msra.mxu1 %v18231_v35  ;;  %15922 = vmatmul.mubr.f32.vlgmr.msra.gmra.mxu0 %v18503_v15 }
 0x218   :  { %15959 = vmatprep.subr.mxu0 %v18237_v20  ;;  %16002 = vmatprep.subr.mxu1 %v18244_v2 }
 0x219   :  { %15960 = vmatpush3.msra.mxu0 %v18237_v20  ;;  %15991 = vmatprep.mubr.f32.mxu0 %v18258_v40 }
 0x21a   :  { %16003 = vmatpush3.msra.mxu1 %v18244_v2  ;;  %15961 = vmatprep.subr.mxu0 %v18251_v37  ;;  %v4363_v2 = vld [vmem:[#allocation9 + $0x148] sm:$0xff] }
 0x21b   :  { %16004 = vmatprep.subr.mxu1 %v18256_v5  ;;  %15962 = vmatpush3.msra.mxu0 %v18251_v37  ;;  %v19240_v3 = vand.u32 4294901760, %v4363_v2 }
 0x21c   :  { %16005 = vmatpush3.msra.mxu1 %v18256_v5  ;;  %15963 = vmatprep.subr.mxu0 %v18267_v41 }
 0x21d   :  { %16006 = vmatprep.subr.mxu1 %v18272_v34  ;;  %15964 = vmatpush3.msra.mxu0 %v18267_v41 }
 0x21e   :  { %16007 = vmatpush3.msra.mxu1 %v18272_v34  ;;  %15965 = vmatprep.subr.mxu0 %v18281_v61  ;;  %v4364_v34 = vld [vmem:[#allocation9 + $0x150] sm:$0xff] }
 0x21f   :  { %16008 = vmatprep.subr.mxu1 %v18286_v46  ;;  %15966 = vmatpush3.msra.mxu0 %v18281_v61 }
 0x220   :  { %16009 = vmatpush3.msra.mxu1 %v18286_v46  ;;  %15967 = vmatprep.subr.mxu0 %v18300_v51 }
 0x221   :  { %16010 = vmatprep.subr.mxu1 %v18307_v63  ;;  %15968 = vmatpush3.msra.mxu0 %v18300_v51 }
 0x222   :  { %16011 = vmatpush3.msra.mxu1 %v18307_v63  ;;  %15969 = vmatprep.subr.mxu0 %v18316_v21 }
 0x223   :  { %16012 = vmatprep.subr.mxu1 %v18324_v26  ;;  %15970 = vmatpush3.msra.mxu0 %v18316_v21 }
 0x224   :  { %16013 = vmatpush3.msra.mxu1 %v18324_v26  ;;  %15971 = vmatprep.subr.mxu0 %v18333_v7 }
 0x225   :  { %16014 = vmatprep.subr.mxu1 %v18340_v29  ;;  %15972 = vmatpush3.msra.mxu0 %v18333_v7 }
 0x226   :  { %16015 = vmatpush3.msra.mxu1 %v18340_v29  ;;  %15973 = vmatprep.subr.mxu0 %v18349_v23 }
 0x227   :  { %16016 = vmatprep.subr.mxu1 %v18359_v48  ;;  %15974 = vmatpush3.msra.mxu0 %v18349_v23 }
 0x228   :  { %16017 = vmatpush3.msra.mxu1 %v18359_v48  ;;  %15975 = vmatprep.subr.mxu0 %v18370_v18 }
 0x229   :  { %16018 = vmatprep.subr.mxu1 %v18375_v27  ;;  %15976 = vmatpush3.msra.mxu0 %v18370_v18 }
 0x22a   :  { %16019 = vmatpush3.msra.mxu1 %v18375_v27  ;;  %15977 = vmatprep.subr.mxu0 %v18386_v57 }
 0x22b   :  { %16020 = vmatprep.subr.mxu1 %v18391_v54  ;;  %15978 = vmatpush3.msra.mxu0 %v18386_v57 }
 0x22c   :  { %16021 = vmatpush3.msra.mxu1 %v18391_v54  ;;  %15979 = vmatprep.subr.mxu0 %v18401_v13 }
 0x22d   :  { %16022 = vmatprep.subr.mxu1 %v18406_v44  ;;  %15980 = vmatpush3.msra.mxu0 %v18401_v13 }
 0x22e   :  { %16023 = vmatpush3.msra.mxu1 %v18406_v44  ;;  %15981 = vmatprep.subr.mxu0 %v18417_v30 }
 0x22f   :  { %16024 = vmatprep.subr.mxu1 %v18422_v24  ;;  %15982 = vmatpush3.msra.mxu0 %v18417_v30 }
 0x230   :  { %16025 = vmatpush3.msra.mxu1 %v18422_v24  ;;  %15983 = vmatprep.subr.mxu0 %v18433_v8 }
 0x231   :  { %16027 = vmatmul.mubr.f32.vlgmr.msra.gmra.mxu1 %v18485_v9  ;;  %15984 = vmatpush3.msra.mxu0 %v18433_v8 }
 0x232   :  { %15985 = vmatprep.subr.mxu0 %v18447_v60  ;;  %16096 = vmatprep.mubr.msk.f32.mxu1 %vm17441_vm2, %v24647_v28 }
 0x233   :  { %15986 = vmatpush3.msra.mxu0 %v18447_v60 }
 0x234   :  { %15987 = vmatprep.subr.mxu0 %v18461_v53 }
 0x235   :  { %15988 = vmatpush3.msra.mxu0 %v18461_v53 }
 0x236   :  { %15989 = vmatprep.subr.mxu0 %v18472_v55 }
 0x237   :  { %15990 = vmatpush3.msra.mxu0 %v18472_v55 }
 0x238   :  { %15992 = vmatmul.mubr.f32.vlgmr.msra.gmra.mxu0 %v18485_v9 }
 0x239   :  { %16061 = vmatprep.mubr.msk.f32.mxu0 %vm17441_vm2, %v24647_v28 }
 0x248   :  { %v15678_v15 = vpop.f32.mrf.mxu1 }
 0x24a   :  { %v2497_v33 = vpop.f32.mrf.mxu1 }
 0x250   :  { %v15643_v40 = vpop.f32.mrf.mxu0 }
 0x251   :  { %v2504_v50 = vadd.f32 %v15678_v15, %v15643_v40 }
 0x252   :  { %v2336_v14 = vpop.f32.mrf.mxu0 }
 0x253   :  { %v2498_v13 = vadd.f32 %v2497_v33, %v2336_v14 }
 0x269   :  { %v15748_v8 = vpop.f32.mrf.mxu1 }
 0x26b   :  { %v2703_v23 = vpop.f32.mrf.mxu1 }
 0x271   :  { %v15713_v0 = vpop.f32.mrf.mxu0 }
 0x272   :  { %v2615_v60 = vadd.f32 %v15713_v0, %v2504_v50 }
 0x273   :  { %v2607_v30 = vpop.f32.mrf.mxu0 }
 0x274   :  { %v2608_v18 = vadd.f32 %v2607_v30, %v2498_v13  ;;  %v2712_v53 = vadd.f32 %v15748_v8, %v2615_v60 }
 0x276   :  { %v2704_v55 = vadd.f32 %v2703_v23, %v2608_v18 }
 0x28b   :  { %v15818_v7 = vpop.f32.mrf.mxu1 }
 0x28d   :  { %v2923_v41 = vpop.f32.mrf.mxu1 }
 0x293   :  { %v15783_v57 = vpop.f32.mrf.mxu0 }
 0x294   :  { %v2837_v51 = vadd.f32 %v15783_v57, %v2712_v53 }
 0x295   :  { %v2830_v21 = vpop.f32.mrf.mxu0 }
 0x296   :  { %v2831_v9 = vadd.f32 %v2830_v21, %v2704_v55  ;;  %v2930_v37 = vadd.f32 %v15818_v7, %v2837_v51 }
 0x298   :  { %v2924_v40 = vadd.f32 %v2923_v41, %v2831_v9 }
 0x2ad   :  { %v15888_v20 = vpop.f32.mrf.mxu1 }
 0x2af   :  { %v3181_v14 = vpop.f32.mrf.mxu1 }
 0x2b5   :  { %v15853_v61 = vpop.f32.mrf.mxu0 }
 0x2b6   :  { %v3031_v31 = vadd.f32 %v15853_v61, %v2930_v37 }
 0x2b7   :  { %v3020_v56 = vpop.f32.mrf.mxu0 }
 0x2b8   :  { %v3021_v17 = vadd.f32 %v3020_v56, %v2924_v40  ;;  %v3188_v0 = vadd.f32 %v15888_v20, %v3031_v31 }
 0x2ba   :  { %v3182_v60 = vadd.f32 %v3181_v14, %v3021_v17 }
 0x2cf   :  { %v15958_v33 = vpop.f32.mrf.mxu1 }
 0x2d1   :  { %v3387_v50 = vpop.f32.mrf.mxu1 }
 0x2d7   :  { %v15923_v15 = vpop.f32.mrf.mxu0 }
 0x2d8   :  { %v3299_v13 = vadd.f32 %v15923_v15, %v3188_v0 }
 0x2d9   :  { %v3291_v30 = vpop.f32.mrf.mxu0 }
 0x2da   :  { %v3292_v8 = vadd.f32 %v3291_v30, %v3182_v60  ;;  %v3396_v53 = vadd.f32 %v15958_v33, %v3299_v13 }
 0x2dc   :  { %v3388_v57 = vadd.f32 %v3387_v50, %v3292_v8 }
 0x2f1   :  { %v16028_v23 = vpop.f32.mrf.mxu1 }
 0x2f3   :  { %v3607_v55 = vpop.f32.mrf.mxu1 }
 0x2f8   :  { %v15993_v18 = vpop.f32.mrf.mxu0 }
 0x2f9   :  { %v3521_v21 = vadd.f32 %v15993_v18, %v3396_v53  ;;  %v221_v18 = vld [vmem:[#allocation7 + $0x178] sm:$0xff] }
 0x2fa   :  { %v3514_v51 = vpop.f32.mrf.mxu0 }
 0x2fb   :  { %v3515_v7 = vadd.f32 %v3514_v51, %v3388_v57  ;;  %v18669_v61 = vadd.f32 %v16028_v23, %v3521_v21  ;;  %v220_v21 = vld [vmem:[#allocation7 + $0x170] sm:$0xff]  ;;  %v219_v57 = vld [vmem:[#allocation7 + $0x168] sm:$0xff]  ;;  %v23801_v51 = vmov 0.0  }
 0x2fc   :  { %16064 = vmatprep.subr.mxu1 %v23801_v51  ;;  %16029 = vmatprep.subr.mxu0 %v23801_v51 }
 0x2fd   :  { %v18671_v37 = vadd.f32 %v3607_v55, %v3515_v7  ;;  %v18679_v7 = vand.u32 4294901760, %v221_v18  ;;  %v18681_v55 = vand.u32 4294901760, %v220_v21 }
 0x2ff   :  { %v3617_v56 = vmax.f32 %v18671_v37, %v18669_v61  ;;  %v3624_v20 = vmin.f32 %v18671_v37, %v18669_v61  ;;  %16030 = vmatpush3.msra.mxu0 %v18679_v7 }
 0x300   :  { %16031 = vmatprep.subr.mxu0 %v23801_v51 }
 0x301   :  { %v3618_v41 = vrot.slane %v3617_v56, 4  ;;  %v3625_v17 = vrot.slane %v3624_v20, 4  ;;  %16032 = vmatpush3.msra.mxu0 %v18681_v55 }
 0x302   :  { %16033 = vmatprep.subr.mxu0 %v23801_v51 }
 0x303   :  { %v3619_v31 = vmax.f32 %v3617_v56, %v3618_v41  ;;  %v3626_v9 = vmin.f32 %v3624_v20, %v3625_v17  ;;  %v18683_v56 = vand.u32 4294901760, %v219_v57  ;;  %v218_v20 = vld [vmem:[#allocation7 + $0x160] sm:$0xff]  ;;  %v217_v41 = vld [vmem:[#allocation7 + $0x158] sm:$0xff]  ;;  %v216_v17 = vld [vmem:[#allocation7 + $0x150] sm:$0xff] }
 0x305   :  { %v3620_v40 = vrot.slane %v3619_v31, 2  ;;  %v3627_v15 = vrot.slane %v3626_v9, 2  ;;  %16034 = vmatpush3.msra.mxu0 %v18683_v56 }
 0x306   :  { %16035 = vmatprep.subr.mxu0 %v23801_v51 }
 0x307   :  { %v3621_v14 = vmax.f32 %v3619_v31, %v3620_v40  ;;  %v3628_v0 = vmin.f32 %v3626_v9, %v3627_v15  ;;  %v18686_v31 = vand.u32 4294901760, %v218_v20  ;;  %v18688_v9 = vand.u32 4294901760, %v217_v41  ;;  %v215_v15 = vld [vmem:[#allocation7 + $0x148] sm:$0xff] }
 0x308   :  { %v18690_v40 = vand.u32 4294901760, %v216_v17 }
 0x309   :  { %v3622_v33 = vrot.slane %v3621_v14, 1  ;;  %v3629_v30 = vrot.slane %v3628_v0, 1  ;;  %16036 = vmatpush3.msra.mxu0 %v18686_v31 }
 0x30a   :  { %16037 = vmatprep.subr.mxu0 %v24647_v28 }
 0x30b   :  { %v3630_v13 = vmin.f32 %v3628_v0, %v3629_v30  ;;  %v3623_v60 = vmax.f32 %v3621_v14, %v3622_v33  ;;  %v214_v14 = vld [vmem:[#allocation7 + $0x140] sm:$0xff]  ;;  %v18693_v0 = vsub.f32 %v221_v18, %v18679_v7  ;;  %v18696_v33 = vsub.f32 %v220_v21, %v18681_v55  ;;  %16038 = vmatpush3.msra.mxu0 %v18688_v9 }
 0x30c   :  { %v18699_v30 = vsub.f32 %v219_v57, %v18683_v56  ;;  %16039 = vmatprep.subr.mxu0 %v24647_v28 }
 0x30d   :  { %v3631_v8 = vsub.f32 0.0, %v3630_v13  ;;  %v18702_v13 = vand.u32 4294901760, %v215_v15  ;;  %v23790_v18 = vand.u32 4294901760, %v18693_v0  ;;  %v23795_v21 = vand.u32 4294901760, %v18696_v33  ;;  %16040 = vmatpush3.msra.mxu0 %v18690_v40 }
 0x30e   :  { %v23800_v57 = vand.u32 4294901760, %v18699_v30  ;;  %16041 = vmatprep.subr.mxu0 %v24647_v28 }
 0x30f   :  { %v3633_v50 = vsel %vm3632_vm1, %v3623_v60, %v3631_v8  ;;  %v18705_v60 = vsub.f32 %v218_v20, %v18686_v31  ;;  %v18708_v8 = vsub.f32 %v217_v41, %v18688_v9  ;;  %v18724_v52 = vsub.f32 %v215_v15, %v18702_v13  ;;  %16042 = vmatpush3.msra.mxu0 %v18702_v13 }
 0x310   :  { %3635 = vrot.lane.b32.xlu0 %v3633_v50, %s17437_s11  ;;  %v3756_v4 = vsub.f32 %v18696_v33, %v23795_v21  ;;  %v3763_v42 = vsub.f32 %v18699_v30, %v23800_v57  ;;  %16043 = vmatprep.subr.mxu0 %v24647_v28 }
 0x311   :  { %v24645_v16 = vand.u32 4294901760, %v18705_v60  ;;  %v24646_v20 = vand.u32 4294901760, %v18708_v8 }
 0x312   :  { %v3757_v10 = vand.u32 4294901760, %v3756_v4  ;;  %v3764_v4 = vand.u32 4294901760, %v3763_v42 }
 0x313   :  { %v3770_v57 = vsub.f32 %v18705_v60, %v24645_v16  ;;  %v3777_v51 = vsub.f32 %v18708_v8, %v24646_v20  ;;  %v18757_v16 = vand.u32 4294901760, %v211_v39 }
 0x382   :  { %v3636_v53 = vpop.permute.xlu0 %3635 }
 0x383   :  { %v3638_v23 = vmax.f32 %v3633_v50, %v3636_v53  ;;  %v18712_v50 = vsub.f32 %v216_v17, %v18690_v40  ;;  %v18714_v53 = vand.u32 4294901760, %v214_v14  ;;  %v3749_v17 = vsub.f32 %v18693_v0, %v23790_v18  ;;  %v212_v18 = vld [vmem:[#allocation7 + $0x130] sm:$0xff] }
 0x385   :  { %3640 = vrot.lane.b32.xlu0 %v3638_v23, %s17438_s20  ;;  %v18739_v15 = vsub.f32 %v214_v14, %v18714_v53  ;;  %v3750_v21 = vand.u32 4294901760, %v3749_v17  ;;  %v24648_v20 = vand.u32 4294901760, %v18712_v50  ;;  %v208_v14 = vld [vmem:[#allocation7 + $0x110] sm:$0xff]  ;;  %16044 = vmatpush3.msra.mxu0 %v18714_v53 }
 0x386   :  { %16045 = vmatprep.subr.mxu0 %v24647_v28 }
 0x387   :  { %16065 = vmatpush3.msra.mxu1 %v3750_v21  ;;  %v3784_v17 = vsub.f32 %v18712_v50, %v24648_v20  ;;  %v3771_v21 = vand.u32 4294901760, %v3770_v57  ;;  %v3778_v20 = vand.u32 4294901760, %v3777_v51 }
 0x388   :  { %16066 = vmatprep.subr.mxu1 %v24647_v28 }
 0x389   :  { %16067 = vmatpush3.msra.mxu1 %v3757_v10  ;;  %v24649_v10 = vand.u32 4294901760, %v18724_v52  ;;  %v3785_v51 = vand.u32 4294901760, %v3784_v17 }
 0x38a   :  { %16068 = vmatprep.subr.mxu1 %v24647_v28 }
 0x38b   :  { %16069 = vmatpush3.msra.mxu1 %v3764_v4  ;;  %v3791_v57 = vsub.f32 %v18724_v52, %v24649_v10  ;;  %v24650_v4 = vand.u32 4294901760, %v18739_v15  ;;  %v18806_v10 = vsub.f32 %v209_v49, %v18784_v47 }
 0x38c   :  { %16070 = vmatprep.subr.mxu1 %v24647_v28 }
 0x38d   :  { %16071 = vmatpush3.msra.mxu1 %v3771_v21  ;;  %v3798_v24 = vsub.f32 %v18739_v15, %v24650_v4  ;;  %v3792_v17 = vand.u32 4294901760, %v3791_v57 }
 0x38e   :  { %16072 = vmatprep.subr.mxu1 %v24647_v28 }
 0x38f   :  { %16073 = vmatpush3.msra.mxu1 %v3778_v20 }
 0x390   :  { %16074 = vmatprep.subr.mxu1 %v24647_v28 }
 0x391   :  { %16075 = vmatpush3.msra.mxu1 %v3785_v51  ;;  %v23823_v51 = vand.u32 4294901760, %v18806_v10 }
 0x392   :  { %16076 = vmatprep.subr.mxu1 %v24647_v28 }
 0x393   :  { %16077 = vmatpush3.msra.mxu1 %v3792_v17 }
 0x394   :  { %16078 = vmatprep.subr.mxu1 %v24647_v28 }
 0x3f7   :  { %v3641_v41 = vpop.permute.xlu0 %3640 }
 0x3f8   :  { %v18741_v32 = vmax.f32 %v3638_v23, %v3641_v41  ;;  %v18753_v23 = vand.u32 4294901760, %v213_v59  ;;  %v18755_v41 = vand.u32 4294901760, %v212_v18 }
 0x3fa   :  { %3645 = vrot.lane.b32.xlu1 %v18741_v32, %s17440_s21  ;;  %v18766_v42 = vsub.f32 %v213_v59, %v18753_v23  ;;  %v18770_v19 = vsub.f32 %v212_v18, %v18755_v41  ;;  %v18782_v18 = vsub.f32 %v211_v39, %v18757_v16  ;;  %v18794_v59 = vsub.f32 %v210_v11, %v18772_v25 }
 0x3fb   :  { %v18796_v39 = vand.u32 4294901760, %v208_v14  ;;  %16046 = vmatpush3.msra.mxu0 %v18753_v23  ;;  %v3799_v11 = vand.u32 4294901760, %v3798_v24 }
 0x3fc   :  { %v24651_v21 = vand.u32 4294901760, %v18766_v42  ;;  %v23821_v4 = vand.u32 4294901760, %v18782_v18  ;;  %v24652_v20 = vand.u32 4294901760, %v18770_v19  ;;  %v23824_v44 = vand.u32 4294901760, %v18794_v59  ;;  %16047 = vmatprep.subr.mxu0 %v24647_v28 }
 0x3fd   :  { %16048 = vmatpush3.msra.mxu0 %v18755_v41  ;;  %16079 = vmatpush3.msra.mxu1 %v3799_v11 }
 0x3fe   :  { %v3805_v62 = vsub.f32 %v18766_v42, %v24651_v21  ;;  %v3812_v57 = vsub.f32 %v18770_v19, %v24652_v20  ;;  %v18816_v21 = vsub.f32 %v208_v14, %v18796_v39  ;;  %v3819_v24 = vsub.f32 %v18782_v18, %v23821_v4  ;;  %16049 = vmatprep.subr.mxu0 %v24647_v28 }
 0x3ff   :  { %16050 = vmatpush3.msra.mxu0 %v18757_v16  ;;  %v3826_v20 = vsub.f32 %v18794_v59, %v23824_v44  ;;  %16080 = vmatprep.subr.mxu1 %v24647_v28  ;;  %v3833_v4 = vsub.f32 %v18806_v10, %v23823_v51 }
 0x400   :  { %v3806_v49 = vand.u32 4294901760, %v3805_v62  ;;  %v3813_v14 = vand.u32 4294901760, %v3812_v57  ;;  %v23822_v62 = vand.u32 4294901760, %v18816_v21  ;;  %16051 = vmatprep.subr.mxu0 %v24647_v28  ;;  %v3820_v17 = vand.u32 4294901760, %v3819_v24 }
 0x401   :  { %16052 = vmatpush3.msra.mxu0 %v18772_v25  ;;  %v3827_v11 = vand.u32 4294901760, %v3826_v20 }
 0x402   :  { %16081 = vmatpush3.msra.mxu1 %v3806_v49  ;;  %16053 = vmatprep.subr.mxu0 %v24647_v28  ;;  %v3840_v57 = vsub.f32 %v18816_v21, %v23822_v62  ;;  %v3834_v49 = vand.u32 4294901760, %v3833_v4  ;;  %v206_v62 = vld [vmem:[#allocation7 + $0x100] sm:$0xff] }
 0x403   :  { %16082 = vmatprep.subr.mxu1 %v24647_v28  ;;  %16054 = vmatpush3.msra.mxu0 %v18784_v47 }
 0x404   :  { %16083 = vmatpush3.msra.mxu1 %v3813_v14  ;;  %16055 = vmatprep.subr.mxu0 %v24647_v28  ;;  %v3841_v24 = vand.u32 4294901760, %v3840_v57  ;;  %v207_v14 = vld [vmem:[#allocation7 + $0x108] sm:$0xff] }
 0x405   :  { %16084 = vmatprep.subr.mxu1 %v24647_v28  ;;  %16056 = vmatpush3.msra.mxu0 %v18796_v39  ;;  %v18851_v20 = vand.u32 4294901760, %v207_v14 }
 0x406   :  { %16085 = vmatpush3.msra.mxu1 %v3820_v17  ;;  %16057 = vmatprep.subr.mxu0 %v24647_v28  ;;  %v18856_v17 = vand.u32 4294901760, %v206_v62 }
 0x407   :  { %16086 = vmatprep.subr.mxu1 %v24647_v28  ;;  %v18854_v4 = vsub.f32 %v207_v14, %v18851_v20  ;;  %16058 = vmatpush3.msra.mxu0 %v18851_v20 }
 0x408   :  { %16087 = vmatpush3.msra.mxu1 %v3827_v11  ;;  %16059 = vmatprep.subr.mxu0 %v24647_v28  ;;  %v18862_v57 = vsub.f32 %v206_v62, %v18856_v17 }
 0x409   :  { %16088 = vmatprep.subr.mxu1 %v24647_v28  ;;  %v23826_v11 = vand.u32 4294901760, %v18854_v4  ;;  %16060 = vmatpush3.msra.mxu0 %v18856_v17 }
 0x40a   :  { %16089 = vmatpush3.msra.mxu1 %v3834_v49  ;;  %16099 = vmatprep.subr.mxu0 %v24647_v28 }
 0x40b   :  { %16090 = vmatprep.subr.mxu1 %v24647_v28  ;;  %v3847_v49 = vsub.f32 %v18854_v4, %v23826_v11 }
 0x40c   :  { %16091 = vmatpush3.msra.mxu1 %v3841_v24  ;;  %v23825_v24 = vand.u32 4294901760, %v18862_v57 }
 0x40d   :  { %16092 = vmatprep.subr.mxu1 %v24647_v28  ;;  %v3848_v14 = vand.u32 4294901760, %v3847_v49 }
 0x40e   :  { %v3854_v51 = vsub.f32 %v18862_v57, %v23825_v24 }
 0x40f   :  { %16093 = vmatpush3.msra.mxu1 %v3848_v14 }
 0x410   :  { %v3855_v44 = vand.u32 4294901760, %v3854_v51  ;;  %16094 = vmatprep.subr.mxu1 %v24647_v28 }
 0x412   :  { %16095 = vmatpush3.msra.mxu1 %v3855_v44 }
 0x413   :  { %16134 = vmatprep.subr.mxu1 %v24647_v28 }
 0x46c   :  { %v3646_v62 = vpop.permute.xlu1 %3645 }
 0x46d   :  { %v3648_v49 = vmax.f32 %v18741_v32, %v3646_v62 }
 0x46f   :  { %3650 = vrot.lane.b32.xlu1 %v3648_v49, %s17442_s22 }
 0x4e1   :  { %v3651_v24 = vpop.permute.xlu1 %3650 }
 0x4e2   :  { %v3653_v14 = vmax.f32 %v3648_v49, %v3651_v24  ;;  %v4379_v49 = vld [vmem:[#allocation9 + $0x1c8] sm:$0xff] }
 0x4e4   :  { %v18880_v51 = vand.u32 4294901760, %v3653_v14 }
 0x4e6   :  { %v18883_v44 = vsub.f32 %v3653_v14, %v18880_v51  ;;  %16097 = vmatmul.mubr.f32.vlgmr.msra.gmra.mxu1 %v18880_v51 }
 0x4e7   :  { %16135 = vmatpush3.msra.mxu1 %v18679_v7  ;;  %16166 = vmatprep.mubr.msk.f32.mxu1 %vm17441_vm2, %v24647_v28 }
 0x4e8   :  { %v3737_v11 = vand.u32 4294901760, %v18883_v44  ;;  %16136 = vmatprep.subr.mxu1 %v24647_v28 }
 0x4e9   :  { %16137 = vmatpush3.msra.mxu1 %v18681_v55 }
 0x4ea   :  { %v3738_v32 = vsub.f32 %v18883_v44, %v3737_v11  ;;  %16138 = vmatprep.subr.mxu1 %v24647_v28 }
 0x4eb   :  { %16139 = vmatpush3.msra.mxu1 %v18683_v56 }
 0x4ec   :  { %16140 = vmatprep.subr.mxu1 %v24647_v28  ;;  %v3739_v24 = vand.u32 4294901760, %v3738_v32  ;;  %v19080_v32 = vand.u32 4294901760, %v4379_v49 }
 0x4ed   :  { %16141 = vmatpush3.msra.mxu1 %v18686_v31 }
 0x4ee   :  { %16142 = vmatprep.subr.mxu1 %v24647_v28  ;;  %16062 = vmatmul.mubr.f32.vlgmr.msra.gmra.mxu0 %v3739_v24  ;;  %v4378_v24 = vld [vmem:[#allocation9 + $0x1c0] sm:$0xff] }
 0x4ef   :  { %16100 = vmatpush3.msra.mxu0 %v18693_v0  ;;  %16143 = vmatpush3.msra.mxu1 %v18688_v9 }
 0x4f0   :  { %16101 = vmatprep.subr.mxu0 %v24647_v28  ;;  %16144 = vmatprep.subr.mxu1 %v24647_v28 }
 0x4f1   :  { %16102 = vmatpush3.msra.mxu0 %v18696_v33  ;;  %16145 = vmatpush3.msra.mxu1 %v18690_v40 }
 0x4f2   :  { %16103 = vmatprep.subr.mxu0 %v24647_v28  ;;  %16146 = vmatprep.subr.mxu1 %v24647_v28 }
 0x4f3   :  { %16104 = vmatpush3.msra.mxu0 %v18699_v30  ;;  %16147 = vmatpush3.msra.mxu1 %v18702_v13 }
 0x4f4   :  { %16105 = vmatprep.subr.mxu0 %v24647_v28  ;;  %16148 = vmatprep.subr.mxu1 %v24647_v28 }
 0x4f5   :  { %16106 = vmatpush3.msra.mxu0 %v18705_v60  ;;  %16149 = vmatpush3.msra.mxu1 %v18714_v53 }
 0x4f6   :  { %16107 = vmatprep.subr.mxu0 %v24647_v28  ;;  %16150 = vmatprep.subr.mxu1 %v24647_v28 }
 0x4f7   :  { %16108 = vmatpush3.msra.mxu0 %v18708_v8  ;;  %16151 = vmatpush3.msra.mxu1 %v18753_v23 }
 0x4f8   :  { %16109 = vmatprep.subr.mxu0 %v24647_v28  ;;  %16152 = vmatprep.subr.mxu1 %v24647_v28 }
 0x4f9   :  { %16110 = vmatpush3.msra.mxu0 %v18712_v50  ;;  %16153 = vmatpush3.msra.mxu1 %v18755_v41 }
 0x4fa   :  { %16111 = vmatprep.subr.mxu0 %v24647_v28  ;;  %16154 = vmatprep.subr.mxu1 %v24647_v28 }
 0x4fb   :  { %16112 = vmatpush3.msra.mxu0 %v18724_v52  ;;  %16155 = vmatpush3.msra.mxu1 %v18757_v16 }
 0x4fc   :  { %16113 = vmatprep.subr.mxu0 %v24647_v28  ;;  %16156 = vmatprep.subr.mxu1 %v24647_v28 }
 0x4fd   :  { %16114 = vmatpush3.msra.mxu0 %v18739_v15  ;;  %16157 = vmatpush3.msra.mxu1 %v18772_v25 }
 0x4fe   :  { %16115 = vmatprep.subr.mxu0 %v24647_v28  ;;  %16158 = vmatprep.subr.mxu1 %v24647_v28 }
 0x4ff   :  { %16116 = vmatpush3.msra.mxu0 %v18766_v42  ;;  %16159 = vmatpush3.msra.mxu1 %v18784_v47 }
 0x500   :  { %16117 = vmatprep.subr.mxu0 %v24647_v28  ;;  %16160 = vmatprep.subr.mxu1 %v24647_v28 }
 0x501   :  { %16118 = vmatpush3.msra.mxu0 %v18770_v19  ;;  %16161 = vmatpush3.msra.mxu1 %v18796_v39 }
 0x502   :  { %16119 = vmatprep.subr.mxu0 %v24647_v28  ;;  %16162 = vmatprep.subr.mxu1 %v24647_v28 }
 0x503   :  { %16120 = vmatpush3.msra.mxu0 %v18782_v18  ;;  %16163 = vmatpush3.msra.mxu1 %v18851_v20 }
 0x504   :  { %16121 = vmatprep.subr.mxu0 %v24647_v28  ;;  %16164 = vmatprep.subr.mxu1 %v24647_v28 }
 0x505   :  { %16122 = vmatpush3.msra.mxu0 %v18794_v59  ;;  %16165 = vmatpush3.msra.mxu1 %v18856_v17 }
 0x506   :  { %16123 = vmatprep.subr.mxu0 %v24647_v28  ;;  %16167 = vmatmul.mubr.f32.vlgmr.msra.gmra.mxu1 %v3737_v11 }
 0x507   :  { %16204 = vmatprep.subr.mxu1 %v24647_v28  ;;  %16124 = vmatpush3.msra.mxu0 %v18806_v10 }
 0x508   :  { %16205 = vmatpush3.msra.mxu1 %v18679_v7  ;;  %16125 = vmatprep.subr.mxu0 %v24647_v28  ;;  %v24653_v7 = vand.u32 4294901760, %v18693_v0  ;;  %v24659_v0 = vand.u32 4294901760, %v18724_v52  ;;  %v24662_v52 = vand.u32 4294901760, %v18770_v19  ;;  %v24665_v19 = vand.u32 4294901760, %v18806_v10 }
 0x509   :  { %16206 = vmatprep.subr.mxu1 %v24647_v28  ;;  %16126 = vmatpush3.msra.mxu0 %v18816_v21 }
 0x50a   :  { %16207 = vmatpush3.msra.mxu1 %v18681_v55  ;;  %16127 = vmatprep.subr.mxu0 %v24647_v28  ;;  %v24654_v55 = vand.u32 4294901760, %v18696_v33  ;;  %v24660_v33 = vand.u32 4294901760, %v18739_v15  ;;  %v4384_v15 = vld [vmem:[#allocation9 + $0x1f0] sm:$0xff] }
 0x50b   :  { %16208 = vmatprep.subr.mxu1 %v24647_v28  ;;  %16128 = vmatpush3.msra.mxu0 %v18854_v4 }
 0x50c   :  { %16209 = vmatpush3.msra.mxu1 %v18683_v56  ;;  %16129 = vmatprep.subr.mxu0 %v24647_v28  ;;  %v24655_v56 = vand.u32 4294901760, %v18699_v30  ;;  %v24661_v30 = vand.u32 4294901760, %v18766_v42 }
 0x50d   :  { %16210 = vmatprep.subr.mxu1 %v24647_v28  ;;  %16130 = vmatpush3.msra.mxu0 %v18862_v57 }
 0x50e   :  { %16131 = vmatprep.mubr.msk.f32.mxu0 %vm17441_vm2, %v24647_v28  ;;  %16211 = vmatpush3.msra.mxu1 %v18686_v31  ;;  %v24656_v31 = vand.u32 4294901760, %v18705_v60  ;;  %v24667_v60 = vand.u32 4294901760, %v18854_v4 }
 0x50f   :  { %16132 = vmatmul.mubr.f32.vlgmr.msra.gmra.mxu0 %v18883_v44  ;;  %16169 = vmatprep.subr.mxu0 %v24647_v28 }
 0x510   :  { %16212 = vmatprep.subr.mxu1 %v24647_v28  ;;  %16170 = vmatpush3.msra.mxu0 %v24653_v7 }
 0x511   :  { %16213 = vmatpush3.msra.mxu1 %v18688_v9  ;;  %16171 = vmatprep.subr.mxu0 %v24647_v28  ;;  %v24657_v9 = vand.u32 4294901760, %v18708_v8  ;;  %v24668_v8 = vand.u32 4294901760, %v18862_v57 }
 0x512   :  { %16214 = vmatprep.subr.mxu1 %v24647_v28  ;;  %16172 = vmatpush3.msra.mxu0 %v24654_v55 }
 0x513   :  { %16215 = vmatpush3.msra.mxu1 %v18690_v40  ;;  %16173 = vmatprep.subr.mxu0 %v24647_v28  ;;  %v24658_v40 = vand.u32 4294901760, %v18712_v50  ;;  %v4385_v50 = vld [vmem:[#allocation9 + $0x1f8] sm:$0xff] }
 0x514   :  { %16216 = vmatprep.subr.mxu1 %v24647_v28  ;;  %16174 = vmatpush3.msra.mxu0 %v24655_v56 }
 0x515   :  { %16217 = vmatpush3.msra.mxu1 %v18702_v13  ;;  %16175 = vmatprep.subr.mxu0 %v24647_v28  ;;  %v24666_v13 = vand.u32 4294901760, %v18816_v21 }
 0x516   :  { %16218 = vmatprep.subr.mxu1 %v24647_v28  ;;  %16176 = vmatpush3.msra.mxu0 %v24656_v31  ;;  %v19090_v31 = vand.u32 4294901760, %v4378_v24 }
 0x517   :  { %16219 = vmatpush3.msra.mxu1 %v18714_v53  ;;  %16177 = vmatprep.subr.mxu0 %v24647_v28  ;;  %v19043_v53 = vand.u32 4294901760, %v4385_v50 }
 0x518   :  { %16220 = vmatprep.subr.mxu1 %v24647_v28  ;;  %16178 = vmatpush3.msra.mxu0 %v24657_v9  ;;  %v4377_v9 = vld [vmem:[#allocation9 + $0x1b8] sm:$0xff] }
 0x519   :  { %16221 = vmatpush3.msra.mxu1 %v18753_v23  ;;  %16179 = vmatprep.subr.mxu0 %v24647_v28  ;;  %24669 = vst [vmem:[#allocation173_spill] sm:$0xff] %v19043_v53  ;;  %v19045_v23 = vand.u32 4294901760, %v4384_v15 }
 0x51a   :  { %16222 = vmatprep.subr.mxu1 %v24647_v28  ;;  %16180 = vmatpush3.msra.mxu0 %v24658_v40 }
 0x51b   :  { %16223 = vmatpush3.msra.mxu1 %v18755_v41  ;;  %16181 = vmatprep.subr.mxu0 %v24647_v28  ;;  %v4383_v41 = vld [vmem:[#allocation9 + $0x1e8] sm:$0xff] }
 0x51c   :  { %16224 = vmatprep.subr.mxu1 %v24647_v28  ;;  %16182 = vmatpush3.msra.mxu0 %v24659_v0  ;;  %v19050_v42 = vand.u32 4294901760, %v4383_v41 }
 0x51d   :  { %16225 = vmatpush3.msra.mxu1 %v18757_v16  ;;  %16183 = vmatprep.subr.mxu0 %v24647_v28  ;;  %v19048_v16 = vsub.f32 %v4385_v50, %v19043_v53 }
 0x51e   :  { %16226 = vmatprep.subr.mxu1 %v24647_v28  ;;  %16184 = vmatpush3.msra.mxu0 %v24660_v33 }
 0x51f   :  { %16227 = vmatpush3.msra.mxu1 %v18772_v25  ;;  %16185 = vmatprep.subr.mxu0 %v24647_v28  ;;  %v24663_v25 = vand.u32 4294901760, %v18782_v18  ;;  %24670 = vst [vmem:[#allocation174_spill] sm:$0xff] %v19048_v16  ;;  %v19054_v18 = vsub.f32 %v4384_v15, %v19045_v23  ;;  %v23835_v21 = vand.u32 4294901760, %v19048_v16 }
 0x520   :  { %16228 = vmatprep.subr.mxu1 %v24647_v28  ;;  %16186 = vmatpush3.msra.mxu0 %v24661_v30  ;;  %v19098_v30 = vsub.f32 %v4379_v49, %v19080_v32 }
 0x521   :  { %16229 = vmatpush3.msra.mxu1 %v18784_v47  ;;  %16187 = vmatprep.subr.mxu0 %v24647_v28  ;;  %v24664_v47 = vand.u32 4294901760, %v18794_v59  ;;  %v4382_v59 = vld [vmem:[#allocation9 + $0x1e0] sm:$0xff]  ;;  %v23833_v11 = vand.u32 4294901760, %v19054_v18  ;;  %v4508_v14 = vsub.f32 %v19048_v16, %v23835_v21 }
 0x522   :  { %16230 = vmatprep.subr.mxu1 %v24647_v28  ;;  %16188 = vmatpush3.msra.mxu0 %v24662_v52  ;;  %v19056_v10 = vand.u32 4294901760, %v4382_v59  ;;  %v4376_v52 = vld [vmem:[#allocation9 + $0x1b0] sm:$0xff]  ;;  %v23828_v15 = vand.u32 4294901760, %v19098_v30 }
 0x523   :  { %16231 = vmatpush3.msra.mxu1 %v18796_v39  ;;  %16189 = vmatprep.subr.mxu0 %v24647_v28  ;;  %v4381_v39 = vld [vmem:[#allocation9 + $0x1d8] sm:$0xff]  ;;  %v4514_v7 = vsub.f32 %v19054_v18, %v23833_v11  ;;  %v4509_v40 = vand.u32 4294901760, %v4508_v14  ;;  %v19119_v49 = vand.u32 4294901760, %v4376_v52  ;;  %v4374_v14 = vld [vmem:[#allocation9 + $0x1a0] sm:$0xff] }
 0x524   :  { %16232 = vmatprep.subr.mxu1 %v24647_v28  ;;  %16190 = vmatpush3.msra.mxu0 %v24663_v25  ;;  %v19063_v4 = vand.u32 4294901760, %v4381_v39  ;;  %v19068_v57 = vsub.f32 %v4382_v59, %v19056_v10  ;;  %v4370_v11 = vld [vmem:[#allocation9 + $0x180] sm:$0xff] }
 0x525   :  { %16233 = vmatpush3.msra.mxu1 %v18851_v20  ;;  %16191 = vmatprep.subr.mxu0 %v24647_v28  ;;  %v19061_v20 = vsub.f32 %v4383_v41, %v19050_v42  ;;  %v4515_v25 = vand.u32 4294901760, %v4514_v7  ;;  %v19113_v41 = vand.u32 4294901760, %v4377_v9  ;;  %v4544_v7 = vsub.f32 %v19098_v30, %v23828_v15 }
 0x526   :  { %16234 = vmatprep.subr.mxu1 %v24647_v28  ;;  %16192 = vmatpush3.msra.mxu0 %v24664_v47  ;;  %v19078_v44 = vsub.f32 %v4381_v39, %v19063_v4  ;;  %v23830_v55 = vand.u32 4294901760, %v19068_v57  ;;  %v19178_v6 = vand.u32 4294901760, %v4370_v11 }
 0x527   :  { %16235 = vmatpush3.msra.mxu1 %v18856_v17  ;;  %16236 = vmatprep.mubr.msk.f32.mxu1 %vm17441_vm2, %v24647_v28  ;;  %v4380_v17 = vld [vmem:[#allocation9 + $0x1d0] sm:$0xff] }
 0x528   :  { %16193 = vmatprep.subr.mxu0 %v24647_v28  ;;  %16237 = vmatmul.mubr.f32.vlgmr.msra.gmra.mxu1 %v18880_v51  ;;  %v19070_v62 = vand.u32 4294901760, %v4380_v17  ;;  %v23829_v33 = vand.u32 4294901760, %v19078_v44  ;;  %v4526_v47 = vsub.f32 %v19068_v57, %v23830_v55  ;;  %v19141_v55 = vand.u32 4294901760, %v4374_v14 }
 0x529   :  { %16194 = vmatpush3.msra.mxu0 %v24665_v19  ;;  %16201 = vmatprep.mubr.msk.f32.mxu0 %vm17441_vm2, %v24647_v28  ;;  %v19192_v26 = vsub.f32 %v4370_v11, %v19178_v6 }
 0x52a   :  { %16195 = vmatprep.subr.mxu0 %v24647_v28  ;;  %4729 = vmatprep.mubr.f32.mxu1 %v24647_v28  ;;  %v19088_v56 = vsub.f32 %v4380_v17, %v19070_v62  ;;  %v4532_v50 = vsub.f32 %v19078_v44, %v23829_v33  ;;  %v4527_v59 = vand.u32 4294901760, %v4526_v47 }
 0x52b   :  { %16196 = vmatpush3.msra.mxu0 %v24666_v13  ;;  %v19106_v13 = vsub.f32 %v4378_v24, %v19090_v31  ;;  %4510 = vmatprep.subr.mxu1 %v4509_v40  ;;  %v19125_v40 = vsub.f32 %v4377_v9, %v19113_v41  ;;  %v4545_v9 = vand.u32 4294901760, %v4544_v7  ;;  %24671 = vst [vmem:[#allocation175_spill] sm:$0xff] %v19192_v26 }
 0x52c   :  { %16197 = vmatprep.subr.mxu0 %v24647_v28  ;;  %v23827_v19 = vand.u32 4294901760, %v19088_v56  ;;  %4516 = vmatpush1.msra.mxu1 %v4515_v25  ;;  %v4533_v24 = vand.u32 4294901760, %v4532_v50  ;;  %v4373_v25 = vld [vmem:[#allocation9 + $0x198] sm:$0xff]  ;;  %v4372_v50 = vld [vmem:[#allocation9 + $0x190] sm:$0xff] }
 0x52d   :  { %16198 = vmatpush3.msra.mxu0 %v24667_v60  ;;  %v4375_v60 = vld [vmem:[#allocation9 + $0x1a8] sm:$0xff]  ;;  %v23831_v17 = vand.u32 4294901760, %v19106_v13  ;;  %v23834_v15 = vand.u32 4294901760, %v19125_v40 }
 0x52e   :  { %16199 = vmatprep.subr.mxu0 %v24647_v28  ;;  %v4538_v39 = vsub.f32 %v19088_v56, %v23827_v19 }
 0x52f   :  { %16200 = vmatpush3.msra.mxu0 %v24668_v8  ;;  %v4550_v19 = vsub.f32 %v19106_v13, %v23831_v17  ;;  %v19145_v17 = vand.u32 4294901760, %v4373_v25 }
 0x530   :  { %16202 = vmatmul.mubr.f32.vlgmr.msra.gmra.mxu0 %v18880_v51  ;;  %4387 = vmatprep.subr.mxu0 %v19043_v53  ;;  %v23832_v51 = vand.u32 4294901760, %v19061_v20  ;;  %v4539_v47 = vand.u32 4294901760, %v4538_v39 }
 0x531   :  { %4482 = vmatprep.mubr.f32.mxu0 %v24647_v28  ;;  %4389 = vmatpush1.msra.mxu0 %v19045_v23  ;;  %v4551_v39 = vand.u32 4294901760, %v4550_v19 }
 0x532   :  { %4391 = vmatprep.subr.mxu0 %v19050_v42  ;;  %v4520_v0 = vsub.f32 %v19061_v20, %v23832_v51  ;;  %v19154_v51 = vand.u32 4294901760, %v4372_v50 }
 0x533   :  { %4393 = vmatpush1.msra.mxu0 %v19056_v10 }
 0x534   :  { %4395 = vmatprep.subr.mxu0 %v19063_v4  ;;  %v4521_v8 = vand.u32 4294901760, %v4520_v0  ;;  %v19127_v0 = vand.u32 4294901760, %v4375_v60 }
 0x535   :  { %4397 = vmatpush1.msra.mxu0 %v19070_v62 }
 0x536   :  { %4399 = vmatprep.subr.mxu0 %v19080_v32  ;;  %4522 = vmatprep.subr.mxu1 %v4521_v8  ;;  %v19134_v8 = vsub.f32 %v4376_v52, %v19119_v49  ;;  %v19139_v33 = vsub.f32 %v4375_v60, %v19127_v0  ;;  %v19152_v60 = vsub.f32 %v4374_v14, %v19141_v55 }
 0x537   :  { %4401 = vmatpush1.msra.mxu0 %v19090_v31  ;;  %4528 = vmatpush1.msra.mxu1 %v4527_v59  ;;  %v4371_v59 = vld [vmem:[#allocation9 + $0x188] sm:$0xff] }
 0x538   :  { %4403 = vmatprep.subr.mxu0 %v19113_v41  ;;  %4534 = vmatprep.subr.mxu1 %v4533_v24  ;;  %v23838_v52 = vand.u32 4294901760, %v19134_v8  ;;  %v4556_v24 = vsub.f32 %v19125_v40, %v23834_v15  ;;  %v23843_v7 = vand.u32 4294901760, %v19139_v33  ;;  %v4369_v15 = vld [vmem:[#allocation9 + $0x178] sm:$0xff]  ;;  %v23852_v1 = vand.u32 4294901760, %v19152_v60 }
 0x539   :  { %4405 = vmatpush1.msra.mxu0 %v19119_v49  ;;  %4540 = vmatpush1.msra.mxu1 %v4539_v47  ;;  %v19161_v47 = vsub.f32 %v4373_v25, %v19145_v17  ;;  %v19185_v48 = vand.u32 4294901760, %v4369_v15 }
 0x53a   :  { %4407 = vmatprep.subr.mxu0 %v19127_v0  ;;  %4546 = vmatprep.subr.mxu1 %v4545_v9  ;;  %v4562_v19 = vsub.f32 %v19134_v8, %v23838_v52  ;;  %v19163_v9 = vand.u32 4294901760, %v4371_v59  ;;  %v4557_v14 = vand.u32 4294901760, %v4556_v24  ;;  %v4568_v21 = vsub.f32 %v19139_v33, %v23843_v7  ;;  %v4368_v24 = vld [vmem:[#allocation9 + $0x170] sm:$0xff] }
 0x53b   :  { %4409 = vmatpush1.msra.mxu0 %v19141_v55  ;;  %4552 = vmatpush1.msra.mxu1 %v4551_v39  ;;  %v19171_v39 = vsub.f32 %v4372_v50, %v19154_v51  ;;  %v23855_v25 = vand.u32 4294901760, %v19161_v47  ;;  %v4574_v50 = vsub.f32 %v19152_v60, %v23852_v1  ;;  %v19201_v63 = vand.u32 4294901760, %v4368_v24 }
 0x53c   :  { %4411 = vmatprep.subr.mxu0 %v19145_v17  ;;  %v4563_v52 = vand.u32 4294901760, %v4562_v19  ;;  %v19176_v54 = vsub.f32 %v4371_v59, %v19163_v9  ;;  %4558 = vmatprep.subr.mxu1 %v4557_v14  ;;  %v4569_v7 = vand.u32 4294901760, %v4568_v21  ;;  %v4367_v19 = vld [vmem:[#allocation9 + $0x168] sm:$0xff]  ;;  %v4366_v21 = vld [vmem:[#allocation9 + $0x160] sm:$0xff] }
 0x53d   :  { %4413 = vmatpush1.msra.mxu0 %v19154_v51  ;;  %v23860_v27 = vand.u32 4294901760, %v19171_v39  ;;  %v4580_v59 = vsub.f32 %v19161_v47, %v23855_v25  ;;  %v4575_v14 = vand.u32 4294901760, %v4574_v50  ;;  %v4365_v25 = vld [vmem:[#allocation9 + $0x158] sm:$0xff]  ;;  %v19208_v50 = vand.u32 4294901760, %v4367_v19 }
 0x53e   :  { %4415 = vmatprep.subr.mxu0 %v19163_v9  ;;  %4564 = vmatpush1.msra.mxu1 %v4563_v52  ;;  %v19199_v52 = vsub.f32 %v4369_v15, %v19185_v48  ;;  %v24673_v11 = vand.u32 4294901760, %v19176_v54  ;;  %v19212_v5 = vsub.f32 %v4368_v24, %v19201_v63  ;;  %v19214_v43 = vand.u32 4294901760, %v4366_v21 }
 0x53f   :  { %4417 = vmatpush1.msra.mxu0 %v19178_v6  ;;  %4570 = vmatprep.subr.mxu1 %v4569_v7  ;;  %v4586_v1 = vsub.f32 %v19171_v39, %v23860_v27  ;;  %v4581_v29 = vand.u32 4294901760, %v4580_v59  ;;  %v23869_v7 = vand.u32 4294901760, %v19192_v26  ;;  %v19221_v12 = vsub.f32 %v4367_v19, %v19208_v50 }
 0x540   :  { %24672 = vst [vmem:[#allocation176_spill] sm:$0xff] %v19199_v52  ;;  %4419 = vmatprep.subr.mxu0 %v19185_v48  ;;  %v4592_v46 = vsub.f32 %v19176_v54, %v24673_v11  ;;  %4576 = vmatpush1.msra.mxu1 %v4575_v14  ;;  %v23874_v15 = vand.u32 4294901760, %v19199_v52  ;;  %24674 = vst [vmem:[#allocation177_spill] sm:$0xff] %v19212_v5 }
 0x541   :  { %v4587_v27 = vand.u32 4294901760, %v4586_v1  ;;  %4421 = vmatpush1.msra.mxu0 %v19201_v63  ;;  %4582 = vmatprep.subr.mxu1 %v4581_v29  ;;  %v4598_v11 = vsub.f32 %v19192_v26, %v23869_v7  ;;  %24675 = vst [vmem:[#allocation178_spill] sm:$0xff] %v19221_v12  ;;  %v19223_v1 = vand.u32 4294901760, %v4365_v25  ;;  %v19231_v29 = vsub.f32 %v4366_v21, %v19214_v43  ;;  %v4362_v7 = vld [vmem:[#allocation9 + $0x140] sm:$0xff] }
 0x542   :  { %v4593_v59 = vand.u32 4294901760, %v4592_v46  ;;  %4423 = vmatprep.subr.mxu0 %v19208_v50  ;;  %v4604_v24 = vsub.f32 %v19199_v52, %v23874_v15  ;;  %v19233_v46 = vand.u32 4294901760, %v4364_v34  ;;  %v23885_v35 = vand.u32 4294901760, %v19221_v12  ;;  %v4361_v15 = vld [vmem:[#allocation9 + $0x138] sm:$0xff] }
 0x543   :  { %4588 = vmatpush1.msra.mxu1 %v4587_v27  ;;  %24676 = vst [vmem:[#allocation179_spill] sm:$0xff] %v19231_v29  ;;  %4425 = vmatpush1.msra.mxu0 %v19214_v43  ;;  %v4599_v19 = vand.u32 4294901760, %v4598_v11  ;;  %v19238_v27 = vsub.f32 %v4365_v25, %v19223_v1  ;;  %v24678_v21 = vand.u32 4294901760, %v19212_v5  ;;  %v23892_v36 = vand.u32 4294901760, %v19231_v29 }
 0x544   :  { %4594 = vmatprep.subr.mxu1 %v4593_v59  ;;  %4427 = vmatprep.subr.mxu0 %v19223_v1  ;;  %v4605_v14 = vand.u32 4294901760, %v4604_v24  ;;  %v19248_v59 = vsub.f32 %v4364_v34, %v19233_v46  ;;  %v4616_v25 = vsub.f32 %v19221_v12, %v23885_v35  ;;  %v19256_v24 = vsub.f32 %v4363_v2, %v19240_v3  ;;  %v4359_v35 = vld [vmem:[#allocation9 + $0x128] sm:$0xff] }
 0x545   :  { %24677 = vst [vmem:[#allocation180_spill] sm:$0xff] %v19238_v27  ;;  %v4610_v45 = vsub.f32 %v19212_v5, %v24678_v21  ;;  %4429 = vmatpush1.msra.mxu0 %v19233_v46  ;;  %4600 = vmatpush1.msra.mxu1 %v4599_v19  ;;  %v19258_v22 = vand.u32 4294901760, %v4362_v7  ;;  %v4360_v21 = vld [vmem:[#allocation9 + $0x130] sm:$0xff]  ;;  %v4622_v19 = vsub.f32 %v19231_v29, %v23892_v36  ;;  %v19265_v38 = vand.u32 4294901760, %v4361_v15 }
 0x546   :  { %24679 = vst [vmem:[#allocation181_spill] sm:$0xff] %v19248_v59  ;;  %24680 = vst [vmem:[#allocation182_spill] sm:$0xff] %v19256_v24  ;;  %4431 = vmatprep.subr.mxu0 %v19240_v3  ;;  %4606 = vmatprep.subr.mxu1 %v4605_v14  ;;  %v23899_v58 = vand.u32 4294901760, %v19248_v59  ;;  %v4617_v11 = vand.u32 4294901760, %v4616_v25  ;;  %v24682_v2 = vand.u32 4294901760, %v19238_v27  ;;  %v23904_v5 = vand.u32 4294901760, %v19256_v24 }
 0x547   :  { %24681 = vst [vmem:[#allocation183_spill] sm:$0xff] %v19258_v22  ;;  %v4611_v34 = vand.u32 4294901760, %v4610_v45  ;;  %v19272_v52 = vsub.f32 %v4362_v7, %v19258_v22  ;;  %v4358_v45 = vld [vmem:[#allocation9 + $0x120] sm:$0xff]  ;;  %4433 = vmatpush1.msra.mxu0 %v19258_v22  ;;  %v4623_v14 = vand.u32 4294901760, %v4622_v19  ;;  %v19279_v25 = vsub.f32 %v4361_v15, %v19265_v38  ;;  %v4356_v22 = vld [vmem:[#allocation9 + $0x110] sm:$0xff] }
 0x548   :  { %v4628_v12 = vsub.f32 %v19238_v27, %v24682_v2  ;;  %v4634_v36 = vsub.f32 %v19248_v59, %v23899_v58  ;;  %v19281_v29 = vand.u32 4294901760, %v4360_v21  ;;  %v4357_v2 = vld [vmem:[#allocation9 + $0x118] sm:$0xff]  ;;  %4435 = vmatprep.subr.mxu0 %v19265_v38  ;;  %v4640_v27 = vsub.f32 %v19256_v24, %v23904_v5 }
 0x549   :  { %24683 = vst [vmem:[#allocation184_spill] sm:$0xff] %v19272_v52  ;;  %4612 = vmatpush1.msra.mxu1 %v4611_v34  ;;  %24684 = vst [vmem:[#allocation185_spill] sm:$0xff] %v19279_v25  ;;  %v23907_v34 = vand.u32 4294901760, %v19272_v52  ;;  %v19288_v19 = vand.u32 4294901760, %v4359_v35  ;;  %v23912_v15 = vand.u32 4294901760, %v19279_v25  ;;  %v19294_v26 = vand.u32 4294901760, %v4358_v45 }
 0x54a   :  { %4618 = vmatprep.subr.mxu1 %v4617_v11  ;;  %v4629_v7 = vand.u32 4294901760, %v4628_v12  ;;  %v4635_v58 = vand.u32 4294901760, %v4634_v36  ;;  %v19292_v59 = vsub.f32 %v4360_v21, %v19281_v29  ;;  %v4355_v11 = vld [vmem:[#allocation9 + $0x108] sm:$0xff]  ;;  %4437 = vmatpush1.msra.mxu0 %v19281_v29  ;;  %v4641_v12 = vand.u32 4294901760, %v4640_v27 }
 0x54b   :  { %24685 = vst [vmem:[#allocation186_spill] sm:$0xff] %v19288_v19  ;;  %4624 = vmatpush1.msra.mxu1 %v4623_v14  ;;  %24687 = vst [vmem:[#allocation188_spill] sm:$0xff] %v19294_v26  ;;  %v4646_v5 = vsub.f32 %v19272_v52, %v23907_v34  ;;  %v19301_v24 = vsub.f32 %v4359_v35, %v19288_v19  ;;  %v19303_v36 = vand.u32 4294901760, %v4357_v2  ;;  %4439 = vmatprep.subr.mxu0 %v19288_v19  ;;  %v4354_v34 = vld [vmem:[#allocation9 + $0x100] sm:$0xff] }
 0x54c   :  { %24686 = vst [vmem:[#allocation187_spill] sm:$0xff] %v19292_v59  ;;  %4630 = vmatprep.subr.mxu1 %v4629_v7  ;;  %v4652_v21 = vsub.f32 %v19279_v25, %v23912_v15  ;;  %v23917_v14 = vand.u32 4294901760, %v19292_v59  ;;  %v19311_v27 = vsub.f32 %v4358_v45, %v19294_v26  ;;  %v19313_v7 = vand.u32 4294901760, %v4356_v22  ;;  %4441 = vmatpush1.msra.mxu0 %v19294_v26 }
 0x54d   :  { %24688 = vst [vmem:[#allocation189_spill] sm:$0xff] %v19301_v24  ;;  %4636 = vmatpush1.msra.mxu1 %v4635_v58  ;;  %v4647_v35 = vand.u32 4294901760, %v4646_v5  ;;  %v23920_v52 = vand.u32 4294901760, %v19301_v24  ;;  %v19318_v58 = vsub.f32 %v4357_v2, %v19303_v36  ;;  %v19320_v19 = vand.u32 4294901760, %v4355_v11  ;;  %4443 = vmatprep.subr.mxu0 %v19303_v36 }
 0x54e   :  { %24689 = vst [vmem:[#allocation190_spill] sm:$0xff] %v19311_v27  ;;  %4642 = vmatprep.subr.mxu1 %v4641_v12  ;;  %v4653_v15 = vand.u32 4294901760, %v4652_v21  ;;  %v4658_v45 = vsub.f32 %v19292_v59, %v23917_v14  ;;  %v23924_v25 = vand.u32 4294901760, %v19311_v27  ;;  %v19328_v26 = vsub.f32 %v4356_v22, %v19313_v7  ;;  %4445 = vmatpush1.msra.mxu0 %v19313_v7 }
 0x54f   :  { %24690 = vst [vmem:[#allocation191_spill] sm:$0xff] %v19318_v58  ;;  %24691 = vst [vmem:[#allocation192_spill] sm:$0xff] %v19320_v19  ;;  %4648 = vmatpush1.msra.mxu1 %v4647_v35  ;;  %v4664_v5 = vsub.f32 %v19301_v24, %v23920_v52  ;;  %v23923_v2 = vand.u32 4294901760, %v19318_v58  ;;  %v19336_v12 = vsub.f32 %v4355_v11, %v19320_v19  ;;  %v19338_v21 = vand.u32 4294901760, %v4354_v34 }
 0x550   :  { %24692 = vst [vmem:[#allocation193_spill] sm:$0xff] %v19328_v26  ;;  %4447 = vmatprep.subr.mxu0 %v19320_v19  ;;  %4654 = vmatprep.subr.mxu1 %v4653_v15  ;;  %v4659_v14 = vand.u32 4294901760, %v4658_v45  ;;  %v4670_v22 = vsub.f32 %v19311_v27, %v23924_v25  ;;  %v23927_v35 = vand.u32 4294901760, %v19328_v26 }
 0x551   :  { %24693 = vst [vmem:[#allocation194_spill] sm:$0xff] %v19336_v12  ;;  %24694 = vst [vmem:[#allocation195_spill] sm:$0xff] %v19338_v21  ;;  %v4665_v59 = vand.u32 4294901760, %v4664_v5  ;;  %v4676_v52 = vsub.f32 %v19318_v58, %v23923_v2  ;;  %v23928_v11 = vand.u32 4294901760, %v19336_v12  ;;  %v19350_v24 = vsub.f32 %v4354_v34, %v19338_v21  ;;  %4449 = vmatpush1.msra.mxu0 %v19338_v21 }
 0x552   :  { %4660 = vmatpush1.msra.mxu1 %v4659_v14  ;;  %v4671_v15 = vand.u32 4294901760, %v4670_v22  ;;  %v4682_v45 = vsub.f32 %v19328_v26, %v23927_v35  ;;  %4746 = vmatprep.subr.mxu0 %v19048_v16 }
 0x553   :  { %24695 = vst [vmem:[#allocation196_spill] sm:$0xff] %v19350_v24  ;;  %4666 = vmatprep.subr.mxu1 %v4665_v59  ;;  %v4677_v5 = vand.u32 4294901760, %v4676_v52  ;;  %v4688_v2 = vsub.f32 %v19336_v12, %v23928_v11  ;;  %v23938_v25 = vand.u32 4294901760, %v19350_v24 }
 0x554   :  { %4672 = vmatpush1.msra.mxu1 %v4671_v15  ;;  %v4683_v34 = vand.u32 4294901760, %v4682_v45 }
 0x555   :  { %4678 = vmatprep.subr.mxu1 %v4677_v5  ;;  %v4689_v58 = vand.u32 4294901760, %v4688_v2  ;;  %v4694_v14 = vsub.f32 %v19350_v24, %v23938_v25 }
 0x556   :  { %4684 = vmatpush1.msra.mxu1 %v4683_v34 }
 0x557   :  { %4690 = vmatprep.subr.mxu1 %v4689_v58  ;;  %v4695_v22 = vand.u32 4294901760, %v4694_v14  ;;  %v4296_v58 = vlaneseq }
 0x559   :  { %4696 = vmatpush1.msra.mxu1 %v4695_v22 }
 0x55a   :  { %4890 = vmatprep.subr.mxu1 %v19043_v53  ;;  %v19365_v53 = vshrl.u32 %v4296_v58, 7 }
 0x55c   :  { %24696 = vst [vmem:[#allocation197_spill] sm:$0xff] %v19365_v53 }
 0x5a6   :  { %v3892_v52 = vpop.f32.mrf.mxu1 }
 0x5a8   :  { %v16098_v59 = vpop.f32.mrf.mxu1 }
 0x5ae   :  { %v3741_v35 = vpop.f32.mrf.mxu0 }
 0x5af   :  { %v3893_v2 = vadd.f32 %v3892_v52, %v3741_v35 }
 0x5b0   :  { %v16063_v11 = vpop.f32.mrf.mxu0 }
 0x5b1   :  { %v23945_v11 = vsub.s32 0, %v19365_v53 }
 0x5c6   :  { %v4085_v16 = vpop.f32.mrf.mxu1 }
 0x5c8   :  { %v16168_v12 = vpop.f32.mrf.mxu1 }
 0x5cf   :  { %v3996_v15 = vpop.f32.mrf.mxu0 }
 0x5d0   :  { %v3997_v27 = vadd.f32 %v3996_v15, %v3893_v2 }
 0x5d1   :  { %v16133_v45 = vpop.f32.mrf.mxu0 }
 0x5d2   :  { %v4086_v21 = vadd.f32 %v4085_v16, %v3997_v27 }
 0x5e8   :  { %v4291_v5 = vpop.f32.mrf.mxu1 }
 0x5ea   :  { %v16238_v26 = vpop.f32.mrf.mxu1 }
 0x5eb   :  { %v23944_v26 = vsub.s32 1, %v19365_v53  ;;  %v24717_v53 = vld [vmem:[#allocation185_spill] sm:$0xff] }
 0x5f0   :  { %v4204_v25 = vpop.f32.mrf.mxu0 }
 0x5f1   :  { %v4205_v34 = vadd.f32 %v4204_v25, %v4086_v21 }
 0x5f2   :  { %v16203_v14 = vpop.f32.mrf.mxu0 }
 0x5f3   :  { %v4292_v22 = vadd.f32 %v4291_v5, %v4205_v34 }
 0x5f5   :  { %v4295_v24 = vsub.f32 0.0, %v4292_v22 }
 0x5f7   :  { %v4303_v59 = vrot.slane %v4295_v24, 1  ;;  %v4299_v16 = vrot.slane %v4295_v24, %v23944_v26  ;;  %v24711_v26 = vld [vmem:[#allocation180_spill] sm:$0xff] }
 0x5f9   :  { %v4305_v19 = vsub.f32 %v4292_v22, %v4303_v59  ;;  %v4300_v25 = vsub.f32 %v18671_v37, %v4299_v16  ;;  %v4301_v27 = vsub.f32 %v18669_v61, %v4299_v16 }
 0x5fb   :  { %v4309_v12 = vrot.slane %v4305_v19, %v23945_v11  ;;  %v24712_v11 = vld [vmem:[#allocation181_spill] sm:$0xff] }
 0x5fd   :  { %17184 = vrcp.f32 %v4309_v12 }
 0x60a   :  { %v17185_v21 = vpop.eup %17184 }
 0x60b   :  { %v19375_v35 = vmul.f32 %v17185_v21, %v4300_v25  ;;  %v19377_v52 = vmul.f32 %v17185_v21, %v4301_v27  ;;  %v24703_v27 = vld [vmem:[#allocation175_spill] sm:$0xff] }
 0x60c   :  { %v24704_v21 = vld [vmem:[#allocation183_spill] sm:$0xff] }
 0x60d   :  { %24697 = vst [vmem:[#allocation198_spill] sm:$0xff] %v19375_v35  ;;  %24698 = vst [vmem:[#allocation199_spill] sm:$0xff] %v19377_v52  ;;  %v19380_v15 = vand.u32 4294901760, %v19375_v35  ;;  %v19383_v19 = vand.u32 4294901760, %v19377_v52  ;;  %v23947_v45 = vrot.slane %v19375_v35, 7  ;;  %v4316_v24 = vrot.slane %v19377_v52, 7 }
 0x60e   :  { %v6195_v37 = vrot.slane %v19375_v35, 1  ;;  %v23946_v61 = vrot.slane %v19377_v52, 1 }
 0x60f   :  { %24699 = vst [vmem:[#allocation200_spill] sm:$0xff] %v19380_v15  ;;  %24700 = vst [vmem:[#allocation201_spill] sm:$0xff] %v19383_v19  ;;  %4731 = vmatmul.mubr.f32.vlgmr.msra.gmra.mxu1 %v19380_v15  ;;  %v19392_v5 = vsub.f32 %v19375_v35, %v19380_v15  ;;  %v19396_v2 = vsub.f32 %v19377_v52, %v19383_v19  ;;  %v19401_v34 = vsel %vm3632_vm1, %v23947_v45, %v4316_v24  ;;  %v24705_v24 = vld [vmem:[#allocation176_spill] sm:$0xff]  ;;  %v24721_v35 = vld [vmem:[#allocation189_spill] sm:$0xff] }
 0x610   :  { %24701 = vst [vmem:[#allocation202_spill] sm:$0xff] %v19401_v34  ;;  %4892 = vmatpush1.msra.mxu1 %v19045_v23  ;;  %4736 = vmatprep.mubr.f32.mxu1 %v24647_v28  ;;  %v19408_v58 = vsel %vm6194_vm3, %v6195_v37, %v23946_v61  ;;  %v24706_v37 = vld [vmem:[#allocation177_spill] sm:$0xff]  ;;  %v24713_v61 = vld [vmem:[#allocation182_spill] sm:$0xff]  ;;  %v24714_v45 = vld [vmem:[#allocation192_spill] sm:$0xff] }
 0x611   :  { %24702 = vst [vmem:[#allocation203_spill] sm:$0xff] %v19408_v58  ;;  %4894 = vmatprep.subr.mxu1 %v19050_v42  ;;  %v23949_v14 = vand.u32 4294901760, %v19392_v5  ;;  %v23948_v22 = vand.u32 4294901760, %v19396_v2  ;;  %v24718_v52 = vand.u32 4294901760, %v19392_v5  ;;  %v24719_v58 = vld [vmem:[#allocation173_spill] sm:$0xff]  ;;  %v24720_v34 = vld [vmem:[#allocation187_spill] sm:$0xff] }
 0x612   :  { %4896 = vmatpush1.msra.mxu1 %v19056_v10  ;;  %v24723_v15 = vld [vmem:[#allocation191_spill] sm:$0xff] }
 0x613   :  { %4898 = vmatprep.subr.mxu1 %v19063_v4  ;;  %4738 = vmatmul.mubr.f32.gmra.mxu1 %v19383_v19  ;;  %v4486_v59 = vsub.f32 %v19392_v5, %v23949_v14  ;;  %v4497_v16 = vsub.f32 %v19396_v2, %v23948_v22  ;;  %v24715_v22 = vld [vmem:[#allocation184_spill] sm:$0xff]  ;;  %v24716_v14 = vld [vmem:[#allocation195_spill] sm:$0xff]  ;;  %v24722_v19 = vld [vmem:[#allocation190_spill] sm:$0xff] }
 0x614   :  { %4900 = vmatpush1.msra.mxu1 %v19070_v62  ;;  %4985 = vmatprep.mubr.f32.mxu1 %v24647_v28 }
 0x615   :  { %4902 = vmatprep.subr.mxu1 %v19080_v32  ;;  %v4487_v12 = vand.u32 4294901760, %v4486_v59  ;;  %v4498_v25 = vand.u32 4294901760, %v4497_v16  ;;  %v24707_v59 = vld [vmem:[#allocation178_spill] sm:$0xff]  ;;  %v24709_v16 = vld [vmem:[#allocation179_spill] sm:$0xff] }
 0x616   :  { %4904 = vmatpush1.msra.mxu1 %v19090_v31 }
 0x617   :  { %4906 = vmatprep.subr.mxu1 %v19113_v41  ;;  %4488 = vmatmul.mubr.f32.vlgmr.msra.gmra.mxu0 %v4487_v12  ;;  %v24708_v12 = vld [vmem:[#allocation186_spill] sm:$0xff] }
 0x618   :  { %4749 = vmatpush1.msra.mxu0 %v19054_v18  ;;  %4908 = vmatpush1.msra.mxu1 %v19119_v49 }
 0x619   :  { %4752 = vmatprep.subr.mxu0 %v19061_v20  ;;  %4910 = vmatprep.subr.mxu1 %v19127_v0 }
 0x61a   :  { %4755 = vmatpush1.msra.mxu0 %v19068_v57  ;;  %4912 = vmatpush1.msra.mxu1 %v19141_v55 }
 0x61b   :  { %4493 = vmatprep.mubr.f32.mxu0 %v24647_v28  ;;  %4758 = vmatprep.subr.mxu0 %v19078_v44 }
 0x61c   :  { %4914 = vmatprep.subr.mxu1 %v19145_v17  ;;  %4499 = vmatmul.mubr.f32.gmra.mxu0 %v4498_v25  ;;  %v24710_v25 = vld [vmem:[#allocation188_spill] sm:$0xff] }
 0x61d   :  { %4761 = vmatpush1.msra.mxu0 %v19088_v56  ;;  %4916 = vmatpush1.msra.mxu1 %v19154_v51 }
 0x61e   :  { %4764 = vmatprep.subr.mxu0 %v19098_v30  ;;  %4918 = vmatprep.subr.mxu1 %v19163_v9 }
 0x61f   :  { %4767 = vmatpush1.msra.mxu0 %v19106_v13  ;;  %4920 = vmatpush1.msra.mxu1 %v19178_v6 }
 0x620   :  { %4770 = vmatprep.subr.mxu0 %v19125_v40  ;;  %4922 = vmatprep.subr.mxu1 %v19185_v48 }
 0x621   :  { %4773 = vmatpush1.msra.mxu0 %v19134_v8  ;;  %4924 = vmatpush1.msra.mxu1 %v19201_v63 }
 0x622   :  { %4776 = vmatprep.subr.mxu0 %v19139_v33  ;;  %4926 = vmatprep.subr.mxu1 %v19208_v50 }
 0x623   :  { %4779 = vmatpush1.msra.mxu0 %v19152_v60  ;;  %4928 = vmatpush1.msra.mxu1 %v19214_v43 }
 0x624   :  { %4782 = vmatprep.subr.mxu0 %v19161_v47  ;;  %4930 = vmatprep.subr.mxu1 %v19223_v1 }
 0x625   :  { %4785 = vmatpush1.msra.mxu0 %v19171_v39  ;;  %4932 = vmatpush1.msra.mxu1 %v19233_v46 }
 0x626   :  { %4788 = vmatprep.subr.mxu0 %v19176_v54  ;;  %4934 = vmatprep.subr.mxu1 %v19240_v3 }
 0x627   :  { %4791 = vmatpush1.msra.mxu0 %v24703_v27  ;;  %4936 = vmatpush1.msra.mxu1 %v24704_v21 }
 0x628   :  { %4794 = vmatprep.subr.mxu0 %v24705_v24  ;;  %4938 = vmatprep.subr.mxu1 %v19265_v38 }
 0x629   :  { %4797 = vmatpush1.msra.mxu0 %v24706_v37  ;;  %4940 = vmatpush1.msra.mxu1 %v19281_v29 }
 0x62a   :  { %4800 = vmatprep.subr.mxu0 %v24707_v59  ;;  %4942 = vmatprep.subr.mxu1 %v24708_v12 }
 0x62b   :  { %4803 = vmatpush1.msra.mxu0 %v24709_v16  ;;  %4944 = vmatpush1.msra.mxu1 %v24710_v25 }
 0x62c   :  { %4806 = vmatprep.subr.mxu0 %v24711_v26  ;;  %4946 = vmatprep.subr.mxu1 %v19303_v36 }
 0x62d   :  { %4809 = vmatpush1.msra.mxu0 %v24712_v11  ;;  %4948 = vmatpush1.msra.mxu1 %v19313_v7 }
 0x62e   :  { %4812 = vmatprep.subr.mxu0 %v24713_v61  ;;  %4950 = vmatprep.subr.mxu1 %v24714_v45 }
 0x62f   :  { %4815 = vmatpush1.msra.mxu0 %v24715_v22  ;;  %4952 = vmatpush1.msra.mxu1 %v24716_v14 }
 0x630   :  { %4818 = vmatprep.subr.mxu0 %v24717_v53  ;;  %4989 = vmatmul.mubr.f32.vlgmr.msra.gmra.mxu1 %v24718_v52  ;;  %v24724_v52 = vand.u32 4294901760, %v19396_v2 }
 0x631   :  { %5180 = vmatprep.subr.mxu1 %v24719_v58  ;;  %4821 = vmatpush1.msra.mxu0 %v24720_v34  ;;  %v24725_v58 = vld [vmem:[#allocation193_spill] sm:$0xff] }
 0x632   :  { %5182 = vmatpush1.msra.mxu1 %v19045_v23  ;;  %4824 = vmatprep.subr.mxu0 %v24721_v35  ;;  %v24726_v23 = vld [vmem:[#allocation194_spill] sm:$0xff] }
 0x633   :  { %5184 = vmatprep.subr.mxu1 %v19050_v42  ;;  %4827 = vmatpush1.msra.mxu0 %v24722_v19  ;;  %v24727_v42 = vld [vmem:[#allocation196_spill] sm:$0xff] }
 0x634   :  { %4994 = vmatprep.mubr.f32.mxu1 %v24647_v28  ;;  %5186 = vmatpush1.msra.mxu1 %v19056_v10  ;;  %v24728_v10 = vld [vmem:[#allocation174_spill] sm:$0xff] }
 0x635   :  { %4830 = vmatprep.subr.mxu0 %v24723_v15  ;;  %4998 = vmatmul.mubr.f32.gmra.mxu1 %v24724_v52  ;;  %v24729_v52 = vand.u32 4294901760, %v24728_v10  ;;  %v4348_v10 = vld [vmem:[#allocation9 + $0xd8] sm:$0xff] }
 0x636   :  { %5188 = vmatprep.subr.mxu1 %v19063_v4  ;;  %4833 = vmatpush1.msra.mxu0 %v24725_v58  ;;  %v24730_v4 = vand.u32 4294901760, %v19054_v18  ;;  %v24733_v18 = vand.u32 4294901760, %v19078_v44  ;;  %v24736_v44 = vand.u32 4294901760, %v19106_v13  ;;  %v19539_v13 = vand.u32 4294901760, %v4348_v10 }
 0x637   :  { %5190 = vmatpush1.msra.mxu1 %v19070_v62  ;;  %4836 = vmatprep.subr.mxu0 %v24726_v23  ;;  %v4352_v62 = vld [vmem:[#allocation9 + $0xf8] sm:$0xff] }
 0x638   :  { %5192 = vmatprep.subr.mxu1 %v19080_v32  ;;  %4839 = vmatpush1.msra.mxu0 %v24727_v42  ;;  %v24731_v32 = vand.u32 4294901760, %v19061_v20  ;;  %v24734_v20 = vand.u32 4294901760, %v19088_v56  ;;  %v4347_v56 = vld [vmem:[#allocation9 + $0xd0] sm:$0xff] }
 0x639   :  { %4872 = vmatprep.mubr.f32.mxu0 %v24647_v28  ;;  %5194 = vmatpush1.msra.mxu1 %v19090_v31  ;;  %v24732_v31 = vand.u32 4294901760, %v19068_v57  ;;  %v24735_v57 = vand.u32 4294901760, %v19098_v30 }
 0x63a   :  { %4875 = vmatmul.mubr.f32.vlgmr.msra.gmra.mxu0 %v19392_v5  ;;  %5007 = vmatprep.subr.mxu0 %v24729_v52  ;;  %v19510_v5 = vand.u32 4294901760, %v4352_v62  ;;  %v4346_v52 = vld [vmem:[#allocation9 + $0xc8] sm:$0xff] }
 0x63b   :  { %5196 = vmatprep.subr.mxu1 %v19113_v41  ;;  %5011 = vmatpush1.msra.mxu0 %v24730_v4  ;;  %v4351_v41 = vld [vmem:[#allocation9 + $0xf0] sm:$0xff]  ;;  %v4345_v4 = vld [vmem:[#allocation9 + $0xc0] sm:$0xff] }
 0x63c   :  { %5198 = vmatpush1.msra.mxu1 %v19119_v49  ;;  %5015 = vmatprep.subr.mxu0 %v24731_v32  ;;  %v4350_v49 = vld [vmem:[#allocation9 + $0xe8] sm:$0xff]  ;;  %v4344_v32 = vld [vmem:[#allocation9 + $0xb8] sm:$0xff] }
 0x63d   :  { %5200 = vmatprep.subr.mxu1 %v19127_v0  ;;  %4880 = vmatprep.mubr.f32.mxu0 %v24647_v28  ;;  %v4349_v0 = vld [vmem:[#allocation9 + $0xe0] sm:$0xff] }
 0x63e   :  { %5019 = vmatpush1.msra.mxu0 %v24732_v31  ;;  %5202 = vmatpush1.msra.mxu1 %v19141_v55  ;;  %v19521_v55 = vand.u32 4294901760, %v4351_v41  ;;  %v19534_v30 = vand.u32 4294901760, %v4349_v0 }
 0x63f   :  { %4883 = vmatmul.mubr.f32.gmra.mxu0 %v19396_v2  ;;  %5023 = vmatprep.subr.mxu0 %v24733_v18  ;;  %v19527_v2 = vsub.f32 %v4352_v62, %v19510_v5  ;;  %v24739_v62 = vand.u32 4294901760, %v19139_v33  ;;  %v4343_v33 = vld [vmem:[#allocation9 + $0xb0] sm:$0xff] }
 0x640   :  { %5204 = vmatprep.subr.mxu1 %v19145_v17  ;;  %5027 = vmatpush1.msra.mxu0 %v24734_v20  ;;  %v19529_v17 = vand.u32 4294901760, %v4350_v49  ;;  %v19562_v18 = vsub.f32 %v4349_v0, %v19534_v30  ;;  %v24744_v20 = vand.u32 4294901760, %v19171_v39  ;;  %v4340_v39 = vld [vmem:[#allocation9 + $0x98] sm:$0xff] }
 0x641   :  { %5206 = vmatpush1.msra.mxu1 %v19154_v51  ;;  %5031 = vmatprep.subr.mxu0 %v24735_v57  ;;  %v24737_v51 = vand.u32 4294901760, %v19125_v40  ;;  %v19547_v40 = vand.u32 4294901760, %v4347_v56  ;;  %v19572_v57 = vand.u32 4294901760, %v4344_v32 }
 0x642   :  { %5208 = vmatprep.subr.mxu1 %v19163_v9  ;;  %5035 = vmatpush1.msra.mxu0 %v24736_v44  ;;  %v24738_v9 = vand.u32 4294901760, %v19134_v8  ;;  %v23967_v8 = vand.u32 4294901760, %v19527_v2  ;;  %v19554_v31 = vsub.f32 %v4350_v49, %v19529_v17  ;;  %24743 = vst [vmem:[#allocation183_spill] sm:$0xff] %v19562_v18  ;;  %v19570_v49 = vsub.f32 %v4348_v10, %v19539_v13 }
 0x643   :  { %5210 = vmatpush1.msra.mxu1 %v19178_v6  ;;  %5039 = vmatprep.subr.mxu0 %v24737_v51  ;;  %v19545_v6 = vsub.f32 %v4351_v41, %v19521_v55  ;;  %v24742_v41 = vand.u32 4294901760, %v19161_v47  ;;  %v24746_v47 = vand.u32 4294901760, %v19176_v54  ;;  %v19579_v44 = vsub.f32 %v4347_v56, %v19547_v40 }
 0x644   :  { %5212 = vmatprep.subr.mxu1 %v19185_v48  ;;  %5043 = vmatpush1.msra.mxu0 %v24738_v9  ;;  %v24740_v48 = vand.u32 4294901760, %v19152_v60  ;;  %24741 = vst [vmem:[#allocation175_spill] sm:$0xff] %v19554_v31  ;;  %v4342_v60 = vld [vmem:[#allocation9 + $0xa8] sm:$0xff]  ;;  %24745 = vst [vmem:[#allocation176_spill] sm:$0xff] %v19570_v49  ;;  %v24748_v10 = vand.u32 4294901760, %v24703_v27  ;;  %v23960_v54 = vand.u32 4294901760, %v19554_v31 }
 0x645   :  { %5214 = vmatpush1.msra.mxu1 %v19201_v63  ;;  %5047 = vmatprep.subr.mxu0 %v24739_v62  ;;  %v19556_v63 = vand.u32 4294901760, %v4346_v52  ;;  %v23965_v0 = vand.u32 4294901760, %v19545_v6  ;;  %24747 = vst [vmem:[#allocation177_spill] sm:$0xff] %v19579_v44  ;;  %v19595_v56 = vand.u32 4294901760, %v4342_v60  ;;  %v4339_v9 = vld [vmem:[#allocation9 + $0x90] sm:$0xff]  ;;  %v23961_v27 = vand.u32 4294901760, %v19562_v18 }
 0x646   :  { %5216 = vmatprep.subr.mxu1 %v19208_v50  ;;  %5051 = vmatpush1.msra.mxu0 %v24740_v48  ;;  %v19564_v50 = vand.u32 4294901760, %v4345_v4 }
 0x647   :  { %5218 = vmatpush1.msra.mxu1 %v19214_v43  ;;  %5055 = vmatprep.subr.mxu0 %v24742_v41  ;;  %v4341_v43 = vld [vmem:[#allocation9 + $0xa0] sm:$0xff]  ;;  %v19593_v51 = vsub.f32 %v4346_v52, %v19556_v63  ;;  %v24752_v52 = vand.u32 4294901760, %v24706_v37  ;;  %v23962_v41 = vand.u32 4294901760, %v19570_v49  ;;  %v23963_v37 = vand.u32 4294901760, %v19579_v44 }
 0x648   :  { %5220 = vmatprep.subr.mxu1 %v19223_v1  ;;  %5059 = vmatpush1.msra.mxu0 %v24744_v20  ;;  %v19581_v1 = vand.u32 4294901760, %v4343_v33  ;;  %v19602_v62 = vsub.f32 %v4345_v4, %v19564_v50  ;;  %v19604_v48 = vand.u32 4294901760, %v4341_v43  ;;  %v19611_v20 = vsub.f32 %v4344_v32, %v19572_v57  ;;  %v4337_v32 = vld [vmem:[#allocation9 + $0x80] sm:$0xff] }
 0x649   :  { %5222 = vmatpush1.msra.mxu1 %v19233_v46  ;;  %5063 = vmatprep.subr.mxu0 %v24746_v47  ;;  %v19589_v46 = vsub.f32 %v19527_v2, %v23967_v8  ;;  %24749 = vst [vmem:[#allocation178_spill] sm:$0xff] %v19593_v51  ;;  %v24754_v4 = vand.u32 4294901760, %v24707_v59  ;;  %v5424_v59 = vsub.f32 %v19554_v31, %v23960_v54  ;;  %v4336_v54 = vld [vmem:[#allocation9 + $0x78] sm:$0xff] }
 0x64a   :  { %5224 = vmatprep.subr.mxu1 %v19240_v3  ;;  %5067 = vmatpush1.msra.mxu0 %v24748_v10  ;;  %v24750_v3 = vand.u32 4294901760, %v24705_v24  ;;  %24751 = vst [vmem:[#allocation186_spill] sm:$0xff] %v19602_v62  ;;  %24753 = vst [vmem:[#allocation179_spill] sm:$0xff] %v19611_v20  ;;  %v4338_v24 = vld [vmem:[#allocation9 + $0x88] sm:$0xff]  ;;  %v19623_v47 = vsub.f32 %v4343_v33, %v19581_v1  ;;  %v19625_v10 = vand.u32 4294901760, %v4339_v9  ;;  %v24758_v33 = vand.u32 4294901760, %v24711_v26 }
 0x64b   :  { %5226 = vmatpush1.msra.mxu1 %v24704_v21  ;;  %v19613_v21 = vand.u32 4294901760, %v4340_v39  ;;  %v19656_v26 = vsub.f32 %v19570_v49, %v23962_v41  ;;  %5275 = vmatprep.mubr.f32.mxu1 %v24647_v28 }
 0x64c   :  { %5071 = vmatprep.subr.mxu0 %v24750_v3  ;;  %5228 = vmatprep.subr.mxu1 %v19265_v38  ;;  %v5418_v38 = vsub.f32 %v19545_v6, %v23965_v0  ;;  %24755 = vst [vmem:[#allocation188_spill] sm:$0xff] %v19623_v47  ;;  %v24756_v3 = vand.u32 4294901760, %v24709_v16  ;;  %v23966_v16 = vand.u32 4294901760, %v19602_v62  ;;  %v19674_v41 = vsub.f32 %v4339_v9, %v19625_v10  ;;  %v24767_v0 = vld [vmem:[#allocation200_spill] sm:$0xff] }
 0x64d   :  { %5075 = vmatpush1.msra.mxu0 %v24752_v52  ;;  %5230 = vmatpush1.msra.mxu1 %v19281_v29  ;;  %v5413_v29 = vand.u32 4294901760, %v19589_v46  ;;  %v23964_v52 = vand.u32 4294901760, %v19593_v51  ;;  %v19646_v46 = vsub.f32 %v4341_v43, %v19604_v48  ;;  %v19662_v43 = vand.u32 4294901760, %v4337_v32 }
 0x64e   :  { %5079 = vmatprep.subr.mxu0 %v24754_v4  ;;  %5232 = vmatprep.subr.mxu1 %v24708_v12  ;;  %v19636_v4 = vsub.f32 %v4342_v60, %v19595_v56  ;;  %v5430_v12 = vsub.f32 %v19562_v18, %v23961_v27  ;;  %v24760_v60 = vand.u32 4294901760, %v24712_v11  ;;  %v24762_v27 = vand.u32 4294901760, %v24713_v61  ;;  %24763 = vst [vmem:[#allocation192_spill] sm:$0xff] %v19674_v41 }
 0x64f   :  { %5083 = vmatpush1.msra.mxu0 %v24756_v3  ;;  %5234 = vmatpush1.msra.mxu1 %v24710_v25  ;;  %24759 = vst [vmem:[#allocation181_spill] sm:$0xff] %v19646_v46  ;;  %v19648_v3 = vand.u32 4294901760, %v4338_v24  ;;  %v23968_v25 = vand.u32 4294901760, %v19611_v20  ;;  %v19670_v11 = vsub.f32 %v19579_v44, %v23963_v37  ;;  %v19682_v61 = vsub.f32 %v19593_v51, %v23964_v52  ;;  %v4335_v37 = vld [vmem:[#allocation9 + $0x70] sm:$0xff] }
 0x650   :  { %24757 = vst [vmem:[#allocation180_spill] sm:$0xff] %v19636_v4  ;;  %5087 = vmatprep.subr.mxu0 %v24758_v33  ;;  %5236 = vmatprep.subr.mxu1 %v19303_v36  ;;  %v19660_v33 = vsub.f32 %v4340_v39, %v19613_v21  ;;  %v5419_v36 = vand.u32 4294901760, %v5418_v38  ;;  %v24764_v39 = vand.u32 4294901760, %v24715_v22  ;;  %v19685_v38 = vand.u32 4294901760, %v4336_v54 }
 0x651   :  { %5091 = vmatpush1.msra.mxu0 %v24760_v60  ;;  %5238 = vmatpush1.msra.mxu1 %v19313_v7  ;;  %v23969_v60 = vand.u32 4294901760, %v19623_v47  ;;  %v5425_v7 = vand.u32 4294901760, %v5424_v59  ;;  %v5431_v9 = vand.u32 4294901760, %v5430_v12  ;;  %v19696_v59 = vsub.f32 %v4338_v24, %v19648_v3  ;;  %v4333_v24 = vld [vmem:[#allocation9 + $0x60] sm:$0xff] }
 0x652   :  { %24761 = vst [vmem:[#allocation182_spill] sm:$0xff] %v19660_v33  ;;  %5095 = vmatprep.subr.mxu0 %v24762_v27  ;;  %5240 = vmatprep.subr.mxu1 %v24714_v45  ;;  %v23970_v27 = vand.u32 4294901760, %v19636_v4  ;;  %v19692_v45 = vsub.f32 %v19602_v62, %v23966_v16  ;;  %v24766_v52 = vand.u32 4294901760, %v24717_v53  ;;  %v19705_v12 = vsub.f32 %v19611_v20, %v23968_v25  ;;  %v4332_v16 = vld [vmem:[#allocation9 + $0x58] sm:$0xff] }
 0x653   :  { %5099 = vmatpush1.msra.mxu0 %v24764_v39  ;;  %5242 = vmatpush1.msra.mxu1 %v24716_v14  ;;  %24765 = vst [vmem:[#allocation184_spill] sm:$0xff] %v19696_v59  ;;  %v4334_v39 = vld [vmem:[#allocation9 + $0x68] sm:$0xff]  ;;  %v5437_v14 = vand.u32 4294901760, %v19656_v26  ;;  %v19709_v8 = vsub.f32 %v4337_v32, %v19662_v43  ;;  %v24769_v22 = vand.u32 4294901760, %v24720_v34  ;;  %v5443_v53 = vand.u32 4294901760, %v19670_v11 }
 0x654   :  { %5103 = vmatprep.subr.mxu0 %v24766_v52  ;;  %5277 = vmatmul.mubr.f32.vlgmr.msra.gmra.mxu1 %v24767_v0  ;;  %v19717_v52 = vsub.f32 %v19623_v47, %v23969_v60  ;;  %v19720_v25 = vand.u32 4294901760, %v4335_v37  ;;  %v24770_v32 = vand.u32 4294901760, %v24721_v35  ;;  %v19728_v34 = vsub.f32 %v19636_v4, %v23970_v27  ;;  %v4331_v60 = vld [vmem:[#allocation9 + $0x50] sm:$0xff] }
 0x655   :  { %24768 = vst [vmem:[#allocation195_spill] sm:$0xff] %v19709_v8  ;;  %5414 = vmatprep.subr.mxu1 %v5413_v29  ;;  %5107 = vmatpush1.msra.mxu0 %v24769_v22  ;;  %v5449_v29 = vand.u32 4294901760, %v19682_v61  ;;  %v19731_v11 = vsub.f32 %v4336_v54, %v19685_v38  ;;  %v19733_v22 = vand.u32 4294901760, %v4334_v39  ;;  %v24772_v26 = vand.u32 4294901760, %v24722_v19  ;;  %v4330_v54 = vld [vmem:[#allocation9 + $0x48] sm:$0xff] }
 0x656   :  { %5420 = vmatpush1.msra.mxu1 %v5419_v36  ;;  %5111 = vmatprep.subr.mxu0 %v24770_v32  ;;  %v5455_v35 = vand.u32 4294901760, %v19692_v45  ;;  %v24773_v36 = vand.u32 4294901760, %v19646_v46  ;;  %v19744_v27 = vand.u32 4294901760, %v4333_v24  ;;  %v24775_v19 = vand.u32 4294901760, %v19660_v33  ;;  %v4328_v45 = vld [vmem:[#allocation9 + $0x38] sm:$0xff] }
 0x657   :  { %24771 = vst [vmem:[#allocation185_spill] sm:$0xff] %v19731_v11  ;;  %5426 = vmatprep.subr.mxu1 %v5425_v7  ;;  %5115 = vmatpush1.msra.mxu0 %v24772_v26  ;;  %v5461_v7 = vand.u32 4294901760, %v19705_v12  ;;  %v19754_v4 = vand.u32 4294901760, %v4332_v16  ;;  %v24777_v32 = vand.u32 4294901760, %v24723_v15  ;;  %v5467_v47 = vand.u32 4294901760, %v19717_v52 }
 0x658   :  { %v19741_v61 = vsub.f32 %v19646_v46, %v24773_v36  ;;  %24774 = vst [vmem:[#allocation173_spill] sm:$0xff] %v19744_v27  ;;  %5282 = vmatprep.mubr.f32.mxu1 %v24647_v28  ;;  %5432 = vmatpush1.msra.mxu1 %v5431_v9  ;;  %v19751_v26 = vsub.f32 %v19660_v33, %v24775_v19  ;;  %v4329_v36 = vld [vmem:[#allocation9 + $0x40] sm:$0xff]  ;;  %v24778_v46 = vld [vmem:[#allocation201_spill] sm:$0xff]  ;;  %v24779_v9 = vand.u32 4294901760, %v19674_v41  ;;  %v19768_v33 = vand.u32 4294901760, %v4331_v60 }
 0x659   :  { %24776 = vst [vmem:[#allocation187_spill] sm:$0xff] %v19754_v4  ;;  %5119 = vmatprep.subr.mxu0 %v24777_v32  ;;  %5284 = vmatmul.mubr.f32.gmra.mxu1 %v24778_v46  ;;  %v19766_v19 = vsub.f32 %v4335_v37, %v19720_v25  ;;  %v24781_v20 = vand.u32 4294901760, %v24725_v58  ;;  %v5473_v15 = vand.u32 4294901760, %v19728_v34  ;;  %v19775_v52 = vsub.f32 %v4334_v39, %v19733_v22  ;;  %v4326_v39 = vld [vmem:[#allocation9 + $0x28] sm:$0xff] }
 0x65a   :  { %v19763_v12 = vsub.f32 %v19674_v41, %v24779_v9  ;;  %5438 = vmatprep.subr.mxu1 %v5437_v14  ;;  %v19777_v62 = vand.u32 4294901760, %v4330_v54  ;;  %v4327_v9 = vld [vmem:[#allocation9 + $0x30] sm:$0xff]  ;;  %v24783_v37 = vand.u32 4294901760, %v24726_v23  ;;  %v5479_v41 = vand.u32 4294901760, %v19741_v61  ;;  %5164 = vmatprep.mubr.f32.mxu0 %v24647_v28 }
 0x65b   :  { %24780 = vst [vmem:[#allocation189_spill] sm:$0xff] %v19766_v19  ;;  %5123 = vmatpush1.msra.mxu0 %v24781_v20  ;;  %24782 = vst [vmem:[#allocation190_spill] sm:$0xff] %v19775_v52  ;;  %5444 = vmatpush1.msra.mxu1 %v5443_v53  ;;  %v24784_v14 = vand.u32 4294901760, %v19696_v59  ;;  %v19788_v20 = vsub.f32 %v4333_v24, %v19744_v27  ;;  %v19790_v34 = vand.u32 4294901760, %v4329_v36  ;;  %v24785_v32 = vand.u32 4294901760, %v24727_v42  ;;  %v4325_v24 = vld [vmem:[#allocation9 + $0x20] sm:$0xff] }
 0x65c   :  { %5127 = vmatprep.subr.mxu0 %v24783_v37  ;;  %5450 = vmatprep.subr.mxu1 %v5449_v29  ;;  %v5485_v23 = vand.u32 4294901760, %v19751_v26  ;;  %v24786_v53 = vand.u32 4294901760, %v19709_v8  ;;  %v19801_v37 = vsub.f32 %v4332_v16, %v19754_v4  ;;  %v5491_v29 = vand.u32 4294901760, %v19763_v12 }
 0x65d   :  { %v19785_v58 = vsub.f32 %v19696_v59, %v24784_v14  ;;  %5131 = vmatpush1.msra.mxu0 %v24785_v32  ;;  %v19803_v14 = vand.u32 4294901760, %v4328_v45  ;;  %5456 = vmatpush1.msra.mxu1 %v5455_v35  ;;  %v19809_v26 = vsub.f32 %v4331_v60, %v19768_v33  ;;  %v19811_v32 = vand.u32 4294901760, %v4327_v9  ;;  %v4323_v60 = vld [vmem:[#allocation9 + $0x10] sm:$0xff] }
 0x65e   :  { %v19798_v61 = vsub.f32 %v19709_v8, %v24786_v53  ;;  %24787 = vst [vmem:[#allocation191_spill] sm:$0xff] %v19801_v37  ;;  %v4324_v53 = vld [vmem:[#allocation9 + $0x18] sm:$0xff]  ;;  %5166 = vmatmul.mubr.f32.vlgmr.msra.gmra.mxu0 %v24767_v0  ;;  %5291 = vmatprep.subr.mxu0 %v19510_v5  ;;  %v24788_v16 = vand.u32 4294901760, %v19731_v11  ;;  %v19820_v12 = vsub.f32 %v4330_v54, %v19777_v62  ;;  %v19822_v42 = vand.u32 4294901760, %v4326_v39 }
 0x65f   :  { %5462 = vmatprep.subr.mxu1 %v5461_v7  ;;  %5293 = vmatpush1.msra.mxu0 %v19521_v55  ;;  %v5497_v59 = vand.u32 4294901760, %v19785_v58  ;;  %v19828_v51 = vsub.f32 %v4329_v36, %v19790_v34  ;;  %v19830_v44 = vand.u32 4294901760, %v4325_v24  ;;  %v19836_v7 = vsub.f32 %v4328_v45, %v19803_v14  ;;  %v4321_v58 = vld [vmem:[#allocation9] sm:$0xff] }
 0x660   :  { %v5508_v8 = vsub.f32 %v19731_v11, %v24788_v16  ;;  %24789 = vst [vmem:[#allocation193_spill] sm:$0xff] %v19820_v12  ;;  %v4322_v16 = vld [vmem:[#allocation9 + $0x8] sm:$0xff]  ;;  %5468 = vmatpush1.msra.mxu1 %v5467_v47  ;;  %5295 = vmatprep.subr.mxu0 %v19529_v17  ;;  %v5503_v54 = vand.u32 4294901760, %v19798_v61  ;;  %v19838_v11 = vand.u32 4294901760, %v4324_v53  ;;  %v24790_v36 = vand.u32 4294901760, %v19766_v19 }
 0x661   :  { %5474 = vmatprep.subr.mxu1 %v5473_v15  ;;  %5171 = vmatprep.mubr.f32.mxu0 %v24647_v28  ;;  %v19846_v49 = vsub.f32 %v4327_v9, %v19811_v32  ;;  %v19848_v61 = vand.u32 4294901760, %v4323_v60  ;;  %v24791_v45 = vand.u32 4294901760, %v19775_v52  ;;  %v19856_v18 = vsub.f32 %v4326_v39, %v19822_v42 }
 0x662   :  { %v5514_v0 = vsub.f32 %v19766_v19, %v24790_v36  ;;  %5297 = vmatpush1.msra.mxu0 %v19534_v30  ;;  %5480 = vmatpush1.msra.mxu1 %v5479_v41  ;;  %v19858_v36 = vand.u32 4294901760, %v4322_v16  ;;  %v24793_v9 = vand.u32 4294901760, %v19788_v20  ;;  %v19867_v19 = vsub.f32 %v4325_v24, %v19830_v44 }
 0x663   :  { %v5520_v15 = vsub.f32 %v19775_v52, %v24791_v45  ;;  %24792 = vst [vmem:[#allocation194_spill] sm:$0xff] %v19856_v18  ;;  %5173 = vmatmul.mubr.f32.gmra.mxu0 %v24778_v46  ;;  %5299 = vmatprep.subr.mxu0 %v19539_v13  ;;  %v19869_v45 = vand.u32 4294901760, %v4321_v58  ;;  %v5509_v39 = vand.u32 4294901760, %v5508_v8  ;;  %v24794_v35 = vand.u32 4294901760, %v19801_v37 }
 0x664   :  { %v5526_v47 = vsub.f32 %v19788_v20, %v24793_v9  ;;  %5486 = vmatprep.subr.mxu1 %v5485_v23  ;;  %5301 = vmatpush1.msra.mxu0 %v19547_v40  ;;  %v19877_v31 = vsub.f32 %v4324_v53, %v19838_v11  ;;  %v5515_v24 = vand.u32 4294901760, %v5514_v0  ;;  %v24795_v9 = vand.u32 4294901760, %v19809_v26 }
 0x665   :  { %v5532_v46 = vsub.f32 %v19801_v37, %v24794_v35  ;;  %5492 = vmatpush1.msra.mxu1 %v5491_v29  ;;  %5303 = vmatprep.subr.mxu0 %v19556_v63  ;;  %v19885_v8 = vsub.f32 %v4323_v60, %v19848_v61  ;;  %v5521_v35 = vand.u32 4294901760, %v5520_v15  ;;  %v24796_v53 = vand.u32 4294901760, %v19820_v12 }
 0x666   :  { %v5538_v23 = vsub.f32 %v19809_v26, %v24795_v9  ;;  %5498 = vmatprep.subr.mxu1 %v5497_v59  ;;  %5305 = vmatpush1.msra.mxu0 %v19564_v50  ;;  %v19893_v0 = vsub.f32 %v4322_v16, %v19858_v36  ;;  %v5527_v9 = vand.u32 4294901760, %v5526_v47  ;;  %v24797_v60 = vand.u32 4294901760, %v19828_v51 }
 0x667   :  { %v5544_v29 = vsub.f32 %v19820_v12, %v24796_v53  ;;  %5504 = vmatpush1.msra.mxu1 %v5503_v54  ;;  %5307 = vmatprep.subr.mxu0 %v19572_v57  ;;  %v19901_v15 = vsub.f32 %v4321_v58, %v19869_v45  ;;  %v5533_v53 = vand.u32 4294901760, %v5532_v46  ;;  %v24798_v16 = vand.u32 4294901760, %v19836_v7 }
 0x668   :  { %v5550_v59 = vsub.f32 %v19828_v51, %v24797_v60  ;;  %5510 = vmatprep.subr.mxu1 %v5509_v39  ;;  %5309 = vmatpush1.msra.mxu0 %v19581_v1  ;;  %v5539_v47 = vand.u32 4294901760, %v5538_v23  ;;  %v24799_v60 = vand.u32 4294901760, %v19846_v49  ;;  %v24800_v46 = vand.u32 4294901760, %v19856_v18 }
 0x669   :  { %v5556_v54 = vsub.f32 %v19836_v7, %v24798_v16  ;;  %5516 = vmatpush1.msra.mxu1 %v5515_v24  ;;  %5311 = vmatprep.subr.mxu0 %v19595_v56  ;;  %v5545_v39 = vand.u32 4294901760, %v5544_v29  ;;  %v24801_v23 = vand.u32 4294901760, %v19867_v19  ;;  %v24802_v29 = vand.u32 4294901760, %v19877_v31 }
 0x66a   :  { %v5562_v41 = vsub.f32 %v19846_v49, %v24799_v60  ;;  %5522 = vmatprep.subr.mxu1 %v5521_v35  ;;  %5313 = vmatpush1.msra.mxu0 %v19604_v48  ;;  %v5568_v16 = vsub.f32 %v19856_v18, %v24800_v46  ;;  %v5551_v24 = vand.u32 4294901760, %v5550_v59  ;;  %v24803_v59 = vand.u32 4294901760, %v19885_v8  ;;  %v24804_v18 = vld [vmem:[#allocation198_spill] sm:$0xff] }
 0x66b   :  { %5528 = vmatpush1.msra.mxu1 %v5527_v9  ;;  %5315 = vmatprep.subr.mxu0 %v19613_v21  ;;  %v5574_v60 = vsub.f32 %v19867_v19, %v24801_v23  ;;  %v5557_v35 = vand.u32 4294901760, %v5556_v54  ;;  %v5580_v46 = vsub.f32 %v19877_v31, %v24802_v29  ;;  %v24805_v23 = vrot.slane %v24804_v18, 7 }
 0x66c   :  { %5534 = vmatprep.subr.mxu1 %v5533_v53  ;;  %5317 = vmatpush1.msra.mxu0 %v19625_v10  ;;  %v5563_v9 = vand.u32 4294901760, %v5562_v41  ;;  %v5586_v52 = vsub.f32 %v19885_v8, %v24803_v59  ;;  %v5569_v53 = vand.u32 4294901760, %v5568_v16  ;;  %v24806_v54 = vand.u32 4294901760, %v19893_v0 }
 0x66d   :  { %5540 = vmatpush1.msra.mxu1 %v5539_v47  ;;  %5319 = vmatprep.subr.mxu0 %v19648_v3  ;;  %v4320_v58 = vsel %vm3632_vm1, 0.0, %v24805_v23  ;;  %v5575_v41 = vand.u32 4294901760, %v5574_v60  ;;  %v24807_v47 = vand.u32 4294901760, %v19901_v15  ;;  %v5581_v18 = vand.u32 4294901760, %v5580_v46  ;;  %v24809_v46 = vld [vmem:[#allocation202_spill] sm:$0xff] }
 0x66e   :  { %5546 = vmatprep.subr.mxu1 %v5545_v39  ;;  %5321 = vmatpush1.msra.mxu0 %v19662_v43  ;;  %v5592_v29 = vsub.f32 %v19893_v0, %v24806_v54  ;;  %v19943_v39 = vand.u32 4294901760, %v4320_v58  ;;  %v5587_v16 = vand.u32 4294901760, %v5586_v52 }
 0x66f   :  { %5552 = vmatpush1.msra.mxu1 %v5551_v24  ;;  %5323 = vmatprep.subr.mxu0 %v19685_v38  ;;  %v5598_v59 = vsub.f32 %v19901_v15, %v24807_v47 }
 0x670   :  { %5558 = vmatprep.subr.mxu1 %v5557_v35  ;;  %5325 = vmatpush1.msra.mxu0 %v19720_v25  ;;  %24808 = vst [vmem:[#allocation196_spill] sm:$0xff] %v19943_v39  ;;  %v5593_v24 = vand.u32 4294901760, %v5592_v29  ;;  %v19950_v35 = vsub.f32 %v4320_v58, %v19943_v39 }
 0x671   :  { %5564 = vmatpush1.msra.mxu1 %v5563_v9  ;;  %5327 = vmatprep.subr.mxu0 %v19733_v22  ;;  %v5599_v60 = vand.u32 4294901760, %v5598_v59  ;;  %v19954_v9 = vand.u32 4294901760, %v24809_v46  ;;  %v24812_v59 = vld [vmem:[#allocation183_spill] sm:$0xff] }
 0x672   :  { %5570 = vmatprep.subr.mxu1 %v5569_v53  ;;  %5329 = vmatpush1.msra.mxu0 %v19744_v27  ;;  %v24008_v52 = vand.u32 4294901760, %v19950_v35 }
 0x673   :  { %5576 = vmatpush1.msra.mxu1 %v5575_v41  ;;  %5331 = vmatprep.subr.mxu0 %v19754_v4  ;;  %24810 = vst [vmem:[#allocation174_spill] sm:$0xff] %v19954_v9  ;;  %v19965_v58 = vsub.f32 %v24809_v46, %v19954_v9  ;;  %v24811_v41 = vld [vmem:[#allocation175_spill] sm:$0xff] }
 0x674   :  { %5582 = vmatprep.subr.mxu1 %v5581_v18  ;;  %5333 = vmatpush1.msra.mxu0 %v19768_v33  ;;  %v5390_v23 = vsub.f32 %v19950_v35, %v24008_v52  ;;  %v24813_v18 = vld [vmem:[#allocation176_spill] sm:$0xff]  ;;  %v24817_v46 = vld [vmem:[#allocation179_spill] sm:$0xff] }
 0x675   :  { %5588 = vmatpush1.msra.mxu1 %v5587_v16  ;;  %5335 = vmatprep.subr.mxu0 %v19777_v62  ;;  %v24007_v53 = vand.u32 4294901760, %v19965_v58  ;;  %v24814_v16 = vld [vmem:[#allocation177_spill] sm:$0xff]  ;;  %v24823_v52 = vld [vmem:[#allocation184_spill] sm:$0xff] }
 0x676   :  { %5594 = vmatprep.subr.mxu1 %v5593_v24  ;;  %5337 = vmatpush1.msra.mxu0 %v19790_v34  ;;  %v5391_v54 = vand.u32 4294901760, %v5390_v23  ;;  %v24815_v24 = vld [vmem:[#allocation178_spill] sm:$0xff]  ;;  %v24818_v23 = vld [vmem:[#allocation188_spill] sm:$0xff] }
 0x677   :  { %5600 = vmatpush1.msra.mxu1 %v5599_v60  ;;  %5633 = vmatprep.mubr.f32.mxu1 %v24647_v28  ;;  %v5401_v29 = vsub.f32 %v19965_v58, %v24007_v53  ;;  %v24816_v60 = vld [vmem:[#allocation186_spill] sm:$0xff]  ;;  %v24822_v53 = vld [vmem:[#allocation192_spill] sm:$0xff] }
 0x678   :  { %5339 = vmatprep.subr.mxu0 %v19803_v14  ;;  %5635 = vmatmul.mubr.f32.vlgmr.msra.gmra.mxu1 %v19943_v39  ;;  %v24825_v39 = vld [vmem:[#allocation185_spill] sm:$0xff] }
 0x679   :  { %5794 = vmatprep.subr.mxu1 %v19510_v5  ;;  %5341 = vmatpush1.msra.mxu0 %v19811_v32  ;;  %v5402_v47 = vand.u32 4294901760, %v5401_v29  ;;  %v24820_v29 = vld [vmem:[#allocation181_spill] sm:$0xff] }
 0x67a   :  { %5796 = vmatpush1.msra.mxu1 %v19521_v55  ;;  %5343 = vmatprep.subr.mxu0 %v19822_v42 }
 0x67b   :  { %5798 = vmatprep.subr.mxu1 %v19529_v17  ;;  %5345 = vmatpush1.msra.mxu0 %v19830_v44 }
 0x67c   :  { %5640 = vmatprep.mubr.f32.mxu1 %v24647_v28  ;;  %5800 = vmatpush1.msra.mxu1 %v19534_v30 }
 0x67d   :  { %5347 = vmatprep.subr.mxu0 %v19838_v11  ;;  %5642 = vmatmul.mubr.f32.gmra.mxu1 %v19954_v9  ;;  %v24824_v9 = vld [vmem:[#allocation195_spill] sm:$0xff] }
 0x67e   :  { %5802 = vmatprep.subr.mxu1 %v19539_v13  ;;  %5349 = vmatpush1.msra.mxu0 %v19848_v61 }
 0x67f   :  { %5804 = vmatpush1.msra.mxu1 %v19547_v40  ;;  %5351 = vmatprep.subr.mxu0 %v19858_v36 }
 0x680   :  { %5806 = vmatprep.subr.mxu1 %v19556_v63  ;;  %5353 = vmatpush1.msra.mxu0 %v19869_v45 }
 0x681   :  { %5386 = vmatprep.mubr.f32.mxu0 %v24647_v28  ;;  %5808 = vmatpush1.msra.mxu1 %v19564_v50 }
 0x682   :  { %5392 = vmatmul.mubr.f32.vlgmr.msra.gmra.mxu0 %v5391_v54  ;;  %5650 = vmatprep.subr.mxu0 %v19527_v2  ;;  %v24819_v54 = vld [vmem:[#allocation180_spill] sm:$0xff] }
 0x683   :  { %5810 = vmatprep.subr.mxu1 %v19572_v57  ;;  %5653 = vmatpush1.msra.mxu0 %v19545_v6 }
 0x684   :  { %5812 = vmatpush1.msra.mxu1 %v19581_v1  ;;  %5656 = vmatprep.subr.mxu0 %v24811_v41 }
 0x685   :  { %5814 = vmatprep.subr.mxu1 %v19595_v56  ;;  %5397 = vmatprep.mubr.f32.mxu0 %v24647_v28 }
 0x686   :  { %5659 = vmatpush1.msra.mxu0 %v24812_v59  ;;  %5816 = vmatpush1.msra.mxu1 %v19604_v48 }
 0x687   :  { %5403 = vmatmul.mubr.f32.gmra.mxu0 %v5402_v47  ;;  %5662 = vmatprep.subr.mxu0 %v24813_v18  ;;  %v24821_v47 = vld [vmem:[#allocation182_spill] sm:$0xff] }
 0x688   :  { %5818 = vmatprep.subr.mxu1 %v19613_v21  ;;  %5665 = vmatpush1.msra.mxu0 %v24814_v16 }
 0x689   :  { %5820 = vmatpush1.msra.mxu1 %v19625_v10  ;;  %5668 = vmatprep.subr.mxu0 %v24815_v24 }
 0x68a   :  { %5822 = vmatprep.subr.mxu1 %v19648_v3  ;;  %5671 = vmatpush1.msra.mxu0 %v24816_v60 }
 0x68b   :  { %5824 = vmatpush1.msra.mxu1 %v19662_v43  ;;  %5674 = vmatprep.subr.mxu0 %v24817_v46 }
 0x68c   :  { %5826 = vmatprep.subr.mxu1 %v19685_v38  ;;  %5677 = vmatpush1.msra.mxu0 %v24818_v23 }
 0x68d   :  { %5828 = vmatpush1.msra.mxu1 %v19720_v25  ;;  %5680 = vmatprep.subr.mxu0 %v24819_v54 }
 0x68e   :  { %5830 = vmatprep.subr.mxu1 %v19733_v22  ;;  %5683 = vmatpush1.msra.mxu0 %v24820_v29 }
 0x68f   :  { %5832 = vmatpush1.msra.mxu1 %v19744_v27  ;;  %5686 = vmatprep.subr.mxu0 %v24821_v47  ;;  %v24826_v27 = vld [vmem:[#allocation189_spill] sm:$0xff] }
 0x690   :  { %5834 = vmatprep.subr.mxu1 %v19754_v4  ;;  %5689 = vmatpush1.msra.mxu0 %v24822_v53  ;;  %v24827_v4 = vld [vmem:[#allocation190_spill] sm:$0xff] }
 0x691   :  { %5836 = vmatpush1.msra.mxu1 %v19768_v33  ;;  %5692 = vmatprep.subr.mxu0 %v24823_v52 }
 0x692   :  { %5838 = vmatprep.subr.mxu1 %v19777_v62  ;;  %5695 = vmatpush1.msra.mxu0 %v24824_v9 }
 0x693   :  { %5840 = vmatpush1.msra.mxu1 %v19790_v34  ;;  %5698 = vmatprep.subr.mxu0 %v24825_v39 }
 0x694   :  { %5842 = vmatprep.subr.mxu1 %v19803_v14  ;;  %5701 = vmatpush1.msra.mxu0 %v24826_v27 }
 0x695   :  { %5844 = vmatpush1.msra.mxu1 %v19811_v32  ;;  %5704 = vmatprep.subr.mxu0 %v24827_v4 }
 0x696   :  { %5846 = vmatprep.subr.mxu1 %v19822_v42  ;;  %5707 = vmatpush1.msra.mxu0 %v19788_v20 }
 0x697   :  { %5848 = vmatpush1.msra.mxu1 %v19830_v44  ;;  %5710 = vmatprep.subr.mxu0 %v19801_v37  ;;  %v24828_v37 = vand.u32 4294901760, %v19950_v35 }
 0x698   :  { %5850 = vmatprep.subr.mxu1 %v19838_v11  ;;  %5713 = vmatpush1.msra.mxu0 %v19809_v26 }
 0x699   :  { %5852 = vmatpush1.msra.mxu1 %v19848_v61  ;;  %5716 = vmatprep.subr.mxu0 %v19820_v12  ;;  %v24829_v12 = vld [vmem:[#allocation194_spill] sm:$0xff] }
 0x69a   :  { %5854 = vmatprep.subr.mxu1 %v19858_v36  ;;  %5719 = vmatpush1.msra.mxu0 %v19828_v51 }
 0x69b   :  { %5856 = vmatpush1.msra.mxu1 %v19869_v45  ;;  %5889 = vmatprep.mubr.f32.mxu1 %v24647_v28 }
 0x69c   :  { %5722 = vmatprep.subr.mxu0 %v19836_v7  ;;  %5893 = vmatmul.mubr.f32.vlgmr.msra.gmra.mxu1 %v24828_v37  ;;  %v24830_v37 = vand.u32 4294901760, %v19965_v58 }
 0x69d   :  { %6084 = vmatprep.subr.mxu1 %v19510_v5  ;;  %5725 = vmatpush1.msra.mxu0 %v19846_v49  ;;  %v24831_v5 = vand.u32 4294901760, %v19527_v2  ;;  %v6232_v2 = vld [vmem:[#allocation9 + $0x2f0] sm:$0xff] }
 0x69e   :  { %6086 = vmatpush1.msra.mxu1 %v19521_v55  ;;  %5728 = vmatprep.subr.mxu0 %v24829_v12  ;;  %v24832_v55 = vand.u32 4294901760, %v19545_v6  ;;  %v24835_v6 = vand.u32 4294901760, %v24813_v18  ;;  %v6227_v18 = vld [vmem:[#allocation9 + $0x2c8] sm:$0xff] }
 0x69f   :  { %6088 = vmatprep.subr.mxu1 %v19529_v17  ;;  %5731 = vmatpush1.msra.mxu0 %v19867_v19  ;;  %v24833_v17 = vand.u32 4294901760, %v24811_v41  ;;  %v24839_v41 = vand.u32 4294901760, %v24817_v46 }
 0x6a0   :  { %5898 = vmatprep.mubr.f32.mxu1 %v24647_v28  ;;  %6090 = vmatpush1.msra.mxu1 %v19534_v30  ;;  %v6233_v30 = vld [vmem:[#allocation9 + $0x2f8] sm:$0xff] }
 0x6a1   :  { %5734 = vmatprep.subr.mxu0 %v19877_v31  ;;  %5902 = vmatmul.mubr.f32.gmra.mxu1 %v24830_v37  ;;  %v6225_v37 = vld [vmem:[#allocation9 + $0x2b8] sm:$0xff] }
 0x6a2   :  { %6092 = vmatprep.subr.mxu1 %v19539_v13  ;;  %5737 = vmatpush1.msra.mxu0 %v19885_v8  ;;  %v24834_v13 = vand.u32 4294901760, %v24812_v59 }
 0x6a3   :  { %6094 = vmatpush1.msra.mxu1 %v19547_v40  ;;  %5740 = vmatprep.subr.mxu0 %v19893_v0  ;;  %v20079_v40 = vand.u32 4294901760, %v6233_v30 }
 0x6a4   :  { %6096 = vmatprep.subr.mxu1 %v19556_v63  ;;  %5743 = vmatpush1.msra.mxu0 %v19901_v15  ;;  %v6231_v63 = vld [vmem:[#allocation9 + $0x2e8] sm:$0xff] }
 0x6a5   :  { %5776 = vmatprep.mubr.f32.mxu0 %v24647_v28  ;;  %6098 = vmatpush1.msra.mxu1 %v19564_v50  ;;  %v24836_v50 = vand.u32 4294901760, %v24814_v16 }
 0x6a6   :  { %5779 = vmatmul.mubr.f32.vlgmr.msra.gmra.mxu0 %v19950_v35  ;;  %5911 = vmatprep.subr.mxu0 %v24831_v5  ;;  %v24838_v35 = vand.u32 4294901760, %v24816_v60  ;;  %v20121_v5 = vand.u32 4294901760, %v6227_v18 }
 0x6a7   :  { %6100 = vmatprep.subr.mxu1 %v19572_v57  ;;  %5915 = vmatpush1.msra.mxu0 %v24832_v55  ;;  %v6230_v57 = vld [vmem:[#allocation9 + $0x2e0] sm:$0xff]  ;;  %v24844_v55 = vld [vmem:[#allocation173_spill] sm:$0xff] }
 0x6a8   :  { %6102 = vmatpush1.msra.mxu1 %v19581_v1  ;;  %5919 = vmatprep.subr.mxu0 %v24833_v17  ;;  %v24837_v1 = vand.u32 4294901760, %v24815_v24  ;;  %v20100_v59 = vand.u32 4294901760, %v6230_v57  ;;  %v6226_v24 = vld [vmem:[#allocation9 + $0x2c0] sm:$0xff] }
 0x6a9   :  { %6104 = vmatprep.subr.mxu1 %v19595_v56  ;;  %5784 = vmatprep.mubr.f32.mxu0 %v24647_v28  ;;  %v20087_v56 = vand.u32 4294901760, %v6232_v2 }
 0x6aa   :  { %5923 = vmatpush1.msra.mxu0 %v24834_v13  ;;  %6106 = vmatpush1.msra.mxu1 %v19604_v48  ;;  %v6229_v48 = vld [vmem:[#allocation9 + $0x2d8] sm:$0xff]  ;;  %v24847_v13 = vld [vmem:[#allocation187_spill] sm:$0xff] }
 0x6ab   :  { %5787 = vmatmul.mubr.f32.gmra.mxu0 %v19965_v58  ;;  %5927 = vmatprep.subr.mxu0 %v24835_v6  ;;  %v20092_v58 = vand.u32 4294901760, %v6231_v63  ;;  %v20105_v16 = vand.u32 4294901760, %v6229_v48  ;;  %v20111_v60 = vsub.f32 %v6232_v2, %v20087_v56  ;;  %v24848_v2 = vand.u32 4294901760, %v24822_v53  ;;  %v6221_v53 = vld [vmem:[#allocation9 + $0x298] sm:$0xff] }
 0x6ac   :  { %6108 = vmatprep.subr.mxu1 %v19613_v21  ;;  %5931 = vmatpush1.msra.mxu0 %v24836_v50  ;;  %v6228_v21 = vld [vmem:[#allocation9 + $0x2d0] sm:$0xff]  ;;  %v24850_v50 = vand.u32 4294901760, %v24823_v52 }
 0x6ad   :  { %6110 = vmatpush1.msra.mxu1 %v19625_v10  ;;  %5935 = vmatprep.subr.mxu0 %v24837_v1  ;;  %v20098_v10 = vsub.f32 %v6233_v30, %v20079_v40  ;;  %v20113_v46 = vand.u32 4294901760, %v6228_v21  ;;  %v20128_v30 = vsub.f32 %v6230_v57, %v20100_v59  ;;  %v20136_v6 = vsub.f32 %v6229_v48, %v20105_v16 }
 0x6ae   :  { %6112 = vmatprep.subr.mxu1 %v19648_v3  ;;  %5939 = vmatpush1.msra.mxu0 %v24838_v35  ;;  %v24840_v3 = vand.u32 4294901760, %v24818_v23  ;;  %v20119_v23 = vsub.f32 %v6231_v63, %v20092_v58  ;;  %v20138_v63 = vand.u32 4294901760, %v6225_v37  ;;  %v24023_v57 = vand.u32 4294901760, %v20111_v60 }
 0x6af   :  { %6114 = vmatpush1.msra.mxu1 %v19662_v43  ;;  %5943 = vmatprep.subr.mxu0 %v24839_v41  ;;  %v24841_v43 = vand.u32 4294901760, %v24819_v54  ;;  %v24845_v54 = vand.u32 4294901760, %v24821_v47  ;;  %v24024_v17 = vand.u32 4294901760, %v20098_v10  ;;  %24846 = vst [vmem:[#allocation201_spill] sm:$0xff] %v20128_v30  ;;  %24849 = vst [vmem:[#allocation198_spill] sm:$0xff] %v20136_v6  ;;  %v6222_v47 = vld [vmem:[#allocation9 + $0x2a0] sm:$0xff]  ;;  %v20145_v1 = vsub.f32 %v6228_v21, %v20113_v46 }
 0x6b0   :  { %6116 = vmatprep.subr.mxu1 %v19685_v38  ;;  %5947 = vmatpush1.msra.mxu0 %v24840_v3  ;;  %v24842_v38 = vand.u32 4294901760, %v24820_v29  ;;  %24843 = vst [vmem:[#allocation200_spill] sm:$0xff] %v20119_v23  ;;  %v6223_v29 = vld [vmem:[#allocation9 + $0x2a8] sm:$0xff]  ;;  %v24852_v48 = vand.u32 4294901760, %v24824_v9  ;;  %v24019_v41 = vand.u32 4294901760, %v20119_v23  ;;  %v6220_v3 = vld [vmem:[#allocation9 + $0x290] sm:$0xff] }
 0x6b1   :  { %6118 = vmatpush1.msra.mxu1 %v19720_v25  ;;  %5951 = vmatprep.subr.mxu0 %v24841_v43  ;;  %v6224_v25 = vld [vmem:[#allocation9 + $0x2b0] sm:$0xff]  ;;  %24851 = vst [vmem:[#allocation202_spill] sm:$0xff] %v20145_v1  ;;  %v20156_v52 = vand.u32 4294901760, %v6223_v29  ;;  %v24854_v21 = vand.u32 4294901760, %v24825_v39  ;;  %v24017_v9 = vand.u32 4294901760, %v20128_v30  ;;  %v24018_v39 = vand.u32 4294901760, %v20136_v6 }
 0x6b2   :  { %6120 = vmatprep.subr.mxu1 %v19733_v22  ;;  %5955 = vmatpush1.msra.mxu0 %v24842_v38  ;;  %v20130_v22 = vand.u32 4294901760, %v6226_v24  ;;  %v20147_v35 = vand.u32 4294901760, %v6224_v25  ;;  %v6219_v38 = vld [vmem:[#allocation9 + $0x288] sm:$0xff] }
 0x6b3   :  { %6122 = vmatpush1.msra.mxu1 %v24844_v55  ;;  %5959 = vmatprep.subr.mxu0 %v24845_v54  ;;  %v20177_v55 = vsub.f32 %v6225_v37, %v20138_v63  ;;  %v20179_v54 = vand.u32 4294901760, %v6221_v53  ;;  %v6218_v37 = vld [vmem:[#allocation9 + $0x280] sm:$0xff] }
 0x6b4   :  { %6124 = vmatprep.subr.mxu1 %v24847_v13  ;;  %5963 = vmatpush1.msra.mxu0 %v24848_v2  ;;  %v20168_v43 = vsub.f32 %v6226_v24, %v20130_v22  ;;  %v24858_v24 = vand.u32 4294901760, %v24827_v4  ;;  %v6362_v13 = vsub.f32 %v20111_v60, %v24023_v57  ;;  %v20191_v2 = vand.u32 4294901760, %v6220_v3 }
 0x6b5   :  { %6126 = vmatpush1.msra.mxu1 %v19768_v33  ;;  %5967 = vmatprep.subr.mxu0 %v24850_v50  ;;  %v20154_v33 = vsub.f32 %v6227_v18, %v20121_v5  ;;  %v20170_v18 = vand.u32 4294901760, %v6222_v47  ;;  %24857 = vst [vmem:[#allocation176_spill] sm:$0xff] %v20177_v55  ;;  %v24860_v50 = vand.u32 4294901760, %v19788_v20  ;;  %v6368_v4 = vsub.f32 %v20119_v23, %v24019_v41 }
 0x6b6   :  { %6128 = vmatprep.subr.mxu1 %v19777_v62  ;;  %5971 = vmatpush1.msra.mxu0 %v24852_v48  ;;  %v20164_v62 = vsub.f32 %v20098_v10, %v24024_v17  ;;  %24855 = vst [vmem:[#allocation183_spill] sm:$0xff] %v20168_v43  ;;  %v20201_v48 = vsub.f32 %v6223_v29, %v20156_v52  ;;  %v24865_v29 = vand.u32 4294901760, %v19809_v26  ;;  %v6363_v26 = vand.u32 4294901760, %v6362_v13  ;;  %v6214_v17 = vld [vmem:[#allocation9 + $0x260] sm:$0xff] }
 0x6b7   :  { %24853 = vst [vmem:[#allocation175_spill] sm:$0xff] %v20154_v33  ;;  %6130 = vmatpush1.msra.mxu1 %v19790_v34  ;;  %5975 = vmatprep.subr.mxu0 %v24854_v21  ;;  %v24856_v34 = vand.u32 4294901760, %v24826_v27  ;;  %v20189_v27 = vsub.f32 %v6224_v25, %v20147_v35  ;;  %v20203_v21 = vand.u32 4294901760, %v6219_v38  ;;  %v24862_v25 = vld [vmem:[#allocation191_spill] sm:$0xff]  ;;  %v6374_v20 = vsub.f32 %v20128_v30, %v24017_v9  ;;  %v6217_v9 = vld [vmem:[#allocation9 + $0x278] sm:$0xff] }
 0x6b8   :  { %6132 = vmatprep.subr.mxu1 %v19803_v14  ;;  %v24020_v14 = vand.u32 4294901760, %v20145_v1  ;;  %24861 = vst [vmem:[#allocation178_spill] sm:$0xff] %v20201_v48  ;;  %v20240_v41 = vsub.f32 %v6220_v3, %v20191_v2  ;;  %6179 = vmatprep.mubr.f32.mxu1 %v24647_v28  ;;  %v24875_v3 = vand.u32 4294901760, %v19846_v49 }
 0x6b9   :  { %5979 = vmatpush1.msra.mxu0 %v24856_v34  ;;  %6134 = vmatpush1.msra.mxu1 %v19811_v32  ;;  %24859 = vst [vmem:[#allocation177_spill] sm:$0xff] %v20189_v27  ;;  %v24021_v32 = vand.u32 4294901760, %v20154_v33  ;;  %v24863_v34 = vand.u32 4294901760, %v24862_v25  ;;  %v20226_v25 = vsub.f32 %v6221_v53, %v20179_v54  ;;  %v24870_v53 = vand.u32 4294901760, %v19828_v51 }
 0x6ba   :  { %5983 = vmatprep.subr.mxu0 %v24858_v24  ;;  %6136 = vmatprep.subr.mxu1 %v19822_v42  ;;  %v6357_v42 = vand.u32 4294901760, %v20164_v62  ;;  %v24022_v24 = vand.u32 4294901760, %v20168_v43  ;;  %v24025_v62 = vand.u32 4294901760, %v20177_v55  ;;  %24869 = vst [vmem:[#allocation188_spill] sm:$0xff] %v20240_v41 }
 0x6bb   :  { %5987 = vmatpush1.msra.mxu0 %v24860_v50  ;;  %6138 = vmatpush1.msra.mxu1 %v19830_v44  ;;  %v20214_v50 = vsub.f32 %v6222_v47, %v20170_v18  ;;  %v20222_v44 = vsub.f32 %v20136_v6, %v24018_v39  ;;  %24866 = vst [vmem:[#allocation179_spill] sm:$0xff] %v20226_v25  ;;  %v24867_v47 = vld [vmem:[#allocation193_spill] sm:$0xff]  ;;  %v24026_v39 = vand.u32 4294901760, %v20189_v27 }
 0x6bc   :  { %5991 = vmatprep.subr.mxu0 %v24863_v34  ;;  %6140 = vmatprep.subr.mxu1 %v19838_v11  ;;  %v20228_v34 = vand.u32 4294901760, %v6218_v37  ;;  %v24868_v11 = vand.u32 4294901760, %v24867_v47  ;;  %v20248_v13 = vsub.f32 %v20154_v33, %v24021_v32  ;;  %v24027_v47 = vand.u32 4294901760, %v20201_v48 }
 0x6bd   :  { %24864 = vst [vmem:[#allocation186_spill] sm:$0xff] %v20214_v50  ;;  %5995 = vmatpush1.msra.mxu0 %v24865_v29  ;;  %6142 = vmatpush1.msra.mxu1 %v19848_v61  ;;  %v20236_v29 = vsub.f32 %v20145_v1, %v24020_v14  ;;  %v6369_v61 = vand.u32 4294901760, %v6368_v4  ;;  %v6216_v14 = vld [vmem:[#allocation9 + $0x270] sm:$0xff]  ;;  %v20259_v51 = vsub.f32 %v20168_v43, %v24022_v24  ;;  %v20262_v4 = vand.u32 4294901760, %v6217_v9  ;;  %v6213_v24 = vld [vmem:[#allocation9 + $0x258] sm:$0xff] }
 0x6be   :  { %5999 = vmatprep.subr.mxu0 %v24868_v11  ;;  %6144 = vmatprep.subr.mxu1 %v19858_v36  ;;  %v20252_v11 = vsub.f32 %v6219_v38, %v20203_v21  ;;  %v6375_v36 = vand.u32 4294901760, %v6374_v20  ;;  %v24872_v32 = vand.u32 4294901760, %v19836_v7  ;;  %v24873_v38 = vld [vmem:[#allocation196_spill] sm:$0xff]  ;;  %v20271_v20 = vsub.f32 %v20177_v55, %v24025_v62 }
 0x6bf   :  { %6003 = vmatpush1.msra.mxu0 %v24870_v53  ;;  %6146 = vmatpush1.msra.mxu1 %v19869_v45  ;;  %v6215_v53 = vld [vmem:[#allocation9 + $0x268] sm:$0xff]  ;;  %v6381_v45 = vand.u32 4294901760, %v20222_v44  ;;  %v20275_v57 = vsub.f32 %v6218_v37, %v20228_v34  ;;  %v6387_v7 = vand.u32 4294901760, %v20236_v29  ;;  %v20286_v62 = vand.u32 4294901760, %v6216_v14 }
 0x6c0   :  { %24871 = vst [vmem:[#allocation180_spill] sm:$0xff] %v20252_v11  ;;  %6007 = vmatprep.subr.mxu0 %v24872_v32  ;;  %6181 = vmatmul.mubr.f32.vlgmr.msra.gmra.mxu1 %v24873_v38  ;;  %v20283_v32 = vsub.f32 %v20189_v27, %v24026_v39  ;;  %v24876_v37 = vand.u32 4294901760, %v24829_v12  ;;  %v20294_v49 = vsub.f32 %v20201_v48, %v24027_v47  ;;  %v6212_v39 = vld [vmem:[#allocation9 + $0x250] sm:$0xff]  ;;  %v24877_v44 = vand.u32 4294901760, %v19867_v19  ;;  %v6211_v29 = vld [vmem:[#allocation9 + $0x248] sm:$0xff]  ;;  %v24884_v48 = vld [vmem:[#allocation174_spill] sm:$0xff] }
 0x6c1   :  { %24874 = vst [vmem:[#allocation181_spill] sm:$0xff] %v20275_v57  ;;  %6358 = vmatprep.subr.mxu1 %v6357_v42  ;;  %6011 = vmatpush1.msra.mxu0 %v24875_v3  ;;  %v6393_v42 = vand.u32 4294901760, %v20248_v13  ;;  %v20297_v3 = vand.u32 4294901760, %v6215_v53  ;;  %v24878_v12 = vand.u32 4294901760, %v20214_v50  ;;  %v20310_v47 = vand.u32 4294901760, %v6214_v17 }
 0x6c2   :  { %6364 = vmatpush1.msra.mxu1 %v6363_v26  ;;  %6015 = vmatprep.subr.mxu0 %v24876_v37  ;;  %v6399_v26 = vand.u32 4294901760, %v20259_v51  ;;  %v20308_v37 = vsub.f32 %v6217_v9, %v20262_v4  ;;  %v24881_v19 = vand.u32 4294901760, %v20226_v25  ;;  %v24883_v9 = vand.u32 4294901760, %v19877_v31 }
 0x6c3   :  { %6370 = vmatprep.subr.mxu1 %v6369_v61  ;;  %6019 = vmatpush1.msra.mxu0 %v24877_v44  ;;  %v20305_v13 = vsub.f32 %v20214_v50, %v24878_v12  ;;  %24880 = vst [vmem:[#allocation192_spill] sm:$0xff] %v20310_v47  ;;  %v6405_v61 = vand.u32 4294901760, %v20271_v20  ;;  %v20320_v12 = vand.u32 4294901760, %v6213_v24  ;;  %v6210_v50 = vld [vmem:[#allocation9 + $0x240] sm:$0xff]  ;;  %v6411_v27 = vand.u32 4294901760, %v20283_v32  ;;  %v6209_v44 = vld [vmem:[#allocation9 + $0x238] sm:$0xff] }
 0x6c4   :  { %24879 = vst [vmem:[#allocation182_spill] sm:$0xff] %v20308_v37  ;;  %6186 = vmatprep.mubr.f32.mxu1 %v24647_v28  ;;  %6376 = vmatpush1.msra.mxu1 %v6375_v36  ;;  %v20317_v51 = vsub.f32 %v20226_v25, %v24881_v19  ;;  %v24885_v36 = vand.u32 4294901760, %v20240_v41  ;;  %v20332_v19 = vsub.f32 %v6216_v14, %v20286_v62  ;;  %v20334_v25 = vand.u32 4294901760, %v6212_v39  ;;  %v6208_v14 = vld [vmem:[#allocation9 + $0x230] sm:$0xff] }
 0x6c5   :  { %24882 = vst [vmem:[#allocation184_spill] sm:$0xff] %v20320_v12  ;;  %6023 = vmatprep.subr.mxu0 %v24883_v9  ;;  %6188 = vmatmul.mubr.f32.gmra.mxu1 %v24884_v48  ;;  %v24887_v55 = vand.u32 4294901760, %v19885_v8  ;;  %v6417_v31 = vand.u32 4294901760, %v20294_v49  ;;  %v24888_v9 = vand.u32 4294901760, %v20252_v11  ;;  %v24890_v43 = vand.u32 4294901760, %v19893_v0 }
 0x6c6   :  { %v20329_v20 = vsub.f32 %v20240_v41, %v24885_v36  ;;  %24886 = vst [vmem:[#allocation195_spill] sm:$0xff] %v20332_v19  ;;  %6382 = vmatprep.subr.mxu1 %v6381_v45  ;;  %v20345_v36 = vsub.f32 %v6215_v53, %v20297_v3  ;;  %v20347_v41 = vand.u32 4294901760, %v6211_v29  ;;  %v6423_v8 = vand.u32 4294901760, %v20305_v13  ;;  %6068 = vmatprep.mubr.f32.mxu0 %v24647_v28 }
 0x6c7   :  { %6027 = vmatpush1.msra.mxu0 %v24887_v55  ;;  %v20342_v32 = vsub.f32 %v20252_v11, %v24888_v9  ;;  %6388 = vmatpush1.msra.mxu1 %v6387_v7  ;;  %v20354_v45 = vsub.f32 %v6214_v17, %v20310_v47  ;;  %v20356_v49 = vand.u32 4294901760, %v6210_v50  ;;  %v6207_v9 = vld [vmem:[#allocation9 + $0x228] sm:$0xff]  ;;  %v24891_v53 = vand.u32 4294901760, %v19901_v15  ;;  %v6206_v17 = vld [vmem:[#allocation9 + $0x220] sm:$0xff]  ;;  %v6204_v15 = vld [vmem:[#allocation9 + $0x210] sm:$0xff] }
 0x6c8   :  { %24889 = vst [vmem:[#allocation185_spill] sm:$0xff] %v20345_v36  ;;  %6031 = vmatprep.subr.mxu0 %v24890_v43  ;;  %6394 = vmatprep.subr.mxu1 %v6393_v42  ;;  %v6429_v11 = vand.u32 4294901760, %v20317_v51  ;;  %v24892_v7 = vand.u32 4294901760, %v20275_v57  ;;  %v20367_v43 = vsub.f32 %v6213_v24, %v20320_v12  ;;  %v20369_v13 = vand.u32 4294901760, %v6209_v44  ;;  %v6203_v55 = vld [vmem:[#allocation9 + $0x208] sm:$0xff] }
 0x6c9   :  { %6035 = vmatpush1.msra.mxu0 %v24891_v53  ;;  %6400 = vmatpush1.msra.mxu1 %v6399_v26  ;;  %v6435_v42 = vand.u32 4294901760, %v20329_v20  ;;  %v20375_v51 = vsub.f32 %v6212_v39, %v20334_v25  ;;  %v20377_v53 = vand.u32 4294901760, %v6208_v14  ;;  %v6441_v24 = vand.u32 4294901760, %v20342_v32 }
 0x6ca   :  { %v20364_v0 = vsub.f32 %v20275_v57, %v24892_v7  ;;  %24893 = vst [vmem:[#allocation189_spill] sm:$0xff] %v20367_v43  ;;  %v6205_v7 = vld [vmem:[#allocation9 + $0x218] sm:$0xff]  ;;  %6070 = vmatmul.mubr.f32.vlgmr.msra.gmra.mxu0 %v24873_v38  ;;  %6235 = vmatprep.subr.mxu0 %v20079_v40  ;;  %v20384_v26 = vsub.f32 %v6211_v29, %v20347_v41  ;;  %v20386_v20 = vand.u32 4294901760, %v6207_v9  ;;  %v24894_v39 = vand.u32 4294901760, %v20308_v37 }
 0x6cb   :  { %6406 = vmatprep.subr.mxu1 %v6405_v61  ;;  %6237 = vmatpush1.msra.mxu0 %v20087_v56  ;;  %v20394_v33 = vsub.f32 %v6210_v50, %v20356_v49  ;;  %v20396_v32 = vand.u32 4294901760, %v6206_v17  ;;  %v20402_v1 = vsub.f32 %v6209_v44, %v20369_v13  ;;  %v20404_v6 = vand.u32 4294901760, %v6205_v7 }
 0x6cc   :  { %v6452_v57 = vsub.f32 %v20308_v37, %v24894_v39  ;;  %6412 = vmatpush1.msra.mxu1 %v6411_v27  ;;  %6239 = vmatprep.subr.mxu0 %v20092_v58  ;;  %v6447_v29 = vand.u32 4294901760, %v20364_v0  ;;  %v6202_v39 = vld [vmem:[#allocation9 + $0x200] sm:$0xff]  ;;  %v24895_v50 = vand.u32 4294901760, %v20332_v19  ;;  %v20412_v37 = vsub.f32 %v6208_v14, %v20377_v53 }
 0x6cd   :  { %6418 = vmatprep.subr.mxu1 %v6417_v31  ;;  %6075 = vmatprep.mubr.f32.mxu0 %v24647_v28  ;;  %v20414_v0 = vand.u32 4294901760, %v6204_v15  ;;  %v24896_v44 = vand.u32 4294901760, %v20345_v36  ;;  %v20422_v30 = vsub.f32 %v6207_v9, %v20386_v20  ;;  %v24897_v14 = vand.u32 4294901760, %v20354_v45 }
 0x6ce   :  { %v6458_v38 = vsub.f32 %v20332_v19, %v24895_v50  ;;  %6241 = vmatpush1.msra.mxu0 %v20100_v59  ;;  %6424 = vmatpush1.msra.mxu1 %v6423_v8  ;;  %v20424_v50 = vand.u32 4294901760, %v6203_v55  ;;  %v20433_v19 = vsub.f32 %v6206_v17, %v20396_v32  ;;  %v6453_v9 = vand.u32 4294901760, %v6452_v57 }
 0x6cf   :  { %v6464_v31 = vsub.f32 %v20345_v36, %v24896_v44  ;;  %6077 = vmatmul.mubr.f32.gmra.mxu0 %v24884_v48  ;;  %6243 = vmatprep.subr.mxu0 %v20105_v16  ;;  %v6470_v27 = vsub.f32 %v20354_v45, %v24897_v14  ;;  %v20435_v44 = vand.u32 4294901760, %v6202_v39  ;;  %v24898_v61 = vand.u32 4294901760, %v20367_v43 }
 0x6d0   :  { %6430 = vmatprep.subr.mxu1 %v6429_v11  ;;  %6245 = vmatpush1.msra.mxu0 %v20113_v46  ;;  %v20443_v23 = vsub.f32 %v6205_v7, %v20404_v6  ;;  %v6459_v17 = vand.u32 4294901760, %v6458_v38  ;;  %v24899_v14 = vand.u32 4294901760, %v20375_v51  ;;  %v20451_v57 = vsub.f32 %v6204_v15, %v20414_v0 }
 0x6d1   :  { %v6476_v48 = vsub.f32 %v20367_v43, %v24898_v61  ;;  %6436 = vmatpush1.msra.mxu1 %v6435_v42  ;;  %6247 = vmatprep.subr.mxu0 %v20121_v5  ;;  %v6465_v61 = vand.u32 4294901760, %v6464_v31  ;;  %v24900_v7 = vand.u32 4294901760, %v20384_v26  ;;  %v20459_v38 = vsub.f32 %v6203_v55, %v20424_v50 }
 0x6d2   :  { %v6482_v11 = vsub.f32 %v20375_v51, %v24899_v14  ;;  %6442 = vmatprep.subr.mxu1 %v6441_v24  ;;  %6249 = vmatpush1.msra.mxu0 %v20130_v22  ;;  %v6471_v14 = vand.u32 4294901760, %v6470_v27  ;;  %v24902_v15 = vand.u32 4294901760, %v20394_v33  ;;  %v20467_v31 = vsub.f32 %v6202_v39, %v20435_v44 }
 0x6d3   :  { %v6488_v42 = vsub.f32 %v20384_v26, %v24900_v7  ;;  %24901 = vst [vmem:[#allocation190_spill] sm:$0xff] %v20459_v38  ;;  %6448 = vmatpush1.msra.mxu1 %v6447_v29  ;;  %6251 = vmatprep.subr.mxu0 %v20138_v63  ;;  %v6477_v7 = vand.u32 4294901760, %v6476_v48  ;;  %v24903_v55 = vand.u32 4294901760, %v20402_v1  ;;  %v24905_v48 = vand.u32 4294901760, %v20422_v30 }
 0x6d4   :  { %v6494_v24 = vsub.f32 %v20394_v33, %v24902_v15  ;;  %6454 = vmatprep.subr.mxu1 %v6453_v9  ;;  %6253 = vmatpush1.msra.mxu0 %v20147_v35  ;;  %v6483_v27 = vand.u32 4294901760, %v6482_v11  ;;  %v24904_v15 = vand.u32 4294901760, %v20412_v37  ;;  %v24906_v11 = vand.u32 4294901760, %v20433_v19 }
 0x6d5   :  { %v6500_v29 = vsub.f32 %v20402_v1, %v24903_v55  ;;  %6460 = vmatpush1.msra.mxu1 %v6459_v17  ;;  %6255 = vmatprep.subr.mxu0 %v20156_v52  ;;  %v6489_v9 = vand.u32 4294901760, %v6488_v42  ;;  %v6512_v55 = vsub.f32 %v20422_v30, %v24905_v48  ;;  %v24064_v39 = vand.u32 4294901760, %v20467_v31 }
 0x6d6   :  { %v6506_v8 = vsub.f32 %v20412_v37, %v24904_v15  ;;  %6466 = vmatprep.subr.mxu1 %v6465_v61  ;;  %6257 = vmatpush1.msra.mxu0 %v20170_v18  ;;  %v6495_v17 = vand.u32 4294901760, %v6494_v24  ;;  %v6518_v15 = vsub.f32 %v20433_v19, %v24906_v11  ;;  %v24907_v42 = vand.u32 4294901760, %v20443_v23 }
 0x6d7   :  { %6472 = vmatpush1.msra.mxu1 %v6471_v14  ;;  %6259 = vmatprep.subr.mxu0 %v20179_v54  ;;  %v6501_v61 = vand.u32 4294901760, %v6500_v29  ;;  %v24908_v24 = vand.u32 4294901760, %v20451_v57  ;;  %v6513_v11 = vand.u32 4294901760, %v6512_v55 }
 0x6d8   :  { %6478 = vmatprep.subr.mxu1 %v6477_v7  ;;  %6261 = vmatpush1.msra.mxu0 %v20191_v2  ;;  %v6524_v48 = vsub.f32 %v20443_v23, %v24907_v42  ;;  %v6507_v14 = vand.u32 4294901760, %v6506_v8  ;;  %v24909_v7 = vand.u32 4294901760, %v20459_v38  ;;  %v6519_v42 = vand.u32 4294901760, %v6518_v15  ;;  %v24912_v15 = vld [vmem:[#allocation199_spill] sm:$0xff] }
 0x6d9   :  { %6484 = vmatpush1.msra.mxu1 %v6483_v27  ;;  %6263 = vmatprep.subr.mxu0 %v20203_v21  ;;  %v6530_v36 = vsub.f32 %v20451_v57, %v24908_v24  ;;  %v6542_v8 = vsub.f32 %v20467_v31, %v24064_v39  ;;  %v24925_v39 = vld [vmem:[#allocation179_spill] sm:$0xff] }
 0x6da   :  { %6490 = vmatprep.subr.mxu1 %v6489_v9  ;;  %6265 = vmatpush1.msra.mxu0 %v20228_v34  ;;  %v6536_v29 = vsub.f32 %v20459_v38, %v24909_v7  ;;  %v6525_v27 = vand.u32 4294901760, %v6524_v48  ;;  %v24910_v9 = vld [vmem:[#allocation203_spill] sm:$0xff]  ;;  %v24913_v7 = vrot.slane %v24912_v15, 1  ;;  %v24918_v15 = vld [vmem:[#allocation202_spill] sm:$0xff] }
 0x6db   :  { %6496 = vmatpush1.msra.mxu1 %v6495_v17  ;;  %6267 = vmatprep.subr.mxu0 %v20262_v4  ;;  %v20507_v24 = vand.u32 4294901760, %v24910_v9  ;;  %v6531_v55 = vand.u32 4294901760, %v6530_v36 }
 0x6dc   :  { %6502 = vmatprep.subr.mxu1 %v6501_v61  ;;  %6269 = vmatpush1.msra.mxu0 %v20286_v62  ;;  %v6537_v17 = vand.u32 4294901760, %v6536_v29  ;;  %v6200_v38 = vsel %vm6194_vm3, %v24913_v7, 0.0  ;;  %v6543_v61 = vand.u32 4294901760, %v6542_v8  ;;  %v24919_v7 = vld [vmem:[#allocation175_spill] sm:$0xff] }
 0x6dd   :  { %24911 = vst [vmem:[#allocation194_spill] sm:$0xff] %v20507_v24  ;;  %6508 = vmatpush1.msra.mxu1 %v6507_v14  ;;  %6271 = vmatprep.subr.mxu0 %v20297_v3  ;;  %v20518_v48 = vsub.f32 %v24910_v9, %v20507_v24  ;;  %v20521_v36 = vand.u32 4294901760, %v6200_v38 }
 0x6de   :  { %6514 = vmatprep.subr.mxu1 %v6513_v11  ;;  %6273 = vmatpush1.msra.mxu0 %v20310_v47 }
 0x6df   :  { %6520 = vmatpush1.msra.mxu1 %v6519_v42  ;;  %6275 = vmatprep.subr.mxu0 %v20320_v12  ;;  %24914 = vst [vmem:[#allocation173_spill] sm:$0xff] %v20521_v36  ;;  %v24066_v14 = vand.u32 4294901760, %v20518_v48  ;;  %v20531_v11 = vsub.f32 %v6200_v38, %v20521_v36 }
 0x6e0   :  { %6526 = vmatprep.subr.mxu1 %v6525_v27  ;;  %6277 = vmatpush1.msra.mxu0 %v20334_v25  ;;  %v24915_v27 = vld [vmem:[#allocation200_spill] sm:$0xff] }
 0x6e1   :  { %6532 = vmatpush1.msra.mxu1 %v6531_v55  ;;  %6279 = vmatprep.subr.mxu0 %v20347_v41  ;;  %v6334_v29 = vsub.f32 %v20518_v48, %v24066_v14  ;;  %v24065_v38 = vand.u32 4294901760, %v20531_v11  ;;  %v24916_v55 = vld [vmem:[#allocation201_spill] sm:$0xff]  ;;  %v24927_v14 = vld [vmem:[#allocation180_spill] sm:$0xff] }
 0x6e2   :  { %6538 = vmatprep.subr.mxu1 %v6537_v17  ;;  %6281 = vmatpush1.msra.mxu0 %v20356_v49  ;;  %v24917_v17 = vld [vmem:[#allocation198_spill] sm:$0xff] }
 0x6e3   :  { %6544 = vmatpush1.msra.mxu1 %v6543_v61  ;;  %6577 = vmatprep.mubr.f32.mxu1 %v24647_v28  ;;  %v6335_v42 = vand.u32 4294901760, %v6334_v29  ;;  %v6345_v8 = vsub.f32 %v20531_v11, %v24065_v38  ;;  %v24920_v61 = vld [vmem:[#allocation183_spill] sm:$0xff]  ;;  %v24921_v29 = vld [vmem:[#allocation176_spill] sm:$0xff] }
 0x6e4   :  { %6283 = vmatprep.subr.mxu0 %v20369_v13  ;;  %6579 = vmatmul.mubr.f32.vlgmr.msra.gmra.mxu1 %v20507_v24  ;;  %v24926_v38 = vld [vmem:[#allocation188_spill] sm:$0xff]  ;;  %v24929_v24 = vld [vmem:[#allocation182_spill] sm:$0xff] }
 0x6e5   :  { %6738 = vmatprep.subr.mxu1 %v20079_v40  ;;  %6285 = vmatpush1.msra.mxu0 %v20377_v53  ;;  %v6346_v9 = vand.u32 4294901760, %v6345_v8  ;;  %v24923_v8 = vld [vmem:[#allocation178_spill] sm:$0xff] }
 0x6e6   :  { %6740 = vmatpush1.msra.mxu1 %v20087_v56  ;;  %6287 = vmatprep.subr.mxu0 %v20386_v20 }
 0x6e7   :  { %6742 = vmatprep.subr.mxu1 %v20092_v58  ;;  %6289 = vmatpush1.msra.mxu0 %v20396_v32 }
 0x6e8   :  { %6584 = vmatprep.mubr.f32.mxu1 %v24647_v28  ;;  %6744 = vmatpush1.msra.mxu1 %v20100_v59 }
 0x6e9   :  { %6291 = vmatprep.subr.mxu0 %v20404_v6  ;;  %6586 = vmatmul.mubr.f32.gmra.mxu1 %v20521_v36  ;;  %v24928_v36 = vld [vmem:[#allocation181_spill] sm:$0xff] }
 0x6ea   :  { %6746 = vmatprep.subr.mxu1 %v20105_v16  ;;  %6293 = vmatpush1.msra.mxu0 %v20414_v0 }
 0x6eb   :  { %6748 = vmatpush1.msra.mxu1 %v20113_v46  ;;  %6295 = vmatprep.subr.mxu0 %v20424_v50 }
 0x6ec   :  { %6750 = vmatprep.subr.mxu1 %v20121_v5  ;;  %6297 = vmatpush1.msra.mxu0 %v20435_v44 }
 0x6ed   :  { %6330 = vmatprep.mubr.f32.mxu0 %v24647_v28  ;;  %6752 = vmatpush1.msra.mxu1 %v20130_v22 }
 0x6ee   :  { %6336 = vmatmul.mubr.f32.vlgmr.msra.gmra.mxu0 %v6335_v42  ;;  %6594 = vmatprep.subr.mxu0 %v20098_v10  ;;  %v24922_v42 = vld [vmem:[#allocation177_spill] sm:$0xff] }
 0x6ef   :  { %6754 = vmatprep.subr.mxu1 %v20138_v63  ;;  %6597 = vmatpush1.msra.mxu0 %v20111_v60 }
 0x6f0   :  { %6756 = vmatpush1.msra.mxu1 %v20147_v35  ;;  %6600 = vmatprep.subr.mxu0 %v24915_v27 }
 0x6f1   :  { %6758 = vmatprep.subr.mxu1 %v20156_v52  ;;  %6341 = vmatprep.mubr.f32.mxu0 %v24647_v28 }
 0x6f2   :  { %6603 = vmatpush1.msra.mxu0 %v24916_v55  ;;  %6760 = vmatpush1.msra.mxu1 %v20170_v18 }
 0x6f3   :  { %6347 = vmatmul.mubr.f32.gmra.mxu0 %v6346_v9  ;;  %6606 = vmatprep.subr.mxu0 %v24917_v17  ;;  %v24924_v9 = vld [vmem:[#allocation186_spill] sm:$0xff] }
 0x6f4   :  { %6762 = vmatprep.subr.mxu1 %v20179_v54  ;;  %6609 = vmatpush1.msra.mxu0 %v24918_v15 }
 0x6f5   :  { %6764 = vmatpush1.msra.mxu1 %v20191_v2  ;;  %6612 = vmatprep.subr.mxu0 %v24919_v7 }
 0x6f6   :  { %6766 = vmatprep.subr.mxu1 %v20203_v21  ;;  %6615 = vmatpush1.msra.mxu0 %v24920_v61 }
 0x6f7   :  { %6768 = vmatpush1.msra.mxu1 %v20228_v34  ;;  %6618 = vmatprep.subr.mxu0 %v24921_v29 }
 0x6f8   :  { %6770 = vmatprep.subr.mxu1 %v20262_v4  ;;  %6621 = vmatpush1.msra.mxu0 %v24922_v42 }
 0x6f9   :  { %6772 = vmatpush1.msra.mxu1 %v20286_v62  ;;  %6624 = vmatprep.subr.mxu0 %v24923_v8 }
 0x6fa   :  { %6774 = vmatprep.subr.mxu1 %v20297_v3  ;;  %6627 = vmatpush1.msra.mxu0 %v24924_v9 }
 0x6fb   :  { %6776 = vmatpush1.msra.mxu1 %v20310_v47  ;;  %6630 = vmatprep.subr.mxu0 %v24925_v39  ;;  %v24930_v47 = vld [vmem:[#allocation195_spill] sm:$0xff] }
 0x6fc   :  { %6778 = vmatprep.subr.mxu1 %v20320_v12  ;;  %6633 = vmatpush1.msra.mxu0 %v24926_v38  ;;  %v24931_v12 = vld [vmem:[#allocation185_spill] sm:$0xff] }
 0x6fd   :  { %6780 = vmatpush1.msra.mxu1 %v20334_v25  ;;  %6636 = vmatprep.subr.mxu0 %v24927_v14 }
 0x6fe   :  { %6782 = vmatprep.subr.mxu1 %v20347_v41  ;;  %6639 = vmatpush1.msra.mxu0 %v24928_v36 }
 0x6ff   :  { %6784 = vmatpush1.msra.mxu1 %v20356_v49  ;;  %6642 = vmatprep.subr.mxu0 %v24929_v24 }
 0x700   :  { %6786 = vmatprep.subr.mxu1 %v20369_v13  ;;  %6645 = vmatpush1.msra.mxu0 %v24930_v47 }
 0x701   :  { %6788 = vmatpush1.msra.mxu1 %v20377_v53  ;;  %6648 = vmatprep.subr.mxu0 %v24931_v12 }
 0x702   :  { %6790 = vmatprep.subr.mxu1 %v20386_v20  ;;  %6651 = vmatpush1.msra.mxu0 %v20354_v45 }
 0x703   :  { %6792 = vmatpush1.msra.mxu1 %v20396_v32  ;;  %6654 = vmatprep.subr.mxu0 %v20367_v43  ;;  %v24932_v43 = vand.u32 4294901760, %v20518_v48 }
 0x704   :  { %6794 = vmatprep.subr.mxu1 %v20404_v6  ;;  %6657 = vmatpush1.msra.mxu0 %v20375_v51 }
 0x705   :  { %6796 = vmatpush1.msra.mxu1 %v20414_v0  ;;  %6660 = vmatprep.subr.mxu0 %v20384_v26 }
 0x706   :  { %6798 = vmatprep.subr.mxu1 %v20424_v50  ;;  %6663 = vmatpush1.msra.mxu0 %v20394_v33 }
 0x707   :  { %6800 = vmatpush1.msra.mxu1 %v20435_v44  ;;  %6833 = vmatprep.mubr.f32.mxu1 %v24647_v28 }
 0x708   :  { %6666 = vmatprep.subr.mxu0 %v20402_v1  ;;  %6837 = vmatmul.mubr.f32.vlgmr.msra.gmra.mxu1 %v24932_v43  ;;  %v24933_v43 = vand.u32 4294901760, %v20531_v11 }
 0x709   :  { %7028 = vmatprep.subr.mxu1 %v20079_v40  ;;  %6669 = vmatpush1.msra.mxu0 %v20412_v37  ;;  %v24934_v40 = vld [vmem:[#allocation190_spill] sm:$0xff] }
 0x70a   :  { %7030 = vmatpush1.msra.mxu1 %v20087_v56  ;;  %6672 = vmatprep.subr.mxu0 %v20422_v30  ;;  %v24935_v56 = vand.u32 4294901760, %v20098_v10  ;;  %v24939_v10 = vand.u32 4294901760, %v24917_v17 }
 0x70b   :  { %7032 = vmatprep.subr.mxu1 %v20092_v58  ;;  %6675 = vmatpush1.msra.mxu0 %v20433_v19  ;;  %v24936_v58 = vand.u32 4294901760, %v20111_v60  ;;  %v24940_v60 = vand.u32 4294901760, %v24918_v15 }
 0x70c   :  { %6842 = vmatprep.mubr.f32.mxu1 %v24647_v28  ;;  %7034 = vmatpush1.msra.mxu1 %v20100_v59  ;;  %v24937_v59 = vand.u32 4294901760, %v24915_v27 }
 0x70d   :  { %6678 = vmatprep.subr.mxu0 %v20443_v23  ;;  %6846 = vmatmul.mubr.f32.gmra.mxu1 %v24933_v43 }
 0x70e   :  { %7036 = vmatprep.subr.mxu1 %v20105_v16  ;;  %6681 = vmatpush1.msra.mxu0 %v20451_v57  ;;  %v24938_v16 = vand.u32 4294901760, %v24916_v55 }
 0x70f   :  { %7038 = vmatpush1.msra.mxu1 %v20113_v46  ;;  %6684 = vmatprep.subr.mxu0 %v24934_v40  ;;  %v24941_v46 = vand.u32 4294901760, %v24919_v7 }
 0x710   :  { %7040 = vmatprep.subr.mxu1 %v20121_v5  ;;  %6687 = vmatpush1.msra.mxu0 %v20467_v31  ;;  %v24942_v5 = vand.u32 4294901760, %v24920_v61 }
 0x711   :  { %6720 = vmatprep.mubr.f32.mxu0 %v24647_v28  ;;  %7042 = vmatpush1.msra.mxu1 %v20130_v22  ;;  %v24943_v22 = vand.u32 4294901760, %v24921_v29 }
 0x712   :  { %6723 = vmatmul.mubr.f32.vlgmr.msra.gmra.mxu0 %v20518_v48  ;;  %6855 = vmatprep.subr.mxu0 %v24935_v56 }
 0x713   :  { %7044 = vmatprep.subr.mxu1 %v20138_v63  ;;  %6859 = vmatpush1.msra.mxu0 %v24936_v58  ;;  %v24944_v63 = vand.u32 4294901760, %v24922_v42 }
 0x714   :  { %7046 = vmatpush1.msra.mxu1 %v20147_v35  ;;  %6863 = vmatprep.subr.mxu0 %v24937_v59  ;;  %v24945_v35 = vand.u32 4294901760, %v24923_v8 }
 0x715   :  { %7048 = vmatprep.subr.mxu1 %v20156_v52  ;;  %6728 = vmatprep.mubr.f32.mxu0 %v24647_v28  ;;  %v24946_v52 = vand.u32 4294901760, %v24924_v9 }
 0x716   :  { %6867 = vmatpush1.msra.mxu0 %v24938_v16  ;;  %7050 = vmatpush1.msra.mxu1 %v20170_v18  ;;  %v24947_v18 = vld [vmem:[#allocation192_spill] sm:$0xff] }
 0x717   :  { %6731 = vmatmul.mubr.f32.gmra.mxu0 %v20531_v11  ;;  %6871 = vmatprep.subr.mxu0 %v24939_v10  ;;  %v7223_v11 = vld [vmem:[#allocation12 + $0x160] sm:$0xff] }
 0x718   :  { %7052 = vmatprep.subr.mxu1 %v20179_v54  ;;  %6875 = vmatpush1.msra.mxu0 %v24940_v60  ;;  %v24948_v54 = vand.u32 4294901760, %v24925_v39  ;;  %v20748_v17 = vand.u32 4294901760, %v7223_v11 }
 0x719   :  { %7054 = vmatpush1.msra.mxu1 %v20191_v2  ;;  %6879 = vmatprep.subr.mxu0 %v24941_v46  ;;  %v24949_v2 = vld [vmem:[#allocation184_spill] sm:$0xff] }
 0x71a   :  { %7056 = vmatprep.subr.mxu1 %v20203_v21  ;;  %6883 = vmatpush1.msra.mxu0 %v24942_v5  ;;  %v24950_v21 = vand.u32 4294901760, %v24926_v38  ;;  %24981 = vst [vmem:[#allocation198_spill] sm:$0xff] %v20748_v17  ;;  %v20770_v43 = vsub.f32 %v7223_v11, %v20748_v17  ;;  %v7238_v5 = vld [vmem:[#allocation12 + $0x1d8] sm:$0xff] }
 0x71b   :  { %7058 = vmatpush1.msra.mxu1 %v20228_v34  ;;  %6887 = vmatprep.subr.mxu0 %v24943_v22  ;;  %v24952_v34 = vand.u32 4294901760, %v24928_v36 }
 0x71c   :  { %7060 = vmatprep.subr.mxu1 %v20262_v4  ;;  %6891 = vmatpush1.msra.mxu0 %v24944_v63  ;;  %v24953_v4 = vand.u32 4294901760, %v24929_v24  ;;  %24987 = vst [vmem:[#allocation178_spill] sm:$0xff] %v20770_v43  ;;  %v24082_v46 = vand.u32 4294901760, %v20770_v43 }
 0x71d   :  { %7062 = vmatpush1.msra.mxu1 %v20286_v62  ;;  %6895 = vmatprep.subr.mxu0 %v24945_v35  ;;  %v24951_v62 = vand.u32 4294901760, %v24927_v14  ;;  %v7239_v14 = vld [vmem:[#allocation12 + $0x1e0] sm:$0xff] }
 0x71e   :  { %7064 = vmatprep.subr.mxu1 %v20297_v3  ;;  %6899 = vmatpush1.msra.mxu0 %v24946_v52  ;;  %v24954_v3 = vand.u32 4294901760, %v24930_v47  ;;  %v24959_v47 = vand.u32 4294901760, %v20375_v51  ;;  %v24964_v51 = vand.u32 4294901760, %v20412_v37  ;;  %v24970_v37 = vand.u32 4294901760, %v24934_v40 }
 0x71f   :  { %7066 = vmatpush1.msra.mxu1 %v24947_v18  ;;  %6903 = vmatprep.subr.mxu0 %v24948_v54  ;;  %v20746_v55 = vand.u32 4294901760, %v7239_v14  ;;  %v7222_v18 = vld [vmem:[#allocation12 + $0x158] sm:$0xff] }
 0x720   :  { %7068 = vmatprep.subr.mxu1 %v24949_v2  ;;  %6907 = vmatpush1.msra.mxu0 %v24950_v21 }
 0x721   :  { %7070 = vmatpush1.msra.mxu1 %v20334_v25  ;;  %6911 = vmatprep.subr.mxu0 %v24951_v62  ;;  %v24955_v25 = vand.u32 4294901760, %v24931_v12  ;;  %v24960_v12 = vand.u32 4294901760, %v20384_v26  ;;  %v24967_v26 = vand.u32 4294901760, %v20443_v23  ;;  %24980 = vst [vmem:[#allocation201_spill] sm:$0xff] %v20746_v55  ;;  %v20767_v9 = vsub.f32 %v7239_v14, %v20746_v55 }
 0x722   :  { %7072 = vmatprep.subr.mxu1 %v20347_v41  ;;  %6915 = vmatpush1.msra.mxu0 %v24952_v34  ;;  %v24956_v41 = vand.u32 4294901760, %v20354_v45  ;;  %v24961_v45 = vand.u32 4294901760, %v20394_v33  ;;  %v24966_v33 = vand.u32 4294901760, %v20433_v19  ;;  %v7226_v19 = vld [vmem:[#allocation12 + $0x178] sm:$0xff]  ;;  %v7395_v62 = vsub.f32 %v20770_v43, %v24082_v46  ;;  %v7237_v34 = vld [vmem:[#allocation12 + $0x1d0] sm:$0xff] }
 0x723   :  { %7074 = vmatpush1.msra.mxu1 %v20356_v49  ;;  %6919 = vmatprep.subr.mxu0 %v24953_v4  ;;  %v24957_v49 = vld [vmem:[#allocation189_spill] sm:$0xff]  ;;  %24986 = vst [vmem:[#allocation177_spill] sm:$0xff] %v20767_v9  ;;  %v24083_v60 = vand.u32 4294901760, %v20767_v9 }
 0x724   :  { %7076 = vmatprep.subr.mxu1 %v20369_v13  ;;  %6923 = vmatpush1.msra.mxu0 %v24954_v3  ;;  %v24958_v39 = vand.u32 4294901760, %v24957_v49  ;;  %v24962_v13 = vand.u32 4294901760, %v20402_v1  ;;  %v24968_v1 = vld [vmem:[#allocation173_spill] sm:$0xff] }
 0x725   :  { %7078 = vmatpush1.msra.mxu1 %v20377_v53  ;;  %6927 = vmatprep.subr.mxu0 %v24955_v25  ;;  %v24965_v53 = vand.u32 4294901760, %v20422_v30  ;;  %v7242_v30 = vld [vmem:[#allocation12 + $0x1f8] sm:$0xff]  ;;  %v7507_v21 = vsub.f32 %v20767_v9, %v24083_v60  ;;  %v7221_v49 = vld [vmem:[#allocation12 + $0x150] sm:$0xff] }
 0x726   :  { %7080 = vmatprep.subr.mxu1 %v20386_v20  ;;  %6931 = vmatpush1.msra.mxu0 %v24956_v41  ;;  %v24969_v20 = vand.u32 4294901760, %v20451_v57  ;;  %v20727_v23 = vand.u32 4294901760, %v7242_v30  ;;  %v7240_v57 = vld [vmem:[#allocation12 + $0x1e8] sm:$0xff]  ;;  %v20807_v41 = vand.u32 4294901760, %v7238_v5 }
 0x727   :  { %7082 = vmatpush1.msra.mxu1 %v20396_v32  ;;  %6935 = vmatprep.subr.mxu0 %v24958_v39  ;;  %v24971_v32 = vand.u32 4294901760, %v20467_v31  ;;  %v20738_v36 = vand.u32 4294901760, %v7240_v57 }
 0x728   :  { %7084 = vmatprep.subr.mxu1 %v20404_v6  ;;  %6939 = vmatpush1.msra.mxu0 %v24959_v47  ;;  %v24963_v6 = vld [vmem:[#allocation194_spill] sm:$0xff]  ;;  %24972 = vst [vmem:[#allocation187_spill] sm:$0xff] %v20727_v23  ;;  %v20732_v24 = vsub.f32 %v7242_v30, %v20727_v23  ;;  %24988 = vst [vmem:[#allocation186_spill] sm:$0xff] %v20807_v41  ;;  %v7508_v47 = vand.u32 4294901760, %v7507_v21 }
 0x729   :  { %7086 = vmatpush1.msra.mxu1 %v20414_v0  ;;  %6943 = vmatprep.subr.mxu0 %v24960_v12  ;;  %v20729_v0 = vand.u32 4294901760, %v7226_v19  ;;  %24977 = vst [vmem:[#allocation203_spill] sm:$0xff] %v20738_v36  ;;  %v20759_v29 = vsub.f32 %v7240_v57, %v20738_v36  ;;  %v20809_v12 = vand.u32 4294901760, %v7222_v18 }
 0x72a   :  { %7088 = vmatprep.subr.mxu1 %v20424_v50  ;;  %6947 = vmatpush1.msra.mxu0 %v24961_v45  ;;  %v7241_v50 = vld [vmem:[#allocation12 + $0x1f0] sm:$0xff]  ;;  %24974 = vst [vmem:[#allocation193_spill] sm:$0xff] %v20732_v24  ;;  %v24093_v15 = vand.u32 4294901760, %v20732_v24  ;;  %v7236_v45 = vld [vmem:[#allocation12 + $0x1c8] sm:$0xff] }
 0x72b   :  { %7090 = vmatpush1.msra.mxu1 %v20435_v44  ;;  %7123 = vmatprep.mubr.f32.mxu1 %v24647_v28  ;;  %24973 = vst [vmem:[#allocation191_spill] sm:$0xff] %v20729_v0  ;;  %v7225_v44 = vld [vmem:[#allocation12 + $0x170] sm:$0xff]  ;;  %v20734_v31 = vand.u32 4294901760, %v7241_v50  ;;  %v20742_v38 = vsub.f32 %v7226_v19, %v20729_v0  ;;  %24984 = vst [vmem:[#allocation183_spill] sm:$0xff] %v20759_v29  ;;  %v24087_v59 = vand.u32 4294901760, %v20759_v29 }
 0x72c   :  { %6951 = vmatprep.subr.mxu0 %v24962_v13  ;;  %7125 = vmatmul.mubr.f32.vlgmr.msra.gmra.mxu1 %v24963_v6  ;;  %v20736_v48 = vand.u32 4294901760, %v7225_v44  ;;  %v7486_v40 = vsub.f32 %v20732_v24, %v24093_v15  ;;  %24989 = vst [vmem:[#allocation179_spill] sm:$0xff] %v20809_v12  ;;  %v20812_v13 = vsub.f32 %v7238_v5, %v20807_v41 }
 0x72d   :  { %6955 = vmatpush1.msra.mxu0 %v24964_v51  ;;  %7130 = vmatprep.mubr.f32.mxu1 %v24647_v28  ;;  %24975 = vst [vmem:[#allocation196_spill] sm:$0xff] %v20734_v31  ;;  %24978 = vst [vmem:[#allocation199_spill] sm:$0xff] %v20742_v38  ;;  %v20753_v7 = vsub.f32 %v7241_v50, %v20734_v31  ;;  %v24092_v42 = vand.u32 4294901760, %v20742_v38  ;;  %v7500_v52 = vsub.f32 %v20759_v29, %v24087_v59 }
 0x72e   :  { %6959 = vmatprep.subr.mxu0 %v24965_v53  ;;  %7012 = vmatprep.mubr.f32.mxu0 %v24647_v28  ;;  %24976 = vst [vmem:[#allocation174_spill] sm:$0xff] %v20736_v48  ;;  %v20756_v61 = vsub.f32 %v7225_v44, %v20736_v48  ;;  %v7487_v22 = vand.u32 4294901760, %v7486_v40  ;;  %24990 = vst [vmem:[#allocation188_spill] sm:$0xff] %v20812_v13  ;;  %v20816_v51 = vand.u32 4294901760, %v7221_v49  ;;  %v20818_v53 = vand.u32 4294901760, %v7236_v45 }
 0x72f   :  { %6963 = vmatpush1.msra.mxu0 %v24966_v33  ;;  %24982 = vst [vmem:[#allocation202_spill] sm:$0xff] %v20753_v7  ;;  %v24090_v56 = vand.u32 4294901760, %v20753_v7  ;;  %v7374_v16 = vsub.f32 %v20742_v38, %v24092_v42  ;;  %v7501_v25 = vand.u32 4294901760, %v7500_v52  ;;  %v7220_v33 = vld [vmem:[#allocation12 + $0x148] sm:$0xff] }
 0x730   :  { %6967 = vmatprep.subr.mxu0 %v24967_v26  ;;  %7132 = vmatmul.mubr.f32.gmra.mxu1 %v24968_v1  ;;  %24983 = vst [vmem:[#allocation175_spill] sm:$0xff] %v20756_v61  ;;  %v24088_v58 = vand.u32 4294901760, %v20756_v61  ;;  %24992 = vst [vmem:[#allocation181_spill] sm:$0xff] %v20816_v51  ;;  %v7396_v26 = vand.u32 4294901760, %v7395_v62  ;;  %v20832_v19 = vsub.f32 %v7221_v49, %v20816_v51  ;;  %v7234_v62 = vld [vmem:[#allocation12 + $0x1b8] sm:$0xff] }
 0x731   :  { %6971 = vmatpush1.msra.mxu0 %v24969_v20  ;;  %v7493_v63 = vsub.f32 %v20753_v7, %v24090_v56  ;;  %v7375_v54 = vand.u32 4294901760, %v7374_v16  ;;  %14315 = vmatprep.subr.mxu1 %v7487_v22  ;;  %24993 = vst [vmem:[#allocation182_spill] sm:$0xff] %v20818_v53  ;;  %v20824_v20 = vand.u32 4294901760, %v7220_v33  ;;  %v20837_v44 = vsub.f32 %v7236_v45, %v20818_v53  ;;  %v7218_v49 = vld [vmem:[#allocation12 + $0x138] sm:$0xff]  ;;  %v7229_v56 = vld [vmem:[#allocation12 + $0x190] sm:$0xff] }
 0x732   :  { %6975 = vmatprep.subr.mxu0 %v24970_v37  ;;  %v7381_v35 = vsub.f32 %v20756_v61, %v24088_v58  ;;  %v7235_v37 = vld [vmem:[#allocation12 + $0x1c0] sm:$0xff]  ;;  %24997 = vst [vmem:[#allocation192_spill] sm:$0xff] %v20832_v19  ;;  %v24077_v16 = vand.u32 4294901760, %v20832_v19  ;;  %v7230_v58 = vld [vmem:[#allocation12 + $0x198] sm:$0xff] }
 0x733   :  { %6979 = vmatpush1.msra.mxu0 %v24971_v32  ;;  %v7494_v4 = vand.u32 4294901760, %v7493_v63  ;;  %14316 = vmatpush3.msra.mxu1 %v7375_v54  ;;  %24995 = vst [vmem:[#allocation185_spill] sm:$0xff] %v20824_v20  ;;  %v24081_v32 = vand.u32 4294901760, %v20812_v13  ;;  %24998 = vst [vmem:[#allocation184_spill] sm:$0xff] %v20837_v44  ;;  %v20840_v57 = vsub.f32 %v7220_v33, %v20824_v20  ;;  %v24076_v5 = vand.u32 4294901760, %v20837_v44  ;;  %v7219_v63 = vld [vmem:[#allocation12 + $0x140] sm:$0xff] }
 0x734   :  { %7014 = vmatmul.mubr.f32.vlgmr.msra.gmra.mxu0 %v24963_v6  ;;  %14277 = vmatprep.subr.mxu0 %v20727_v23  ;;  %v7382_v3 = vand.u32 4294901760, %v7381_v35  ;;  %v20814_v6 = vand.u32 4294901760, %v7237_v34 }
 0x735   :  { %7019 = vmatprep.mubr.f32.mxu0 %v24647_v28  ;;  %v7224_v28 = vld [vmem:[#allocation12 + $0x168] sm:$0xff]  ;;  %14278 = vmatpush3.msra.mxu0 %v20729_v0  ;;  %24999 = vst [vmem:[#allocation189_spill] sm:$0xff] %v20840_v57  ;;  %v7514_v14 = vsub.f32 %v20812_v13, %v24081_v32  ;;  %v24074_v22 = vand.u32 4294901760, %v20840_v57  ;;  %v7528_v21 = vsub.f32 %v20837_v44, %v24076_v5 }
 0x736   :  { %v20744_v27 = vand.u32 4294901760, %v7224_v28  ;;  %14279 = vmatprep.subr.mxu0 %v20734_v31  ;;  %14317 = vmatprep.subr.mxu1 %v7494_v4  ;;  %24991 = vst [vmem:[#allocation180_spill] sm:$0xff] %v20814_v6  ;;  %v20829_v30 = vsub.f32 %v7237_v34, %v20814_v6 }
 0x737   :  { %14280 = vmatpush3.msra.mxu0 %v20736_v48  ;;  %14318 = vmatpush3.msra.mxu1 %v7382_v3  ;;  %v7515_v35 = vand.u32 4294901760, %v7514_v14  ;;  %v7416_v4 = vsub.f32 %v20840_v57, %v24074_v22  ;;  %v7529_v33 = vand.u32 4294901760, %v7528_v21  ;;  %v20885_v22 = vand.u32 4294901760, %v7218_v49  ;;  %v7231_v21 = vld [vmem:[#allocation12 + $0x1a0] sm:$0xff] }
 0x738   :  { %7021 = vmatmul.mubr.f32.gmra.mxu0 %v24968_v1  ;;  %24979 = vst [vmem:[#allocation200_spill] sm:$0xff] %v20744_v27  ;;  %v20764_v8 = vsub.f32 %v7224_v28, %v20744_v27  ;;  %14281 = vmatprep.subr.mxu0 %v20738_v36  ;;  %v20822_v1 = vsub.f32 %v7222_v18, %v20809_v12  ;;  %24996 = vst [vmem:[#allocation190_spill] sm:$0xff] %v20829_v30  ;;  %v20842_v28 = vand.u32 4294901760, %v7235_v37 }
 0x739   :  { %14282 = vmatpush3.msra.mxu0 %v20744_v27  ;;  %14319 = vmatprep.subr.mxu1 %v7501_v25  ;;  %v24078_v11 = vand.u32 4294901760, %v20829_v30  ;;  %v20874_v25 = vand.u32 4294901760, %v7219_v63  ;;  %25005 = vst [vmem:[#allocation207_spill] sm:$0xff] %v20885_v22 }
 0x73a   :  { %24985 = vst [vmem:[#allocation176_spill] sm:$0xff] %v20764_v8  ;;  %v24085_v10 = vand.u32 4294901760, %v20764_v8  ;;  %14283 = vmatprep.subr.mxu0 %v20746_v55  ;;  %24994 = vst [vmem:[#allocation195_spill] sm:$0xff] %v20822_v1  ;;  %v24079_v50 = vand.u32 4294901760, %v20822_v1  ;;  %v20861_v18 = vsub.f32 %v7235_v37, %v20842_v28  ;;  %v7417_v37 = vand.u32 4294901760, %v7416_v4 }
 0x73b   :  { %14284 = vmatpush3.msra.mxu0 %v20748_v17  ;;  %25000 = vst [vmem:[#allocation194_spill] sm:$0xff] %v20842_v28  ;;  %v7521_v52 = vsub.f32 %v20829_v30, %v24078_v11  ;;  %25002 = vst [vmem:[#allocation204_spill] sm:$0xff] %v20874_v25 }
 0x73c   :  { %v7388_v2 = vsub.f32 %v20764_v8, %v24085_v10  ;;  %14285 = vmatprep.subr.mxu0 %v20807_v41  ;;  %v7402_v40 = vsub.f32 %v20822_v1, %v24079_v50  ;;  %25001 = vst [vmem:[#allocation173_spill] sm:$0xff] %v20861_v18  ;;  %v24075_v3 = vand.u32 4294901760, %v20861_v18  ;;  %v7215_v50 = vld [vmem:[#allocation12 + $0x120] sm:$0xff] }
 0x73d   :  { %14286 = vmatpush3.msra.mxu0 %v20809_v12  ;;  %v7522_v34 = vand.u32 4294901760, %v7521_v52  ;;  %v7216_v52 = vld [vmem:[#allocation12 + $0x128] sm:$0xff]  ;;  %v20950_v59 = vand.u32 4294901760, %v7215_v50 }
 0x73e   :  { %v7389_v39 = vand.u32 4294901760, %v7388_v2  ;;  %14287 = vmatprep.subr.mxu0 %v20814_v6  ;;  %v7403_v54 = vand.u32 4294901760, %v7402_v40  ;;  %v7409_v2 = vsub.f32 %v20832_v19, %v24077_v16  ;;  %v7535_v14 = vsub.f32 %v20861_v18, %v24075_v3 }
 0x73f   :  { %14288 = vmatpush3.msra.mxu0 %v20816_v51  ;;  %v20880_v40 = vsub.f32 %v7219_v63, %v20874_v25  ;;  %25018 = vst [vmem:[#allocation220_spill] sm:$0xff] %v20950_v59 }
 0x740   :  { %14320 = vmatpush3.msra.mxu1 %v7389_v39  ;;  %14289 = vmatprep.subr.mxu0 %v20818_v53  ;;  %v7233_v39 = vld [vmem:[#allocation12 + $0x1b0] sm:$0xff]  ;;  %v7410_v45 = vand.u32 4294901760, %v7409_v2 }
 0x741   :  { %14321 = vmatprep.subr.mxu1 %v7508_v47  ;;  %14290 = vmatpush3.msra.mxu0 %v20824_v20  ;;  %v7217_v47 = vld [vmem:[#allocation12 + $0x130] sm:$0xff]  ;;  %25003 = vst [vmem:[#allocation205_spill] sm:$0xff] %v20880_v40  ;;  %v24080_v4 = vand.u32 4294901760, %v20880_v40 }
 0x742   :  { %14322 = vmatpush3.msra.mxu1 %v7396_v26  ;;  %14291 = vmatprep.subr.mxu0 %v20842_v28  ;;  %v7232_v26 = vld [vmem:[#allocation12 + $0x1a8] sm:$0xff]  ;;  %v20889_v2 = vand.u32 4294901760, %v7217_v47 }
 0x743   :  { %14323 = vmatprep.subr.mxu1 %v7515_v35  ;;  %v20882_v35 = vand.u32 4294901760, %v7234_v62  ;;  %14292 = vmatpush3.msra.mxu0 %v20874_v25  ;;  %v20895_v3 = vand.u32 4294901760, %v7232_v26 }
 0x744   :  { %14324 = vmatpush3.msra.mxu1 %v7403_v54  ;;  %v20887_v54 = vand.u32 4294901760, %v7233_v39  ;;  %25007 = vst [vmem:[#allocation209_spill] sm:$0xff] %v20889_v2  ;;  %v20905_v16 = vsub.f32 %v7217_v47, %v20889_v2 }
 0x745   :  { %14325 = vmatprep.subr.mxu1 %v7522_v34  ;;  %25004 = vst [vmem:[#allocation206_spill] sm:$0xff] %v20882_v35  ;;  %v7536_v34 = vand.u32 4294901760, %v7535_v14  ;;  %v20893_v63 = vsub.f32 %v7234_v62, %v20882_v35  ;;  %25009 = vst [vmem:[#allocation211_spill] sm:$0xff] %v20895_v3  ;;  %14293 = vmatprep.subr.mxu0 %v20882_v35  ;;  %v7423_v62 = vsub.f32 %v20880_v40, %v24080_v4 }
 0x746   :  { %14326 = vmatpush3.msra.mxu1 %v7410_v45  ;;  %25006 = vst [vmem:[#allocation208_spill] sm:$0xff] %v20887_v54  ;;  %v20899_v45 = vsub.f32 %v7218_v49, %v20885_v22  ;;  %v20902_v5 = vsub.f32 %v7233_v39, %v20887_v54  ;;  %25012 = vst [vmem:[#allocation214_spill] sm:$0xff] %v20905_v16  ;;  %14294 = vmatpush3.msra.mxu0 %v20885_v22  ;;  %v20917_v14 = vand.u32 4294901760, %v7231_v21 }
 0x747   :  { %14327 = vmatprep.subr.mxu1 %v7529_v33  ;;  %25008 = vst [vmem:[#allocation210_spill] sm:$0xff] %v20893_v63  ;;  %v20907_v33 = vand.u32 4294901760, %v7216_v52  ;;  %v20915_v49 = vsub.f32 %v7232_v26, %v20895_v3  ;;  %14295 = vmatprep.subr.mxu0 %v20887_v54  ;;  %v24091_v11 = vand.u32 4294901760, %v20905_v16  ;;  %v7424_v4 = vand.u32 4294901760, %v7423_v62 }
 0x748   :  { %14328 = vmatpush3.msra.mxu1 %v7417_v37  ;;  %25010 = vst [vmem:[#allocation212_spill] sm:$0xff] %v20899_v45  ;;  %25011 = vst [vmem:[#allocation213_spill] sm:$0xff] %v20902_v5  ;;  %v24084_v37 = vand.u32 4294901760, %v20893_v63  ;;  %v24086_v39 = vand.u32 4294901760, %v20899_v45  ;;  %v24089_v47 = vand.u32 4294901760, %v20902_v5  ;;  %14296 = vmatpush3.msra.mxu0 %v20889_v2  ;;  %v20932_v46 = vsub.f32 %v7231_v21, %v20917_v14 }
 0x749   :  { %25013 = vst [vmem:[#allocation215_spill] sm:$0xff] %v20907_v33  ;;  %14329 = vmatprep.subr.mxu1 %v7536_v34  ;;  %25014 = vst [vmem:[#allocation216_spill] sm:$0xff] %v20915_v49  ;;  %v20924_v34 = vsub.f32 %v7216_v52, %v20907_v33  ;;  %v24096_v32 = vand.u32 4294901760, %v20915_v49  ;;  %14297 = vmatprep.subr.mxu0 %v20895_v3  ;;  %v7437_v62 = vsub.f32 %v20905_v16, %v24091_v11 }
 0x74a   :  { %25015 = vst [vmem:[#allocation217_spill] sm:$0xff] %v20917_v14  ;;  %v7542_v26 = vsub.f32 %v20893_v63, %v24084_v37  ;;  %25017 = vst [vmem:[#allocation219_spill] sm:$0xff] %v20932_v46  ;;  %v7430_v52 = vsub.f32 %v20899_v45, %v24086_v39  ;;  %v7549_v60 = vsub.f32 %v20902_v5, %v24089_v47  ;;  %14298 = vmatpush3.msra.mxu0 %v20907_v33  ;;  %v7214_v47 = vld [vmem:[#allocation12 + $0x118] sm:$0xff]  ;;  %v7228_v5 = vld [vmem:[#allocation12 + $0x188] sm:$0xff] }
 0x74b   :  { %25016 = vst [vmem:[#allocation218_spill] sm:$0xff] %v20924_v34  ;;  %v24101_v37 = vand.u32 4294901760, %v20924_v34  ;;  %14330 = vmatpush3.msra.mxu1 %v7424_v4  ;;  %v7556_v10 = vsub.f32 %v20915_v49, %v24096_v32  ;;  %v24104_v39 = vand.u32 4294901760, %v20932_v46  ;;  %14299 = vmatprep.subr.mxu0 %v20917_v14  ;;  %v7438_v15 = vand.u32 4294901760, %v7437_v62 }
 0x74c   :  { %v7543_v21 = vand.u32 4294901760, %v7542_v26  ;;  %v7431_v11 = vand.u32 4294901760, %v7430_v52  ;;  %v7550_v42 = vand.u32 4294901760, %v7549_v60  ;;  %v7213_v26 = vld [vmem:[#allocation12 + $0x110] sm:$0xff]  ;;  %v20960_v49 = vsub.f32 %v7215_v50, %v20950_v59  ;;  %14300 = vmatpush3.msra.mxu0 %v20950_v59 }
 0x74d   :  { %v7444_v4 = vsub.f32 %v20924_v34, %v24101_v37  ;;  %v7557_v16 = vand.u32 4294901760, %v7556_v10  ;;  %v7563_v32 = vsub.f32 %v20932_v46, %v24104_v39  ;;  %v20963_v52 = vand.u32 4294901760, %v7230_v58  ;;  %v7227_v10 = vld [vmem:[#allocation12 + $0x180] sm:$0xff] }
 0x74e   :  { %14331 = vmatprep.subr.mxu1 %v7543_v21  ;;  %25019 = vst [vmem:[#allocation221_spill] sm:$0xff] %v20960_v49  ;;  %v20965_v62 = vand.u32 4294901760, %v7214_v47  ;;  %v20967_v37 = vand.u32 4294901760, %v7229_v56  ;;  %v7212_v21 = vld [vmem:[#allocation12 + $0x108] sm:$0xff]  ;;  %v24111_v39 = vand.u32 4294901760, %v20960_v49  ;;  %v20970_v46 = vand.u32 4294901760, %v7213_v26 }
 0x74f   :  { %14332 = vmatpush3.msra.mxu1 %v7431_v11  ;;  %v7445_v60 = vand.u32 4294901760, %v7444_v4  ;;  %25020 = vst [vmem:[#allocation222_spill] sm:$0xff] %v20963_v52  ;;  %v7564_v34 = vand.u32 4294901760, %v7563_v32  ;;  %v20973_v50 = vsub.f32 %v7230_v58, %v20963_v52  ;;  %v20981_v45 = vand.u32 4294901760, %v7228_v5  ;;  %14301 = vmatprep.subr.mxu0 %v20963_v52 }
 0x750   :  { %25021 = vst [vmem:[#allocation223_spill] sm:$0xff] %v20965_v62  ;;  %25022 = vst [vmem:[#allocation224_spill] sm:$0xff] %v20967_v37  ;;  %14333 = vmatprep.subr.mxu1 %v7550_v42  ;;  %v20976_v11 = vsub.f32 %v7214_v47, %v20965_v62  ;;  %v20979_v4 = vsub.f32 %v7229_v56, %v20967_v37  ;;  %v7451_v42 = vsub.f32 %v20960_v49, %v24111_v39  ;;  %v7211_v39 = vld [vmem:[#allocation12 + $0x100] sm:$0xff]  ;;  %v21010_v47 = vpop.f32.mrf.mxu1 }
 0x751   :  { %25023 = vst [vmem:[#allocation225_spill] sm:$0xff] %v20970_v46  ;;  %14334 = vmatpush3.msra.mxu1 %v7438_v15  ;;  %25024 = vst [vmem:[#allocation226_spill] sm:$0xff] %v20973_v50  ;;  %v20988_v15 = vsub.f32 %v7213_v26, %v20970_v46  ;;  %v20990_v58 = vand.u32 4294901760, %v7212_v21  ;;  %v20992_v32 = vand.u32 4294901760, %v7227_v10  ;;  %14302 = vmatpush3.msra.mxu0 %v20965_v62  ;;  %v24120_v56 = vand.u32 4294901760, %v20973_v50 }
 0x752   :  { %25025 = vst [vmem:[#allocation227_spill] sm:$0xff] %v20976_v11  ;;  %25026 = vst [vmem:[#allocation228_spill] sm:$0xff] %v20979_v4  ;;  %14335 = vmatprep.subr.mxu1 %v7557_v16  ;;  %v20999_v52 = vsub.f32 %v7228_v5, %v20981_v45  ;;  %14303 = vmatprep.subr.mxu0 %v20967_v37  ;;  %v7452_v26 = vand.u32 4294901760, %v7451_v42  ;;  %v25034_v16 = vand.u32 4294901760, %v20976_v11  ;;  %v25035_v42 = vand.u32 4294901760, %v20979_v4 }
 0x753   :  { %25027 = vst [vmem:[#allocation229_spill] sm:$0xff] %v20981_v45  ;;  %25028 = vst [vmem:[#allocation230_spill] sm:$0xff] %v20988_v15  ;;  %14336 = vmatpush3.msra.mxu1 %v7445_v60  ;;  %v21004_v63 = vsub.f32 %v7212_v21, %v20990_v58  ;;  %v21007_v60 = vsub.f32 %v7227_v10, %v20992_v32  ;;  %14304 = vmatpush3.msra.mxu0 %v20970_v46  ;;  %v25036_v10 = vand.u32 4294901760, %v20988_v15 }
 0x754   :  { %25029 = vst [vmem:[#allocation231_spill] sm:$0xff] %v20990_v58  ;;  %25030 = vst [vmem:[#allocation232_spill] sm:$0xff] %v20992_v32  ;;  %14337 = vmatprep.subr.mxu1 %v7564_v34  ;;  %v7570_v5 = vsub.f32 %v20973_v50, %v24120_v56  ;;  %v7458_v34 = vsub.f32 %v20976_v11, %v25034_v16  ;;  %v7577_v21 = vsub.f32 %v20979_v4, %v25035_v42 }
 0x755   :  { %25031 = vst [vmem:[#allocation233_spill] sm:$0xff] %v20999_v52  ;;  %25032 = vst [vmem:[#allocation234_spill] sm:$0xff] %v21004_v63  ;;  %v24132_v49 = vand.u32 4294901760, %v20999_v52  ;;  %14305 = vmatprep.subr.mxu0 %v20981_v45  ;;  %14338 = vmatpush3.msra.mxu1 %v7452_v26  ;;  %v7465_v46 = vsub.f32 %v20988_v15, %v25036_v10  ;;  %v24131_v37 = vand.u32 4294901760, %v21004_v63  ;;  %v24133_v56 = vand.u32 4294901760, %v21007_v60 }
 0x756   :  { %25033 = vst [vmem:[#allocation235_spill] sm:$0xff] %v21007_v60  ;;  %v21028_v50 = vand.u32 4294901760, %v7211_v39  ;;  %14306 = vmatpush3.msra.mxu0 %v20990_v58  ;;  %v7571_v16 = vand.u32 4294901760, %v7570_v5  ;;  %v7459_v11 = vand.u32 4294901760, %v7458_v34  ;;  %v7578_v42 = vand.u32 4294901760, %v7577_v21  ;;  %v21045_v5 = vpop.f32.mrf.mxu1  ;;  %v21047_v34 = vpop.f32.mrf.mxu0 }
 0x757   :  { %v7584_v4 = vsub.f32 %v20999_v52, %v24132_v49  ;;  %14307 = vmatprep.subr.mxu0 %v20992_v32  ;;  %v7466_v26 = vand.u32 4294901760, %v7465_v46  ;;  %v7472_v10 = vsub.f32 %v21004_v63, %v24131_v37  ;;  %v7591_v15 = vsub.f32 %v21007_v60, %v24133_v56 }
 0x758   :  { %25037 = vst [vmem:[#allocation236_spill] sm:$0xff] %v21028_v50  ;;  %v21042_v58 = vsub.f32 %v7211_v39, %v21028_v50  ;;  %14308 = vmatpush3.msra.mxu0 %v21028_v50  ;;  %14339 = vmatprep.subr.mxu1 %v7571_v16  ;;  %v4739_v56 = vpop.f32.mrf.mxu1  ;;  %v4491_v60 = vpop.f32.mrf.mxu0  ;;  %v4733_v61 = vadd.f32 %v21010_v47, %v21047_v34 }
 0x759   :  { %v7585_v21 = vand.u32 4294901760, %v7584_v4  ;;  %14353 = vmatprep.subr.mxu0 %v20732_v24  ;;  %14340 = vmatpush3.msra.mxu1 %v7459_v11  ;;  %v7473_v46 = vand.u32 4294901760, %v7472_v10  ;;  %v7592_v49 = vand.u32 4294901760, %v7591_v15  ;;  %v4735_v6 = vadd.f32 %v21045_v5, %v4491_v60 }
 0x75a   :  { %25038 = vst [vmem:[#allocation237_spill] sm:$0xff] %v21042_v58  ;;  %v24143_v37 = vand.u32 4294901760, %v21042_v58  ;;  %14341 = vmatprep.subr.mxu1 %v7578_v42  ;;  %v4741_v4 = vpop.f32.mrf.mxu1  ;;  %v4500_v16 = vpop.f32.mrf.mxu0 }
 0x75b   :  { %14342 = vmatpush3.msra.mxu1 %v7466_v26  ;;  %v4740_v12 = vadd.f32 %v4739_v56, %v4500_v16 }
 0x75c   :  { %v7479_v39 = vsub.f32 %v21042_v58, %v24143_v37  ;;  %14343 = vmatprep.subr.mxu1 %v7585_v21  ;;  %v4990_v11 = vpop.f32.mrf.mxu1  ;;  %v4502_v10 = vpop.f32.mrf.mxu0 }
 0x75d   :  { %14344 = vmatpush3.msra.mxu1 %v7473_v46  ;;  %v4742_v55 = vadd.f32 %v4741_v4, %v4502_v10 }
 0x75e   :  { %v7480_v63 = vand.u32 4294901760, %v7479_v39  ;;  %14345 = vmatprep.subr.mxu1 %v7592_v49  ;;  %v4992_v42 = vpop.f32.mrf.mxu1  ;;  %v4876_v15 = vpop.f32.mrf.mxu0 }
 0x75f   :  { %v4877_v7 = vadd.f32 %v4876_v15, %v4733_v61 }
 0x760   :  { %14346 = vmatpush3.msra.mxu1 %v7480_v63  ;;  %v4999_v26 = vpop.f32.mrf.mxu1  ;;  %v4878_v24 = vpop.f32.mrf.mxu0 }
 0x761   :  { %14391 = vmatprep.subr.mxu1 %v20727_v23  ;;  %v4879_v38 = vadd.f32 %v4878_v24, %v4735_v6  ;;  %v4991_v36 = vadd.f32 %v4990_v11, %v4877_v7 }
 0x762   :  { %v5001_v52 = vpop.f32.mrf.mxu1  ;;  %v4884_v50 = vpop.f32.mrf.mxu0 }
 0x763   :  { %v4885_v27 = vadd.f32 %v4884_v50, %v4740_v12  ;;  %v4993_v31 = vadd.f32 %v4992_v42, %v4879_v38 }
 0x764   :  { %v5278_v37 = vpop.f32.mrf.mxu1  ;;  %v4886_v58 = vpop.f32.mrf.mxu0 }
 0x765   :  { %v4887_v48 = vadd.f32 %v4886_v58, %v4742_v55 }
 0x766   :  { %v5280_v32 = vpop.f32.mrf.mxu1  ;;  %v5167_v21 = vpop.f32.mrf.mxu0 }
 0x767   :  { %v5002_v47 = vadd.f32 %v5001_v52, %v4887_v48 }
 0x768   :  { %v5285_v46 = vpop.f32.mrf.mxu1  ;;  %v5169_v39 = vpop.f32.mrf.mxu0 }
 0x76a   :  { %v5287_v49 = vpop.f32.mrf.mxu1  ;;  %v5174_v63 = vpop.f32.mrf.mxu0 }
 0x76c   :  { %v5636_v45 = vpop.f32.mrf.mxu1  ;;  %v5176_v62 = vpop.f32.mrf.mxu0 }
 0x76d   :  { %v5177_v61 = vadd.f32 %v5176_v62, %v5002_v47 }
 0x76e   :  { %v5638_v59 = vpop.f32.mrf.mxu1  ;;  %v5393_v23 = vpop.f32.mrf.mxu0 }
 0x76f   :  { %v5288_v55 = vadd.f32 %v5287_v49, %v5177_v61 }
 0x770   :  { %v21055_v40 = vpop.f32.mrf.mxu1  ;;  %v5395_v14 = vpop.f32.mrf.mxu0 }
 0x772   :  { %v21057_v18 = vpop.f32.mrf.mxu1  ;;  %v5404_v33 = vpop.f32.mrf.mxu0 }
 0x774   :  { %v21059_v57 = vpop.f32.mrf.mxu1  ;;  %v5406_v3 = vpop.f32.mrf.mxu0 }
 0x776   :  { %v21061_v44 = vpop.f32.mrf.mxu1  ;;  %v5780_v2 = vpop.f32.mrf.mxu0 }
 0x778   :  { %v21063_v19 = vpop.f32.mrf.mxu1  ;;  %v5782_v54 = vpop.f32.mrf.mxu0 }
 0x77a   :  { %v21065_v30 = vpop.f32.mrf.mxu1  ;;  %v5788_v22 = vpop.f32.mrf.mxu0 }
 0x77b   :  { %25039 = vst [vmem:[#allocation238_spill] sm:$0xff] %v21065_v30 }
 0x77c   :  { %v5790_v35 = vpop.f32.mrf.mxu0 }
 0x780   :  { %v21067_v1 = vpop.f32.mrf.mxu1 }
 0x781   :  { %25040 = vst [vmem:[#allocation239_spill] sm:$0xff] %v21067_v1 }
 0x782   :  { %v21069_v13 = vpop.f32.mrf.mxu1 }
 0x783   :  { %25041 = vst [vmem:[#allocation240_spill] sm:$0xff] %v21069_v13  ;;  %v5000_v13 = vadd.f32 %v4999_v26, %v4885_v27 }
 0x785   :  { %v21071_v43 = vpop.f32.mrf.mxu1  ;;  %v5175_v30 = vadd.f32 %v5174_v63, %v5000_v13 }
 0x786   :  { %25042 = vst [vmem:[#allocation241_spill] sm:$0xff] %v21071_v43  ;;  %v5168_v43 = vadd.f32 %v5167_v21, %v4991_v36  ;;  %v5407_v36 = vadd.f32 %v5406_v3, %v5288_v55 }
 0x787   :  { %v21075_v9 = vpop.f32.mrf.mxu1  ;;  %v5286_v12 = vadd.f32 %v5285_v46, %v5175_v30 }
 0x788   :  { %25043 = vst [vmem:[#allocation242_spill] sm:$0xff] %v21075_v9  ;;  %v5279_v60 = vadd.f32 %v5278_v37, %v5168_v43  ;;  %v25048_v15 = vld [vmem:[#allocation239_spill] sm:$0xff] }
 0x789   :  { %v5405_v7 = vadd.f32 %v5404_v33, %v5286_v12 }
 0x78a   :  { %v6071_v25 = vpop.f32.mrf.mxu0  ;;  %v5394_v5 = vadd.f32 %v5393_v23, %v5279_v60  ;;  %v5646_v23 = vadd.f32 %v21057_v18, %v5407_v36  ;;  %v25049_v46 = vld [vmem:[#allocation240_spill] sm:$0xff] }
 0x78b   :  { %v5644_v48 = vadd.f32 %v21055_v40, %v5405_v7 }
 0x78c   :  { %v21073_v28 = vpop.f32.mrf.mxu0  ;;  %v5637_v58 = vadd.f32 %v5636_v45, %v5394_v5  ;;  %v5791_v45 = vadd.f32 %v5790_v35, %v5646_v23 }
 0x78d   :  { %v5789_v62 = vadd.f32 %v5788_v22, %v5644_v48 }
 0x78e   :  { %v5781_v27 = vadd.f32 %v5780_v2, %v5637_v58  ;;  %v7142_v2 = vld [vmem:[#allocation10] sm:$0x3] }
 0x78f   :  { %v21077_v20 = vpop.f32.mrf.mxu0 }
 0x790   :  { %v5895_v33 = vadd.f32 %v21059_v57, %v5781_v27 }
 0x791   :  { %v21079_v53 = vpop.f32.mrf.mxu0 }
 0x792   :  { %25044 = vst [vmem:[#allocation243_spill] sm:$0xff] %v21079_v53  ;;  %v5170_v53 = vadd.f32 %v5169_v39, %v4993_v31 }
 0x794   :  { %v5281_v56 = vadd.f32 %v5280_v32, %v5170_v53 }
 0x796   :  { %v5396_v4 = vadd.f32 %v5395_v14, %v5281_v56 }
 0x798   :  { %v5639_v31 = vadd.f32 %v5638_v59, %v5396_v4 }
 0x799   :  { %v25050_v39 = vld [vmem:[#allocation243_spill] sm:$0xff] }
 0x79a   :  { %v5783_v13 = vadd.f32 %v5782_v54, %v5639_v31 }
 0x79c   :  { %v5897_v59 = vadd.f32 %v21061_v44, %v5783_v13  ;;  %v25046_v44 = vld [vmem:[#allocation197_spill] sm:$0xff] }
 0x79d   :  { %v25047_v42 = vsub.s32 0, %v25046_v44  ;;  %v25051_v47 = vsub.s32 1, %v25046_v44 }
 0x7a4   :  { %v6580_v8 = vpop.f32.mrf.mxu1 }
 0x7a6   :  { %v6582_v29 = vpop.f32.mrf.mxu1 }
 0x7a9   :  { %v6587_v41 = vpop.f32.mrf.mxu1 }
 0x7ab   :  { %v6589_v0 = vpop.f32.mrf.mxu1 }
 0x7ae   :  { %v6337_v51 = vpop.f32.mrf.mxu0 }
 0x7af   :  { %v6581_v16 = vadd.f32 %v6580_v8, %v6337_v51  ;;  %v6072_v8 = vadd.f32 %v6071_v25, %v5895_v33  ;;  %v7147_v25 = vrot.slane %v7142_v2, %v25047_v42 }
 0x7b0   :  { %v6339_v17 = vpop.f32.mrf.mxu0 }
 0x7b1   :  { %v6583_v53 = vadd.f32 %v6582_v29, %v6339_v17  ;;  %v6074_v17 = vadd.f32 %v21073_v28, %v5897_v59  ;;  %v5904_v29 = vadd.f32 %v21063_v19, %v5789_v62 }
 0x7b3   :  { %v6348_v9 = vpop.f32.mrf.mxu0  ;;  %v6185_v19 = vadd.f32 %v25049_v46, %v6074_v17  ;;  %v25068_v46 = vld [vmem:[#allocation198_spill] sm:$0xff] }
 0x7b4   :  { %v6588_v14 = vadd.f32 %v6587_v41, %v6348_v9  ;;  %v6079_v9 = vadd.f32 %v21077_v20, %v5904_v29  ;;  %v25045_v41 = vld [vmem:[#allocation238_spill] sm:$0xff] }
 0x7b5   :  { %v6350_v34 = vpop.f32.mrf.mxu0  ;;  %v5906_v35 = vadd.f32 %v25045_v41, %v5791_v45 }
 0x7b6   :  { %v6590_v51 = vadd.f32 %v6589_v0, %v6350_v34  ;;  %v7151_v34 = vrot.slane %v7142_v2, %v25051_v47  ;;  %v25061_v2 = vld [vmem:[#allocation196_spill] sm:$0xff] }
 0x7b7   :  { %v6081_v49 = vadd.f32 %v25050_v39, %v5906_v35  ;;  %v25064_v35 = vld [vmem:[#allocation203_spill] sm:$0xff] }
 0x7c8   :  { %v6838_v1 = vpop.f32.mrf.mxu1 }
 0x7ca   :  { %v6840_v24 = vpop.f32.mrf.mxu1 }
 0x7cd   :  { %v6847_v38 = vpop.f32.mrf.mxu1 }
 0x7cf   :  { %v6849_v43 = vpop.f32.mrf.mxu1 }
 0x7d2   :  { %v6724_v6 = vpop.f32.mrf.mxu0 }
 0x7d3   :  { %v6725_v52 = vadd.f32 %v6724_v6, %v6581_v16  ;;  %v25052_v6 = vld [vmem:[#allocation241_spill] sm:$0xff] }
 0x7d4   :  { %v6726_v50 = vpop.f32.mrf.mxu0  ;;  %v6190_v5 = vadd.f32 %v25052_v6, %v6079_v9  ;;  %v25077_v6 = vld [vmem:[#allocation181_spill] sm:$0xff] }
 0x7d5   :  { %v6727_v32 = vadd.f32 %v6726_v50, %v6583_v53  ;;  %v6839_v40 = vadd.f32 %v6838_v1, %v6725_v52  ;;  %v6183_v1 = vadd.f32 %v25048_v15, %v6072_v8  ;;  %v25053_v50 = vld [vmem:[#allocation242_spill] sm:$0xff]  ;;  %v25059_v8 = vld [vmem:[#allocation191_spill] sm:$0xff] }
 0x7d6   :  { %v6192_v58 = vadd.f32 %v25053_v50, %v6081_v49  ;;  %v25083_v50 = vld [vmem:[#allocation194_spill] sm:$0xff] }
 0x7d7   :  { %v6732_v37 = vpop.f32.mrf.mxu0  ;;  %v6841_v57 = vadd.f32 %v6840_v24, %v6727_v32 }
 0x7d8   :  { %v6733_v54 = vadd.f32 %v6732_v37, %v6588_v14 }
 0x7d9   :  { %v6734_v3 = vpop.f32.mrf.mxu0 }
 0x7da   :  { %v6735_v11 = vadd.f32 %v6734_v3, %v6590_v51  ;;  %v6848_v28 = vadd.f32 %v6847_v38, %v6733_v54 }
 0x7dc   :  { %v6850_v24 = vadd.f32 %v6849_v43, %v6735_v11 }
 0x7ec   :  { %v7126_v30 = vpop.f32.mrf.mxu1 }
 0x7ee   :  { %v7128_v22 = vpop.f32.mrf.mxu1 }
 0x7f0   :  { %v7133_v63 = vpop.f32.mrf.mxu1 }
 0x7f2   :  { %v7135_v36 = vpop.f32.mrf.mxu1 }
 0x7f4   :  { %v7015_v18 = vpop.f32.mrf.mxu0 }
 0x7f5   :  { %v7016_v10 = vadd.f32 %v7015_v18, %v6839_v40 }
 0x7f6   :  { %v7017_v0 = vpop.f32.mrf.mxu0 }
 0x7f7   :  { %v7127_v26 = vadd.f32 %v7126_v30, %v7016_v10  ;;  %v7018_v21 = vadd.f32 %v7017_v0, %v6841_v57  ;;  %v25063_v10 = vld [vmem:[#allocation174_spill] sm:$0xff] }
 0x7f8   :  { %v7022_v20 = vpop.f32.mrf.mxu0 }
 0x7f9   :  { %v7138_v60 = vadd.f32 %v7127_v26, %v6183_v1  ;;  %v7129_v61 = vadd.f32 %v7128_v22, %v7018_v21  ;;  %v7023_v56 = vadd.f32 %v7022_v20, %v6848_v28  ;;  %v25067_v1 = vld [vmem:[#allocation201_spill] sm:$0xff]  ;;  %v25073_v20 = vld [vmem:[#allocation179_spill] sm:$0xff] }
 0x7fa   :  { %v7024_v4 = vpop.f32.mrf.mxu0 }
 0x7fb   :  { %v7154_v12 = vadd.f32 %v7147_v25, %v7138_v60  ;;  %v7139_v7 = vadd.f32 %v7129_v61, %v6185_v19  ;;  %v7134_v55 = vadd.f32 %v7133_v63, %v7023_v56  ;;  %v7025_v38 = vadd.f32 %v7024_v4, %v6850_v24  ;;  %v25070_v63 = vld [vmem:[#allocation186_spill] sm:$0xff]  ;;  %v25075_v56 = vld [vmem:[#allocation180_spill] sm:$0xff]  ;;  %v25076_v24 = vld [vmem:[#allocation175_spill] sm:$0xff] }
 0x7fc   :  { %v25074_v61 = vld [vmem:[#allocation202_spill] sm:$0xff]  ;;  %v25078_v4 = vld [vmem:[#allocation183_spill] sm:$0xff] }
 0x7fd   :  { %v21101_v31 = vmax.f32 %v7154_v12, 0.0  ;;  %v7155_v27 = vadd.f32 %v7151_v34, %v7139_v7  ;;  %v7140_v16 = vadd.f32 %v7134_v55, %v6190_v5  ;;  %v7136_v13 = vadd.f32 %v7135_v36, %v7025_v38  ;;  %v25079_v12 = vld [vmem:[#allocation182_spill] sm:$0xff]  ;;  %v25080_v7 = vld [vmem:[#allocation176_spill] sm:$0xff]  ;;  %v25081_v55 = vld [vmem:[#allocation185_spill] sm:$0xff] }
 0x7fe   :  { %v25082_v38 = vld [vmem:[#allocation177_spill] sm:$0xff]  ;;  %v25085_v36 = vld [vmem:[#allocation204_spill] sm:$0xff] }
 0x7ff   :  { %25054 = vst [vmem:[#allocation238_spill] sm:$0xff] %v21101_v31  ;;  %v21103_v48 = vmax.f32 %v7155_v27, 0.0  ;;  %v7156_v37 = vadd.f32 %v7147_v25, %v7140_v16  ;;  %v7141_v53 = vadd.f32 %v7136_v13, %v6192_v58  ;;  %v21106_v43 = vand.u32 4294901760, %v21101_v31  ;;  %v25066_v25 = vld [vmem:[#allocation200_spill] sm:$0xff]  ;;  %v25084_v58 = vld [vmem:[#allocation178_spill] sm:$0xff]  ;;  %v25088_v13 = vld [vmem:[#allocation195_spill] sm:$0xff] }
 0x800   :  { %v24231_v59 = vrot.slane %v21101_v31, 7  ;;  %v9079_v42 = vrot.slane %v21101_v31, 1  ;;  %v25086_v27 = vld [vmem:[#allocation188_spill] sm:$0xff]  ;;  %v25087_v16 = vld [vmem:[#allocation206_spill] sm:$0xff] }
 0x801   :  { %25055 = vst [vmem:[#allocation197_spill] sm:$0xff] %v21106_v43  ;;  %v21108_v52 = vmax.f32 %v7156_v37, 0.0  ;;  %v7157_v62 = vadd.f32 %v7151_v34, %v7141_v53  ;;  %v21111_v23 = vand.u32 4294901760, %v21103_v48  ;;  %v21115_v30 = vsub.f32 %v21101_v31, %v21106_v43  ;;  %v25072_v34 = vld [vmem:[#allocation199_spill] sm:$0xff]  ;;  %v25090_v53 = vld [vmem:[#allocation190_spill] sm:$0xff] }
 0x802   :  { %v24232_v29 = vrot.slane %v21103_v48, 7  ;;  %v9082_v21 = vrot.slane %v21103_v48, 1  ;;  %v25089_v37 = vld [vmem:[#allocation207_spill] sm:$0xff] }
 0x803   :  { %25056 = vst [vmem:[#allocation239_spill] sm:$0xff] %v21108_v52  ;;  %v21117_v33 = vmax.f32 %v7157_v62, 0.0  ;;  %7595 = vmatprep.mubr.f32.mxu1 %v21111_v23  ;;  %v21121_v14 = vand.u32 4294901760, %v21108_v52  ;;  %v7340_v32 = vsub.f32 %v21103_v48, %v21111_v23  ;;  %v24235_v45 = vand.u32 4294901760, %v21115_v30  ;;  %v25091_v62 = vld [vmem:[#allocation208_spill] sm:$0xff] }
 0x804   :  { %7597 = vmatmul.mubr.f32.vlgmr.msra.gmra.mxu1 %v21106_v43  ;;  %v7168_v3 = vrot.slane %v21108_v52, 7  ;;  %v24229_v11 = vrot.slane %v21108_v52, 1  ;;  %v25119_v31 = vand.u32 4294901760, %v21115_v30 }
 0x805   :  { %25057 = vst [vmem:[#allocation240_spill] sm:$0xff] %v21117_v33  ;;  %25058 = vst [vmem:[#allocation243_spill] sm:$0xff] %v21121_v14  ;;  %14392 = vmatpush3.msra.mxu1 %v25059_v8  ;;  %v21131_v51 = vand.u32 4294901760, %v21117_v33  ;;  %v7341_v54 = vand.u32 4294901760, %v7340_v32  ;;  %v21135_v40 = vsub.f32 %v21108_v52, %v21121_v14  ;;  %v7348_v17 = vsub.f32 %v21115_v30, %v24235_v45  ;;  %v25112_v45 = vld [vmem:[#allocation218_spill] sm:$0xff]  ;;  %v25113_v52 = vld [vmem:[#allocation231_spill] sm:$0xff] }
 0x806   :  { %14393 = vmatprep.subr.mxu1 %v25061_v2  ;;  %v7170_v22 = vrot.slane %v21117_v33, 7  ;;  %v21146_v18 = vsel %vm3632_vm1, %v24231_v59, %v7168_v3  ;;  %v24230_v28 = vrot.slane %v21117_v33, 1  ;;  %v21179_v49 = vsel %vm6194_vm3, %v9079_v42, %v24229_v11  ;;  %v25092_v3 = vld [vmem:[#allocation192_spill] sm:$0xff]  ;;  %v25098_v42 = vld [vmem:[#allocation173_spill] sm:$0xff]  ;;  %v25108_v59 = vld [vmem:[#allocation214_spill] sm:$0xff] }
 0x807   :  { %25060 = vst [vmem:[#allocation241_spill] sm:$0xff] %v21131_v51  ;;  %25062 = vst [vmem:[#allocation242_spill] sm:$0xff] %v21146_v18  ;;  %14394 = vmatpush3.msra.mxu1 %v25063_v10  ;;  %7602 = vmatprep.mubr.f32.mxu1 %v21131_v51  ;;  %v7342_v57 = vsub.f32 %v7340_v32, %v7341_v54  ;;  %v21153_v9 = vsub.f32 %v21117_v33, %v21131_v51  ;;  %v24233_v41 = vand.u32 4294901760, %v21135_v40  ;;  %v25106_v11 = vld [vmem:[#allocation213_spill] sm:$0xff]  ;;  %v25115_v33 = vld [vmem:[#allocation232_spill] sm:$0xff] }
 0x808   :  { %14395 = vmatprep.subr.mxu1 %v25064_v35  ;;  %7604 = vmatmul.mubr.f32.gmra.mxu1 %v21121_v14  ;;  %v21161_v44 = vsel %vm3632_vm1, %v24232_v29, %v7170_v22  ;;  %v7349_v26 = vand.u32 4294901760, %v7348_v17  ;;  %25069 = vst [vmem:[#allocation196_spill] sm:$0xff] %v21179_v49  ;;  %v21185_v47 = vsel %vm6194_vm3, %v9082_v21, %v24230_v28  ;;  %v25095_v17 = vld [vmem:[#allocation211_spill] sm:$0xff]  ;;  %v25096_v22 = vld [vmem:[#allocation189_spill] sm:$0xff]  ;;  %v25101_v21 = vld [vmem:[#allocation220_spill] sm:$0xff] }
 0x809   :  { %25065 = vst [vmem:[#allocation191_spill] sm:$0xff] %v21161_v44  ;;  %14396 = vmatpush3.msra.mxu1 %v25066_v25  ;;  %7855 = vmatprep.mubr.f32.mxu1 %v7341_v54  ;;  %v7343_v0 = vand.u32 4294901760, %v7342_v57  ;;  %v24234_v15 = vand.u32 4294901760, %v21153_v9  ;;  %v7363_v39 = vsub.f32 %v21135_v40, %v24233_v41  ;;  %25071 = vst [vmem:[#allocation174_spill] sm:$0xff] %v21185_v47  ;;  %v25094_v54 = vld [vmem:[#allocation184_spill] sm:$0xff]  ;;  %v25097_v57 = vld [vmem:[#allocation215_spill] sm:$0xff] }
 0x80a   :  { %14397 = vmatprep.subr.mxu1 %v25067_v1  ;;  %v25107_v28 = vld [vmem:[#allocation224_spill] sm:$0xff]  ;;  %v25109_v29 = vld [vmem:[#allocation225_spill] sm:$0xff]  ;;  %v25114_v49 = vld [vmem:[#allocation219_spill] sm:$0xff]  ;;  %v25122_v43 = vand.u32 4294901760, %v21153_v9 }
 0x80b   :  { %14398 = vmatpush3.msra.mxu1 %v25068_v46  ;;  %7344 = vmatprep.mubr.f32.mxu0 %v7343_v0  ;;  %v7357_v19 = vsub.f32 %v21153_v9, %v24234_v15  ;;  %v7364_v5 = vand.u32 4294901760, %v7363_v39  ;;  %v25099_v0 = vld [vmem:[#allocation217_spill] sm:$0xff]  ;;  %v25103_v39 = vld [vmem:[#allocation222_spill] sm:$0xff]  ;;  %v25110_v41 = vld [vmem:[#allocation216_spill] sm:$0xff] }
 0x80c   :  { %14399 = vmatprep.subr.mxu1 %v25070_v63  ;;  %7350 = vmatmul.mubr.f32.vlgmr.msra.gmra.mxu0 %v7349_v26  ;;  %v25100_v26 = vld [vmem:[#allocation205_spill] sm:$0xff]  ;;  %v25117_v18 = vld [vmem:[#allocation236_spill] sm:$0xff]  ;;  %v25118_v44 = vld [vmem:[#allocation226_spill] sm:$0xff] }
 0x80d   :  { %14354 = vmatpush3.msra.mxu0 %v25072_v34  ;;  %14400 = vmatpush3.msra.mxu1 %v25073_v20  ;;  %v7358_v60 = vand.u32 4294901760, %v7357_v19  ;;  %v25102_v19 = vld [vmem:[#allocation210_spill] sm:$0xff]  ;;  %v25111_v15 = vld [vmem:[#allocation229_spill] sm:$0xff]  ;;  %v25120_v14 = vld [vmem:[#allocation187_spill] sm:$0xff] }
 0x80e   :  { %14355 = vmatprep.subr.mxu0 %v25074_v61  ;;  %14401 = vmatprep.subr.mxu1 %v25075_v56  ;;  %v25116_v47 = vld [vmem:[#allocation221_spill] sm:$0xff]  ;;  %v25121_v51 = vld [vmem:[#allocation227_spill] sm:$0xff] }
 0x80f   :  { %14356 = vmatpush3.msra.mxu0 %v25076_v24  ;;  %14402 = vmatpush3.msra.mxu1 %v25077_v6 }
 0x810   :  { %7359 = vmatprep.mubr.f32.mxu0 %v7358_v60  ;;  %14357 = vmatprep.subr.mxu0 %v25078_v4  ;;  %v25104_v60 = vld [vmem:[#allocation212_spill] sm:$0xff] }
 0x811   :  { %14403 = vmatprep.subr.mxu1 %v25079_v12  ;;  %7365 = vmatmul.mubr.f32.gmra.mxu0 %v7364_v5  ;;  %v25105_v5 = vld [vmem:[#allocation223_spill] sm:$0xff] }
 0x812   :  { %14358 = vmatpush3.msra.mxu0 %v25080_v7  ;;  %14404 = vmatpush3.msra.mxu1 %v25081_v55 }
 0x813   :  { %14359 = vmatprep.subr.mxu0 %v25082_v38  ;;  %7739 = vmatprep.mubr.f32.mxu0 %v7340_v32  ;;  %v25093_v32 = vld [vmem:[#allocation209_spill] sm:$0xff] }
 0x814   :  { %14405 = vmatprep.subr.mxu1 %v25083_v50  ;;  %14360 = vmatpush3.msra.mxu0 %v25084_v58 }
 0x815   :  { %14406 = vmatpush3.msra.mxu1 %v25085_v36  ;;  %14361 = vmatprep.subr.mxu0 %v25086_v27 }
 0x816   :  { %14407 = vmatprep.subr.mxu1 %v25087_v16  ;;  %14362 = vmatpush3.msra.mxu0 %v25088_v13 }
 0x817   :  { %14408 = vmatpush3.msra.mxu1 %v25089_v37  ;;  %14363 = vmatprep.subr.mxu0 %v25090_v53 }
 0x818   :  { %14409 = vmatprep.subr.mxu1 %v25091_v62  ;;  %14364 = vmatpush3.msra.mxu0 %v25092_v3 }
 0x819   :  { %14410 = vmatpush3.msra.mxu1 %v25093_v32  ;;  %14365 = vmatprep.subr.mxu0 %v25094_v54 }
 0x81a   :  { %14411 = vmatprep.subr.mxu1 %v25095_v17  ;;  %14366 = vmatpush3.msra.mxu0 %v25096_v22 }
 0x81b   :  { %14412 = vmatpush3.msra.mxu1 %v25097_v57  ;;  %14367 = vmatprep.subr.mxu0 %v25098_v42 }
 0x81c   :  { %14413 = vmatprep.subr.mxu1 %v25099_v0  ;;  %14368 = vmatpush3.msra.mxu0 %v25100_v26 }
 0x81d   :  { %14414 = vmatpush3.msra.mxu1 %v25101_v21  ;;  %14369 = vmatprep.subr.mxu0 %v25102_v19 }
 0x81e   :  { %14415 = vmatprep.subr.mxu1 %v25103_v39  ;;  %14370 = vmatpush3.msra.mxu0 %v25104_v60 }
 0x81f   :  { %14416 = vmatpush3.msra.mxu1 %v25105_v5  ;;  %14371 = vmatprep.subr.mxu0 %v25106_v11 }
 0x820   :  { %14417 = vmatprep.subr.mxu1 %v25107_v28  ;;  %14372 = vmatpush3.msra.mxu0 %v25108_v59 }
 0x821   :  { %14418 = vmatpush3.msra.mxu1 %v25109_v29  ;;  %14373 = vmatprep.subr.mxu0 %v25110_v41 }
 0x822   :  { %14419 = vmatprep.subr.mxu1 %v25111_v15  ;;  %14374 = vmatpush3.msra.mxu0 %v25112_v45 }
 0x823   :  { %14420 = vmatpush3.msra.mxu1 %v25113_v52  ;;  %14375 = vmatprep.subr.mxu0 %v25114_v49  ;;  %v25123_v49 = vld [vmem:[#allocation228_spill] sm:$0xff] }
 0x824   :  { %14421 = vmatprep.subr.mxu1 %v25115_v33  ;;  %14376 = vmatpush3.msra.mxu0 %v25116_v47  ;;  %v25124_v47 = vld [vmem:[#allocation230_spill] sm:$0xff] }
 0x825   :  { %14422 = vmatpush3.msra.mxu1 %v25117_v18  ;;  %14377 = vmatprep.subr.mxu0 %v25118_v44  ;;  %v25125_v44 = vld [vmem:[#allocation233_spill] sm:$0xff] }
 0x826   :  { %7859 = vmatmul.mubr.f32.vlgmr.msra.gmra.mxu1 %v25119_v31  ;;  %14467 = vmatprep.subr.mxu1 %v25120_v14  ;;  %v25126_v31 = vand.u32 4294901760, %v21135_v40  ;;  %v25127_v14 = vld [vmem:[#allocation234_spill] sm:$0xff] }
 0x827   :  { %14378 = vmatpush3.msra.mxu0 %v25121_v51  ;;  %7866 = vmatprep.mubr.f32.mxu1 %v25122_v43  ;;  %v25128_v43 = vld [vmem:[#allocation235_spill] sm:$0xff] }
 0x828   :  { %14468 = vmatpush3.msra.mxu1 %v25059_v8  ;;  %14379 = vmatprep.subr.mxu0 %v25123_v49  ;;  %v25129_v8 = vld [vmem:[#allocation237_spill] sm:$0xff] }
 0x829   :  { %14469 = vmatprep.subr.mxu1 %v25061_v2  ;;  %14380 = vmatpush3.msra.mxu0 %v25124_v47  ;;  %v7209_v2 = vld [vmem:[#allocation12 + $0xf8] sm:$0xff] }
 0x82a   :  { %14470 = vmatpush3.msra.mxu1 %v25063_v10  ;;  %14381 = vmatprep.subr.mxu0 %v25125_v44  ;;  %v25130_v10 = vld [vmem:[#allocation193_spill] sm:$0xff] }
 0x82b   :  { %7870 = vmatmul.mubr.f32.gmra.mxu1 %v25126_v31  ;;  %14471 = vmatprep.subr.mxu1 %v25064_v35  ;;  %v25131_v31 = vand.u32 4294901760, %v25130_v10  ;;  %v25132_v35 = vand.u32 4294901760, %v25072_v34  ;;  %v25135_v34 = vand.u32 4294901760, %v25078_v4  ;;  %v7191_v4 = vld [vmem:[#allocation12 + $0x68] sm:$0xff] }
 0x82c   :  { %14382 = vmatpush3.msra.mxu0 %v25127_v14  ;;  %14472 = vmatpush3.msra.mxu1 %v25066_v25  ;;  %v21263_v25 = vand.u32 4294901760, %v7209_v2  ;;  %v21309_v10 = vand.u32 4294901760, %v7191_v4 }
 0x82d   :  { %8147 = vmatprep.mubr.f32.mxu1 %v21111_v23  ;;  %14383 = vmatprep.subr.mxu0 %v25128_v43 }
 0x82e   :  { %14473 = vmatprep.subr.mxu1 %v25067_v1  ;;  %14384 = vmatpush3.msra.mxu0 %v25129_v8  ;;  %v7193_v1 = vld [vmem:[#allocation12 + $0x78] sm:$0xff]  ;;  %v25133_v8 = vand.u32 4294901760, %v25074_v61  ;;  %v25136_v61 = vand.u32 4294901760, %v25080_v7 }
 0x82f   :  { %14474 = vmatpush3.msra.mxu1 %v25068_v46  ;;  %7742 = vmatmul.mubr.f32.vlgmr.msra.gmra.mxu0 %v21115_v30  ;;  %v25134_v30 = vand.u32 4294901760, %v25076_v24  ;;  %v7208_v46 = vld [vmem:[#allocation12 + $0xf0] sm:$0xff]  ;;  %v7207_v24 = vld [vmem:[#allocation12 + $0xe8] sm:$0xff] }
 0x830   :  { %14429 = vmatprep.subr.mxu0 %v25131_v31  ;;  %14475 = vmatprep.subr.mxu1 %v25070_v63  ;;  %v7192_v63 = vld [vmem:[#allocation12 + $0x70] sm:$0xff]  ;;  %v7205_v31 = vld [vmem:[#allocation12 + $0xd8] sm:$0xff] }
 0x831   :  { %7748 = vmatprep.mubr.f32.mxu0 %v21153_v9  ;;  %14430 = vmatpush3.msra.mxu0 %v25132_v35  ;;  %v21273_v9 = vand.u32 4294901760, %v7193_v1 }
 0x832   :  { %14476 = vmatpush3.msra.mxu1 %v25073_v20  ;;  %14431 = vmatprep.subr.mxu0 %v25133_v8  ;;  %v21279_v20 = vsub.f32 %v7209_v2, %v21263_v25  ;;  %v25139_v8 = vand.u32 4294901760, %v25086_v27  ;;  %v7190_v2 = vld [vmem:[#allocation12 + $0x60] sm:$0xff] }
 0x833   :  { %14477 = vmatprep.subr.mxu1 %v25075_v56  ;;  %14432 = vmatpush3.msra.mxu0 %v25134_v30  ;;  %v21284_v56 = vand.u32 4294901760, %v7208_v46  ;;  %v21295_v7 = vsub.f32 %v7193_v1, %v21273_v9  ;;  %v21323_v30 = vand.u32 4294901760, %v7190_v2 }
 0x834   :  { %14478 = vmatpush3.msra.mxu1 %v25077_v6  ;;  %7751 = vmatmul.mubr.f32.gmra.mxu0 %v21135_v40  ;;  %v25137_v40 = vand.u32 4294901760, %v25082_v38  ;;  %v21289_v6 = vand.u32 4294901760, %v7192_v63  ;;  %v21301_v38 = vand.u32 4294901760, %v7207_v24 }
 0x835   :  { %14433 = vmatprep.subr.mxu0 %v25135_v34  ;;  %14479 = vmatprep.subr.mxu1 %v25079_v12  ;;  %v25138_v12 = vand.u32 4294901760, %v25084_v58  ;;  %v21307_v58 = vsub.f32 %v7208_v46, %v21284_v56  ;;  %v24255_v1 = vand.u32 4294901760, %v21295_v7  ;;  %v7204_v46 = vld [vmem:[#allocation12 + $0xd0] sm:$0xff]  ;;  %v25147_v34 = vand.u32 4294901760, %v25096_v22 }
 0x836   :  { %14434 = vmatpush3.msra.mxu0 %v25136_v61  ;;  %8036 = vmatprep.mubr.f32.mxu0 %v21111_v23  ;;  %v7206_v23 = vld [vmem:[#allocation12 + $0xe0] sm:$0xff]  ;;  %v21315_v27 = vsub.f32 %v7192_v63, %v21289_v6  ;;  %v7188_v63 = vld [vmem:[#allocation12 + $0x50] sm:$0xff]  ;;  %v21354_v22 = vand.u32 4294901760, %v7204_v46 }
 0x837   :  { %14480 = vmatpush3.msra.mxu1 %v25081_v55  ;;  %14435 = vmatprep.subr.mxu0 %v25137_v40  ;;  %v24256_v55 = vand.u32 4294901760, %v21279_v20  ;;  %25141 = vst [vmem:[#allocation203_spill] sm:$0xff] %v21307_v58  ;;  %v21317_v35 = vand.u32 4294901760, %v7206_v23  ;;  %v7203_v40 = vld [vmem:[#allocation12 + $0xc8] sm:$0xff] }
 0x838   :  { %14481 = vmatprep.subr.mxu1 %v25083_v50  ;;  %14436 = vmatpush3.msra.mxu0 %v25138_v12  ;;  %v25140_v50 = vand.u32 4294901760, %v25088_v13  ;;  %25143 = vst [vmem:[#allocation200_spill] sm:$0xff] %v21315_v27  ;;  %v25144_v13 = vand.u32 4294901760, %v25092_v3  ;;  %v21336_v3 = vand.u32 4294901760, %v7205_v31  ;;  %v24251_v12 = vand.u32 4294901760, %v21315_v27 }
 0x839   :  { %14482 = vmatpush3.msra.mxu1 %v25085_v36  ;;  %14437 = vmatprep.subr.mxu0 %v25139_v8  ;;  %v25142_v36 = vand.u32 4294901760, %v25090_v53  ;;  %v21331_v53 = vsub.f32 %v21279_v20, %v24256_v55  ;;  %v7187_v8 = vld [vmem:[#allocation12 + $0x48] sm:$0xff]  ;;  %v25175_v55 = vld [vmem:[#allocation197_spill] sm:$0xff] }
 0x83a   :  { %14483 = vmatprep.subr.mxu1 %v25087_v16  ;;  %14438 = vmatpush3.msra.mxu0 %v25140_v50  ;;  %v7189_v16 = vld [vmem:[#allocation12 + $0x58] sm:$0xff]  ;;  %v21367_v50 = vand.u32 4294901760, %v7188_v63 }
 0x83b   :  { %14484 = vmatpush3.msra.mxu1 %v25089_v37  ;;  %14439 = vmatprep.subr.mxu0 %v25142_v36  ;;  %v25145_v37 = vand.u32 4294901760, %v25094_v54  ;;  %v21343_v54 = vsub.f32 %v7191_v4, %v21309_v10  ;;  %v21345_v61 = vand.u32 4294901760, %v7189_v16  ;;  %v25151_v4 = vand.u32 4294901760, %v25100_v26 }
 0x83c   :  { %14485 = vmatprep.subr.mxu1 %v25091_v62  ;;  %14440 = vmatpush3.msra.mxu0 %v25144_v13  ;;  %v21334_v62 = vsub.f32 %v7207_v24, %v21301_v38  ;;  %v25149_v24 = vand.u32 4294901760, %v25098_v42  ;;  %v21365_v42 = vsub.f32 %v7190_v2, %v21323_v30  ;;  %v25153_v36 = vand.u32 4294901760, %v25102_v19 }
 0x83d   :  { %14486 = vmatpush3.msra.mxu1 %v25093_v32  ;;  %14441 = vmatprep.subr.mxu0 %v25145_v37  ;;  %v24253_v32 = vand.u32 4294901760, %v21307_v58  ;;  %25148 = vst [vmem:[#allocation198_spill] sm:$0xff] %v21343_v54  ;;  %v21375_v13 = vsub.f32 %v7205_v31, %v21336_v3  ;;  %v21377_v37 = vand.u32 4294901760, %v7203_v40  ;;  %v25155_v2 = vand.u32 4294901760, %v25104_v60 }
 0x83e   :  { %25146 = vst [vmem:[#allocation201_spill] sm:$0xff] %v21334_v62  ;;  %14487 = vmatprep.subr.mxu1 %v25095_v17  ;;  %14442 = vmatpush3.msra.mxu0 %v25147_v34  ;;  %v21352_v17 = vsub.f32 %v7206_v23, %v21317_v35  ;;  %25152 = vst [vmem:[#allocation199_spill] sm:$0xff] %v21365_v42  ;;  %v7202_v23 = vld [vmem:[#allocation12 + $0xc0] sm:$0xff]  ;;  %v24249_v26 = vand.u32 4294901760, %v21334_v62  ;;  %v24250_v19 = vand.u32 4294901760, %v21343_v54  ;;  %v21391_v31 = vand.u32 4294901760, %v7187_v8 }
 0x83f   :  { %14488 = vmatpush3.msra.mxu1 %v25097_v57  ;;  %14443 = vmatprep.subr.mxu0 %v25149_v24  ;;  %v21362_v57 = vsub.f32 %v21295_v7, %v24255_v1  ;;  %25154 = vst [vmem:[#allocation179_spill] sm:$0xff] %v21375_v13  ;;  %v7186_v34 = vld [vmem:[#allocation12 + $0x40] sm:$0xff]  ;;  %v25157_v24 = vand.u32 4294901760, %v25106_v11 }
 0x840   :  { %25150 = vst [vmem:[#allocation186_spill] sm:$0xff] %v21352_v17  ;;  %14489 = vmatprep.subr.mxu1 %v25099_v0  ;;  %14444 = vmatpush3.msra.mxu0 %v25151_v4  ;;  %v8405_v0 = vand.u32 4294901760, %v21331_v53  ;;  %v21389_v53 = vsub.f32 %v7189_v16, %v21345_v61  ;;  %v24252_v60 = vand.u32 4294901760, %v21352_v17  ;;  %v21403_v4 = vsub.f32 %v7204_v46, %v21354_v22 }
 0x841   :  { %14490 = vmatpush3.msra.mxu1 %v25101_v21  ;;  %14445 = vmatprep.subr.mxu0 %v25153_v36  ;;  %v21385_v21 = vsub.f32 %v21307_v58, %v24253_v32  ;;  %v21405_v36 = vand.u32 4294901760, %v7202_v23  ;;  %v25159_v16 = vand.u32 4294901760, %v25108_v59  ;;  %v8293_v11 = vand.u32 4294901760, %v21362_v57  ;;  %v25173_v32 = vld [vmem:[#allocation226_spill] sm:$0xff] }
 0x842   :  { %14491 = vmatprep.subr.mxu1 %v25103_v39  ;;  %14446 = vmatpush3.msra.mxu0 %v25155_v2  ;;  %25156 = vst [vmem:[#allocation202_spill] sm:$0xff] %v21389_v53  ;;  %v21399_v39 = vsub.f32 %v21315_v27, %v24251_v12  ;;  %25158 = vst [vmem:[#allocation180_spill] sm:$0xff] %v21403_v4  ;;  %v21413_v2 = vsub.f32 %v7188_v63, %v21367_v50  ;;  %v25161_v46 = vand.u32 4294901760, %v25110_v41  ;;  %v25169_v12 = vld [vmem:[#allocation221_spill] sm:$0xff] }
 0x843   :  { %14492 = vmatpush3.msra.mxu1 %v25105_v5  ;;  %14447 = vmatprep.subr.mxu0 %v25157_v24  ;;  %v24254_v5 = vand.u32 4294901760, %v21365_v42  ;;  %v21415_v24 = vand.u32 4294901760, %v7186_v34  ;;  %v25162_v59 = vrot.slane %v21103_v48, 7  ;;  %v21430_v63 = vsub.f32 %v7203_v40, %v21377_v37  ;;  %v25166_v40 = vld [vmem:[#allocation219_spill] sm:$0xff] }
 0x844   :  { %14493 = vmatprep.subr.mxu1 %v25107_v28  ;;  %14448 = vmatpush3.msra.mxu0 %v25159_v16  ;;  %25160 = vst [vmem:[#allocation175_spill] sm:$0xff] %v21413_v2  ;;  %v21423_v28 = vsub.f32 %v21334_v62, %v24249_v26  ;;  %v24257_v16 = vand.u32 4294901760, %v21375_v13  ;;  %v8412_v41 = vand.u32 4294901760, %v21385_v21  ;;  %v24258_v48 = vand.u32 4294901760, %v21389_v53  ;;  %v7201_v26 = vld [vmem:[#allocation12 + $0xb8] sm:$0xff] }
 0x845   :  { %14494 = vmatpush3.msra.mxu1 %v25109_v29  ;;  %14449 = vmatprep.subr.mxu0 %v25161_v46  ;;  %v7177_v57 = vsel %vm3632_vm1, 0.0, %v25162_v59  ;;  %25163 = vst [vmem:[#allocation181_spill] sm:$0xff] %v21430_v63  ;;  %v25164_v29 = vand.u32 4294901760, %v25112_v45  ;;  %v21439_v46 = vsub.f32 %v21343_v54, %v24250_v19  ;;  %v21443_v59 = vsub.f32 %v7187_v8, %v21391_v31  ;;  %v7185_v8 = vld [vmem:[#allocation12 + $0x38] sm:$0xff] }
 0x846   :  { %14495 = vmatprep.subr.mxu1 %v25111_v15  ;;  %v25167_v15 = vand.u32 4294901760, %v25166_v40  ;;  %v8300_v45 = vand.u32 4294901760, %v21399_v39  ;;  %v21452_v21 = vsub.f32 %v21352_v17, %v24252_v60  ;;  %v21456_v19 = vsub.f32 %v7202_v23, %v21405_v36  ;;  %v7200_v23 = vld [vmem:[#allocation12 + $0xb0] sm:$0xff] }
 0x847   :  { %14450 = vmatpush3.msra.mxu0 %v25164_v29  ;;  %25165 = vst [vmem:[#allocation183_spill] sm:$0xff] %v21443_v59  ;;  %14496 = vmatpush3.msra.mxu1 %v25113_v52  ;;  %v24263_v29 = vand.u32 4294901760, %v21403_v4  ;;  %v25170_v52 = vand.u32 4294901760, %v25169_v12  ;;  %v21461_v40 = vand.u32 4294901760, %v7177_v57  ;;  %v21466_v39 = vsub.f32 %v21365_v42, %v24254_v5  ;;  %v25177_v5 = vld [vmem:[#allocation241_spill] sm:$0xff] }
 0x848   :  { %14451 = vmatprep.subr.mxu0 %v25167_v15  ;;  %25168 = vst [vmem:[#allocation182_spill] sm:$0xff] %v21456_v19  ;;  %14497 = vmatprep.subr.mxu1 %v25115_v33  ;;  %v21470_v60 = vsub.f32 %v7186_v34, %v21415_v24  ;;  %v25174_v33 = vand.u32 4294901760, %v25173_v32  ;;  %v8419_v12 = vand.u32 4294901760, %v21423_v28  ;;  %v21482_v1 = vand.u32 4294901760, %v7201_v26  ;;  %v7199_v32 = vld [vmem:[#allocation12 + $0xa8] sm:$0xff] }
 0x849   :  { %14452 = vmatpush3.msra.mxu0 %v25170_v52  ;;  %25171 = vst [vmem:[#allocation176_spill] sm:$0xff] %v21461_v40  ;;  %14498 = vmatpush3.msra.mxu1 %v25117_v18  ;;  %v21479_v52 = vsub.f32 %v21375_v13, %v24257_v16  ;;  %v8307_v34 = vand.u32 4294901760, %v21439_v46  ;;  %v21489_v18 = vsub.f32 %v21389_v53, %v24258_v48  ;;  %v21492_v28 = vand.u32 4294901760, %v7185_v8  ;;  %v7183_v46 = vld [vmem:[#allocation12 + $0x28] sm:$0xff] }
 0x84a   :  { %25172 = vst [vmem:[#allocation185_spill] sm:$0xff] %v21470_v60  ;;  %14453 = vmatprep.subr.mxu0 %v25174_v33  ;;  %8149 = vmatmul.mubr.f32.vlgmr.msra.gmra.mxu1 %v25175_v55  ;;  %v7184_v33 = vld [vmem:[#allocation12 + $0x30] sm:$0xff]  ;;  %v25176_v16 = vand.u32 4294901760, %v25121_v51  ;;  %v8426_v15 = vand.u32 4294901760, %v21452_v21  ;;  %v21504_v48 = vand.u32 4294901760, %v7200_v23  ;;  %v25178_v53 = vand.u32 4294901760, %v25123_v49 }
 0x84b   :  { %14543 = vmatprep.subr.mxu1 %v8405_v0  ;;  %8154 = vmatprep.mubr.f32.mxu1 %v25177_v5  ;;  %v21501_v0 = vsub.f32 %v21403_v4, %v24263_v29  ;;  %v8314_v51 = vand.u32 4294901760, %v21466_v39  ;;  %v21515_v13 = vsub.f32 %v7177_v57, %v21461_v40  ;;  %v25180_v4 = vand.u32 4294901760, %v25124_v47  ;;  %v7198_v57 = vld [vmem:[#allocation12 + $0xa0] sm:$0xff] }
 0x84c   :  { %14454 = vmatpush3.msra.mxu0 %v25176_v16  ;;  %14544 = vmatpush3.msra.mxu1 %v8293_v11  ;;  %v25179_v16 = vand.u32 4294901760, %v21413_v2  ;;  %v8433_v49 = vand.u32 4294901760, %v21479_v52  ;;  %v21527_v39 = vsub.f32 %v7201_v26, %v21482_v1  ;;  %v25184_v29 = vand.u32 4294901760, %v25125_v44  ;;  %v7182_v26 = vld [vmem:[#allocation12 + $0x20] sm:$0xff] }
 0x84d   :  { %14455 = vmatprep.subr.mxu0 %v25178_v53  ;;  %14545 = vmatprep.subr.mxu1 %v8412_v41  ;;  %v25181_v53 = vand.u32 4294901760, %v21430_v63  ;;  %v8321_v47 = vand.u32 4294901760, %v21489_v18  ;;  %v21540_v52 = vsub.f32 %v7185_v8, %v21492_v28  ;;  %v25189_v44 = vand.u32 4294901760, %v21456_v19  ;;  %v7197_v8 = vld [vmem:[#allocation12 + $0x98] sm:$0xff] }
 0x84e   :  { %v21512_v21 = vsub.f32 %v21413_v2, %v25179_v16  ;;  %14456 = vmatpush3.msra.mxu0 %v25180_v4  ;;  %25182 = vst [vmem:[#allocation177_spill] sm:$0xff] %v21527_v39  ;;  %v21529_v16 = vand.u32 4294901760, %v7184_v33  ;;  %14546 = vmatpush3.msra.mxu1 %v8300_v45  ;;  %v25185_v4 = vand.u32 4294901760, %v21443_v59  ;;  %v8440_v45 = vand.u32 4294901760, %v21501_v0 }
 0x84f   :  { %v21524_v11 = vsub.f32 %v21430_v63, %v25181_v53  ;;  %14457 = vmatprep.subr.mxu0 %v25184_v29  ;;  %25186 = vst [vmem:[#allocation178_spill] sm:$0xff] %v21540_v52  ;;  %v21542_v53 = vand.u32 4294901760, %v7199_v32  ;;  %v25188_v63 = vld [vmem:[#allocation243_spill] sm:$0xff]  ;;  %14547 = vmatprep.subr.mxu1 %v8419_v12  ;;  %v21549_v29 = vsub.f32 %v21456_v19, %v25189_v44  ;;  %v25192_v0 = vand.u32 4294901760, %v21470_v60  ;;  %v7196_v12 = vld [vmem:[#allocation12 + $0x90] sm:$0xff] }
 0x850   :  { %25183 = vst [vmem:[#allocation194_spill] sm:$0xff] %v21529_v16  ;;  %v21537_v41 = vsub.f32 %v21443_v59, %v25185_v4  ;;  %8156 = vmatmul.mubr.f32.gmra.mxu1 %v25188_v63  ;;  %v21552_v18 = vsub.f32 %v7200_v23, %v21504_v48  ;;  %v21554_v4 = vand.u32 4294901760, %v7183_v46  ;;  %v25191_v59 = vand.u32 4294901760, %v25127_v14  ;;  %v7181_v23 = vld [vmem:[#allocation12 + $0x18] sm:$0xff] }
 0x851   :  { %25187 = vst [vmem:[#allocation204_spill] sm:$0xff] %v21542_v53  ;;  %14548 = vmatpush3.msra.mxu1 %v8307_v34  ;;  %v8328_v2 = vand.u32 4294901760, %v21512_v21  ;;  %v21563_v42 = vsub.f32 %v21470_v60, %v25192_v0  ;;  %v21565_v44 = vand.u32 4294901760, %v7198_v57  ;;  %8513 = vmatprep.mubr.f32.mxu1 %v21461_v40  ;;  %v25193_v19 = vand.u32 4294901760, %v25128_v43  ;;  %v25194_v0 = vld [vmem:[#allocation237_spill] sm:$0xff] }
 0x852   :  { %25190 = vst [vmem:[#allocation188_spill] sm:$0xff] %v21552_v18  ;;  %14458 = vmatpush3.msra.mxu0 %v25191_v59  ;;  %v8447_v14 = vand.u32 4294901760, %v21524_v11  ;;  %v24288_v59 = vand.u32 4294901760, %v21527_v39  ;;  %v21573_v34 = vsub.f32 %v7184_v33, %v21529_v16  ;;  %v21575_v21 = vand.u32 4294901760, %v7182_v26  ;;  %14549 = vmatprep.subr.mxu1 %v8426_v15  ;;  %v7180_v11 = vld [vmem:[#allocation12 + $0x10] sm:$0xff]  ;;  %v7179_v15 = vld [vmem:[#allocation12 + $0x8] sm:$0xff] }
 0x853   :  { %14459 = vmatprep.subr.mxu0 %v25193_v19  ;;  %v25195_v60 = vand.u32 4294901760, %v25194_v0  ;;  %v8335_v17 = vand.u32 4294901760, %v21537_v41  ;;  %v21582_v43 = vsub.f32 %v7199_v32, %v21542_v53  ;;  %v21584_v19 = vand.u32 4294901760, %v7197_v8  ;;  %14550 = vmatpush3.msra.mxu1 %v8314_v51  ;;  %v7195_v41 = vld [vmem:[#allocation12 + $0x88] sm:$0xff] }
 0x854   :  { %v8454_v33 = vand.u32 4294901760, %v21549_v29  ;;  %v21590_v0 = vsub.f32 %v7183_v46, %v21554_v4  ;;  %14551 = vmatprep.subr.mxu1 %v8433_v49  ;;  %v25197_v32 = vand.u32 4294901760, %v21515_v13  ;;  %v8342_v51 = vand.u32 4294901760, %v21563_v42  ;;  %v7178_v49 = vld [vmem:[#allocation12] sm:$0xff] }
 0x855   :  { %14460 = vmatpush3.msra.mxu0 %v25195_v60  ;;  %v21592_v60 = vand.u32 4294901760, %v7181_v23  ;;  %v21602_v29 = vand.u32 4294901760, %v7196_v12  ;;  %v8460_v46 = vsub.f32 %v21527_v39, %v24288_v59  ;;  %v21613_v42 = vand.u32 4294901760, %v7180_v11  ;;  %14552 = vmatpush3.msra.mxu1 %v8321_v47 }
 0x856   :  { %8038 = vmatmul.mubr.f32.vlgmr.msra.gmra.mxu0 %v25175_v55  ;;  %25196 = vst [vmem:[#allocation206_spill] sm:$0xff] %v21590_v0  ;;  %14505 = vmatprep.subr.mxu0 %v21263_v25  ;;  %v8260_v40 = vsub.f32 %v21515_v13, %v25197_v32  ;;  %v21600_v55 = vsub.f32 %v7198_v57, %v21565_v44  ;;  %v7194_v57 = vld [vmem:[#allocation12 + $0x80] sm:$0xff]  ;;  %v25200_v54 = vand.u32 4294901760, %v21540_v52  ;;  %v21623_v59 = vand.u32 4294901760, %v7195_v41 }
 0x857   :  { %8043 = vmatprep.mubr.f32.mxu0 %v25177_v5  ;;  %14506 = vmatpush3.msra.mxu0 %v21273_v9  ;;  %v21611_v32 = vsub.f32 %v7182_v26, %v21575_v21  ;;  %25199 = vst [vmem:[#allocation207_spill] sm:$0xff] %v21613_v42  ;;  %v21621_v27 = vsub.f32 %v7197_v8, %v21584_v19  ;;  %v25201_v26 = vand.u32 4294901760, %v21552_v18 }
 0x858   :  { %25198 = vst [vmem:[#allocation195_spill] sm:$0xff] %v21600_v55  ;;  %14507 = vmatprep.subr.mxu0 %v21284_v56  ;;  %v8348_v5 = vsub.f32 %v21540_v52, %v25200_v54  ;;  %14553 = vmatprep.subr.mxu1 %v8440_v45  ;;  %v21631_v58 = vsub.f32 %v7181_v23, %v21592_v60  ;;  %v21633_v54 = vand.u32 4294901760, %v7179_v15  ;;  %v8261_v8 = vand.u32 4294901760, %v8260_v40 }
 0x859   :  { %14508 = vmatpush3.msra.mxu0 %v21289_v6  ;;  %v8467_v47 = vsub.f32 %v21552_v18, %v25201_v26  ;;  %14554 = vmatpush3.msra.mxu1 %v8328_v2  ;;  %v21638_v45 = vsub.f32 %v7196_v12, %v21602_v29  ;;  %v21640_v52 = vand.u32 4294901760, %v7194_v57  ;;  %v25203_v26 = vand.u32 4294901760, %v21573_v34 }
 0x85a   :  { %8045 = vmatmul.mubr.f32.gmra.mxu0 %v25188_v63  ;;  %14509 = vmatprep.subr.mxu0 %v21301_v38  ;;  %v21648_v2 = vsub.f32 %v7180_v11, %v21613_v42  ;;  %v21650_v63 = vand.u32 4294901760, %v7178_v49  ;;  %v8461_v40 = vand.u32 4294901760, %v8460_v46  ;;  %v25204_v12 = vand.u32 4294901760, %v21582_v43 }
 0x85b   :  { %25202 = vst [vmem:[#allocation190_spill] sm:$0xff] %v21638_v45  ;;  %14555 = vmatprep.subr.mxu1 %v8447_v14  ;;  %v8355_v23 = vsub.f32 %v21573_v34, %v25203_v26  ;;  %14510 = vmatpush3.msra.mxu0 %v21309_v10  ;;  %v21658_v18 = vsub.f32 %v7195_v41, %v21623_v59  ;;  %v8349_v11 = vand.u32 4294901760, %v8348_v5  ;;  %v25205_v26 = vand.u32 4294901760, %v21590_v0 }
 0x85c   :  { %8262 = vmatprep.mubr.f32.mxu0 %v8261_v8  ;;  %v8474_v62 = vsub.f32 %v21582_v43, %v25204_v12  ;;  %14556 = vmatpush3.msra.mxu1 %v8335_v17  ;;  %v21666_v46 = vsub.f32 %v7179_v15, %v21633_v54  ;;  %v8468_v12 = vand.u32 4294901760, %v8467_v47  ;;  %v25206_v41 = vand.u32 4294901760, %v21600_v55 }
 0x85d   :  { %14511 = vmatprep.subr.mxu0 %v21317_v35  ;;  %v8362_v39 = vsub.f32 %v21590_v0, %v25205_v26  ;;  %14557 = vmatprep.subr.mxu1 %v8454_v33  ;;  %v21674_v5 = vsub.f32 %v7194_v57, %v21640_v52  ;;  %v8356_v26 = vand.u32 4294901760, %v8355_v23  ;;  %v25207_v15 = vand.u32 4294901760, %v21611_v32 }
 0x85e   :  { %14512 = vmatpush3.msra.mxu0 %v21323_v30  ;;  %v8481_v17 = vsub.f32 %v21600_v55, %v25206_v41  ;;  %14558 = vmatpush3.msra.mxu1 %v8342_v51  ;;  %v21682_v47 = vsub.f32 %v7178_v49, %v21650_v63  ;;  %v8475_v41 = vand.u32 4294901760, %v8474_v62  ;;  %v25208_v57 = vand.u32 4294901760, %v21621_v27 }
 0x85f   :  { %14513 = vmatprep.subr.mxu0 %v21336_v3  ;;  %v8369_v33 = vsub.f32 %v21611_v32, %v25207_v15  ;;  %14559 = vmatprep.subr.mxu1 %v8461_v40  ;;  %v8363_v23 = vand.u32 4294901760, %v8362_v39  ;;  %v25209_v15 = vand.u32 4294901760, %v21631_v58  ;;  %v25210_v40 = vand.u32 4294901760, %v21638_v45 }
 0x860   :  { %14514 = vmatpush3.msra.mxu0 %v21345_v61  ;;  %v8488_v51 = vsub.f32 %v21621_v27, %v25208_v57  ;;  %14560 = vmatpush3.msra.mxu1 %v8349_v11  ;;  %v8482_v62 = vand.u32 4294901760, %v8481_v17  ;;  %v25211_v11 = vand.u32 4294901760, %v21648_v2  ;;  %v25212_v17 = vand.u32 4294901760, %v21658_v18 }
 0x861   :  { %14515 = vmatprep.subr.mxu0 %v21354_v22  ;;  %v8376_v8 = vsub.f32 %v21631_v58, %v25209_v15  ;;  %14561 = vmatprep.subr.mxu1 %v8468_v12  ;;  %v8495_v57 = vsub.f32 %v21638_v45, %v25210_v40  ;;  %v8370_v39 = vand.u32 4294901760, %v8369_v33  ;;  %v25213_v45 = vld [vmem:[#allocation238_spill] sm:$0xff] }
 0x862   :  { %14516 = vmatpush3.msra.mxu0 %v21367_v50  ;;  %14562 = vmatpush3.msra.mxu1 %v8356_v26  ;;  %v8383_v15 = vsub.f32 %v21648_v2, %v25211_v11  ;;  %v8489_v12 = vand.u32 4294901760, %v8488_v51  ;;  %v8502_v40 = vsub.f32 %v21658_v18, %v25212_v17  ;;  %v25214_v14 = vrot.slane %v25213_v45, 7 }
 0x863   :  { %14517 = vmatprep.subr.mxu0 %v21377_v37  ;;  %14563 = vmatprep.subr.mxu1 %v8475_v41  ;;  %v8377_v33 = vand.u32 4294901760, %v8376_v8  ;;  %v25215_v11 = vand.u32 4294901760, %v21666_v46  ;;  %v8496_v41 = vand.u32 4294901760, %v8495_v57  ;;  %v25216_v51 = vand.u32 4294901760, %v21674_v5 }
 0x864   :  { %14518 = vmatpush3.msra.mxu0 %v21391_v31  ;;  %v7176_v26 = vsel %vm3632_vm1, 0.0, %v25214_v14  ;;  %14564 = vmatpush3.msra.mxu1 %v8363_v23  ;;  %v8384_v45 = vand.u32 4294901760, %v8383_v15  ;;  %v25217_v14 = vand.u32 4294901760, %v21682_v47 }
 0x865   :  { %14519 = vmatprep.subr.mxu0 %v21405_v36  ;;  %v8390_v49 = vsub.f32 %v21666_v46, %v25215_v11  ;;  %14565 = vmatprep.subr.mxu1 %v8482_v62  ;;  %v8509_v17 = vsub.f32 %v21674_v5, %v25216_v51  ;;  %v21723_v23 = vand.u32 4294901760, %v7176_v26  ;;  %v8503_v62 = vand.u32 4294901760, %v8502_v40  ;;  %v25219_v11 = vld [vmem:[#allocation191_spill] sm:$0xff]  ;;  %v25221_v40 = vld [vmem:[#allocation242_spill] sm:$0xff] }
 0x866   :  { %14520 = vmatpush3.msra.mxu0 %v21415_v24  ;;  %14566 = vmatpush3.msra.mxu1 %v8370_v39  ;;  %v8397_v8 = vsub.f32 %v21682_v47, %v25217_v14  ;;  %v21728_v51 = vand.u32 4294901760, %v25219_v11 }
 0x867   :  { %14521 = vmatprep.subr.mxu0 %v21482_v1  ;;  %25218 = vst [vmem:[#allocation208_spill] sm:$0xff] %v21723_v23  ;;  %14567 = vmatprep.subr.mxu1 %v8489_v12  ;;  %v8391_v57 = vand.u32 4294901760, %v8390_v49  ;;  %v8510_v39 = vand.u32 4294901760, %v8509_v17  ;;  %v21733_v12 = vsub.f32 %v7176_v26, %v21723_v23 }
 0x868   :  { %14522 = vmatpush3.msra.mxu0 %v21492_v28  ;;  %14568 = vmatpush3.msra.mxu1 %v8377_v33  ;;  %25220 = vst [vmem:[#allocation192_spill] sm:$0xff] %v21728_v51  ;;  %v8398_v15 = vand.u32 4294901760, %v8397_v8  ;;  %v21737_v33 = vand.u32 4294901760, %v25221_v40  ;;  %v21742_v49 = vsub.f32 %v25219_v11, %v21728_v51 }
 0x869   :  { %14523 = vmatprep.subr.mxu0 %v21504_v48  ;;  %14569 = vmatprep.subr.mxu1 %v8496_v41  ;;  %v24301_v26 = vand.u32 4294901760, %v21733_v12 }
 0x86a   :  { %14524 = vmatpush3.msra.mxu0 %v21529_v16  ;;  %14570 = vmatpush3.msra.mxu1 %v8384_v45  ;;  %25222 = vst [vmem:[#allocation209_spill] sm:$0xff] %v21737_v33  ;;  %v21751_v41 = vsub.f32 %v25221_v40, %v21737_v33  ;;  %v24300_v17 = vand.u32 4294901760, %v21742_v49 }
 0x86b   :  { %14525 = vmatprep.subr.mxu0 %v21542_v53  ;;  %14571 = vmatprep.subr.mxu1 %v8503_v62  ;;  %v8266_v45 = vsub.f32 %v21733_v12, %v24301_v26  ;;  %v25223_v62 = vand.u32 4294901760, %v21515_v13  ;;  %v25235_v26 = vld [vmem:[#allocation183_spill] sm:$0xff] }
 0x86c   :  { %14526 = vmatpush3.msra.mxu0 %v21554_v4  ;;  %14572 = vmatpush3.msra.mxu1 %v8391_v57  ;;  %v24299_v14 = vand.u32 4294901760, %v21751_v41  ;;  %v8275_v8 = vsub.f32 %v21742_v49, %v24300_v17  ;;  %v25234_v17 = vld [vmem:[#allocation181_spill] sm:$0xff] }
 0x86d   :  { %14527 = vmatprep.subr.mxu0 %v21565_v44  ;;  %14573 = vmatprep.subr.mxu1 %v8510_v39  ;;  %v8267_v57 = vand.u32 4294901760, %v8266_v45  ;;  %v25225_v45 = vld [vmem:[#allocation200_spill] sm:$0xff] }
 0x86e   :  { %14528 = vmatpush3.msra.mxu0 %v21575_v21  ;;  %14574 = vmatpush3.msra.mxu1 %v8398_v15  ;;  %v8281_v11 = vsub.f32 %v21751_v41, %v24299_v14  ;;  %v8276_v39 = vand.u32 4294901760, %v8275_v8  ;;  %v25224_v15 = vld [vmem:[#allocation203_spill] sm:$0xff]  ;;  %v25226_v8 = vld [vmem:[#allocation201_spill] sm:$0xff]  ;;  %v25232_v14 = vld [vmem:[#allocation180_spill] sm:$0xff] }
 0x86f   :  { %14529 = vmatprep.subr.mxu0 %v21584_v19  ;;  %8515 = vmatmul.mubr.f32.vlgmr.msra.gmra.mxu1 %v21723_v23  ;;  %v25238_v23 = vld [vmem:[#allocation177_spill] sm:$0xff] }
 0x870   :  { %14619 = vmatprep.subr.mxu1 %v21263_v25  ;;  %14530 = vmatpush3.msra.mxu0 %v21592_v60  ;;  %v8282_v40 = vand.u32 4294901760, %v8281_v11  ;;  %v25229_v11 = vld [vmem:[#allocation199_spill] sm:$0xff] }
 0x871   :  { %8520 = vmatprep.mubr.f32.mxu1 %v21728_v51  ;;  %14620 = vmatpush3.msra.mxu1 %v21273_v9  ;;  %v25237_v51 = vld [vmem:[#allocation185_spill] sm:$0xff] }
 0x872   :  { %14531 = vmatprep.subr.mxu0 %v21602_v29  ;;  %14621 = vmatprep.subr.mxu1 %v21284_v56 }
 0x873   :  { %14532 = vmatpush3.msra.mxu0 %v21613_v42  ;;  %14622 = vmatpush3.msra.mxu1 %v21289_v6 }
 0x874   :  { %14533 = vmatprep.subr.mxu0 %v21623_v59  ;;  %8522 = vmatmul.mubr.f32.gmra.mxu1 %v21737_v33  ;;  %v25236_v33 = vld [vmem:[#allocation182_spill] sm:$0xff] }
 0x875   :  { %14623 = vmatprep.subr.mxu1 %v21301_v38  ;;  %14534 = vmatpush3.msra.mxu0 %v21633_v54 }
 0x876   :  { %14624 = vmatpush3.msra.mxu1 %v21309_v10  ;;  %8773 = vmatprep.mubr.f32.mxu1 %v25223_v62  ;;  %v25227_v62 = vld [vmem:[#allocation198_spill] sm:$0xff] }
 0x877   :  { %14535 = vmatprep.subr.mxu0 %v21640_v52  ;;  %14625 = vmatprep.subr.mxu1 %v21317_v35 }
 0x878   :  { %14536 = vmatpush3.msra.mxu0 %v21650_v63  ;;  %14626 = vmatpush3.msra.mxu1 %v21323_v30 }
 0x879   :  { %8268 = vmatmul.mubr.f32.vlgmr.msra.gmra.mxu0 %v8267_v57  ;;  %14581 = vmatprep.subr.mxu0 %v21279_v20  ;;  %v25228_v57 = vld [vmem:[#allocation186_spill] sm:$0xff] }
 0x87a   :  { %14627 = vmatprep.subr.mxu1 %v21336_v3  ;;  %8277 = vmatprep.mubr.f32.mxu0 %v8276_v39  ;;  %v25230_v39 = vld [vmem:[#allocation179_spill] sm:$0xff] }
 0x87b   :  { %14582 = vmatpush3.msra.mxu0 %v21295_v7  ;;  %14628 = vmatpush3.msra.mxu1 %v21345_v61 }
 0x87c   :  { %14583 = vmatprep.subr.mxu0 %v25224_v15  ;;  %14629 = vmatprep.subr.mxu1 %v21354_v22 }
 0x87d   :  { %14584 = vmatpush3.msra.mxu0 %v25225_v45  ;;  %14630 = vmatpush3.msra.mxu1 %v21367_v50 }
 0x87e   :  { %8283 = vmatmul.mubr.f32.gmra.mxu0 %v8282_v40  ;;  %14585 = vmatprep.subr.mxu0 %v25226_v8  ;;  %v25231_v40 = vld [vmem:[#allocation202_spill] sm:$0xff] }
 0x87f   :  { %14631 = vmatprep.subr.mxu1 %v21377_v37  ;;  %14586 = vmatpush3.msra.mxu0 %v25227_v62 }
 0x880   :  { %8657 = vmatprep.mubr.f32.mxu0 %v21515_v13  ;;  %14632 = vmatpush3.msra.mxu1 %v21391_v31  ;;  %v25233_v13 = vld [vmem:[#allocation175_spill] sm:$0xff] }
 0x881   :  { %14587 = vmatprep.subr.mxu0 %v25228_v57  ;;  %14633 = vmatprep.subr.mxu1 %v21405_v36 }
 0x882   :  { %14588 = vmatpush3.msra.mxu0 %v25229_v11  ;;  %14634 = vmatpush3.msra.mxu1 %v21415_v24 }
 0x883   :  { %14589 = vmatprep.subr.mxu0 %v25230_v39  ;;  %14635 = vmatprep.subr.mxu1 %v21482_v1 }
 0x884   :  { %14590 = vmatpush3.msra.mxu0 %v25231_v40  ;;  %14636 = vmatpush3.msra.mxu1 %v21492_v28 }
 0x885   :  { %14591 = vmatprep.subr.mxu0 %v25232_v14  ;;  %14637 = vmatprep.subr.mxu1 %v21504_v48 }
 0x886   :  { %14592 = vmatpush3.msra.mxu0 %v25233_v13  ;;  %14638 = vmatpush3.msra.mxu1 %v21529_v16  ;;  %v25239_v16 = vld [vmem:[#allocation178_spill] sm:$0xff] }
 0x887   :  { %14593 = vmatprep.subr.mxu0 %v25234_v17  ;;  %14639 = vmatprep.subr.mxu1 %v21542_v53  ;;  %v25240_v53 = vld [vmem:[#allocation188_spill] sm:$0xff] }
 0x888   :  { %14594 = vmatpush3.msra.mxu0 %v25235_v26  ;;  %14640 = vmatpush3.msra.mxu1 %v21554_v4 }
 0x889   :  { %14595 = vmatprep.subr.mxu0 %v25236_v33  ;;  %14641 = vmatprep.subr.mxu1 %v21565_v44 }
 0x88a   :  { %14596 = vmatpush3.msra.mxu0 %v25237_v51  ;;  %14642 = vmatpush3.msra.mxu1 %v21575_v21 }
 0x88b   :  { %14597 = vmatprep.subr.mxu0 %v25238_v23  ;;  %14643 = vmatprep.subr.mxu1 %v21584_v19 }
 0x88c   :  { %14598 = vmatpush3.msra.mxu0 %v25239_v16  ;;  %14644 = vmatpush3.msra.mxu1 %v21592_v60 }
 0x88d   :  { %14599 = vmatprep.subr.mxu0 %v25240_v53  ;;  %14645 = vmatprep.subr.mxu1 %v21602_v29 }
 0x88e   :  { %14600 = vmatpush3.msra.mxu0 %v21573_v34  ;;  %14646 = vmatpush3.msra.mxu1 %v21613_v42  ;;  %v25241_v42 = vand.u32 4294901760, %v21733_v12 }
 0x88f   :  { %14601 = vmatprep.subr.mxu0 %v21582_v43  ;;  %14647 = vmatprep.subr.mxu1 %v21623_v59 }
 0x890   :  { %14602 = vmatpush3.msra.mxu0 %v21590_v0  ;;  %14648 = vmatpush3.msra.mxu1 %v21633_v54  ;;  %v25242_v0 = vand.u32 4294901760, %v21742_v49 }
 0x891   :  { %14603 = vmatprep.subr.mxu0 %v21600_v55  ;;  %14649 = vmatprep.subr.mxu1 %v21640_v52  ;;  %v25243_v55 = vld [vmem:[#allocation190_spill] sm:$0xff] }
 0x892   :  { %14604 = vmatpush3.msra.mxu0 %v21611_v32  ;;  %14650 = vmatpush3.msra.mxu1 %v21650_v63 }
 0x893   :  { %14605 = vmatprep.subr.mxu0 %v21621_v27  ;;  %8777 = vmatmul.mubr.f32.vlgmr.msra.gmra.mxu1 %v25241_v42  ;;  %v25244_v42 = vand.u32 4294901760, %v21751_v41 }
 0x894   :  { %14695 = vmatprep.subr.mxu1 %v21263_v25  ;;  %14606 = vmatpush3.msra.mxu0 %v21631_v58  ;;  %v25245_v25 = vld [vmem:[#allocation176_spill] sm:$0xff] }
 0x895   :  { %8784 = vmatprep.mubr.f32.mxu1 %v25242_v0  ;;  %14696 = vmatpush3.msra.mxu1 %v21273_v9  ;;  %v25246_v9 = vand.u32 4294901760, %v21279_v20  ;;  %v25251_v20 = vand.u32 4294901760, %v25225_v45  ;;  %v25253_v0 = vand.u32 4294901760, %v25227_v62  ;;  %v9105_v45 = vld [vmem:[#allocation12 + $0x268] sm:$0xff] }
 0x896   :  { %14607 = vmatprep.subr.mxu0 %v25243_v55  ;;  %14697 = vmatprep.subr.mxu1 %v21284_v56  ;;  %v25247_v56 = vand.u32 4294901760, %v21295_v7  ;;  %v9107_v7 = vld [vmem:[#allocation12 + $0x278] sm:$0xff] }
 0x897   :  { %14608 = vmatpush3.msra.mxu0 %v21648_v2  ;;  %14698 = vmatpush3.msra.mxu1 %v21289_v6  ;;  %v25248_v6 = vand.u32 4294901760, %v25224_v15 }
 0x898   :  { %14609 = vmatprep.subr.mxu0 %v21658_v18  ;;  %8788 = vmatmul.mubr.f32.gmra.mxu1 %v25244_v42  ;;  %v9104_v42 = vld [vmem:[#allocation12 + $0x260] sm:$0xff] }
 0x899   :  { %14699 = vmatprep.subr.mxu1 %v21301_v38  ;;  %14610 = vmatpush3.msra.mxu0 %v21666_v46  ;;  %v9123_v38 = vld [vmem:[#allocation12 + $0x2f8] sm:$0xff] }
 0x89a   :  { %14700 = vmatpush3.msra.mxu1 %v21309_v10  ;;  %9065 = vmatprep.mubr.f32.mxu1 %v25245_v25  ;;  %v25249_v10 = vld [vmem:[#allocation174_spill] sm:$0xff] }
 0x89b   :  { %14611 = vmatprep.subr.mxu0 %v21674_v5  ;;  %14701 = vmatprep.subr.mxu1 %v21317_v35  ;;  %v21865_v35 = vand.u32 4294901760, %v25249_v10 }
 0x89c   :  { %14612 = vmatpush3.msra.mxu0 %v21682_v47  ;;  %14702 = vmatpush3.msra.mxu1 %v21323_v30  ;;  %v25252_v30 = vand.u32 4294901760, %v25226_v8  ;;  %v25256_v8 = vand.u32 4294901760, %v25230_v39 }
 0x89d   :  { %8660 = vmatmul.mubr.f32.vlgmr.msra.gmra.mxu0 %v21733_v12  ;;  %14657 = vmatprep.subr.mxu0 %v25246_v9  ;;  %25250 = vst [vmem:[#allocation184_spill] sm:$0xff] %v21865_v35  ;;  %v25254_v12 = vand.u32 4294901760, %v25228_v57  ;;  %v9120_v57 = vld [vmem:[#allocation12 + $0x2e0] sm:$0xff]  ;;  %v21914_v9 = vand.u32 4294901760, %v9105_v45 }
 0x89e   :  { %14703 = vmatprep.subr.mxu1 %v21336_v3  ;;  %8666 = vmatprep.mubr.f32.mxu0 %v21742_v49  ;;  %v21875_v3 = vand.u32 4294901760, %v9123_v38  ;;  %v21887_v49 = vand.u32 4294901760, %v9107_v7 }
 0x89f   :  { %14658 = vmatpush3.msra.mxu0 %v25247_v56  ;;  %14704 = vmatpush3.msra.mxu1 %v21345_v61  ;;  %v9122_v61 = vld [vmem:[#allocation12 + $0x2f0] sm:$0xff]  ;;  %v9119_v56 = vld [vmem:[#allocation12 + $0x2d8] sm:$0xff] }
 0x8a0   :  { %14659 = vmatprep.subr.mxu0 %v25248_v6  ;;  %14705 = vmatprep.subr.mxu1 %v21354_v22  ;;  %v9106_v22 = vld [vmem:[#allocation12 + $0x270] sm:$0xff]  ;;  %v21892_v15 = vand.u32 4294901760, %v9122_v61  ;;  %v21912_v39 = vsub.f32 %v9107_v7, %v21887_v49  ;;  %v21922_v6 = vand.u32 4294901760, %v9120_v57 }
 0x8a1   :  { %14660 = vmatpush3.msra.mxu0 %v25251_v20  ;;  %14706 = vmatpush3.msra.mxu1 %v21367_v50  ;;  %v21882_v50 = vsub.f32 %v25249_v10, %v21865_v35  ;;  %v21900_v62 = vand.u32 4294901760, %v9106_v22  ;;  %v25264_v7 = vld [vmem:[#allocation204_spill] sm:$0xff] }
 0x8a2   :  { %8669 = vmatmul.mubr.f32.gmra.mxu0 %v21751_v41  ;;  %14661 = vmatprep.subr.mxu0 %v25252_v30  ;;  %v25255_v41 = vand.u32 4294901760, %v25229_v11  ;;  %v25265_v30 = vand.u32 4294901760, %v25235_v26  ;;  %v21951_v26 = vsub.f32 %v9105_v45, %v21914_v9  ;;  %v25271_v45 = vand.u32 4294901760, %v25238_v23 }
 0x8a3   :  { %14707 = vmatprep.subr.mxu1 %v21377_v37  ;;  %14662 = vmatpush3.msra.mxu0 %v25253_v0  ;;  %v9121_v37 = vld [vmem:[#allocation12 + $0x2e8] sm:$0xff]  ;;  %v21929_v20 = vsub.f32 %v9106_v22, %v21900_v62  ;;  %v21939_v0 = vand.u32 4294901760, %v9119_v56  ;;  %v25267_v22 = vand.u32 4294901760, %v25236_v33 }
 0x8a4   :  { %8954 = vmatprep.mubr.f32.mxu0 %v25245_v25  ;;  %14708 = vmatpush3.msra.mxu1 %v21391_v31  ;;  %v21898_v31 = vsub.f32 %v9123_v38, %v21875_v3  ;;  %v21905_v11 = vand.u32 4294901760, %v9121_v37  ;;  %v24316_v25 = vand.u32 4294901760, %v21882_v50  ;;  %v25261_v38 = vld [vmem:[#allocation194_spill] sm:$0xff]  ;;  %25268 = vst [vmem:[#allocation173_spill] sm:$0xff] %v21951_v26 }
 0x8a5   :  { %14663 = vmatprep.subr.mxu0 %v25254_v12  ;;  %14709 = vmatprep.subr.mxu1 %v21405_v36  ;;  %v25257_v36 = vand.u32 4294901760, %v25231_v40  ;;  %v21920_v40 = vsub.f32 %v9122_v61, %v21892_v15  ;;  %25263 = vst [vmem:[#allocation189_spill] sm:$0xff] %v21929_v20  ;;  %v21981_v23 = vsub.f32 %v9119_v56, %v21939_v0 }
 0x8a6   :  { %14664 = vmatpush3.msra.mxu0 %v25255_v41  ;;  %14710 = vmatpush3.msra.mxu1 %v21415_v24  ;;  %v25258_v24 = vand.u32 4294901760, %v25232_v14  ;;  %v25262_v14 = vand.u32 4294901760, %v25234_v17  ;;  %v24314_v10 = vand.u32 4294901760, %v21898_v31  ;;  %v21937_v61 = vsub.f32 %v9121_v37, %v21905_v11  ;;  %v9102_v17 = vld [vmem:[#allocation12 + $0x250] sm:$0xff] }
 0x8a7   :  { %14665 = vmatprep.subr.mxu0 %v25256_v8  ;;  %14711 = vmatprep.subr.mxu1 %v21482_v1  ;;  %v25259_v1 = vand.u32 4294901760, %v25233_v13  ;;  %25260 = vst [vmem:[#allocation211_spill] sm:$0xff] %v21920_v40  ;;  %v9118_v13 = vld [vmem:[#allocation12 + $0x2d0] sm:$0xff]  ;;  %v21944_v12 = vsub.f32 %v21882_v50, %v24316_v25  ;;  %v24313_v41 = vand.u32 4294901760, %v21912_v39  ;;  %v9117_v8 = vld [vmem:[#allocation12 + $0x2c8] sm:$0xff]  ;;  %25274 = vst [vmem:[#allocation220_spill] sm:$0xff] %v21981_v23 }
 0x8a8   :  { %14666 = vmatpush3.msra.mxu0 %v25257_v36  ;;  %14712 = vmatpush3.msra.mxu1 %v21492_v28  ;;  %v9103_v28 = vld [vmem:[#allocation12 + $0x258] sm:$0xff]  ;;  %25266 = vst [vmem:[#allocation215_spill] sm:$0xff] %v21937_v61  ;;  %v25269_v36 = vand.u32 4294901760, %v25237_v51  ;;  %v21962_v33 = vand.u32 4294901760, %v9118_v13  ;;  %v24317_v51 = vand.u32 4294901760, %v21929_v20 }
 0x8a9   :  { %14667 = vmatprep.subr.mxu0 %v25258_v24  ;;  %14713 = vmatprep.subr.mxu1 %v21504_v48  ;;  %v21931_v48 = vand.u32 4294901760, %v9104_v42  ;;  %v21953_v37 = vand.u32 4294901760, %v9103_v28  ;;  %v24315_v24 = vand.u32 4294901760, %v21920_v40 }
 0x8aa   :  { %14668 = vmatpush3.msra.mxu0 %v25259_v1  ;;  %14714 = vmatpush3.msra.mxu1 %v25261_v38  ;;  %v9101_v1 = vld [vmem:[#allocation12 + $0x248] sm:$0xff] }
 0x8ab   :  { %14669 = vmatprep.subr.mxu0 %v25262_v14  ;;  %14715 = vmatprep.subr.mxu1 %v25264_v7  ;;  %v21972_v38 = vsub.f32 %v9104_v42, %v21931_v48  ;;  %v21974_v14 = vand.u32 4294901760, %v9102_v17  ;;  %v25273_v7 = vand.u32 4294901760, %v25239_v16  ;;  %v25275_v42 = vand.u32 4294901760, %v25240_v53 }
 0x8ac   :  { %14670 = vmatpush3.msra.mxu0 %v25265_v30  ;;  %14716 = vmatpush3.msra.mxu1 %v21554_v4  ;;  %v21960_v4 = vsub.f32 %v9120_v57, %v21922_v6  ;;  %v9116_v57 = vld [vmem:[#allocation12 + $0x2c0] sm:$0xff]  ;;  %v21983_v30 = vand.u32 4294901760, %v9117_v8  ;;  %v24320_v16 = vand.u32 4294901760, %v21951_v26  ;;  %v21996_v56 = vand.u32 4294901760, %v9101_v1 }
 0x8ad   :  { %14671 = vmatprep.subr.mxu0 %v25267_v22  ;;  %14717 = vmatprep.subr.mxu1 %v21565_v44  ;;  %v9367_v44 = vsub.f32 %v21898_v31, %v24314_v10  ;;  %25272 = vst [vmem:[#allocation205_spill] sm:$0xff] %v21972_v38  ;;  %v9374_v53 = vsub.f32 %v21920_v40, %v24315_v24  ;;  %v25280_v10 = vand.u32 4294901760, %v21582_v43 }
 0x8ae   :  { %14672 = vmatpush3.msra.mxu0 %v25269_v36  ;;  %25270 = vst [vmem:[#allocation217_spill] sm:$0xff] %v21960_v4  ;;  %14718 = vmatpush3.msra.mxu1 %v21575_v21  ;;  %v24318_v21 = vand.u32 4294901760, %v21937_v61  ;;  %v21994_v36 = vsub.f32 %v9103_v28, %v21953_v37  ;;  %v25279_v28 = vld [vmem:[#allocation207_spill] sm:$0xff]  ;;  %v22018_v24 = vsub.f32 %v9102_v17, %v21974_v14 }
 0x8af   :  { %14673 = vmatprep.subr.mxu0 %v25271_v45  ;;  %14719 = vmatprep.subr.mxu1 %v21584_v19  ;;  %v9255_v19 = vsub.f32 %v21912_v39, %v24313_v41  ;;  %v9100_v45 = vld [vmem:[#allocation12 + $0x240] sm:$0xff]  ;;  %v22008_v41 = vand.u32 4294901760, %v9116_v57 }
 0x8b0   :  { %14674 = vmatpush3.msra.mxu0 %v25273_v7  ;;  %14720 = vmatpush3.msra.mxu1 %v21592_v60  ;;  %25276 = vst [vmem:[#allocation210_spill] sm:$0xff] %v21994_v36  ;;  %v25277_v7 = vand.u32 4294901760, %v21573_v34  ;;  %v24319_v60 = vand.u32 4294901760, %v21960_v4  ;;  %v9262_v34 = vsub.f32 %v21929_v20, %v24317_v51  ;;  %25281 = vst [vmem:[#allocation212_spill] sm:$0xff] %v22018_v24  ;;  %v9115_v51 = vld [vmem:[#allocation12 + $0x2b8] sm:$0xff]  ;;  %v25285_v17 = vld [vmem:[#allocation195_spill] sm:$0xff] }
 0x8b1   :  { %14675 = vmatprep.subr.mxu0 %v25275_v42  ;;  %14721 = vmatprep.subr.mxu1 %v21602_v29  ;;  %v22006_v42 = vsub.f32 %v9118_v13, %v21962_v33  ;;  %v9368_v29 = vand.u32 4294901760, %v9367_v44  ;;  %v25282_v13 = vld [vmem:[#allocation206_spill] sm:$0xff]  ;;  %v9381_v43 = vsub.f32 %v21937_v61, %v24318_v21  ;;  %v22028_v44 = vsub.f32 %v9117_v8, %v21983_v30 }
 0x8b2   :  { %14676 = vmatpush3.msra.mxu0 %v25277_v7  ;;  %14722 = vmatpush3.msra.mxu1 %v25279_v28  ;;  %v24321_v7 = vand.u32 4294901760, %v21972_v38  ;;  %v25283_v25 = vand.u32 4294901760, %v25282_v13  ;;  %v22030_v28 = vand.u32 4294901760, %v9100_v45  ;;  %v25286_v22 = vand.u32 4294901760, %v25285_v17  ;;  %v9099_v17 = vld [vmem:[#allocation12 + $0x238] sm:$0xff] }
 0x8b3   :  { %25278 = vst [vmem:[#allocation222_spill] sm:$0xff] %v22006_v42  ;;  %14677 = vmatprep.subr.mxu0 %v25280_v10  ;;  %14723 = vmatprep.subr.mxu1 %v21623_v59  ;;  %25284 = vst [vmem:[#allocation223_spill] sm:$0xff] %v22028_v44  ;;  %v9256_v59 = vand.u32 4294901760, %v9255_v19  ;;  %v22040_v21 = vsub.f32 %v9101_v1, %v21996_v56  ;;  %v25288_v8 = vand.u32 4294901760, %v21611_v32  ;;  %v9375_v10 = vand.u32 4294901760, %v9374_v53 }
 0x8b4   :  { %14678 = vmatpush3.msra.mxu0 %v25283_v25  ;;  %14724 = vmatpush3.msra.mxu1 %v21633_v54  ;;  %v9269_v25 = vsub.f32 %v21951_v26, %v24320_v16  ;;  %v22048_v54 = vsub.f32 %v21960_v4, %v24319_v60  ;;  %v22052_v19 = vsub.f32 %v9116_v57, %v22008_v41  ;;  %v25290_v1 = vand.u32 4294901760, %v21621_v27  ;;  %v9114_v60 = vld [vmem:[#allocation12 + $0x2b0] sm:$0xff] }
 0x8b5   :  { %14679 = vmatprep.subr.mxu0 %v25286_v22  ;;  %25287 = vst [vmem:[#allocation213_spill] sm:$0xff] %v22040_v21  ;;  %14725 = vmatprep.subr.mxu1 %v21640_v52  ;;  %v9263_v52 = vand.u32 4294901760, %v9262_v34  ;;  %v22060_v32 = vsub.f32 %v21972_v38, %v24321_v7  ;;  %v25291_v16 = vld [vmem:[#allocation208_spill] sm:$0xff]  ;;  %v9382_v57 = vand.u32 4294901760, %v9381_v43  ;;  %v25294_v53 = vand.u32 4294901760, %v21631_v58  ;;  %v9112_v38 = vld [vmem:[#allocation12 + $0x2a0] sm:$0xff] }
 0x8b6   :  { %14680 = vmatpush3.msra.mxu0 %v25288_v8  ;;  %25289 = vst [vmem:[#allocation224_spill] sm:$0xff] %v22052_v19  ;;  %14726 = vmatpush3.msra.mxu1 %v21650_v63  ;;  %v22063_v8 = vand.u32 4294901760, %v9115_v51  ;;  %v25292_v63 = vand.u32 4294901760, %v21981_v23  ;;  %v9098_v7 = vld [vmem:[#allocation12 + $0x230] sm:$0xff]  ;;  %v9270_v13 = vand.u32 4294901760, %v9269_v25  ;;  %v9113_v34 = vld [vmem:[#allocation12 + $0x2a8] sm:$0xff] }
 0x8b7   :  { %14681 = vmatprep.subr.mxu0 %v25290_v1  ;;  %9067 = vmatmul.mubr.f32.vlgmr.msra.gmra.mxu1 %v25291_v16  ;;  %v22073_v1 = vsub.f32 %v9100_v45, %v22030_v28  ;;  %v25295_v22 = vld [vmem:[#allocation192_spill] sm:$0xff]  ;;  %v25297_v45 = vand.u32 4294901760, %v25243_v55  ;;  %v9389_v58 = vand.u32 4294901760, %v22048_v54  ;;  %v25300_v55 = vand.u32 4294901760, %v22018_v24 }
 0x8b8   :  { %14771 = vmatprep.subr.mxu1 %v9368_v29  ;;  %v22069_v27 = vsub.f32 %v21981_v23, %v25292_v63  ;;  %14682 = vmatpush3.msra.mxu0 %v25294_v53  ;;  %v25296_v29 = vand.u32 4294901760, %v21994_v36  ;;  %v22084_v23 = vand.u32 4294901760, %v9099_v17  ;;  %v25298_v53 = vand.u32 4294901760, %v22006_v42 }
 0x8b9   :  { %25293 = vst [vmem:[#allocation214_spill] sm:$0xff] %v22073_v1  ;;  %9072 = vmatprep.mubr.f32.mxu1 %v25295_v22  ;;  %14772 = vmatpush3.msra.mxu1 %v9256_v59  ;;  %v25299_v63 = vand.u32 4294901760, %v21648_v2  ;;  %v9277_v59 = vand.u32 4294901760, %v22060_v32  ;;  %v22103_v54 = vsub.f32 %v22018_v24, %v25300_v55  ;;  %v22119_v55 = vand.u32 4294901760, %v9113_v34  ;;  %v25305_v24 = vld [vmem:[#allocation209_spill] sm:$0xff] }
 0x8ba   :  { %v22081_v43 = vsub.f32 %v21994_v36, %v25296_v29  ;;  %14683 = vmatprep.subr.mxu0 %v25297_v45  ;;  %v22092_v25 = vsub.f32 %v22006_v42, %v25298_v53  ;;  %v22095_v29 = vand.u32 4294901760, %v9114_v60  ;;  %v9097_v36 = vld [vmem:[#allocation12 + $0x228] sm:$0xff]  ;;  %14773 = vmatprep.subr.mxu1 %v9375_v10  ;;  %v22106_v45 = vsub.f32 %v9115_v51, %v22063_v8  ;;  %v9096_v51 = vld [vmem:[#allocation12 + $0x220] sm:$0xff] }
 0x8bb   :  { %14684 = vmatpush3.msra.mxu0 %v25299_v63  ;;  %v22108_v53 = vand.u32 4294901760, %v9098_v7  ;;  %14774 = vmatpush3.msra.mxu1 %v9263_v52  ;;  %v25302_v42 = vand.u32 4294901760, %v21658_v18  ;;  %v9396_v2 = vand.u32 4294901760, %v22069_v27  ;;  %v25303_v10 = vand.u32 4294901760, %v22028_v44  ;;  %25304 = vst [vmem:[#allocation216_spill] sm:$0xff] %v22119_v55 }
 0x8bc   :  { %25301 = vst [vmem:[#allocation225_spill] sm:$0xff] %v22106_v45  ;;  %9074 = vmatmul.mubr.f32.gmra.mxu1 %v25305_v24  ;;  %14775 = vmatprep.subr.mxu1 %v9382_v57  ;;  %v9284_v52 = vand.u32 4294901760, %v22081_v43  ;;  %v25306_v18 = vand.u32 4294901760, %v22040_v21  ;;  %v22129_v27 = vsub.f32 %v9099_v17, %v22084_v23  ;;  %v25309_v63 = vand.u32 4294901760, %v21666_v46  ;;  %v9095_v17 = vld [vmem:[#allocation12 + $0x218] sm:$0xff] }
 0x8bd   :  { %14685 = vmatprep.subr.mxu0 %v25302_v42  ;;  %v22116_v32 = vsub.f32 %v22028_v44, %v25303_v10  ;;  %v22131_v10 = vand.u32 4294901760, %v9097_v36  ;;  %v9111_v44 = vld [vmem:[#allocation12 + $0x298] sm:$0xff]  ;;  %14776 = vmatpush3.msra.mxu1 %v9270_v13  ;;  %v9403_v4 = vand.u32 4294901760, %v22092_v25  ;;  %v25310_v57 = vand.u32 4294901760, %v22052_v19 }
 0x8be   :  { %v22126_v42 = vsub.f32 %v22040_v21, %v25306_v18  ;;  %25307 = vst [vmem:[#allocation229_spill] sm:$0xff] %v22129_v27  ;;  %14686 = vmatpush3.msra.mxu0 %v25309_v63  ;;  %v22142_v18 = vsub.f32 %v9114_v60, %v22095_v29  ;;  %v22144_v21 = vand.u32 4294901760, %v9112_v38  ;;  %9476 = vmatprep.mubr.f32.mxu1 %v21865_v35  ;;  %v25312_v26 = vand.u32 4294901760, %v21674_v5 }
 0x8bf   :  { %25308 = vst [vmem:[#allocation218_spill] sm:$0xff] %v22131_v10  ;;  %v22139_v43 = vsub.f32 %v22052_v19, %v25310_v57  ;;  %v9291_v46 = vand.u32 4294901760, %v22103_v54  ;;  %v22152_v25 = vsub.f32 %v9098_v7, %v22108_v53  ;;  %v22154_v63 = vand.u32 4294901760, %v9096_v51  ;;  %v9110_v57 = vld [vmem:[#allocation12 + $0x290] sm:$0xff]  ;;  %14777 = vmatprep.subr.mxu1 %v9389_v58 }
 0x8c0   :  { %25311 = vst [vmem:[#allocation231_spill] sm:$0xff] %v22142_v18  ;;  %14687 = vmatprep.subr.mxu0 %v25312_v26  ;;  %v25314_v60 = vand.u32 4294901760, %v21682_v47  ;;  %v9410_v19 = vand.u32 4294901760, %v22116_v32  ;;  %v25315_v35 = vand.u32 4294901760, %v22073_v1  ;;  %v22165_v26 = vsub.f32 %v9113_v34, %v22119_v55  ;;  %v9094_v7 = vld [vmem:[#allocation12 + $0x210] sm:$0xff]  ;;  %14778 = vmatpush3.msra.mxu1 %v9277_v59 }
 0x8c1   :  { %25313 = vst [vmem:[#allocation232_spill] sm:$0xff] %v22152_v25  ;;  %v22167_v54 = vand.u32 4294901760, %v9111_v44  ;;  %v9298_v58 = vand.u32 4294901760, %v22126_v42  ;;  %v22173_v32 = vsub.f32 %v9097_v36, %v22131_v10  ;;  %14779 = vmatprep.subr.mxu1 %v9396_v2  ;;  %v9417_v34 = vand.u32 4294901760, %v22139_v43  ;;  %v9093_v42 = vld [vmem:[#allocation12 + $0x208] sm:$0xff] }
 0x8c2   :  { %14688 = vmatpush3.msra.mxu0 %v25314_v60  ;;  %v22162_v5 = vsub.f32 %v22073_v1, %v25315_v35  ;;  %v22175_v60 = vand.u32 4294901760, %v9095_v17  ;;  %v9109_v35 = vld [vmem:[#allocation12 + $0x288] sm:$0xff]  ;;  %v22181_v59 = vsub.f32 %v9112_v38, %v22144_v21  ;;  %v25317_v36 = vand.u32 4294901760, %v22106_v45  ;;  %v9108_v38 = vld [vmem:[#allocation12 + $0x280] sm:$0xff]  ;;  %14780 = vmatpush3.msra.mxu1 %v9284_v52 }
 0x8c3   :  { %8956 = vmatmul.mubr.f32.vlgmr.msra.gmra.mxu0 %v25291_v16  ;;  %25316 = vst [vmem:[#allocation236_spill] sm:$0xff] %v22173_v32  ;;  %14733 = vmatprep.subr.mxu0 %v21875_v3  ;;  %v22183_v16 = vand.u32 4294901760, %v9110_v57  ;;  %v22192_v43 = vsub.f32 %v9096_v51, %v22154_v63  ;;  %v22194_v13 = vand.u32 4294901760, %v9094_v7  ;;  %v22200_v61 = vsub.f32 %v9111_v44, %v22167_v54 }
 0x8c4   :  { %8961 = vmatprep.mubr.f32.mxu0 %v25295_v22  ;;  %14734 = vmatpush3.msra.mxu0 %v21887_v49  ;;  %v9423_v47 = vsub.f32 %v22106_v45, %v25317_v36  ;;  %v9305_v1 = vand.u32 4294901760, %v22162_v5  ;;  %v22202_v20 = vand.u32 4294901760, %v9109_v35  ;;  %v9092_v36 = vld [vmem:[#allocation12 + $0x200] sm:$0xff]  ;;  %v25319_v51 = vand.u32 4294901760, %v22129_v27 }
 0x8c5   :  { %25318 = vst [vmem:[#allocation187_spill] sm:$0xff] %v22194_v13  ;;  %14735 = vmatprep.subr.mxu0 %v21892_v15  ;;  %14781 = vmatprep.subr.mxu1 %v9403_v4  ;;  %v22210_v45 = vsub.f32 %v9095_v17, %v22175_v60  ;;  %v22212_v5 = vand.u32 4294901760, %v9093_v42  ;;  %v25320_v44 = vand.u32 4294901760, %v22142_v18  ;;  %v22220_v40 = vsub.f32 %v9110_v57, %v22183_v16 }
 0x8c6   :  { %14736 = vmatpush3.msra.mxu0 %v21900_v62  ;;  %v9311_v2 = vsub.f32 %v22129_v27, %v25319_v51  ;;  %14782 = vmatpush3.msra.mxu1 %v9291_v46  ;;  %v22222_v51 = vand.u32 4294901760, %v9108_v38  ;;  %v25321_v17 = vand.u32 4294901760, %v22152_v25  ;;  %v22230_v52 = vsub.f32 %v9094_v7, %v22194_v13 }
 0x8c7   :  { %8963 = vmatmul.mubr.f32.gmra.mxu0 %v25305_v24  ;;  %v9430_v4 = vsub.f32 %v22142_v18, %v25320_v44  ;;  %14737 = vmatprep.subr.mxu0 %v21905_v11  ;;  %v22232_v44 = vand.u32 4294901760, %v9092_v36  ;;  %v25322_v57 = vand.u32 4294901760, %v21944_v12  ;;  %v9424_v22 = vand.u32 4294901760, %v9423_v47 }
 0x8c8   :  { %14783 = vmatprep.subr.mxu1 %v9410_v19  ;;  %v9318_v46 = vsub.f32 %v22152_v25, %v25321_v17  ;;  %14738 = vmatpush3.msra.mxu0 %v21914_v9  ;;  %v25323_v18 = vand.u32 4294901760, %v22165_v26  ;;  %v24360_v27 = vand.u32 4294901760, %v22200_v61  ;;  %v22242_v17 = vsub.f32 %v9109_v35, %v22202_v20 }
 0x8c9   :  { %9225 = vmatprep.mubr.f32.mxu0 %v25322_v57  ;;  %14784 = vmatpush3.msra.mxu1 %v9298_v58  ;;  %v9312_v7 = vand.u32 4294901760, %v9311_v2  ;;  %v25324_v24 = vand.u32 4294901760, %v22173_v32  ;;  %v22250_v47 = vsub.f32 %v9093_v42, %v22212_v5  ;;  %v25326_v35 = vand.u32 4294901760, %v22181_v59 }
 0x8ca   :  { %v9437_v19 = vsub.f32 %v22165_v26, %v25323_v18  ;;  %14739 = vmatprep.subr.mxu0 %v21922_v6  ;;  %14785 = vmatprep.subr.mxu1 %v9417_v34  ;;  %v9431_v18 = vand.u32 4294901760, %v9430_v4  ;;  %v24361_v57 = vand.u32 4294901760, %v22220_v40  ;;  %v22258_v2 = vsub.f32 %v9108_v38, %v22222_v51 }
 0x8cb   :  { %v9325_v25 = vsub.f32 %v22173_v32, %v25324_v24  ;;  %25325 = vst [vmem:[#allocation227_spill] sm:$0xff] %v22250_v47  ;;  %14740 = vmatpush3.msra.mxu0 %v21931_v48  ;;  %v9444_v58 = vsub.f32 %v22181_v59, %v25326_v35  ;;  %14786 = vmatpush3.msra.mxu1 %v9305_v1  ;;  %v9319_v24 = vand.u32 4294901760, %v9318_v46  ;;  %v25327_v42 = vand.u32 4294901760, %v22192_v43 }
 0x8cc   :  { %14741 = vmatprep.subr.mxu0 %v21939_v0  ;;  %v22266_v4 = vsub.f32 %v9092_v36, %v22232_v44  ;;  %14787 = vmatprep.subr.mxu1 %v9424_v22  ;;  %v9438_v35 = vand.u32 4294901760, %v9437_v19  ;;  %v9451_v1 = vsub.f32 %v22200_v61, %v24360_v27  ;;  %v24362_v38 = vand.u32 4294901760, %v22242_v17 }
 0x8cd   :  { %v9332_v34 = vsub.f32 %v22192_v43, %v25327_v42  ;;  %14742 = vmatpush3.msra.mxu0 %v21953_v37  ;;  %14788 = vmatpush3.msra.mxu1 %v9312_v7  ;;  %v9326_v46 = vand.u32 4294901760, %v9325_v25  ;;  %v25328_v42 = vand.u32 4294901760, %v22210_v45  ;;  %v9445_v22 = vand.u32 4294901760, %v9444_v58 }
 0x8ce   :  { %14743 = vmatprep.subr.mxu0 %v21962_v33  ;;  %14789 = vmatprep.subr.mxu1 %v9431_v18  ;;  %v9458_v19 = vsub.f32 %v22220_v40, %v24361_v57  ;;  %v24365_v27 = vand.u32 4294901760, %v22258_v2  ;;  %v25329_v7 = vand.u32 4294901760, %v22230_v52  ;;  %v9452_v18 = vand.u32 4294901760, %v9451_v1  ;;  %v25331_v1 = vld [vmem:[#allocation240_spill] sm:$0xff] }
 0x8cf   :  { %v9339_v12 = vsub.f32 %v22210_v45, %v25328_v42  ;;  %14744 = vmatpush3.msra.mxu0 %v21974_v14  ;;  %14790 = vmatpush3.msra.mxu1 %v9319_v24  ;;  %v9333_v25 = vand.u32 4294901760, %v9332_v34  ;;  %v9465_v58 = vsub.f32 %v22242_v17, %v24362_v38  ;;  %v25330_v34 = vand.u32 4294901760, %v22250_v47 }
 0x8d0   :  { %14745 = vmatprep.subr.mxu0 %v21983_v30  ;;  %v9346_v42 = vsub.f32 %v22230_v52, %v25329_v7  ;;  %14791 = vmatprep.subr.mxu1 %v9438_v35  ;;  %v9459_v7 = vand.u32 4294901760, %v9458_v19  ;;  %v9472_v35 = vsub.f32 %v22258_v2, %v24365_v27  ;;  %v25332_v36 = vrot.slane %v25331_v1, 1 }
 0x8d1   :  { %14746 = vmatpush3.msra.mxu0 %v21996_v56  ;;  %14792 = vmatpush3.msra.mxu1 %v9326_v46  ;;  %v9340_v24 = vand.u32 4294901760, %v9339_v12  ;;  %v9353_v57 = vsub.f32 %v22250_v47, %v25330_v34  ;;  %v25333_v46 = vand.u32 4294901760, %v22266_v4  ;;  %v9466_v19 = vand.u32 4294901760, %v9465_v58 }
 0x8d2   :  { %14747 = vmatprep.subr.mxu0 %v22008_v41  ;;  %14793 = vmatprep.subr.mxu1 %v9445_v22  ;;  %v9090_v38 = vsel %vm6194_vm3, %v25332_v36, 0.0  ;;  %v9347_v12 = vand.u32 4294901760, %v9346_v42  ;;  %v25334_v22 = vld [vmem:[#allocation196_spill] sm:$0xff] }
 0x8d3   :  { %14748 = vmatpush3.msra.mxu0 %v22030_v28  ;;  %14794 = vmatpush3.msra.mxu1 %v9333_v25  ;;  %v9360_v34 = vsub.f32 %v22266_v4, %v25333_v46  ;;  %v22308_v47 = vand.u32 4294901760, %v25334_v22  ;;  %v9354_v1 = vand.u32 4294901760, %v9353_v57  ;;  %v22312_v36 = vand.u32 4294901760, %v9090_v38  ;;  %v25337_v25 = vld [vmem:[#allocation239_spill] sm:$0xff] }
 0x8d4   :  { %14749 = vmatprep.subr.mxu0 %v22063_v8  ;;  %14795 = vmatprep.subr.mxu1 %v9452_v18  ;;  %v25338_v27 = vrot.slane %v25337_v25, 1  ;;  %v9473_v46 = vand.u32 4294901760, %v9472_v35 }
 0x8d5   :  { %25335 = vst [vmem:[#allocation228_spill] sm:$0xff] %v22308_v47  ;;  %14750 = vmatpush3.msra.mxu0 %v22084_v23  ;;  %14796 = vmatpush3.msra.mxu1 %v9340_v24  ;;  %25336 = vst [vmem:[#allocation230_spill] sm:$0xff] %v22312_v36  ;;  %v9361_v18 = vand.u32 4294901760, %v9360_v34  ;;  %v22321_v58 = vsub.f32 %v25334_v22, %v22308_v47  ;;  %v25340_v22 = vand.u32 4294901760, %v21882_v50 }
 0x8d6   :  { %14751 = vmatprep.subr.mxu0 %v22095_v29  ;;  %v9089_v42 = vsel %vm6194_vm3, %v25338_v27, 0.0  ;;  %14797 = vmatprep.subr.mxu1 %v9459_v7  ;;  %v22328_v27 = vsub.f32 %v9090_v38, %v22312_v36 }
 0x8d7   :  { %14752 = vmatpush3.msra.mxu0 %v22108_v53  ;;  %14798 = vmatpush3.msra.mxu1 %v9347_v12  ;;  %v22324_v57 = vand.u32 4294901760, %v9089_v42  ;;  %v24368_v24 = vand.u32 4294901760, %v22321_v58 }
 0x8d8   :  { %14753 = vmatprep.subr.mxu0 %v22119_v55  ;;  %14799 = vmatprep.subr.mxu1 %v9466_v19  ;;  %v24367_v38 = vand.u32 4294901760, %v22328_v27 }
 0x8d9   :  { %14754 = vmatpush3.msra.mxu0 %v22131_v10  ;;  %25339 = vst [vmem:[#allocation233_spill] sm:$0xff] %v22324_v57  ;;  %14800 = vmatpush3.msra.mxu1 %v9354_v1  ;;  %v22336_v7 = vsub.f32 %v9089_v42, %v22324_v57  ;;  %v9229_v35 = vsub.f32 %v22321_v58, %v24368_v24  ;;  %v25341_v42 = vld [vmem:[#allocation211_spill] sm:$0xff]  ;;  %v25353_v24 = vld [vmem:[#allocation224_spill] sm:$0xff] }
 0x8da   :  { %14755 = vmatprep.subr.mxu0 %v22144_v21  ;;  %14801 = vmatprep.subr.mxu1 %v9473_v46  ;;  %v9238_v34 = vsub.f32 %v22328_v27, %v24367_v38  ;;  %v25352_v38 = vld [vmem:[#allocation213_spill] sm:$0xff] }
 0x8db   :  { %14756 = vmatpush3.msra.mxu0 %v22154_v63  ;;  %14802 = vmatpush3.msra.mxu1 %v9361_v18  ;;  %v24366_v12 = vand.u32 4294901760, %v22336_v7  ;;  %v9230_v19 = vand.u32 4294901760, %v9229_v35  ;;  %v25342_v18 = vld [vmem:[#allocation189_spill] sm:$0xff]  ;;  %v25343_v35 = vld [vmem:[#allocation215_spill] sm:$0xff] }
 0x8dc   :  { %14757 = vmatprep.subr.mxu0 %v22167_v54  ;;  %9478 = vmatmul.mubr.f32.vlgmr.msra.gmra.mxu1 %v22308_v47  ;;  %v9239_v25 = vand.u32 4294901760, %v9238_v34  ;;  %v25344_v34 = vld [vmem:[#allocation173_spill] sm:$0xff] }
 0x8dd   :  { %14847 = vmatprep.subr.mxu1 %v21875_v3  ;;  %14758 = vmatpush3.msra.mxu0 %v22175_v60  ;;  %v9244_v1 = vsub.f32 %v22336_v7, %v24366_v12  ;;  %v25351_v12 = vld [vmem:[#allocation223_spill] sm:$0xff]  ;;  %v25356_v47 = vld [vmem:[#allocation229_spill] sm:$0xff] }
 0x8de   :  { %9483 = vmatprep.mubr.f32.mxu1 %v22312_v36  ;;  %14848 = vmatpush3.msra.mxu1 %v21887_v49  ;;  %v25355_v36 = vld [vmem:[#allocation225_spill] sm:$0xff] }
 0x8df   :  { %14759 = vmatprep.subr.mxu0 %v22183_v16  ;;  %14849 = vmatprep.subr.mxu1 %v21892_v15  ;;  %v9245_v46 = vand.u32 4294901760, %v9244_v1  ;;  %v25347_v1 = vld [vmem:[#allocation220_spill] sm:$0xff] }
 0x8e0   :  { %14760 = vmatpush3.msra.mxu0 %v22194_v13  ;;  %14850 = vmatpush3.msra.mxu1 %v21900_v62 }
 0x8e1   :  { %14761 = vmatprep.subr.mxu0 %v22202_v20  ;;  %9485 = vmatmul.mubr.f32.gmra.mxu1 %v22324_v57  ;;  %v25354_v57 = vld [vmem:[#allocation214_spill] sm:$0xff] }
 0x8e2   :  { %14851 = vmatprep.subr.mxu1 %v21905_v11  ;;  %14762 = vmatpush3.msra.mxu0 %v22212_v5 }
 0x8e3   :  { %14852 = vmatpush3.msra.mxu1 %v21914_v9  ;;  %9736 = vmatprep.mubr.f32.mxu1 %v25340_v22  ;;  %v25345_v22 = vld [vmem:[#allocation217_spill] sm:$0xff] }
 0x8e4   :  { %14763 = vmatprep.subr.mxu0 %v22222_v51  ;;  %14853 = vmatprep.subr.mxu1 %v21922_v6 }
 0x8e5   :  { %14764 = vmatpush3.msra.mxu0 %v22232_v44  ;;  %14854 = vmatpush3.msra.mxu1 %v21931_v48 }
 0x8e6   :  { %9231 = vmatmul.mubr.f32.vlgmr.msra.gmra.mxu0 %v9230_v19  ;;  %14809 = vmatprep.subr.mxu0 %v21898_v31  ;;  %v25346_v19 = vld [vmem:[#allocation205_spill] sm:$0xff] }
 0x8e7   :  { %14855 = vmatprep.subr.mxu1 %v21939_v0  ;;  %9240 = vmatprep.mubr.f32.mxu0 %v9239_v25  ;;  %v25348_v25 = vld [vmem:[#allocation210_spill] sm:$0xff] }
 0x8e8   :  { %14810 = vmatpush3.msra.mxu0 %v21912_v39  ;;  %14856 = vmatpush3.msra.mxu1 %v21953_v37 }
 0x8e9   :  { %14811 = vmatprep.subr.mxu0 %v25341_v42  ;;  %14857 = vmatprep.subr.mxu1 %v21962_v33 }
 0x8ea   :  { %14812 = vmatpush3.msra.mxu0 %v25342_v18  ;;  %14858 = vmatpush3.msra.mxu1 %v21974_v14 }
 0x8eb   :  { %9246 = vmatmul.mubr.f32.gmra.mxu0 %v9245_v46  ;;  %14813 = vmatprep.subr.mxu0 %v25343_v35  ;;  %v25349_v46 = vld [vmem:[#allocation222_spill] sm:$0xff] }
 0x8ec   :  { %14859 = vmatprep.subr.mxu1 %v21983_v30  ;;  %14814 = vmatpush3.msra.mxu0 %v25344_v34 }
 0x8ed   :  { %9620 = vmatprep.mubr.f32.mxu0 %v21882_v50  ;;  %14860 = vmatpush3.msra.mxu1 %v21996_v56  ;;  %v25350_v50 = vld [vmem:[#allocation212_spill] sm:$0xff] }
 0x8ee   :  { %14815 = vmatprep.subr.mxu0 %v25345_v22  ;;  %14861 = vmatprep.subr.mxu1 %v22008_v41 }
 0x8ef   :  { %14816 = vmatpush3.msra.mxu0 %v25346_v19  ;;  %14862 = vmatpush3.msra.mxu1 %v22030_v28 }
 0x8f0   :  { %14817 = vmatprep.subr.mxu0 %v25347_v1  ;;  %14863 = vmatprep.subr.mxu1 %v22063_v8 }
 0x8f1   :  { %14818 = vmatpush3.msra.mxu0 %v25348_v25  ;;  %14864 = vmatpush3.msra.mxu1 %v22084_v23 }
 0x8f2   :  { %14819 = vmatprep.subr.mxu0 %v25349_v46  ;;  %14865 = vmatprep.subr.mxu1 %v22095_v29 }
 0x8f3   :  { %14820 = vmatpush3.msra.mxu0 %v25350_v50  ;;  %14866 = vmatpush3.msra.mxu1 %v22108_v53 }
 0x8f4   :  { %14821 = vmatprep.subr.mxu0 %v25351_v12  ;;  %14867 = vmatprep.subr.mxu1 %v22119_v55  ;;  %v25357_v55 = vld [vmem:[#allocation231_spill] sm:$0xff] }
 0x8f5   :  { %14822 = vmatpush3.msra.mxu0 %v25352_v38  ;;  %14868 = vmatpush3.msra.mxu1 %v22131_v10  ;;  %v25358_v10 = vld [vmem:[#allocation232_spill] sm:$0xff] }
 0x8f6   :  { %14823 = vmatprep.subr.mxu0 %v25353_v24  ;;  %14869 = vmatprep.subr.mxu1 %v22144_v21 }
 0x8f7   :  { %14824 = vmatpush3.msra.mxu0 %v25354_v57  ;;  %14870 = vmatpush3.msra.mxu1 %v22154_v63 }
 0x8f8   :  { %14825 = vmatprep.subr.mxu0 %v25355_v36  ;;  %14871 = vmatprep.subr.mxu1 %v22167_v54 }
 0x8f9   :  { %14826 = vmatpush3.msra.mxu0 %v25356_v47  ;;  %14872 = vmatpush3.msra.mxu1 %v22175_v60 }
 0x8fa   :  { %14827 = vmatprep.subr.mxu0 %v25357_v55  ;;  %14873 = vmatprep.subr.mxu1 %v22183_v16 }
 0x8fb   :  { %14828 = vmatpush3.msra.mxu0 %v25358_v10  ;;  %14874 = vmatpush3.msra.mxu1 %v22194_v13  ;;  %v25359_v13 = vand.u32 4294901760, %v22321_v58 }
 0x8fc   :  { %14829 = vmatprep.subr.mxu0 %v22165_v26  ;;  %14875 = vmatprep.subr.mxu1 %v22202_v20 }
 0x8fd   :  { %14830 = vmatpush3.msra.mxu0 %v22173_v32  ;;  %14876 = vmatpush3.msra.mxu1 %v22212_v5  ;;  %v25360_v32 = vand.u32 4294901760, %v22328_v27 }
 0x8fe   :  { %14831 = vmatprep.subr.mxu0 %v22181_v59  ;;  %14877 = vmatprep.subr.mxu1 %v22222_v51 }
 0x8ff   :  { %14832 = vmatpush3.msra.mxu0 %v22192_v43  ;;  %14878 = vmatpush3.msra.mxu1 %v22232_v44 }
 0x900   :  { %14833 = vmatprep.subr.mxu0 %v22200_v61  ;;  %9740 = vmatmul.mubr.f32.vlgmr.msra.gmra.mxu1 %v25359_v13  ;;  %v25361_v13 = vand.u32 4294901760, %v22336_v7 }
 0x901   :  { %14923 = vmatprep.subr.mxu1 %v21875_v3  ;;  %14834 = vmatpush3.msra.mxu0 %v22210_v45  ;;  %v25362_v3 = vld [vmem:[#allocation227_spill] sm:$0xff] }
 0x902   :  { %9747 = vmatprep.mubr.f32.mxu1 %v25360_v32  ;;  %14924 = vmatpush3.msra.mxu1 %v21887_v49  ;;  %v25363_v49 = vld [vmem:[#allocation184_spill] sm:$0xff]  ;;  %v25384_v32 = vand.u32 4294901760, %v25357_v55  ;;  %v25390_v55 = vand.u32 4294901760, %v22181_v59  ;;  %v25396_v59 = vand.u32 4294901760, %v22220_v40 }
 0x903   :  { %14835 = vmatprep.subr.mxu0 %v22220_v40  ;;  %14925 = vmatprep.subr.mxu1 %v21892_v15  ;;  %v25364_v15 = vand.u32 4294901760, %v21898_v31  ;;  %v25368_v31 = vand.u32 4294901760, %v25343_v35  ;;  %v25404_v40 = vld [vmem:[#allocation43_spill] sm:$0xff] }
 0x904   :  { %14836 = vmatpush3.msra.mxu0 %v22230_v52  ;;  %14926 = vmatpush3.msra.mxu1 %v21900_v62  ;;  %v25365_v62 = vand.u32 4294901760, %v21912_v39  ;;  %v25369_v39 = vand.u32 4294901760, %v25344_v34 }
 0x905   :  { %14837 = vmatprep.subr.mxu0 %v22242_v17  ;;  %9751 = vmatmul.mubr.f32.gmra.mxu1 %v25361_v13 }
 0x906   :  { %14927 = vmatprep.subr.mxu1 %v21905_v11  ;;  %14838 = vmatpush3.msra.mxu0 %v25362_v3  ;;  %v25366_v11 = vand.u32 4294901760, %v25341_v42 }
 0x907   :  { %14928 = vmatpush3.msra.mxu1 %v21914_v9  ;;  %10028 = vmatprep.mubr.f32.mxu1 %v25363_v49  ;;  %v25367_v9 = vand.u32 4294901760, %v25342_v18 }
 0x908   :  { %14839 = vmatprep.subr.mxu0 %v22258_v2  ;;  %14929 = vmatprep.subr.mxu1 %v21922_v6  ;;  %v25370_v6 = vand.u32 4294901760, %v25345_v22 }
 0x909   :  { %14840 = vmatpush3.msra.mxu0 %v22266_v4  ;;  %14930 = vmatpush3.msra.mxu1 %v21931_v48  ;;  %v25371_v48 = vand.u32 4294901760, %v25346_v19 }
 0x90a   :  { %9623 = vmatmul.mubr.f32.vlgmr.msra.gmra.mxu0 %v22321_v58  ;;  %14885 = vmatprep.subr.mxu0 %v25364_v15  ;;  %v25386_v58 = vld [vmem:[#allocation187_spill] sm:$0xff] }
 0x90b   :  { %14931 = vmatprep.subr.mxu1 %v21939_v0  ;;  %9629 = vmatprep.mubr.f32.mxu0 %v22328_v27  ;;  %v25372_v0 = vand.u32 4294901760, %v25347_v1 }
 0x90c   :  { %14886 = vmatpush3.msra.mxu0 %v25365_v62  ;;  %14932 = vmatpush3.msra.mxu1 %v21953_v37  ;;  %v25373_v37 = vand.u32 4294901760, %v25348_v25 }
 0x90d   :  { %14887 = vmatprep.subr.mxu0 %v25366_v11  ;;  %14933 = vmatprep.subr.mxu1 %v21962_v33  ;;  %v25374_v33 = vand.u32 4294901760, %v25349_v46 }
 0x90e   :  { %14888 = vmatpush3.msra.mxu0 %v25367_v9  ;;  %14934 = vmatpush3.msra.mxu1 %v21974_v14  ;;  %v25376_v14 = vand.u32 4294901760, %v25351_v12 }
 0x90f   :  { %9632 = vmatmul.mubr.f32.gmra.mxu0 %v22336_v7  ;;  %14889 = vmatprep.subr.mxu0 %v25368_v31 }
 0x910   :  { %14935 = vmatprep.subr.mxu1 %v21983_v30  ;;  %14890 = vmatpush3.msra.mxu0 %v25369_v39  ;;  %v25377_v30 = vld [vmem:[#allocation216_spill] sm:$0xff] }
 0x911   :  { %9917 = vmatprep.mubr.f32.mxu0 %v25363_v49  ;;  %14936 = vmatpush3.msra.mxu1 %v21996_v56  ;;  %v25378_v56 = vand.u32 4294901760, %v25352_v38 }
 0x912   :  { %14891 = vmatprep.subr.mxu0 %v25370_v6  ;;  %14937 = vmatprep.subr.mxu1 %v22008_v41  ;;  %v25375_v41 = vand.u32 4294901760, %v25350_v50 }
 0x913   :  { %14892 = vmatpush3.msra.mxu0 %v25371_v48  ;;  %14938 = vmatpush3.msra.mxu1 %v22030_v28  ;;  %v25379_v28 = vld [vmem:[#allocation218_spill] sm:$0xff] }
 0x914   :  { %14893 = vmatprep.subr.mxu0 %v25372_v0  ;;  %14939 = vmatprep.subr.mxu1 %v22063_v8  ;;  %v25381_v8 = vand.u32 4294901760, %v25354_v57  ;;  %v14309_v57 = vpop.f32.mrf.mxu0 }
 0x915   :  { %14894 = vmatpush3.msra.mxu0 %v25373_v37  ;;  %14940 = vmatpush3.msra.mxu1 %v22084_v23  ;;  %v25380_v23 = vand.u32 4294901760, %v25353_v24 }
 0x916   :  { %14895 = vmatprep.subr.mxu0 %v25374_v33  ;;  %14941 = vmatprep.subr.mxu1 %v22095_v29  ;;  %v25382_v29 = vand.u32 4294901760, %v25355_v36  ;;  %v25403_v36 = vand.u32 4294901760, %v22266_v4  ;;  %v14310_v24 = vpop.f32.mrf.mxu0 }
 0x917   :  { %14896 = vmatpush3.msra.mxu0 %v25375_v41  ;;  %14942 = vmatpush3.msra.mxu1 %v22108_v53  ;;  %v25383_v53 = vand.u32 4294901760, %v25356_v47 }
 0x918   :  { %14897 = vmatprep.subr.mxu0 %v25376_v14  ;;  %14943 = vmatprep.subr.mxu1 %v25377_v30  ;;  %v14312_v7 = vpop.f32.mrf.mxu0 }
 0x919   :  { %14898 = vmatpush3.msra.mxu0 %v25378_v56  ;;  %14944 = vmatpush3.msra.mxu1 %v25379_v28 }
 0x91a   :  { %14899 = vmatprep.subr.mxu0 %v25380_v23  ;;  %14945 = vmatprep.subr.mxu1 %v22144_v21  ;;  %v25385_v21 = vand.u32 4294901760, %v25358_v10  ;;  %v25391_v10 = vand.u32 4294901760, %v22192_v43  ;;  %v25398_v43 = vand.u32 4294901760, %v22242_v17  ;;  %v14313_v12 = vpop.f32.mrf.mxu0 }
 0x91b   :  { %14900 = vmatpush3.msra.mxu0 %v25381_v8  ;;  %14946 = vmatpush3.msra.mxu1 %v22154_v63  ;;  %v25387_v63 = vand.u32 4294901760, %v22165_v26  ;;  %v25392_v26 = vand.u32 4294901760, %v22200_v61  ;;  %v25400_v61 = vand.u32 4294901760, %v25362_v3 }
 0x91c   :  { %14901 = vmatprep.subr.mxu0 %v25382_v29  ;;  %14947 = vmatprep.subr.mxu1 %v22167_v54  ;;  %v25388_v54 = vld [vmem:[#allocation236_spill] sm:$0xff]  ;;  %v14385_v4 = vpop.f32.mrf.mxu0 }
 0x91d   :  { %14902 = vmatpush3.msra.mxu0 %v25383_v53  ;;  %14948 = vmatpush3.msra.mxu1 %v22175_v60  ;;  %v25389_v47 = vand.u32 4294901760, %v25388_v54  ;;  %v25393_v60 = vld [vmem:[#allocation228_spill] sm:$0xff] }
 0x91e   :  { %14903 = vmatprep.subr.mxu0 %v25384_v32  ;;  %14949 = vmatprep.subr.mxu1 %v22183_v16  ;;  %v25395_v16 = vld [vmem:[#allocation230_spill] sm:$0xff]  ;;  %v14386_v35 = vpop.f32.mrf.mxu0 }
 0x91f   :  { %14904 = vmatpush3.msra.mxu0 %v25385_v21  ;;  %14950 = vmatpush3.msra.mxu1 %v25386_v58 }
 0x920   :  { %14905 = vmatprep.subr.mxu0 %v25387_v63  ;;  %14951 = vmatprep.subr.mxu1 %v22202_v20  ;;  %v25394_v20 = vand.u32 4294901760, %v22210_v45  ;;  %v25402_v45 = vld [vmem:[#allocation35_spill] sm:$0xff]  ;;  %v14388_v22 = vpop.f32.mrf.mxu0 }
 0x921   :  { %14906 = vmatpush3.msra.mxu0 %v25389_v47  ;;  %14952 = vmatpush3.msra.mxu1 %v22212_v5  ;;  %v25397_v5 = vand.u32 4294901760, %v22230_v52  ;;  %v14347_v52 = vpop.f32.mrf.mxu1 }
 0x922   :  { %14907 = vmatprep.subr.mxu0 %v25390_v55  ;;  %14953 = vmatprep.subr.mxu1 %v22222_v51  ;;  %v25399_v51 = vld [vmem:[#allocation233_spill] sm:$0xff]  ;;  %v14389_v1 = vpop.f32.mrf.mxu0 }
 0x923   :  { %14908 = vmatpush3.msra.mxu0 %v25391_v10  ;;  %14954 = vmatpush3.msra.mxu1 %v22232_v44  ;;  %v25401_v44 = vand.u32 4294901760, %v22258_v2  ;;  %v14348_v17 = vpop.f32.mrf.mxu1 }
 0x924   :  { %14909 = vmatprep.subr.mxu0 %v25392_v26  ;;  %10030 = vmatmul.mubr.f32.vlgmr.msra.gmra.mxu1 %v25393_v60  ;;  %v14461_v46 = vpop.f32.mrf.mxu0  ;;  %v14311_v26 = vadd.f32 %v14310_v24, %v14309_v57 }
 0x925   :  { %14910 = vmatpush3.msra.mxu0 %v25394_v20  ;;  %10035 = vmatprep.mubr.f32.mxu1 %v25395_v16  ;;  %v14350_v27 = vpop.f32.mrf.mxu1  ;;  %v14387_v20 = vadd.f32 %v14386_v35, %v14385_v4 }
 0x926   :  { %14911 = vmatprep.subr.mxu0 %v25396_v59  ;;  %v14462_v13 = vpop.f32.mrf.mxu0 }
 0x927   :  { %14912 = vmatpush3.msra.mxu0 %v25397_v5  ;;  %v14351_v2 = vpop.f32.mrf.mxu1 }
 0x928   :  { %14913 = vmatprep.subr.mxu0 %v25398_v43  ;;  %10037 = vmatmul.mubr.f32.gmra.mxu1 %v25399_v51  ;;  %v14464_v49 = vpop.f32.mrf.mxu0  ;;  %v14314_v43 = vadd.f32 %v14313_v12, %v14312_v7 }
 0x929   :  { %14914 = vmatpush3.msra.mxu0 %v25400_v61  ;;  %16250 = vmatprep.mubr.f32.mxu1 %v25402_v45  ;;  %v14423_v38 = vpop.f32.mrf.mxu1 }
 0x92a   :  { %14915 = vmatprep.subr.mxu0 %v25401_v44  ;;  %v14465_v62 = vpop.f32.mrf.mxu0 }
 0x92b   :  { %14916 = vmatpush3.msra.mxu0 %v25403_v36  ;;  %v14424_v42 = vpop.f32.mrf.mxu1  ;;  %v14352_v36 = vadd.f32 %v14351_v2, %v14350_v27  ;;  %v14466_v24 = vadd.f32 %v14465_v62, %v14464_v49 }
 0x92c   :  { %9919 = vmatmul.mubr.f32.vlgmr.msra.gmra.mxu0 %v25393_v60  ;;  %v14349_v60 = vadd.f32 %v14348_v17, %v14347_v52  ;;  %v14425_v45 = vadd.f32 %v14424_v42, %v14423_v38 }
 0x92d   :  { %9924 = vmatprep.mubr.f32.mxu0 %v25395_v16  ;;  %v14426_v18 = vpop.f32.mrf.mxu1 }
 0x92e   :  { %v7599_v5 = vadd.f32 %v14349_v60, %v14311_v26 }
 0x92f   :  { %v14427_v34 = vpop.f32.mrf.mxu1 }
 0x930   :  { %9926 = vmatmul.mubr.f32.gmra.mxu0 %v25399_v51  ;;  %v7744_v51 = vadd.f32 %v14387_v20, %v7599_v5  ;;  %v14428_v17 = vadd.f32 %v14427_v34, %v14426_v18 }
 0x931   :  { %16243 = vmatprep.mubr.f32.mxu0 %v25404_v40  ;;  %v14499_v19 = vpop.f32.mrf.mxu1  ;;  %v14390_v40 = vadd.f32 %v14389_v1, %v14388_v22 }
 0x933   :  { %v14500_v25 = vpop.f32.mrf.mxu1 }
 0x934   :  { %v14501_v4 = vadd.f32 %v14500_v25, %v14499_v19 }
 0x935   :  { %v22539_v50 = vpop.f32.mrf.mxu1 }
 0x937   :  { %v14503_v3 = vpop.f32.mrf.mxu1 }
 0x938   :  { %v14504_v38 = vadd.f32 %v14503_v3, %v22539_v50 }
 0x939   :  { %v14575_v15 = vpop.f32.mrf.mxu1  ;;  %v14537_v9 = vpop.f32.mrf.mxu0 }
 0x93b   :  { %v14576_v11 = vpop.f32.mrf.mxu1  ;;  %v14538_v39 = vpop.f32.mrf.mxu0 }
 0x93c   :  { %v14539_v35 = vadd.f32 %v14538_v39, %v14537_v9  ;;  %v14577_v22 = vadd.f32 %v14576_v11, %v14575_v15 }
 0x93d   :  { %v22541_v31 = vpop.f32.mrf.mxu1 }
 0x93e   :  { %v14540_v48 = vpop.f32.mrf.mxu0 }
 0x93f   :  { %v22543_v6 = vpop.f32.mrf.mxu1 }
 0x940   :  { %v14541_v37 = vpop.f32.mrf.mxu0  ;;  %v14580_v9 = vadd.f32 %v22543_v6, %v22541_v31 }
 0x941   :  { %v14542_v42 = vadd.f32 %v14541_v37, %v14540_v48 }
 0x953   :  { %v22545_v0 = vpop.f32.mrf.mxu1 }
 0x955   :  { %v22547_v33 = vpop.f32.mrf.mxu1 }
 0x956   :  { %v14653_v3 = vadd.f32 %v22547_v33, %v22545_v0 }
 0x958   :  { %v22549_v14 = vpop.f32.mrf.mxu1 }
 0x95a   :  { %v22551_v56 = vpop.f32.mrf.mxu1 }
 0x95b   :  { %25405 = vst [vmem:[#allocation234_spill] sm:$0xff] %v22551_v56 }
 0x95d   :  { %v14613_v41 = vpop.f32.mrf.mxu0 }
 0x95f   :  { %v14614_v30 = vpop.f32.mrf.mxu0 }
 0x962   :  { %v14616_v28 = vpop.f32.mrf.mxu0  ;;  %v25412_v20 = vld [vmem:[#allocation234_spill] sm:$0xff] }
 0x963   :  { %v14656_v31 = vadd.f32 %v25412_v20, %v22549_v14  ;;  %v25435_v20 = vld [vmem:[#allocation110_spill] sm:$0xff] }
 0x964   :  { %v14617_v8 = vpop.f32.mrf.mxu0 }
 0x965   :  { %v14618_v39 = vadd.f32 %v14617_v8, %v14616_v28 }
 0x977   :  { %v22553_v23 = vpop.f32.mrf.mxu1 }
 0x978   :  { %25406 = vst [vmem:[#allocation235_spill] sm:$0xff] %v22553_v23  ;;  %v7861_v23 = vadd.f32 %v14425_v45, %v7744_v51  ;;  %v14615_v45 = vadd.f32 %v14614_v30, %v14613_v41 }
 0x979   :  { %v22555_v29 = vpop.f32.mrf.mxu1 }
 0x97a   :  { %25407 = vst [vmem:[#allocation193_spill] sm:$0xff] %v22555_v29  ;;  %v7606_v29 = vadd.f32 %v14352_v36, %v14314_v43 }
 0x97c   :  { %v22557_v32 = vpop.f32.mrf.mxu1 }
 0x97d   :  { %25408 = vst [vmem:[#allocation219_spill] sm:$0xff] %v22557_v32 }
 0x97e   :  { %v22559_v58 = vpop.f32.mrf.mxu1 }
 0x97f   :  { %25409 = vst [vmem:[#allocation221_spill] sm:$0xff] %v22559_v58  ;;  %v14463_v58 = vadd.f32 %v14462_v13, %v14461_v46 }
 0x981   :  { %v8040_v56 = vadd.f32 %v14463_v58, %v7861_v23  ;;  %v25416_v5 = vld [vmem:[#allocation193_spill] sm:$0xff] }
 0x983   :  { %v14689_v53 = vpop.f32.mrf.mxu0  ;;  %v8151_v12 = vadd.f32 %v14501_v4, %v8040_v56 }
 0x985   :  { %v14690_v21 = vpop.f32.mrf.mxu0  ;;  %v8270_v2 = vadd.f32 %v14539_v35, %v8151_v12  ;;  %v13862_v35 = vld [vmem:[#allocation13] ss:$0 sm:$0xff] }
 0x986   :  { %v14691_v15 = vadd.f32 %v14690_v21, %v14689_v53  ;;  %v25418_v12 = vld [vmem:[#allocation221_spill] sm:$0xff] }
 0x987   :  { %v22561_v63 = vpop.f32.mrf.mxu0 }
 0x988   :  { %25410 = vst [vmem:[#allocation226_spill] sm:$0xff] %v22561_v63  ;;  %v7753_v63 = vadd.f32 %v14390_v40, %v7606_v29  ;;  %v8517_v29 = vadd.f32 %v14577_v22, %v8270_v2 }
 0x989   :  { %v22563_v47 = vpop.f32.mrf.mxu0 }
 0x98a   :  { %25411 = vst [vmem:[#allocation197_spill] sm:$0xff] %v22563_v47  ;;  %v7872_v7 = vadd.f32 %v14428_v17, %v7753_v63  ;;  %v8662_v49 = vadd.f32 %v14615_v45, %v8517_v29 }
 0x98c   :  { %v8047_v27 = vadd.f32 %v14466_v24, %v7872_v7  ;;  %v8779_v58 = vadd.f32 %v14653_v3, %v8662_v49  ;;  %v25417_v7 = vld [vmem:[#allocation219_spill] sm:$0xff] }
 0x98d   :  { %v25423_v3 = vld [vmem:[#allocation35_spill] sm:$0xff] }
 0x98e   :  { %v8158_v13 = vadd.f32 %v14504_v38, %v8047_v27  ;;  %v8958_v6 = vadd.f32 %v14691_v15, %v8779_v58  ;;  %v25424_v15 = vld [vmem:[#allocation41_spill] sm:$0xff] }
 0x98f   :  { %v25430_v58 = vld [vmem:[#allocation29_spill] sm:$0xff] }
 0x990   :  { %v8285_v34 = vadd.f32 %v14542_v42, %v8158_v13 }
 0x992   :  { %v8524_v48 = vadd.f32 %v14580_v9, %v8285_v34 }
 0x99c   :  { %v14803_v54 = vpop.f32.mrf.mxu1 }
 0x99e   :  { %v14804_v55 = vpop.f32.mrf.mxu1 }
 0x99f   :  { %v14805_v19 = vadd.f32 %v14804_v55, %v14803_v54  ;;  %v8671_v54 = vadd.f32 %v14618_v39, %v8524_v48  ;;  %v25426_v48 = vld [vmem:[#allocation36_spill] sm:$0xff] }
 0x9a1   :  { %v14806_v16 = vpop.f32.mrf.mxu1 }
 0x9a3   :  { %v14807_v61 = vpop.f32.mrf.mxu1 }
 0x9a4   :  { %v14808_v37 = vadd.f32 %v14807_v61, %v14806_v16  ;;  %v25415_v16 = vld [vmem:[#allocation235_spill] sm:$0xff]  ;;  %v8790_v61 = vadd.f32 %v14656_v31, %v8671_v54  ;;  %v25432_v54 = vld [vmem:[#allocation33_spill] sm:$0xff]  ;;  %v25436_v31 = vld [vmem:[#allocation128_spill] sm:$0xff] }
 0x9a5   :  { %v14729_v43 = vadd.f32 %v25416_v5, %v25415_v16  ;;  %v25446_v16 = vld [vmem:[#allocation124_spill] sm:$0xff] }
 0x9a6   :  { %v14765_v10 = vpop.f32.mrf.mxu0  ;;  %v25447_v5 = vld [vmem:[#allocation152_spill] sm:$0xff] }
 0x9a7   :  { %v9069_v40 = vadd.f32 %v14729_v43, %v8958_v6  ;;  %v25437_v6 = vld [vmem:[#allocation132_spill] sm:$0xff]  ;;  %v25448_v43 = vld [vmem:[#allocation127_spill] sm:$0xff] }
 0x9a8   :  { %v14766_v59 = vpop.f32.mrf.mxu0 }
 0x9a9   :  { %v14767_v23 = vadd.f32 %v14766_v59, %v14765_v10  ;;  %v25414_v59 = vld [vmem:[#allocation197_spill] sm:$0xff] }
 0x9ab   :  { %v14768_v44 = vpop.f32.mrf.mxu0  ;;  %v9480_v56 = vadd.f32 %v14805_v19, %v14767_v23  ;;  %v25419_v19 = vld [vmem:[#allocation44_spill] sm:$0xff] }
 0x9ad   :  { %v14769_v47 = vpop.f32.mrf.mxu0 }
 0x9ae   :  { %v14770_v50 = vadd.f32 %v14769_v47, %v14768_v44  ;;  %v25413_v47 = vld [vmem:[#allocation226_spill] sm:$0xff] }
 0x9af   :  { %v14694_v0 = vadd.f32 %v25414_v59, %v25413_v47  ;;  %v25440_v47 = vld [vmem:[#allocation114_spill] sm:$0xff]  ;;  %v25441_v59 = vld [vmem:[#allocation140_spill] sm:$0xff] }
 0x9b0   :  { %v9487_v55 = vadd.f32 %v14808_v37, %v14770_v50  ;;  %v25422_v50 = vld [vmem:[#allocation37_spill] sm:$0xff]  ;;  %v25427_v37 = vld [vmem:[#allocation38_spill] sm:$0xff] }
 0x9c0   :  { %v14879_v32 = vpop.f32.mrf.mxu1 }
 0x9c2   :  { %v14880_v57 = vpop.f32.mrf.mxu1 }
 0x9c3   :  { %v14881_v10 = vadd.f32 %v14880_v57, %v14879_v32 }
 0x9c5   :  { %v14882_v26 = vpop.f32.mrf.mxu1 }
 0x9c7   :  { %v14883_v1 = vpop.f32.mrf.mxu1 }
 0x9c8   :  { %v14884_v44 = vadd.f32 %v14883_v1, %v14882_v26 }
 0x9ca   :  { %v14841_v52 = vpop.f32.mrf.mxu0 }
 0x9cc   :  { %v14842_v60 = vpop.f32.mrf.mxu0 }
 0x9cd   :  { %v14843_v25 = vadd.f32 %v14842_v60, %v14841_v52  ;;  %v8965_v52 = vadd.f32 %v14694_v0, %v8790_v61  ;;  %v14732_v60 = vadd.f32 %v25418_v12, %v25417_v7  ;;  %v25442_v0 = vld [vmem:[#allocation118_spill] sm:$0xff]  ;;  %v25450_v61 = vld [vmem:[#allocation131_spill] sm:$0xff] }
 0x9ce   :  { %v25462_v7 = vld [vmem:[#allocation155_spill] sm:$0xff] }
 0x9cf   :  { %v14844_v46 = vpop.f32.mrf.mxu0  ;;  %v9625_v41 = vadd.f32 %v14843_v25, %v9480_v56  ;;  %v9076_v42 = vadd.f32 %v14732_v60, %v8965_v52  ;;  %v25421_v56 = vld [vmem:[#allocation40_spill] sm:$0xff]  ;;  %v25463_v12 = vld [vmem:[#allocation171_spill] sm:$0xff] }
 0x9d0   :  { %v25457_v52 = vld [vmem:[#allocation168_spill] sm:$0xff]  ;;  %v25464_v60 = vld [vmem:[#allocation159_spill] sm:$0xff] }
 0x9d1   :  { %v14845_v62 = vpop.f32.mrf.mxu0  ;;  %v9742_v53 = vadd.f32 %v14881_v10, %v9625_v41  ;;  %v25428_v41 = vld [vmem:[#allocation31_spill] sm:$0xff]  ;;  %v25434_v10 = vld [vmem:[#allocation34_spill] sm:$0xff] }
 0x9d2   :  { %v14846_v30 = vadd.f32 %v14845_v62, %v14844_v46  ;;  %v25420_v62 = vld [vmem:[#allocation39_spill] sm:$0xff] }
 0x9d4   :  { %v9634_v33 = vadd.f32 %v14846_v30, %v9487_v55  ;;  %v25429_v30 = vld [vmem:[#allocation32_spill] sm:$0xff]  ;;  %v25433_v55 = vld [vmem:[#allocation109_spill] sm:$0xff] }
 0x9d6   :  { %v9753_v24 = vadd.f32 %v14884_v44, %v9634_v33  ;;  %v25443_v33 = vld [vmem:[#allocation144_spill] sm:$0xff] }
 0x9d7   :  { %v25451_v44 = vld [vmem:[#allocation160_spill] sm:$0xff] }
 0x9e4   :  { %v14955_v18 = vpop.f32.mrf.mxu1 }
 0x9e6   :  { %v14956_v11 = vpop.f32.mrf.mxu1 }
 0x9e7   :  { %v14957_v36 = vadd.f32 %v14956_v11, %v14955_v18  ;;  %v25425_v11 = vld [vmem:[#allocation42_spill] sm:$0xff] }
 0x9e8   :  { %v14958_v28 = vpop.f32.mrf.mxu1 }
 0x9ea   :  { %v14959_v57 = vpop.f32.mrf.mxu1 }
 0x9eb   :  { %v14960_v27 = vadd.f32 %v14959_v57, %v14958_v28  ;;  %v25438_v28 = vld [vmem:[#allocation112_spill] sm:$0xff]  ;;  %v25455_v57 = vld [vmem:[#allocation166_spill] sm:$0xff] }
 0x9ec   :  { %v14917_v63 = vpop.f32.mrf.mxu0 }
 0x9ee   :  { %v14918_v8 = vpop.f32.mrf.mxu0 }
 0x9ef   :  { %v14919_v21 = vadd.f32 %v14918_v8, %v14917_v63  ;;  %v25431_v63 = vld [vmem:[#allocation30_spill] sm:$0xff]  ;;  %v25439_v8 = vld [vmem:[#allocation136_spill] sm:$0xff] }
 0x9f0   :  { %v14920_v51 = vpop.f32.mrf.mxu0 }
 0x9f1   :  { %v9921_v32 = vadd.f32 %v14919_v21, %v9742_v53  ;;  %v25444_v53 = vld [vmem:[#allocation121_spill] sm:$0xff]  ;;  %v25445_v21 = vld [vmem:[#allocation148_spill] sm:$0xff] }
 0x9f2   :  { %v14921_v14 = vpop.f32.mrf.mxu0 }
 0x9f3   :  { %v10032_v17 = vadd.f32 %v14957_v36, %v9921_v32  ;;  %v14922_v4 = vadd.f32 %v14921_v14, %v14920_v51  ;;  %v25449_v51 = vld [vmem:[#allocation156_spill] sm:$0xff]  ;;  %v25452_v36 = vld [vmem:[#allocation135_spill] sm:$0xff] }
 0x9f4   :  { %v25453_v32 = vld [vmem:[#allocation163_spill] sm:$0xff] }
 0x9f5   :  { %v10042_v2 = vadd.f32 %v10032_v17, %v9069_v40  ;;  %v9928_v38 = vadd.f32 %v14922_v4, %v9753_v24  ;;  %v25454_v40 = vld [vmem:[#allocation139_spill] sm:$0xff]  ;;  %v25459_v24 = vld [vmem:[#allocation170_spill] sm:$0xff] }
 0x9f6   :  { %v25456_v14 = vld [vmem:[#allocation143_spill] sm:$0xff] }
 0x9f7   :  { %v10051_v22 = vadd.f32 %v13862_v35, %v10042_v2  ;;  %v10039_v45 = vadd.f32 %v14960_v27, %v9928_v38  ;;  %v25458_v17 = vld [vmem:[#allocation147_spill] sm:$0xff]  ;;  %v25465_v27 = vld [vmem:[#allocation172_spill] sm:$0xff] }
 0x9f8   :  { %v25460_v4 = vld [vmem:[#allocation151_spill] sm:$0xff] }
 0x9f9   :  { %v22578_v26 = vand.u32 4294901760, %v10051_v22  ;;  %v10043_v1 = vadd.f32 %v10039_v45, %v9076_v42  ;;  %v25466_v2 = vld [vmem:[#allocation111_spill] sm:$0xff] }
 0x9fb   :  { %v10177_v46 = vsub.f32 %v10051_v22, %v22578_v26  ;;  %v10052_v13 = vadd.f32 %v13862_v35, %v10043_v1  ;;  %v25461_v35 = vld [vmem:[#allocation115_spill] sm:$0xff] }
 0x9fd   :  { %v22581_v23 = vand.u32 4294901760, %v10052_v13  ;;  %v10178_v18 = vand.u32 4294901760, %v10177_v46 }
 0x9ff   :  { %v10170_v29 = vsub.f32 %v10052_v13, %v22581_v23  ;;  %16239 = vmatprep.subr.mxu0 %v22581_v23  ;;  %v10179_v49 = vsub.f32 %v10177_v46, %v10178_v18 }
 0xa00   :  { %16240 = vmatpush3.msra.mxu0 %v22581_v23 }
 0xa01   :  { %16241 = vmatprep.subr.mxu0 %v22578_v26  ;;  %v10171_v34 = vand.u32 4294901760, %v10170_v29  ;;  %v10180_v39 = vand.u32 4294901760, %v10179_v49 }
 0xa02   :  { %16242 = vmatpush3.msra.mxu0 %v22578_v26 }
 0xa03   :  { %16253 = vmatprep.subr.mxu0 %v10170_v29  ;;  %16244 = vmatmul.mubr.f32.vlgmr.msra.gmra.mxu0 %v25419_v19  ;;  %v10172_v25 = vsub.f32 %v10170_v29, %v10171_v34 }
 0xa04   :  { %16254 = vmatpush3.msra.mxu0 %v10170_v29  ;;  %16257 = vmatprep.mubr.f32.mxu0 %v25420_v62 }
 0xa05   :  { %16255 = vmatprep.subr.mxu0 %v10177_v46  ;;  %v10173_v9 = vand.u32 4294901760, %v10172_v25 }
 0xa06   :  { %16256 = vmatpush3.msra.mxu0 %v10177_v46 }
 0xa07   :  { %16246 = vmatprep.subr.mxu1 %v10173_v9  ;;  %16267 = vmatprep.subr.mxu0 %v10171_v34 }
 0xa08   :  { %16247 = vmatpush3.msra.mxu1 %v10173_v9  ;;  %16258 = vmatmul.mubr.f32.vlgmr.msra.gmra.mxu0 %v25421_v56 }
 0xa09   :  { %16268 = vmatpush3.msra.mxu0 %v10171_v34  ;;  %16248 = vmatprep.subr.mxu1 %v10180_v39 }
 0xa0a   :  { %16269 = vmatprep.subr.mxu0 %v10178_v18  ;;  %16249 = vmatpush3.msra.mxu1 %v10180_v39 }
 0xa0b   :  { %16270 = vmatpush3.msra.mxu0 %v10178_v18  ;;  %16251 = vmatmul.mubr.f32.vlgmr.msra.gmra.mxu1 %v25422_v50 }
 0xa0c   :  { %16260 = vmatprep.subr.mxu1 %v22581_v23  ;;  %16271 = vmatprep.mubr.f32.mxu0 %v25423_v3 }
 0xa0d   :  { %16281 = vmatprep.subr.mxu0 %v22581_v23  ;;  %16261 = vmatpush3.msra.mxu1 %v22581_v23 }
 0xa0e   :  { %16272 = vmatmul.mubr.f32.vlgmr.msra.gmra.mxu0 %v25422_v50  ;;  %16262 = vmatprep.subr.mxu1 %v22578_v26 }
 0xa0f   :  { %16282 = vmatpush3.msra.mxu0 %v22581_v23  ;;  %16263 = vmatpush3.msra.mxu1 %v22578_v26 }
 0xa10   :  { %16283 = vmatprep.subr.mxu0 %v22578_v26  ;;  %16264 = vmatprep.mubr.f32.mxu1 %v25424_v15 }
 0xa11   :  { %16284 = vmatpush3.msra.mxu0 %v22578_v26  ;;  %16265 = vmatmul.mubr.f32.vlgmr.msra.gmra.mxu1 %v25425_v11 }
 0xa12   :  { %16274 = vmatprep.subr.mxu1 %v22581_v23  ;;  %16285 = vmatprep.mubr.f32.mxu0 %v25426_v48 }
 0xa13   :  { %16295 = vmatprep.subr.mxu0 %v10170_v29  ;;  %16275 = vmatpush3.msra.mxu1 %v22581_v23 }
 0xa14   :  { %16286 = vmatmul.mubr.f32.vlgmr.msra.gmra.mxu0 %v25427_v37  ;;  %16276 = vmatprep.subr.mxu1 %v22578_v26 }
 0xa15   :  { %16296 = vmatpush3.msra.mxu0 %v10170_v29  ;;  %16277 = vmatpush3.msra.mxu1 %v22578_v26 }
 0xa16   :  { %16297 = vmatprep.subr.mxu0 %v10177_v46  ;;  %16278 = vmatprep.mubr.f32.mxu1 %v25423_v3 }
 0xa17   :  { %16298 = vmatpush3.msra.mxu0 %v10177_v46  ;;  %16279 = vmatmul.mubr.f32.vlgmr.msra.gmra.mxu1 %v25422_v50 }
 0xa18   :  { %16288 = vmatprep.subr.mxu1 %v10173_v9  ;;  %16299 = vmatprep.mubr.f32.mxu0 %v25428_v41 }
 0xa19   :  { %16309 = vmatprep.subr.mxu0 %v10171_v34  ;;  %16289 = vmatpush3.msra.mxu1 %v10173_v9 }
 0xa1a   :  { %16300 = vmatmul.mubr.f32.vlgmr.msra.gmra.mxu0 %v25429_v30  ;;  %16290 = vmatprep.subr.mxu1 %v10180_v39 }
 0xa1b   :  { %16310 = vmatpush3.msra.mxu0 %v10171_v34  ;;  %16291 = vmatpush3.msra.mxu1 %v10180_v39 }
 0xa1c   :  { %16311 = vmatprep.subr.mxu0 %v10178_v18  ;;  %16292 = vmatprep.mubr.f32.mxu1 %v25430_v58 }
 0xa1d   :  { %16312 = vmatpush3.msra.mxu0 %v10178_v18  ;;  %16302 = vmatprep.subr.mxu1 %v22581_v23 }
 0xa1e   :  { %16293 = vmatmul.mubr.f32.vlgmr.msra.gmra.mxu1 %v25431_v63  ;;  %16313 = vmatprep.mubr.f32.mxu0 %v25430_v58 }
 0xa1f   :  { %16303 = vmatpush3.msra.mxu1 %v22581_v23  ;;  %16306 = vmatprep.mubr.f32.mxu1 %v25432_v54 }
 0xa20   :  { %16304 = vmatprep.subr.mxu1 %v22578_v26  ;;  %16314 = vmatmul.mubr.f32.vlgmr.msra.gmra.mxu0 %v25431_v63 }
 0xa21   :  { %16305 = vmatpush3.msra.mxu1 %v22578_v26  ;;  %16323 = vmatprep.subr.mxu0 %v25433_v55 }
 0xa22   :  { %16316 = vmatprep.subr.mxu1 %v22581_v23  ;;  %16307 = vmatmul.mubr.f32.vlgmr.msra.gmra.mxu1 %v25434_v10 }
 0xa23   :  { %16317 = vmatpush3.msra.mxu1 %v22581_v23  ;;  %16320 = vmatprep.mubr.f32.mxu1 %v25430_v58 }
 0xa24   :  { %16318 = vmatprep.subr.mxu1 %v22578_v26  ;;  %16324 = vmatpush3.msra.mxu0 %v25433_v55 }
 0xa25   :  { %16319 = vmatpush3.msra.mxu1 %v22578_v26  ;;  %16325 = vmatprep.subr.mxu0 %v25435_v20 }
 0xa26   :  { %16321 = vmatmul.mubr.f32.vlgmr.msra.gmra.mxu1 %v25431_v63  ;;  %16358 = vmatprep.subr.mxu1 %v25436_v31 }
 0xa27   :  { %16359 = vmatpush3.msra.mxu1 %v25436_v31  ;;  %16326 = vmatpush3.msra.mxu0 %v25435_v20 }
 0xa28   :  { %16360 = vmatprep.subr.mxu1 %v25437_v6  ;;  %16327 = vmatprep.subr.mxu0 %v25438_v28 }
 0xa29   :  { %16361 = vmatpush3.msra.mxu1 %v25437_v6  ;;  %16328 = vmatpush3.msra.mxu0 %v25438_v28 }
 0xa2a   :  { %16362 = vmatprep.subr.mxu1 %v25439_v8  ;;  %16329 = vmatprep.subr.mxu0 %v25440_v47 }
 0xa2b   :  { %16363 = vmatpush3.msra.mxu1 %v25439_v8  ;;  %16330 = vmatpush3.msra.mxu0 %v25440_v47 }
 0xa2c   :  { %16364 = vmatprep.subr.mxu1 %v25441_v59  ;;  %16331 = vmatprep.subr.mxu0 %v25442_v0 }
 0xa2d   :  { %16365 = vmatpush3.msra.mxu1 %v25441_v59  ;;  %16332 = vmatpush3.msra.mxu0 %v25442_v0 }
 0xa2e   :  { %16366 = vmatprep.subr.mxu1 %v25443_v33  ;;  %16333 = vmatprep.subr.mxu0 %v25444_v53 }
 0xa2f   :  { %16367 = vmatpush3.msra.mxu1 %v25443_v33  ;;  %16334 = vmatpush3.msra.mxu0 %v25444_v53 }
 0xa30   :  { %16368 = vmatprep.subr.mxu1 %v25445_v21  ;;  %16335 = vmatprep.subr.mxu0 %v25446_v16 }
 0xa31   :  { %16369 = vmatpush3.msra.mxu1 %v25445_v21  ;;  %16336 = vmatpush3.msra.mxu0 %v25446_v16 }
 0xa32   :  { %16370 = vmatprep.subr.mxu1 %v25447_v5  ;;  %16337 = vmatprep.subr.mxu0 %v25448_v43 }
 0xa33   :  { %16371 = vmatpush3.msra.mxu1 %v25447_v5  ;;  %16338 = vmatpush3.msra.mxu0 %v25448_v43 }
 0xa34   :  { %16372 = vmatprep.subr.mxu1 %v25449_v51  ;;  %16339 = vmatprep.subr.mxu0 %v25450_v61 }
 0xa35   :  { %16373 = vmatpush3.msra.mxu1 %v25449_v51  ;;  %16340 = vmatpush3.msra.mxu0 %v25450_v61 }
 0xa36   :  { %16374 = vmatprep.subr.mxu1 %v25451_v44  ;;  %16341 = vmatprep.subr.mxu0 %v25452_v36 }
 0xa37   :  { %16375 = vmatpush3.msra.mxu1 %v25451_v44  ;;  %16342 = vmatpush3.msra.mxu0 %v25452_v36 }
 0xa38   :  { %16376 = vmatprep.subr.mxu1 %v25453_v32  ;;  %16343 = vmatprep.subr.mxu0 %v25454_v40 }
 0xa39   :  { %16377 = vmatpush3.msra.mxu1 %v25453_v32  ;;  %16344 = vmatpush3.msra.mxu0 %v25454_v40 }
 0xa3a   :  { %16378 = vmatprep.subr.mxu1 %v25455_v57  ;;  %16345 = vmatprep.subr.mxu0 %v25456_v14 }
 0xa3b   :  { %16379 = vmatpush3.msra.mxu1 %v25455_v57  ;;  %16346 = vmatpush3.msra.mxu0 %v25456_v14 }
 0xa3c   :  { %16380 = vmatprep.subr.mxu1 %v25457_v52  ;;  %16347 = vmatprep.subr.mxu0 %v25458_v17 }
 0xa3d   :  { %16381 = vmatpush3.msra.mxu1 %v25457_v52  ;;  %16348 = vmatpush3.msra.mxu0 %v25458_v17 }
 0xa3e   :  { %16382 = vmatprep.subr.mxu1 %v25459_v24  ;;  %16349 = vmatprep.subr.mxu0 %v25460_v4 }
 0xa3f   :  { %16383 = vmatpush3.msra.mxu1 %v25459_v24  ;;  %16350 = vmatpush3.msra.mxu0 %v25460_v4 }
 0xa40   :  { %16384 = vmatprep.subr.mxu1 %v25461_v35  ;;  %16351 = vmatprep.subr.mxu0 %v25462_v7 }
 0xa41   :  { %16385 = vmatpush3.msra.mxu1 %v25461_v35  ;;  %16352 = vmatpush3.msra.mxu0 %v25462_v7 }
 0xa42   :  { %16386 = vmatprep.subr.mxu1 %v25463_v12  ;;  %16353 = vmatprep.subr.mxu0 %v25464_v60 }
 0xa43   :  { %16387 = vmatpush3.msra.mxu1 %v25463_v12  ;;  %16354 = vmatpush3.msra.mxu0 %v25464_v60 }
 0xa44   :  { %16388 = vmatprep.subr.mxu1 %v25465_v27  ;;  %16393 = vmatprep.subr.mxu0 %v25466_v2 }
 0xa45   :  { %16389 = vmatpush3.msra.mxu1 %v25465_v27 }
 0xa46   :  { %16428 = vmatprep.subr.mxu1 %v25433_v55 }
 0xac3   :  { %v16245_v38 = vpop.f32.mrf.mxu0 }
 0xac5   :  { %v10126_v42 = vpop.f32.mrf.mxu0 }
 0xac8   :  { %v16259_v22 = vpop.f32.mrf.mxu0 }
 0xaca   :  { %v10299_v46 = vpop.f32.mrf.mxu0 }
 0xacb   :  { %v16252_v45 = vpop.f32.mrf.mxu1 }
 0xacc   :  { %v10224_v26 = vadd.f32 %v16252_v45, %v16245_v38  ;;  %v25477_v45 = vld [vmem:[#allocation120_spill] sm:$0xff] }
 0xacd   :  { %v10217_v1 = vpop.f32.mrf.mxu1 }
 0xace   :  { %v10218_v13 = vadd.f32 %v10217_v1, %v10126_v42  ;;  %v10307_v23 = vadd.f32 %v16259_v22, %v10224_v26  ;;  %v16273_v34 = vpop.f32.mrf.mxu0  ;;  %v25475_v42 = vld [vmem:[#allocation113_spill] sm:$0xff]  ;;  %v25478_v26 = vld [vmem:[#allocation123_spill] sm:$0xff]  ;;  %v25479_v1 = vld [vmem:[#allocation126_spill] sm:$0xff] }
 0xacf   :  { %v25476_v22 = vld [vmem:[#allocation117_spill] sm:$0xff] }
 0xad0   :  { %v10300_v29 = vadd.f32 %v10299_v46, %v10218_v13  ;;  %v10466_v9 = vpop.f32.mrf.mxu0  ;;  %v25480_v46 = vld [vmem:[#allocation130_spill] sm:$0xff] }
 0xad1   :  { %v16266_v18 = vpop.f32.mrf.mxu1  ;;  %v25481_v13 = vld [vmem:[#allocation134_spill] sm:$0xff] }
 0xad2   :  { %v10390_v19 = vadd.f32 %v16266_v18, %v10307_v23  ;;  %v25482_v23 = vld [vmem:[#allocation138_spill] sm:$0xff] }
 0xad3   :  { %v10381_v25 = vpop.f32.mrf.mxu1  ;;  %v25484_v18 = vld [vmem:[#allocation146_spill] sm:$0xff] }
 0xad4   :  { %v10382_v49 = vadd.f32 %v10381_v25, %v10300_v29  ;;  %v10473_v62 = vadd.f32 %v16273_v34, %v10390_v19  ;;  %v25483_v29 = vld [vmem:[#allocation142_spill] sm:$0xff] }
 0xad5   :  { %v25485_v34 = vld [vmem:[#allocation150_spill] sm:$0xff] }
 0xad6   :  { %v10467_v39 = vadd.f32 %v10466_v9, %v10382_v49  ;;  %v25486_v19 = vld [vmem:[#allocation154_spill] sm:$0xff]  ;;  %v25490_v9 = vld [vmem:[#allocation116_spill] sm:$0xff] }
 0xad7   :  { %v16280_v56 = vpop.f32.mrf.mxu1  ;;  %v25487_v25 = vld [vmem:[#allocation158_spill] sm:$0xff] }
 0xad8   :  { %v10552_v50 = vadd.f32 %v16280_v56, %v10473_v62  ;;  %v25488_v49 = vld [vmem:[#allocation162_spill] sm:$0xff]  ;;  %v25489_v62 = vld [vmem:[#allocation165_spill] sm:$0xff] }
 0xad9   :  { %v10545_v3 = vpop.f32.mrf.mxu1  ;;  %v25492_v56 = vld [vmem:[#allocation122_spill] sm:$0xff] }
 0xada   :  { %v22696_v15 = vand.u32 4294901760, %v10552_v50  ;;  %v10546_v11 = vadd.f32 %v10545_v3, %v10467_v39  ;;  %v25491_v39 = vld [vmem:[#allocation119_spill] sm:$0xff]  ;;  %v25494_v3 = vld [vmem:[#allocation129_spill] sm:$0xff] }
 0xadc   :  { %25467 = vst [vmem:[#allocation241_spill] sm:$0xff] %v22696_v15  ;;  %v22699_v48 = vsub.f32 %v10552_v50, %v22696_v15  ;;  %v22701_v37 = vand.u32 4294901760, %v10546_v11  ;;  %v25493_v50 = vld [vmem:[#allocation125_spill] sm:$0xff] }
 0xade   :  { %25468 = vst [vmem:[#allocation243_spill] sm:$0xff] %v22699_v48  ;;  %25469 = vst [vmem:[#allocation237_spill] sm:$0xff] %v22701_v37  ;;  %v22704_v41 = vand.u32 4294901760, %v22699_v48  ;;  %v22707_v30 = vsub.f32 %v10546_v11, %v22701_v37  ;;  %16390 = vmatprep.mubr.f32.mxu1 %v22701_v37  ;;  %v25495_v11 = vld [vmem:[#allocation133_spill] sm:$0xff] }
 0xadf   :  { %16391 = vmatmul.mubr.f32.vlgmr.msra.gmra.mxu1 %v22696_v15 }
 0xae0   :  { %25470 = vst [vmem:[#allocation238_spill] sm:$0xff] %v22704_v41  ;;  %25471 = vst [vmem:[#allocation191_spill] sm:$0xff] %v22707_v30  ;;  %16429 = vmatpush3.msra.mxu1 %v25433_v55  ;;  %v22713_v58 = vand.u32 4294901760, %v22707_v30  ;;  %v11151_v63 = vsub.f32 %v22699_v48, %v22704_v41 }
 0xae1   :  { %16430 = vmatprep.subr.mxu1 %v25435_v20 }
 0xae2   :  { %25472 = vst [vmem:[#allocation242_spill] sm:$0xff] %v22713_v58  ;;  %16431 = vmatpush3.msra.mxu1 %v25435_v20  ;;  %16460 = vmatprep.mubr.f32.mxu1 %v22713_v58  ;;  %v11141_v54 = vsub.f32 %v22707_v30, %v22713_v58  ;;  %v22726_v38 = vand.u32 4294901760, %v11151_v63  ;;  %v25496_v63 = vld [vmem:[#allocation137_spill] sm:$0xff] }
 0xae3   :  { %16432 = vmatprep.subr.mxu1 %v25438_v28  ;;  %v25499_v58 = vld [vmem:[#allocation149_spill] sm:$0xff] }
 0xae4   :  { %16433 = vmatpush3.msra.mxu1 %v25438_v28  ;;  %v22724_v10 = vand.u32 4294901760, %v11141_v54  ;;  %25474 = vst [vmem:[#allocation200_spill] sm:$0xff] %v22726_v38  ;;  %v16287_v54 = vpop.f32.mrf.mxu0 }
 0xae5   :  { %16434 = vmatprep.subr.mxu1 %v25440_v47 }
 0xae6   :  { %25473 = vst [vmem:[#allocation203_spill] sm:$0xff] %v22724_v10  ;;  %16435 = vmatpush3.msra.mxu1 %v25440_v47  ;;  %16355 = vmatprep.mubr.f32.mxu0 %v22724_v10  ;;  %v25500_v10 = vld [vmem:[#allocation153_spill] sm:$0xff] }
 0xae7   :  { %16436 = vmatprep.subr.mxu1 %v25442_v0  ;;  %16356 = vmatmul.mubr.f32.vlgmr.msra.gmra.mxu0 %v22726_v38  ;;  %v16294_v38 = vpop.f32.mrf.mxu1 }
 0xae8   :  { %16394 = vmatpush3.msra.mxu0 %v25466_v2  ;;  %16437 = vmatpush3.msra.mxu1 %v25442_v0 }
 0xae9   :  { %16395 = vmatprep.subr.mxu0 %v25475_v42  ;;  %16425 = vmatprep.mubr.f32.mxu0 %v22707_v30  ;;  %v10628_v30 = vpop.f32.mrf.mxu0 }
 0xaea   :  { %16438 = vmatprep.subr.mxu1 %v25444_v53  ;;  %16396 = vmatpush3.msra.mxu0 %v25475_v42 }
 0xaeb   :  { %16439 = vmatpush3.msra.mxu1 %v25444_v53  ;;  %16397 = vmatprep.subr.mxu0 %v25476_v22 }
 0xaec   :  { %16440 = vmatprep.subr.mxu1 %v25446_v16  ;;  %16398 = vmatpush3.msra.mxu0 %v25476_v22 }
 0xaed   :  { %16441 = vmatpush3.msra.mxu1 %v25446_v16  ;;  %16399 = vmatprep.subr.mxu0 %v25477_v45 }
 0xaee   :  { %16442 = vmatprep.subr.mxu1 %v25448_v43  ;;  %16400 = vmatpush3.msra.mxu0 %v25477_v45 }
 0xaef   :  { %16443 = vmatpush3.msra.mxu1 %v25448_v43  ;;  %16401 = vmatprep.subr.mxu0 %v25478_v26 }
 0xaf0   :  { %16444 = vmatprep.subr.mxu1 %v25450_v61  ;;  %16402 = vmatpush3.msra.mxu0 %v25478_v26  ;;  %v25542_v26 = vld [vmem:[#allocation61_spill] sm:$0xff] }
 0xaf1   :  { %16445 = vmatpush3.msra.mxu1 %v25450_v61  ;;  %16403 = vmatprep.subr.mxu0 %v25479_v1 }
 0xaf2   :  { %16446 = vmatprep.subr.mxu1 %v25452_v36  ;;  %16404 = vmatpush3.msra.mxu0 %v25479_v1  ;;  %v25540_v1 = vld [vmem:[#allocation52_spill] sm:$0xff] }
 0xaf3   :  { %16447 = vmatpush3.msra.mxu1 %v25452_v36  ;;  %16405 = vmatprep.subr.mxu0 %v25480_v46 }
 0xaf4   :  { %16448 = vmatprep.subr.mxu1 %v25454_v40  ;;  %16406 = vmatpush3.msra.mxu0 %v25480_v46  ;;  %v25538_v46 = vld [vmem:[#allocation46_spill] sm:$0xff] }
 0xaf5   :  { %16449 = vmatpush3.msra.mxu1 %v25454_v40  ;;  %16407 = vmatprep.subr.mxu0 %v25481_v13 }
 0xaf6   :  { %16450 = vmatprep.subr.mxu1 %v25456_v14  ;;  %16408 = vmatpush3.msra.mxu0 %v25481_v13  ;;  %v25537_v13 = vld [vmem:[#allocation100_spill] sm:$0xff] }
 0xaf7   :  { %16451 = vmatpush3.msra.mxu1 %v25456_v14  ;;  %16409 = vmatprep.subr.mxu0 %v25482_v23 }
 0xaf8   :  { %16452 = vmatprep.subr.mxu1 %v25458_v17  ;;  %16410 = vmatpush3.msra.mxu0 %v25482_v23 }
 0xaf9   :  { %16453 = vmatpush3.msra.mxu1 %v25458_v17  ;;  %16411 = vmatprep.subr.mxu0 %v25483_v29 }
 0xafa   :  { %16454 = vmatprep.subr.mxu1 %v25460_v4  ;;  %16412 = vmatpush3.msra.mxu0 %v25483_v29 }
 0xafb   :  { %16455 = vmatpush3.msra.mxu1 %v25460_v4  ;;  %16413 = vmatprep.subr.mxu0 %v25484_v18 }
 0xafc   :  { %16456 = vmatprep.subr.mxu1 %v25462_v7  ;;  %16414 = vmatpush3.msra.mxu0 %v25484_v18 }
 0xafd   :  { %16457 = vmatpush3.msra.mxu1 %v25462_v7  ;;  %16415 = vmatprep.subr.mxu0 %v25485_v34 }
 0xafe   :  { %16458 = vmatprep.subr.mxu1 %v25464_v60  ;;  %16416 = vmatpush3.msra.mxu0 %v25485_v34  ;;  %v25533_v34 = vld [vmem:[#allocation108_spill] sm:$0xff] }
 0xaff   :  { %16459 = vmatpush3.msra.mxu1 %v25464_v60  ;;  %16417 = vmatprep.subr.mxu0 %v25486_v19 }
 0xb00   :  { %16461 = vmatmul.mubr.f32.vlgmr.msra.gmra.mxu1 %v22704_v41  ;;  %16498 = vmatprep.subr.mxu1 %v25433_v55  ;;  %v25498_v41 = vld [vmem:[#allocation145_spill] sm:$0xff] }
 0xb01   :  { %16418 = vmatpush3.msra.mxu0 %v25486_v19  ;;  %16499 = vmatpush3.msra.mxu1 %v25433_v55  ;;  %v25531_v19 = vld [vmem:[#allocation107_spill] sm:$0xff] }
 0xb02   :  { %16530 = vmatprep.mubr.f32.mxu1 %v22701_v37  ;;  %16419 = vmatprep.subr.mxu0 %v25487_v25 }
 0xb03   :  { %16500 = vmatprep.subr.mxu1 %v25435_v20  ;;  %16420 = vmatpush3.msra.mxu0 %v25487_v25 }
 0xb04   :  { %16501 = vmatpush3.msra.mxu1 %v25435_v20  ;;  %16421 = vmatprep.subr.mxu0 %v25488_v49 }
 0xb05   :  { %16502 = vmatprep.subr.mxu1 %v25438_v28  ;;  %16422 = vmatpush3.msra.mxu0 %v25488_v49 }
 0xb06   :  { %16503 = vmatpush3.msra.mxu1 %v25438_v28  ;;  %16423 = vmatprep.subr.mxu0 %v25489_v62 }
 0xb07   :  { %16504 = vmatprep.subr.mxu1 %v25440_v47  ;;  %16424 = vmatpush3.msra.mxu0 %v25489_v62 }
 0xb08   :  { %16505 = vmatpush3.msra.mxu1 %v25440_v47  ;;  %16426 = vmatmul.mubr.f32.vlgmr.msra.gmra.mxu0 %v22699_v48  ;;  %v25497_v48 = vld [vmem:[#allocation141_spill] sm:$0xff] }
 0xb09   :  { %16463 = vmatprep.subr.mxu0 %v25490_v9  ;;  %16506 = vmatprep.subr.mxu1 %v25442_v0 }
 0xb0a   :  { %16464 = vmatpush3.msra.mxu0 %v25490_v9  ;;  %16495 = vmatprep.mubr.f32.mxu0 %v22701_v37  ;;  %v10719_v37 = vpop.f32.mrf.mxu1 }
 0xb0b   :  { %16507 = vmatpush3.msra.mxu1 %v25442_v0  ;;  %16465 = vmatprep.subr.mxu0 %v25491_v39 }
 0xb0c   :  { %16508 = vmatprep.subr.mxu1 %v25444_v53  ;;  %16466 = vmatpush3.msra.mxu0 %v25491_v39  ;;  %v10726_v39 = vadd.f32 %v16294_v38, %v16287_v54 }
 0xb0d   :  { %16509 = vmatpush3.msra.mxu1 %v25444_v53  ;;  %16467 = vmatprep.subr.mxu0 %v25492_v56 }
 0xb0e   :  { %16510 = vmatprep.subr.mxu1 %v25446_v16  ;;  %16468 = vmatpush3.msra.mxu0 %v25492_v56  ;;  %v25505_v56 = vld [vmem:[#allocation58_spill] sm:$0xff] }
 0xb0f   :  { %16511 = vmatpush3.msra.mxu1 %v25446_v16  ;;  %16469 = vmatprep.subr.mxu0 %v25493_v50 }
 0xb10   :  { %16512 = vmatprep.subr.mxu1 %v25448_v43  ;;  %16470 = vmatpush3.msra.mxu0 %v25493_v50  ;;  %v25504_v50 = vld [vmem:[#allocation164_spill] sm:$0xff] }
 0xb11   :  { %16513 = vmatpush3.msra.mxu1 %v25448_v43  ;;  %16471 = vmatprep.subr.mxu0 %v25494_v3 }
 0xb12   :  { %16514 = vmatprep.subr.mxu1 %v25450_v61  ;;  %16472 = vmatpush3.msra.mxu0 %v25494_v3  ;;  %v16308_v3 = vpop.f32.mrf.mxu1 }
 0xb13   :  { %16515 = vmatpush3.msra.mxu1 %v25450_v61  ;;  %16473 = vmatprep.subr.mxu0 %v25495_v11 }
 0xb14   :  { %16516 = vmatprep.subr.mxu1 %v25452_v36  ;;  %16474 = vmatpush3.msra.mxu0 %v25495_v11  ;;  %v25503_v11 = vld [vmem:[#allocation54_spill] sm:$0xff]  ;;  %v10883_v9 = vpop.f32.mrf.mxu1 }
 0xb15   :  { %16517 = vmatpush3.msra.mxu1 %v25452_v36  ;;  %16475 = vmatprep.subr.mxu0 %v25496_v63 }
 0xb16   :  { %16518 = vmatprep.subr.mxu1 %v25454_v40  ;;  %16476 = vmatpush3.msra.mxu0 %v25496_v63  ;;  %v10720_v63 = vadd.f32 %v10719_v37, %v10628_v30  ;;  %v25506_v37 = vld [vmem:[#allocation167_spill] sm:$0xff]  ;;  %v25507_v30 = vld [vmem:[#allocation62_spill] sm:$0xff] }
 0xb17   :  { %16519 = vmatpush3.msra.mxu1 %v25454_v40  ;;  %16477 = vmatprep.subr.mxu0 %v25497_v48 }
 0xb18   :  { %16520 = vmatprep.subr.mxu1 %v25456_v14  ;;  %16478 = vmatpush3.msra.mxu0 %v25497_v48  ;;  %v25501_v48 = vld [vmem:[#allocation157_spill] sm:$0xff] }
 0xb19   :  { %16521 = vmatpush3.msra.mxu1 %v25456_v14  ;;  %16479 = vmatprep.subr.mxu0 %v25498_v41 }
 0xb1a   :  { %16522 = vmatprep.subr.mxu1 %v25458_v17  ;;  %16480 = vmatpush3.msra.mxu0 %v25498_v41  ;;  %v16301_v41 = vpop.f32.mrf.mxu0 }
 0xb1b   :  { %16523 = vmatpush3.msra.mxu1 %v25458_v17  ;;  %16481 = vmatprep.subr.mxu0 %v25499_v58  ;;  %v10809_v38 = vadd.f32 %v16301_v41, %v10726_v39 }
 0xb1c   :  { %16524 = vmatprep.subr.mxu1 %v25460_v4  ;;  %16482 = vmatpush3.msra.mxu0 %v25499_v58  ;;  %v25502_v58 = vld [vmem:[#allocation161_spill] sm:$0xff] }
 0xb1d   :  { %16525 = vmatpush3.msra.mxu1 %v25460_v4  ;;  %16483 = vmatprep.subr.mxu0 %v25500_v10  ;;  %v10892_v41 = vadd.f32 %v16308_v3, %v10809_v38  ;;  %v25519_v3 = vld [vmem:[#allocation86_spill] sm:$0xff]  ;;  %v25520_v38 = vld [vmem:[#allocation60_spill] sm:$0xff] }
 0xb1e   :  { %16526 = vmatprep.subr.mxu1 %v25462_v7  ;;  %16484 = vmatpush3.msra.mxu0 %v25500_v10  ;;  %v10801_v10 = vpop.f32.mrf.mxu0 }
 0xb1f   :  { %16527 = vmatpush3.msra.mxu1 %v25462_v7  ;;  %16485 = vmatprep.subr.mxu0 %v25501_v48 }
 0xb20   :  { %16528 = vmatprep.subr.mxu1 %v25464_v60  ;;  %16486 = vmatpush3.msra.mxu0 %v25501_v48  ;;  %v10802_v48 = vadd.f32 %v10801_v10, %v10720_v63  ;;  %v16315_v62 = vpop.f32.mrf.mxu0  ;;  %v25510_v63 = vld [vmem:[#allocation45_spill] sm:$0xff] }
 0xb21   :  { %16529 = vmatpush3.msra.mxu1 %v25464_v60  ;;  %16487 = vmatprep.subr.mxu0 %v25502_v58 }
 0xb22   :  { %16531 = vmatmul.mubr.f32.vlgmr.msra.gmra.mxu1 %v22696_v15  ;;  %16568 = vmatprep.subr.mxu1 %v25503_v11  ;;  %v10884_v10 = vadd.f32 %v10883_v9, %v10802_v48  ;;  %v10968_v54 = vpop.f32.mrf.mxu0  ;;  %v25514_v9 = vld [vmem:[#allocation50_spill] sm:$0xff] }
 0xb23   :  { %16488 = vmatpush3.msra.mxu0 %v25502_v58  ;;  %16569 = vmatpush3.msra.mxu1 %v25503_v11  ;;  %v25508_v11 = vld [vmem:[#allocation169_spill] sm:$0xff]  ;;  %v25509_v58 = vld [vmem:[#allocation66_spill] sm:$0xff] }
 0xb24   :  { %16489 = vmatprep.subr.mxu0 %v25504_v50  ;;  %16570 = vmatprep.subr.mxu1 %v25505_v56  ;;  %v10969_v48 = vadd.f32 %v10968_v54, %v10884_v10  ;;  %v25518_v10 = vld [vmem:[#allocation57_spill] sm:$0xff]  ;;  %v10975_v54 = vadd.f32 %v16315_v62, %v10892_v41  ;;  %v25523_v62 = vld [vmem:[#allocation94_spill] sm:$0xff] }
 0xb25   :  { %16490 = vmatpush3.msra.mxu0 %v25504_v50  ;;  %16571 = vmatpush3.msra.mxu1 %v25505_v56  ;;  %v16322_v56 = vpop.f32.mrf.mxu1  ;;  %v25511_v50 = vld [vmem:[#allocation73_spill] sm:$0xff] }
 0xb26   :  { %16491 = vmatprep.subr.mxu0 %v25506_v37  ;;  %16572 = vmatprep.subr.mxu1 %v25507_v30  ;;  %v25524_v41 = vld [vmem:[#allocation69_spill] sm:$0xff] }
 0xb27   :  { %16492 = vmatpush3.msra.mxu0 %v25506_v37  ;;  %16573 = vmatpush3.msra.mxu1 %v25507_v30  ;;  %v25512_v30 = vld [vmem:[#allocation47_spill] sm:$0xff]  ;;  %v25513_v37 = vld [vmem:[#allocation74_spill] sm:$0xff]  ;;  %v11047_v39 = vpop.f32.mrf.mxu1 }
 0xb28   :  { %16493 = vmatprep.subr.mxu0 %v25508_v11  ;;  %16574 = vmatprep.subr.mxu1 %v25509_v58 }
 0xb29   :  { %16494 = vmatpush3.msra.mxu0 %v25508_v11  ;;  %16575 = vmatpush3.msra.mxu1 %v25509_v58  ;;  %v25517_v58 = vld [vmem:[#allocation82_spill] sm:$0xff]  ;;  %v11048_v11 = vadd.f32 %v11047_v39, %v10969_v48  ;;  %v25522_v48 = vld [vmem:[#allocation64_spill] sm:$0xff]  ;;  %v11054_v39 = vadd.f32 %v16322_v56, %v10975_v54 }
 0xb2a   :  { %16496 = vmatmul.mubr.f32.vlgmr.msra.gmra.mxu0 %v22696_v15  ;;  %16533 = vmatprep.subr.mxu0 %v25510_v63  ;;  %v25515_v15 = vld [vmem:[#allocation78_spill] sm:$0xff]  ;;  %v25526_v56 = vld [vmem:[#allocation72_spill] sm:$0xff] }
 0xb2b   :  { %16576 = vmatprep.subr.mxu1 %v25511_v50  ;;  %16534 = vmatpush3.msra.mxu0 %v25510_v63  ;;  %v22902_v49 = vand.u32 4294901760, %v11054_v39  ;;  %v25527_v54 = vld [vmem:[#allocation102_spill] sm:$0xff] }
 0xb2c   :  { %16577 = vmatpush3.msra.mxu1 %v25511_v50  ;;  %16535 = vmatprep.subr.mxu0 %v25512_v30  ;;  %v25516_v50 = vld [vmem:[#allocation53_spill] sm:$0xff] }
 0xb2d   :  { %16578 = vmatprep.subr.mxu1 %v25513_v37  ;;  %16536 = vmatpush3.msra.mxu0 %v25512_v30  ;;  %v22916_v25 = vsub.f32 %v11054_v39, %v22902_v49 }
 0xb2e   :  { %16579 = vmatpush3.msra.mxu1 %v25513_v37  ;;  %16537 = vmatprep.subr.mxu0 %v25514_v9  ;;  %v22889_v37 = vand.u32 4294901760, %v11048_v11 }
 0xb2f   :  { %16580 = vmatprep.subr.mxu1 %v25515_v15  ;;  %16538 = vmatpush3.msra.mxu0 %v25514_v9  ;;  %v22929_v18 = vand.u32 4294901760, %v22916_v25 }
 0xb30   :  { %16581 = vmatpush3.msra.mxu1 %v25515_v15  ;;  %16539 = vmatprep.subr.mxu0 %v25516_v50  ;;  %v25521_v15 = vld [vmem:[#allocation93_spill] sm:$0xff] }
 0xb31   :  { %16582 = vmatprep.subr.mxu1 %v25517_v58  ;;  %16540 = vmatpush3.msra.mxu0 %v25516_v50  ;;  %v11835_v23 = vsub.f32 %v22916_v25, %v22929_v18 }
 0xb32   :  { %16583 = vmatpush3.msra.mxu1 %v25517_v58  ;;  %16541 = vmatprep.subr.mxu0 %v25518_v10  ;;  %v22900_v58 = vsub.f32 %v11048_v11, %v22889_v37 }
 0xb33   :  { %16584 = vmatprep.subr.mxu1 %v25519_v3  ;;  %16542 = vmatpush3.msra.mxu0 %v25518_v10 }
 0xb34   :  { %16585 = vmatpush3.msra.mxu1 %v25519_v3  ;;  %16543 = vmatprep.subr.mxu0 %v25520_v38  ;;  %v25525_v3 = vld [vmem:[#allocation98_spill] sm:$0xff]  ;;  %v22913_v11 = vand.u32 4294901760, %v22900_v58 }
 0xb35   :  { %16586 = vmatprep.subr.mxu1 %v25521_v15  ;;  %16544 = vmatpush3.msra.mxu0 %v25520_v38 }
 0xb36   :  { %16587 = vmatpush3.msra.mxu1 %v25521_v15  ;;  %16545 = vmatprep.subr.mxu0 %v25522_v48  ;;  %v25529_v15 = vld [vmem:[#allocation105_spill] sm:$0xff]  ;;  %v11825_v39 = vsub.f32 %v22900_v58, %v22913_v11 }
 0xb37   :  { %16588 = vmatprep.subr.mxu1 %v25523_v62  ;;  %16546 = vmatpush3.msra.mxu0 %v25522_v48 }
 0xb38   :  { %16589 = vmatpush3.msra.mxu1 %v25523_v62  ;;  %16547 = vmatprep.subr.mxu0 %v25524_v41  ;;  %v25528_v62 = vld [vmem:[#allocation77_spill] sm:$0xff]  ;;  %v22939_v29 = vand.u32 4294901760, %v11825_v39  ;;  %v22951_v39 = vand.u32 4294901760, %v11835_v23 }
 0xb39   :  { %16590 = vmatprep.subr.mxu1 %v25525_v3  ;;  %16548 = vmatpush3.msra.mxu0 %v25524_v41  ;;  %v25539_v23 = vld [vmem:[#allocation49_spill] sm:$0xff] }
 0xb3a   :  { %16591 = vmatpush3.msra.mxu1 %v25525_v3  ;;  %16549 = vmatprep.subr.mxu0 %v25526_v56  ;;  %v25530_v3 = vld [vmem:[#allocation80_spill] sm:$0xff] }
 0xb3b   :  { %16592 = vmatprep.subr.mxu1 %v25527_v54  ;;  %16550 = vmatpush3.msra.mxu0 %v25526_v56 }
 0xb3c   :  { %16593 = vmatpush3.msra.mxu1 %v25527_v54  ;;  %16551 = vmatprep.subr.mxu0 %v25528_v62  ;;  %v25532_v54 = vld [vmem:[#allocation84_spill] sm:$0xff] }
 0xb3d   :  { %16594 = vmatprep.subr.mxu1 %v25529_v15  ;;  %16552 = vmatpush3.msra.mxu0 %v25528_v62 }
 0xb3e   :  { %16595 = vmatpush3.msra.mxu1 %v25529_v15  ;;  %16553 = vmatprep.subr.mxu0 %v25530_v3  ;;  %v25534_v15 = vld [vmem:[#allocation89_spill] sm:$0xff] }
 0xb3f   :  { %16596 = vmatprep.subr.mxu1 %v25531_v19  ;;  %16554 = vmatpush3.msra.mxu0 %v25530_v3 }
 0xb40   :  { %16597 = vmatpush3.msra.mxu1 %v25531_v19  ;;  %16555 = vmatprep.subr.mxu0 %v25532_v54  ;;  %v25535_v19 = vld [vmem:[#allocation92_spill] sm:$0xff] }
 0xb41   :  { %16598 = vmatprep.subr.mxu1 %v25533_v34  ;;  %16556 = vmatpush3.msra.mxu0 %v25532_v54 }
 0xb42   :  { %16599 = vmatpush3.msra.mxu1 %v25533_v34  ;;  %16600 = vmatprep.mubr.f32.mxu1 %v22889_v37  ;;  %v25536_v34 = vld [vmem:[#allocation97_spill] sm:$0xff] }
 0xb43   :  { %16557 = vmatprep.subr.mxu0 %v25534_v15  ;;  %16601 = vmatmul.mubr.f32.vlgmr.msra.gmra.mxu1 %v22902_v49 }
 0xb44   :  { %16638 = vmatprep.subr.mxu1 %v25510_v63  ;;  %16558 = vmatpush3.msra.mxu0 %v25534_v15 }
 0xb45   :  { %16639 = vmatpush3.msra.mxu1 %v25510_v63  ;;  %16559 = vmatprep.subr.mxu0 %v25535_v19 }
 0xb46   :  { %16640 = vmatprep.subr.mxu1 %v25512_v30  ;;  %16560 = vmatpush3.msra.mxu0 %v25535_v19 }
 0xb47   :  { %16641 = vmatpush3.msra.mxu1 %v25512_v30  ;;  %16670 = vmatprep.mubr.f32.mxu1 %v22913_v11 }
 0xb48   :  { %16561 = vmatprep.subr.mxu0 %v25536_v34  ;;  %16642 = vmatprep.subr.mxu1 %v25514_v9 }
 0xb49   :  { %16562 = vmatpush3.msra.mxu0 %v25536_v34  ;;  %16565 = vmatprep.mubr.f32.mxu0 %v22939_v29 }
 0xb4a   :  { %16643 = vmatpush3.msra.mxu1 %v25514_v9  ;;  %16563 = vmatprep.subr.mxu0 %v25537_v13 }
 0xb4b   :  { %16644 = vmatprep.subr.mxu1 %v25516_v50  ;;  %16564 = vmatpush3.msra.mxu0 %v25537_v13 }
 0xb4c   :  { %16645 = vmatpush3.msra.mxu1 %v25516_v50  ;;  %16566 = vmatmul.mubr.f32.vlgmr.msra.gmra.mxu0 %v22951_v39 }
 0xb4d   :  { %16603 = vmatprep.subr.mxu0 %v25538_v46  ;;  %16646 = vmatprep.subr.mxu1 %v25518_v10 }
 0xb4e   :  { %16604 = vmatpush3.msra.mxu0 %v25538_v46  ;;  %16635 = vmatprep.mubr.f32.mxu0 %v22900_v58  ;;  %v25541_v46 = vld [vmem:[#allocation56_spill] sm:$0xff] }
 0xb4f   :  { %16647 = vmatpush3.msra.mxu1 %v25518_v10  ;;  %16605 = vmatprep.subr.mxu0 %v25539_v23 }
 0xb50   :  { %16648 = vmatprep.subr.mxu1 %v25520_v38  ;;  %16606 = vmatpush3.msra.mxu0 %v25539_v23  ;;  %v25543_v23 = vld [vmem:[#allocation63_spill] sm:$0xff] }
 0xb51   :  { %16649 = vmatpush3.msra.mxu1 %v25520_v38  ;;  %16607 = vmatprep.subr.mxu0 %v25540_v1 }
 0xb52   :  { %16650 = vmatprep.subr.mxu1 %v25522_v48  ;;  %16608 = vmatpush3.msra.mxu0 %v25540_v1  ;;  %v25544_v1 = vld [vmem:[#allocation68_spill] sm:$0xff] }
 0xb53   :  { %16651 = vmatpush3.msra.mxu1 %v25522_v48  ;;  %16609 = vmatprep.subr.mxu0 %v25541_v46 }
 0xb54   :  { %16652 = vmatprep.subr.mxu1 %v25524_v41  ;;  %16610 = vmatpush3.msra.mxu0 %v25541_v46  ;;  %v25545_v46 = vld [vmem:[#allocation71_spill] sm:$0xff] }
 0xb55   :  { %16653 = vmatpush3.msra.mxu1 %v25524_v41  ;;  %16611 = vmatprep.subr.mxu0 %v25542_v26 }
 0xb56   :  { %16654 = vmatprep.subr.mxu1 %v25526_v56  ;;  %16612 = vmatpush3.msra.mxu0 %v25542_v26  ;;  %v25546_v26 = vld [vmem:[#allocation76_spill] sm:$0xff] }
 0xb57   :  { %16655 = vmatpush3.msra.mxu1 %v25526_v56  ;;  %16613 = vmatprep.subr.mxu0 %v25543_v23 }
 0xb58   :  { %16656 = vmatprep.subr.mxu1 %v25528_v62  ;;  %16614 = vmatpush3.msra.mxu0 %v25543_v23  ;;  %v25547_v23 = vld [vmem:[#allocation81_spill] sm:$0xff] }
 0xb59   :  { %16657 = vmatpush3.msra.mxu1 %v25528_v62  ;;  %16615 = vmatprep.subr.mxu0 %v25544_v1 }
 0xb5a   :  { %16658 = vmatprep.subr.mxu1 %v25530_v3  ;;  %16616 = vmatpush3.msra.mxu0 %v25544_v1  ;;  %v25548_v1 = vld [vmem:[#allocation83_spill] sm:$0xff] }
 0xb5b   :  { %16659 = vmatpush3.msra.mxu1 %v25530_v3  ;;  %16617 = vmatprep.subr.mxu0 %v25545_v46 }
 0xb5c   :  { %16660 = vmatprep.subr.mxu1 %v25532_v54  ;;  %16618 = vmatpush3.msra.mxu0 %v25545_v46  ;;  %v25549_v46 = vld [vmem:[#allocation88_spill] sm:$0xff] }
 0xb5d   :  { %16661 = vmatpush3.msra.mxu1 %v25532_v54  ;;  %16619 = vmatprep.subr.mxu0 %v25546_v26 }
 0xb5e   :  { %16662 = vmatprep.subr.mxu1 %v25534_v15  ;;  %16620 = vmatpush3.msra.mxu0 %v25546_v26  ;;  %v25550_v26 = vld [vmem:[#allocation91_spill] sm:$0xff] }
 0xb5f   :  { %16663 = vmatpush3.msra.mxu1 %v25534_v15  ;;  %16621 = vmatprep.subr.mxu0 %v25547_v23 }
 0xb60   :  { %16664 = vmatprep.subr.mxu1 %v25535_v19  ;;  %16622 = vmatpush3.msra.mxu0 %v25547_v23  ;;  %v25558_v23 = vld [vmem:[#allocation65_spill] sm:$0xff] }
 0xb61   :  { %16665 = vmatpush3.msra.mxu1 %v25535_v19  ;;  %16623 = vmatprep.subr.mxu0 %v25548_v1 }
 0xb62   :  { %16666 = vmatprep.subr.mxu1 %v25536_v34  ;;  %16624 = vmatpush3.msra.mxu0 %v25548_v1  ;;  %v25551_v1 = vld [vmem:[#allocation96_spill] sm:$0xff] }
 0xb63   :  { %16667 = vmatpush3.msra.mxu1 %v25536_v34  ;;  %16625 = vmatprep.subr.mxu0 %v25549_v46 }
 0xb64   :  { %16668 = vmatprep.subr.mxu1 %v25537_v13  ;;  %16626 = vmatpush3.msra.mxu0 %v25549_v46  ;;  %v25552_v46 = vld [vmem:[#allocation101_spill] sm:$0xff] }
 0xb65   :  { %16669 = vmatpush3.msra.mxu1 %v25537_v13  ;;  %16627 = vmatprep.subr.mxu0 %v25550_v26 }
 0xb66   :  { %16671 = vmatmul.mubr.f32.vlgmr.msra.gmra.mxu1 %v22929_v18  ;;  %16708 = vmatprep.subr.mxu1 %v25510_v63 }
 0xb67   :  { %16628 = vmatpush3.msra.mxu0 %v25550_v26  ;;  %16709 = vmatpush3.msra.mxu1 %v25510_v63  ;;  %v25553_v26 = vld [vmem:[#allocation103_spill] sm:$0xff] }
 0xb68   :  { %16740 = vmatprep.mubr.f32.mxu1 %v22889_v37  ;;  %16629 = vmatprep.subr.mxu0 %v25551_v1 }
 0xb69   :  { %16710 = vmatprep.subr.mxu1 %v25512_v30  ;;  %16630 = vmatpush3.msra.mxu0 %v25551_v1  ;;  %v25554_v1 = vld [vmem:[#allocation48_spill] sm:$0xff] }
 0xb6a   :  { %16711 = vmatpush3.msra.mxu1 %v25512_v30  ;;  %16631 = vmatprep.subr.mxu0 %v25552_v46 }
 0xb6b   :  { %16712 = vmatprep.subr.mxu1 %v25514_v9  ;;  %16632 = vmatpush3.msra.mxu0 %v25552_v46  ;;  %v25555_v46 = vld [vmem:[#allocation51_spill] sm:$0xff] }
 0xb6c   :  { %16713 = vmatpush3.msra.mxu1 %v25514_v9  ;;  %16633 = vmatprep.subr.mxu0 %v25553_v26 }
 0xb6d   :  { %16714 = vmatprep.subr.mxu1 %v25516_v50  ;;  %16634 = vmatpush3.msra.mxu0 %v25553_v26  ;;  %v25556_v26 = vld [vmem:[#allocation55_spill] sm:$0xff] }
 0xb6e   :  { %16715 = vmatpush3.msra.mxu1 %v25516_v50  ;;  %16636 = vmatmul.mubr.f32.vlgmr.msra.gmra.mxu0 %v22916_v25 }
 0xb6f   :  { %16673 = vmatprep.subr.mxu0 %v25554_v1  ;;  %16716 = vmatprep.subr.mxu1 %v25518_v10 }
 0xb70   :  { %16674 = vmatpush3.msra.mxu0 %v25554_v1  ;;  %16705 = vmatprep.mubr.f32.mxu0 %v22889_v37  ;;  %v25557_v1 = vld [vmem:[#allocation59_spill] sm:$0xff] }
 0xb71   :  { %16717 = vmatpush3.msra.mxu1 %v25518_v10  ;;  %16675 = vmatprep.subr.mxu0 %v25555_v46 }
 0xb72   :  { %16718 = vmatprep.subr.mxu1 %v25520_v38  ;;  %16676 = vmatpush3.msra.mxu0 %v25555_v46  ;;  %v25559_v46 = vld [vmem:[#allocation67_spill] sm:$0xff] }
 0xb73   :  { %16719 = vmatpush3.msra.mxu1 %v25520_v38  ;;  %16677 = vmatprep.subr.mxu0 %v25556_v26 }
 0xb74   :  { %16720 = vmatprep.subr.mxu1 %v25522_v48  ;;  %16678 = vmatpush3.msra.mxu0 %v25556_v26  ;;  %v25560_v26 = vld [vmem:[#allocation70_spill] sm:$0xff] }
 0xb75   :  { %16721 = vmatpush3.msra.mxu1 %v25522_v48  ;;  %16679 = vmatprep.subr.mxu0 %v25557_v1 }
 0xb76   :  { %16722 = vmatprep.subr.mxu1 %v25524_v41  ;;  %16680 = vmatpush3.msra.mxu0 %v25557_v1  ;;  %v25561_v1 = vld [vmem:[#allocation75_spill] sm:$0xff] }
 0xb77   :  { %16723 = vmatpush3.msra.mxu1 %v25524_v41  ;;  %16681 = vmatprep.subr.mxu0 %v25558_v23 }
 0xb78   :  { %16724 = vmatprep.subr.mxu1 %v25526_v56  ;;  %16682 = vmatpush3.msra.mxu0 %v25558_v23  ;;  %v25562_v23 = vld [vmem:[#allocation79_spill] sm:$0xff] }
 0xb79   :  { %16725 = vmatpush3.msra.mxu1 %v25526_v56  ;;  %16683 = vmatprep.subr.mxu0 %v25559_v46 }
 0xb7a   :  { %16726 = vmatprep.subr.mxu1 %v25528_v62  ;;  %16684 = vmatpush3.msra.mxu0 %v25559_v46  ;;  %v25563_v46 = vld [vmem:[#allocation85_spill] sm:$0xff] }
 0xb7b   :  { %16727 = vmatpush3.msra.mxu1 %v25528_v62  ;;  %16685 = vmatprep.subr.mxu0 %v25560_v26 }
 0xb7c   :  { %16728 = vmatprep.subr.mxu1 %v25530_v3  ;;  %16686 = vmatpush3.msra.mxu0 %v25560_v26  ;;  %v25564_v26 = vld [vmem:[#allocation87_spill] sm:$0xff] }
 0xb7d   :  { %16729 = vmatpush3.msra.mxu1 %v25530_v3  ;;  %16687 = vmatprep.subr.mxu0 %v25561_v1 }
 0xb7e   :  { %16730 = vmatprep.subr.mxu1 %v25532_v54  ;;  %16688 = vmatpush3.msra.mxu0 %v25561_v1  ;;  %v25565_v1 = vld [vmem:[#allocation90_spill] sm:$0xff] }
 0xb7f   :  { %16731 = vmatpush3.msra.mxu1 %v25532_v54  ;;  %16689 = vmatprep.subr.mxu0 %v25562_v23 }
 0xb80   :  { %16732 = vmatprep.subr.mxu1 %v25534_v15  ;;  %16690 = vmatpush3.msra.mxu0 %v25562_v23  ;;  %v25566_v23 = vld [vmem:[#allocation95_spill] sm:$0xff] }
 0xb81   :  { %16733 = vmatpush3.msra.mxu1 %v25534_v15  ;;  %16691 = vmatprep.subr.mxu0 %v25563_v46 }
 0xb82   :  { %16734 = vmatprep.subr.mxu1 %v25535_v19  ;;  %16692 = vmatpush3.msra.mxu0 %v25563_v46 }
 0xb83   :  { %16735 = vmatpush3.msra.mxu1 %v25535_v19  ;;  %16693 = vmatprep.subr.mxu0 %v25564_v26 }
 0xb84   :  { %16736 = vmatprep.subr.mxu1 %v25536_v34  ;;  %16694 = vmatpush3.msra.mxu0 %v25564_v26  ;;  %v25567_v26 = vld [vmem:[#allocation99_spill] sm:$0xff] }
 0xb85   :  { %16737 = vmatpush3.msra.mxu1 %v25536_v34  ;;  %16695 = vmatprep.subr.mxu0 %v25565_v1 }
 0xb86   :  { %16738 = vmatprep.subr.mxu1 %v25537_v13  ;;  %16696 = vmatpush3.msra.mxu0 %v25565_v1  ;;  %v25568_v1 = vld [vmem:[#allocation104_spill] sm:$0xff] }
 0xb87   :  { %16739 = vmatpush3.msra.mxu1 %v25537_v13  ;;  %16697 = vmatprep.subr.mxu0 %v25566_v23 }
 0xb88   :  { %16741 = vmatmul.mubr.f32.vlgmr.msra.gmra.mxu1 %v22902_v49  ;;  %16778 = vmatprep.subr.mxu1 %v25436_v31 }
 0xb89   :  { %16698 = vmatpush3.msra.mxu0 %v25566_v23  ;;  %16779 = vmatpush3.msra.mxu1 %v25436_v31  ;;  %v25569_v23 = vld [vmem:[#allocation106_spill] sm:$0xff]  ;;  %v25570_v31 = vld [vmem:[#allocation123_spill] sm:$0xff] }
 0xb8a   :  { %16810 = vmatprep.mubr.f32.mxu1 %v22889_v37  ;;  %16699 = vmatprep.subr.mxu0 %v25567_v26 }
 0xb8b   :  { %16780 = vmatprep.subr.mxu1 %v25437_v6  ;;  %16700 = vmatpush3.msra.mxu0 %v25567_v26 }
 0xb8c   :  { %16781 = vmatpush3.msra.mxu1 %v25437_v6  ;;  %16701 = vmatprep.subr.mxu0 %v25568_v1  ;;  %v25571_v6 = vld [vmem:[#allocation126_spill] sm:$0xff] }
 0xb8d   :  { %16782 = vmatprep.subr.mxu1 %v25439_v8  ;;  %16702 = vmatpush3.msra.mxu0 %v25568_v1 }
 0xb8e   :  { %16783 = vmatpush3.msra.mxu1 %v25439_v8  ;;  %16703 = vmatprep.subr.mxu0 %v25569_v23  ;;  %v25572_v8 = vld [vmem:[#allocation130_spill] sm:$0xff] }
 0xb8f   :  { %16784 = vmatprep.subr.mxu1 %v25441_v59  ;;  %16704 = vmatpush3.msra.mxu0 %v25569_v23 }
 0xb90   :  { %16785 = vmatpush3.msra.mxu1 %v25441_v59  ;;  %16706 = vmatmul.mubr.f32.vlgmr.msra.gmra.mxu0 %v22902_v49  ;;  %v25573_v59 = vld [vmem:[#allocation134_spill] sm:$0xff] }
 0xb91   :  { %16743 = vmatprep.subr.mxu0 %v25433_v55  ;;  %16786 = vmatprep.subr.mxu1 %v25443_v33 }
 0xb92   :  { %16744 = vmatpush3.msra.mxu0 %v25433_v55  ;;  %16775 = vmatprep.mubr.f32.mxu0 %v22939_v29  ;;  %v25607_v29 = vld [vmem:[#allocation82_spill] sm:$0xff] }
 0xb93   :  { %16787 = vmatpush3.msra.mxu1 %v25443_v33  ;;  %16745 = vmatprep.subr.mxu0 %v25435_v20  ;;  %v25574_v33 = vld [vmem:[#allocation138_spill] sm:$0xff] }
 0xb94   :  { %16788 = vmatprep.subr.mxu1 %v25445_v21  ;;  %16746 = vmatpush3.msra.mxu0 %v25435_v20 }
 0xb95   :  { %16789 = vmatpush3.msra.mxu1 %v25445_v21  ;;  %16747 = vmatprep.subr.mxu0 %v25438_v28  ;;  %v25575_v21 = vld [vmem:[#allocation142_spill] sm:$0xff] }
 0xb96   :  { %16790 = vmatprep.subr.mxu1 %v25447_v5  ;;  %16748 = vmatpush3.msra.mxu0 %v25438_v28 }
 0xb97   :  { %16791 = vmatpush3.msra.mxu1 %v25447_v5  ;;  %16749 = vmatprep.subr.mxu0 %v25440_v47  ;;  %v25576_v5 = vld [vmem:[#allocation146_spill] sm:$0xff] }
 0xb98   :  { %16792 = vmatprep.subr.mxu1 %v25449_v51  ;;  %16750 = vmatpush3.msra.mxu0 %v25440_v47 }
 0xb99   :  { %16793 = vmatpush3.msra.mxu1 %v25449_v51  ;;  %16751 = vmatprep.subr.mxu0 %v25442_v0  ;;  %v25577_v51 = vld [vmem:[#allocation150_spill] sm:$0xff] }
 0xb9a   :  { %16794 = vmatprep.subr.mxu1 %v25451_v44  ;;  %16752 = vmatpush3.msra.mxu0 %v25442_v0 }
 0xb9b   :  { %16795 = vmatpush3.msra.mxu1 %v25451_v44  ;;  %16753 = vmatprep.subr.mxu0 %v25444_v53  ;;  %v25578_v44 = vld [vmem:[#allocation154_spill] sm:$0xff] }
 0xb9c   :  { %16796 = vmatprep.subr.mxu1 %v25453_v32  ;;  %16754 = vmatpush3.msra.mxu0 %v25444_v53 }
 0xb9d   :  { %16797 = vmatpush3.msra.mxu1 %v25453_v32  ;;  %16755 = vmatprep.subr.mxu0 %v25446_v16  ;;  %v25579_v32 = vld [vmem:[#allocation158_spill] sm:$0xff] }
 0xb9e   :  { %16798 = vmatprep.subr.mxu1 %v25455_v57  ;;  %16756 = vmatpush3.msra.mxu0 %v25446_v16 }
 0xb9f   :  { %16799 = vmatpush3.msra.mxu1 %v25455_v57  ;;  %16757 = vmatprep.subr.mxu0 %v25448_v43  ;;  %v25580_v57 = vld [vmem:[#allocation162_spill] sm:$0xff] }
 0xba0   :  { %16800 = vmatprep.subr.mxu1 %v25457_v52  ;;  %16758 = vmatpush3.msra.mxu0 %v25448_v43 }
 0xba1   :  { %16801 = vmatpush3.msra.mxu1 %v25457_v52  ;;  %16759 = vmatprep.subr.mxu0 %v25450_v61  ;;  %v25581_v52 = vld [vmem:[#allocation165_spill] sm:$0xff] }
 0xba2   :  { %16802 = vmatprep.subr.mxu1 %v25459_v24  ;;  %16760 = vmatpush3.msra.mxu0 %v25450_v61 }
 0xba3   :  { %16803 = vmatpush3.msra.mxu1 %v25459_v24  ;;  %16761 = vmatprep.subr.mxu0 %v25452_v36  ;;  %v25595_v24 = vld [vmem:[#allocation54_spill] sm:$0xff] }
 0xba4   :  { %16804 = vmatprep.subr.mxu1 %v25461_v35  ;;  %16762 = vmatpush3.msra.mxu0 %v25452_v36 }
 0xba5   :  { %16805 = vmatpush3.msra.mxu1 %v25461_v35  ;;  %16763 = vmatprep.subr.mxu0 %v25454_v40  ;;  %v25597_v35 = vld [vmem:[#allocation164_spill] sm:$0xff] }
 0xba6   :  { %16806 = vmatprep.subr.mxu1 %v25463_v12  ;;  %16764 = vmatpush3.msra.mxu0 %v25454_v40 }
 0xba7   :  { %16807 = vmatpush3.msra.mxu1 %v25463_v12  ;;  %16765 = vmatprep.subr.mxu0 %v25456_v14  ;;  %v25599_v12 = vld [vmem:[#allocation167_spill] sm:$0xff] }
 0xba8   :  { %16808 = vmatprep.subr.mxu1 %v25465_v27  ;;  %16766 = vmatpush3.msra.mxu0 %v25456_v14 }
 0xba9   :  { %16809 = vmatpush3.msra.mxu1 %v25465_v27  ;;  %16767 = vmatprep.subr.mxu0 %v25458_v17  ;;  %v25601_v27 = vld [vmem:[#allocation169_spill] sm:$0xff] }
 0xbaa   :  { %16811 = vmatmul.mubr.f32.vlgmr.msra.gmra.mxu1 %v22902_v49  ;;  %16848 = vmatprep.subr.mxu1 %v25433_v55 }
 0xbab   :  { %16768 = vmatpush3.msra.mxu0 %v25458_v17  ;;  %16849 = vmatpush3.msra.mxu1 %v25433_v55 }
 0xbac   :  { %16880 = vmatprep.mubr.f32.mxu1 %v22913_v11  ;;  %16769 = vmatprep.subr.mxu0 %v25460_v4  ;;  %v25612_v11 = vld [vmem:[#allocation102_spill] sm:$0xff] }
 0xbad   :  { %16850 = vmatprep.subr.mxu1 %v25435_v20  ;;  %16770 = vmatpush3.msra.mxu0 %v25460_v4 }
 0xbae   :  { %16851 = vmatpush3.msra.mxu1 %v25435_v20  ;;  %16771 = vmatprep.subr.mxu0 %v25462_v7 }
 0xbaf   :  { %16852 = vmatprep.subr.mxu1 %v25438_v28  ;;  %16772 = vmatpush3.msra.mxu0 %v25462_v7 }
 0xbb0   :  { %16853 = vmatpush3.msra.mxu1 %v25438_v28  ;;  %16773 = vmatprep.subr.mxu0 %v25464_v60 }
 0xbb1   :  { %16854 = vmatprep.subr.mxu1 %v25440_v47  ;;  %16774 = vmatpush3.msra.mxu0 %v25464_v60 }
 0xbb2   :  { %16855 = vmatpush3.msra.mxu1 %v25440_v47  ;;  %16776 = vmatmul.mubr.f32.vlgmr.msra.gmra.mxu0 %v22951_v39  ;;  %v25613_v39 = vld [vmem:[#allocation105_spill] sm:$0xff] }
 0xbb3   :  { %16813 = vmatprep.subr.mxu0 %v25466_v2  ;;  %16856 = vmatprep.subr.mxu1 %v25442_v0 }
 0xbb4   :  { %16814 = vmatpush3.msra.mxu0 %v25466_v2  ;;  %16845 = vmatprep.mubr.f32.mxu0 %v22900_v58  ;;  %v25602_v2 = vld [vmem:[#allocation66_spill] sm:$0xff]  ;;  %v25603_v58 = vld [vmem:[#allocation73_spill] sm:$0xff] }
 0xbb5   :  { %16857 = vmatpush3.msra.mxu1 %v25442_v0  ;;  %16815 = vmatprep.subr.mxu0 %v25475_v42 }
 0xbb6   :  { %16858 = vmatprep.subr.mxu1 %v25444_v53  ;;  %16816 = vmatpush3.msra.mxu0 %v25475_v42  ;;  %v25604_v42 = vld [vmem:[#allocation203_spill] sm:$0xff] }
 0xbb7   :  { %16859 = vmatpush3.msra.mxu1 %v25444_v53  ;;  %16817 = vmatprep.subr.mxu0 %v25476_v22 }
 0xbb8   :  { %16860 = vmatprep.subr.mxu1 %v25446_v16  ;;  %16818 = vmatpush3.msra.mxu0 %v25476_v22  ;;  %v25605_v22 = vld [vmem:[#allocation74_spill] sm:$0xff] }
 0xbb9   :  { %16861 = vmatpush3.msra.mxu1 %v25446_v16  ;;  %16819 = vmatprep.subr.mxu0 %v25477_v45 }
 0xbba   :  { %16862 = vmatprep.subr.mxu1 %v25448_v43  ;;  %16820 = vmatpush3.msra.mxu0 %v25477_v45  ;;  %v25606_v45 = vld [vmem:[#allocation78_spill] sm:$0xff] }
 0xbbb   :  { %16863 = vmatpush3.msra.mxu1 %v25448_v43  ;;  %16821 = vmatprep.subr.mxu0 %v25570_v31 }
 0xbbc   :  { %16864 = vmatprep.subr.mxu1 %v25450_v61  ;;  %16822 = vmatpush3.msra.mxu0 %v25570_v31  ;;  %v25614_v31 = vld [vmem:[#allocation107_spill] sm:$0xff] }
 0xbbd   :  { %16865 = vmatpush3.msra.mxu1 %v25450_v61  ;;  %16823 = vmatprep.subr.mxu0 %v25571_v6 }
 0xbbe   :  { %16866 = vmatprep.subr.mxu1 %v25452_v36  ;;  %16824 = vmatpush3.msra.mxu0 %v25571_v6  ;;  %v25615_v6 = vld [vmem:[#allocation108_spill] sm:$0xff] }
 0xbbf   :  { %16867 = vmatpush3.msra.mxu1 %v25452_v36  ;;  %16825 = vmatprep.subr.mxu0 %v25572_v8 }
 0xbc0   :  { %16868 = vmatprep.subr.mxu1 %v25454_v40  ;;  %16826 = vmatpush3.msra.mxu0 %v25572_v8  ;;  %v25616_v8 = vld [vmem:[#allocation241_spill] sm:$0xff] }
 0xbc1   :  { %16869 = vmatpush3.msra.mxu1 %v25454_v40  ;;  %16827 = vmatprep.subr.mxu0 %v25573_v59 }
 0xbc2   :  { %16870 = vmatprep.subr.mxu1 %v25456_v14  ;;  %16828 = vmatpush3.msra.mxu0 %v25573_v59  ;;  %v25617_v59 = vld [vmem:[#allocation242_spill] sm:$0xff] }
 0xbc3   :  { %16871 = vmatpush3.msra.mxu1 %v25456_v14  ;;  %16829 = vmatprep.subr.mxu0 %v25574_v33 }
 0xbc4   :  { %16872 = vmatprep.subr.mxu1 %v25458_v17  ;;  %16830 = vmatpush3.msra.mxu0 %v25574_v33  ;;  %v25618_v33 = vld [vmem:[#allocation200_spill] sm:$0xff] }
 0xbc5   :  { %16873 = vmatpush3.msra.mxu1 %v25458_v17  ;;  %16831 = vmatprep.subr.mxu0 %v25575_v21 }
 0xbc6   :  { %16874 = vmatprep.subr.mxu1 %v25460_v4  ;;  %16832 = vmatpush3.msra.mxu0 %v25575_v21  ;;  %v25619_v21 = vld [vmem:[#allocation46_spill] sm:$0xff] }
 0xbc7   :  { %16875 = vmatpush3.msra.mxu1 %v25460_v4  ;;  %16833 = vmatprep.subr.mxu0 %v25576_v5 }
 0xbc8   :  { %16876 = vmatprep.subr.mxu1 %v25462_v7  ;;  %16834 = vmatpush3.msra.mxu0 %v25576_v5  ;;  %v25620_v5 = vld [vmem:[#allocation191_spill] sm:$0xff] }
 0xbc9   :  { %16877 = vmatpush3.msra.mxu1 %v25462_v7  ;;  %16835 = vmatprep.subr.mxu0 %v25577_v51 }
 0xbca   :  { %16878 = vmatprep.subr.mxu1 %v25464_v60  ;;  %16836 = vmatpush3.msra.mxu0 %v25577_v51  ;;  %v25621_v51 = vld [vmem:[#allocation49_spill] sm:$0xff] }
 0xbcb   :  { %16879 = vmatpush3.msra.mxu1 %v25464_v60  ;;  %16837 = vmatprep.subr.mxu0 %v25578_v44 }
 0xbcc   :  { %16881 = vmatmul.mubr.f32.vlgmr.msra.gmra.mxu1 %v22929_v18  ;;  %16918 = vmatprep.subr.mxu1 %v25433_v55  ;;  %v25608_v18 = vld [vmem:[#allocation86_spill] sm:$0xff] }
 0xbcd   :  { %16838 = vmatpush3.msra.mxu0 %v25578_v44  ;;  %16919 = vmatpush3.msra.mxu1 %v25433_v55  ;;  %v25582_v55 = vld [vmem:[#allocation116_spill] sm:$0xff] }
 0xbce   :  { %16950 = vmatprep.mubr.f32.mxu1 %v22889_v37  ;;  %16839 = vmatprep.subr.mxu0 %v25579_v32  ;;  %v25622_v44 = vld [vmem:[#allocation52_spill] sm:$0xff] }
 0xbcf   :  { %16920 = vmatprep.subr.mxu1 %v25435_v20  ;;  %16840 = vmatpush3.msra.mxu0 %v25579_v32  ;;  %v25623_v32 = vld [vmem:[#allocation56_spill] sm:$0xff] }
 0xbd0   :  { %16921 = vmatpush3.msra.mxu1 %v25435_v20  ;;  %16841 = vmatprep.subr.mxu0 %v25580_v57  ;;  %v25583_v20 = vld [vmem:[#allocation119_spill] sm:$0xff] }
 0xbd1   :  { %16922 = vmatprep.subr.mxu1 %v25438_v28  ;;  %16842 = vmatpush3.msra.mxu0 %v25580_v57  ;;  %v25624_v57 = vld [vmem:[#allocation61_spill] sm:$0xff] }
 0xbd2   :  { %16923 = vmatpush3.msra.mxu1 %v25438_v28  ;;  %16843 = vmatprep.subr.mxu0 %v25581_v52  ;;  %v25584_v28 = vld [vmem:[#allocation122_spill] sm:$0xff] }
 0xbd3   :  { %16924 = vmatprep.subr.mxu1 %v25440_v47  ;;  %16844 = vmatpush3.msra.mxu0 %v25581_v52  ;;  %v25625_v52 = vld [vmem:[#allocation63_spill] sm:$0xff] }
 0xbd4   :  { %16925 = vmatpush3.msra.mxu1 %v25440_v47  ;;  %16846 = vmatmul.mubr.f32.vlgmr.msra.gmra.mxu0 %v22916_v25  ;;  %v25585_v47 = vld [vmem:[#allocation125_spill] sm:$0xff] }
 0xbd5   :  { %16883 = vmatprep.subr.mxu0 %v25582_v55  ;;  %16926 = vmatprep.subr.mxu1 %v25442_v0  ;;  %v25609_v25 = vld [vmem:[#allocation93_spill] sm:$0xff] }
 0xbd6   :  { %16884 = vmatpush3.msra.mxu0 %v25582_v55  ;;  %16915 = vmatprep.mubr.f32.mxu0 %v22889_v37  ;;  %v25611_v37 = vld [vmem:[#allocation98_spill] sm:$0xff]  ;;  %v25626_v55 = vld [vmem:[#allocation68_spill] sm:$0xff] }
 0xbd7   :  { %16927 = vmatpush3.msra.mxu1 %v25442_v0  ;;  %16885 = vmatprep.subr.mxu0 %v25583_v20  ;;  %v25586_v0 = vld [vmem:[#allocation129_spill] sm:$0xff] }
 0xbd8   :  { %16928 = vmatprep.subr.mxu1 %v25444_v53  ;;  %16886 = vmatpush3.msra.mxu0 %v25583_v20  ;;  %v25627_v20 = vld [vmem:[#allocation71_spill] sm:$0xff] }
 0xbd9   :  { %16929 = vmatpush3.msra.mxu1 %v25444_v53  ;;  %16887 = vmatprep.subr.mxu0 %v25584_v28  ;;  %v25587_v53 = vld [vmem:[#allocation133_spill] sm:$0xff] }
 0xbda   :  { %16930 = vmatprep.subr.mxu1 %v25446_v16  ;;  %16888 = vmatpush3.msra.mxu0 %v25584_v28  ;;  %v25628_v28 = vld [vmem:[#allocation76_spill] sm:$0xff] }
 0xbdb   :  { %16931 = vmatpush3.msra.mxu1 %v25446_v16  ;;  %16889 = vmatprep.subr.mxu0 %v25585_v47  ;;  %v25588_v16 = vld [vmem:[#allocation137_spill] sm:$0xff] }
 0xbdc   :  { %16932 = vmatprep.subr.mxu1 %v25448_v43  ;;  %16890 = vmatpush3.msra.mxu0 %v25585_v47  ;;  %v25629_v47 = vld [vmem:[#allocation81_spill] sm:$0xff] }
 0xbdd   :  { %16933 = vmatpush3.msra.mxu1 %v25448_v43  ;;  %16891 = vmatprep.subr.mxu0 %v25586_v0  ;;  %v25589_v43 = vld [vmem:[#allocation141_spill] sm:$0xff] }
 0xbde   :  { %16934 = vmatprep.subr.mxu1 %v25450_v61  ;;  %16892 = vmatpush3.msra.mxu0 %v25586_v0  ;;  %v25630_v0 = vld [vmem:[#allocation83_spill] sm:$0xff] }
 0xbdf   :  { %16935 = vmatpush3.msra.mxu1 %v25450_v61  ;;  %16893 = vmatprep.subr.mxu0 %v25587_v53  ;;  %v25590_v61 = vld [vmem:[#allocation145_spill] sm:$0xff] }
 0xbe0   :  { %16936 = vmatprep.subr.mxu1 %v25452_v36  ;;  %16894 = vmatpush3.msra.mxu0 %v25587_v53  ;;  %v23409_v53 = vpop.f32.mrf.mxu0 }
 0xbe1   :  { %16937 = vmatpush3.msra.mxu1 %v25452_v36  ;;  %16895 = vmatprep.subr.mxu0 %v25588_v16  ;;  %v25591_v36 = vld [vmem:[#allocation149_spill] sm:$0xff] }
 0xbe2   :  { %16938 = vmatprep.subr.mxu1 %v25454_v40  ;;  %16896 = vmatpush3.msra.mxu0 %v25588_v16  ;;  %v25631_v16 = vld [vmem:[#allocation88_spill] sm:$0xff] }
 0xbe3   :  { %16939 = vmatpush3.msra.mxu1 %v25454_v40  ;;  %16897 = vmatprep.subr.mxu0 %v25589_v43  ;;  %v25592_v40 = vld [vmem:[#allocation153_spill] sm:$0xff] }
 0xbe4   :  { %16940 = vmatprep.subr.mxu1 %v25456_v14  ;;  %16898 = vmatpush3.msra.mxu0 %v25589_v43  ;;  %v25632_v43 = vld [vmem:[#allocation91_spill] sm:$0xff] }
 0xbe5   :  { %16941 = vmatpush3.msra.mxu1 %v25456_v14  ;;  %16899 = vmatprep.subr.mxu0 %v25590_v61  ;;  %v25593_v14 = vld [vmem:[#allocation157_spill] sm:$0xff] }
 0xbe6   :  { %16942 = vmatprep.subr.mxu1 %v25458_v17  ;;  %16900 = vmatpush3.msra.mxu0 %v25590_v61  ;;  %v16392_v61 = vpop.f32.mrf.mxu1 }
 0xbe7   :  { %16943 = vmatpush3.msra.mxu1 %v25458_v17  ;;  %16901 = vmatprep.subr.mxu0 %v25591_v36  ;;  %v25594_v17 = vld [vmem:[#allocation161_spill] sm:$0xff] }
 0xbe8   :  { %16944 = vmatprep.subr.mxu1 %v25460_v4  ;;  %16902 = vmatpush3.msra.mxu0 %v25591_v36  ;;  %v11144_v36 = vpop.f32.mrf.mxu0 }
 0xbe9   :  { %16945 = vmatpush3.msra.mxu1 %v25460_v4  ;;  %16903 = vmatprep.subr.mxu0 %v25592_v40  ;;  %v25596_v4 = vld [vmem:[#allocation237_spill] sm:$0xff] }
 0xbea   :  { %16946 = vmatprep.subr.mxu1 %v25462_v7  ;;  %16904 = vmatpush3.msra.mxu0 %v25592_v40  ;;  %v25633_v40 = vld [vmem:[#allocation238_spill] sm:$0xff] }
 0xbeb   :  { %16947 = vmatpush3.msra.mxu1 %v25462_v7  ;;  %16905 = vmatprep.subr.mxu0 %v25593_v14  ;;  %v25598_v7 = vld [vmem:[#allocation58_spill] sm:$0xff] }
 0xbec   :  { %16948 = vmatprep.subr.mxu1 %v25464_v60  ;;  %16906 = vmatpush3.msra.mxu0 %v25593_v14  ;;  %v16427_v14 = vpop.f32.mrf.mxu0 }
 0xbed   :  { %16949 = vmatpush3.msra.mxu1 %v25464_v60  ;;  %16907 = vmatprep.subr.mxu0 %v25594_v17  ;;  %v25600_v60 = vld [vmem:[#allocation62_spill] sm:$0xff] }
 0xbee   :  { %16951 = vmatmul.mubr.f32.vlgmr.msra.gmra.mxu1 %v22902_v49  ;;  %16988 = vmatprep.subr.mxu1 %v25595_v24 }
 0xbef   :  { %16908 = vmatpush3.msra.mxu0 %v25594_v17  ;;  %16989 = vmatpush3.msra.mxu1 %v25595_v24  ;;  %v25634_v17 = vld [vmem:[#allocation96_spill] sm:$0xff]  ;;  %v11305_v24 = vpop.f32.mrf.mxu1 }
 0xbf0   :  { %17020 = vmatprep.mubr.f32.mxu1 %v25596_v4  ;;  %16909 = vmatprep.subr.mxu0 %v25597_v35 }
 0xbf1   :  { %16990 = vmatprep.subr.mxu1 %v25598_v7  ;;  %16910 = vmatpush3.msra.mxu0 %v25597_v35  ;;  %v25635_v35 = vld [vmem:[#allocation101_spill] sm:$0xff] }
 0xbf2   :  { %16991 = vmatpush3.msra.mxu1 %v25598_v7  ;;  %16911 = vmatprep.subr.mxu0 %v25599_v12  ;;  %v23431_v7 = vpop.f32.mrf.mxu1 }
 0xbf3   :  { %16992 = vmatprep.subr.mxu1 %v25600_v60  ;;  %16912 = vmatpush3.msra.mxu0 %v25599_v12  ;;  %v25636_v12 = vld [vmem:[#allocation103_spill] sm:$0xff] }
 0xbf4   :  { %16993 = vmatpush3.msra.mxu1 %v25600_v60  ;;  %16913 = vmatprep.subr.mxu0 %v25601_v27 }
 0xbf5   :  { %16994 = vmatprep.subr.mxu1 %v25602_v2  ;;  %16914 = vmatpush3.msra.mxu0 %v25601_v27  ;;  %v25638_v27 = vld [vmem:[#allocation48_spill] sm:$0xff] }
 0xbf6   :  { %16995 = vmatpush3.msra.mxu1 %v25602_v2  ;;  %16916 = vmatmul.mubr.f32.vlgmr.msra.gmra.mxu0 %v22902_v49  ;;  %v25610_v49 = vld [vmem:[#allocation94_spill] sm:$0xff]  ;;  %v11511_v2 = vpop.f32.mrf.mxu1 }
 0xbf7   :  { %16953 = vmatprep.subr.mxu0 %v25510_v63  ;;  %16996 = vmatprep.subr.mxu1 %v25603_v58 }
 0xbf8   :  { %16954 = vmatpush3.msra.mxu0 %v25510_v63  ;;  %16985 = vmatprep.mubr.f32.mxu0 %v25604_v42 }
 0xbf9   :  { %16997 = vmatpush3.msra.mxu1 %v25603_v58  ;;  %16955 = vmatprep.subr.mxu0 %v25512_v30  ;;  %v23447_v58 = vpop.f32.mrf.mxu1 }
 0xbfa   :  { %16998 = vmatprep.subr.mxu1 %v25605_v22  ;;  %16956 = vmatpush3.msra.mxu0 %v25512_v30 }
 0xbfb   :  { %16999 = vmatpush3.msra.mxu1 %v25605_v22  ;;  %16957 = vmatprep.subr.mxu0 %v25514_v9 }
 0xbfc   :  { %17000 = vmatprep.subr.mxu1 %v25606_v45  ;;  %16958 = vmatpush3.msra.mxu0 %v25514_v9 }
 0xbfd   :  { %17001 = vmatpush3.msra.mxu1 %v25606_v45  ;;  %16959 = vmatprep.subr.mxu0 %v25516_v50 }
 0xbfe   :  { %17002 = vmatprep.subr.mxu1 %v25607_v29  ;;  %16960 = vmatpush3.msra.mxu0 %v25516_v50 }
 0xbff   :  { %17003 = vmatpush3.msra.mxu1 %v25607_v29  ;;  %16961 = vmatprep.subr.mxu0 %v25518_v10 }
 0xc00   :  { %17004 = vmatprep.subr.mxu1 %v25608_v18  ;;  %16962 = vmatpush3.msra.mxu0 %v25518_v10 }
 0xc01   :  { %17005 = vmatpush3.msra.mxu1 %v25608_v18  ;;  %16963 = vmatprep.subr.mxu0 %v25520_v38 }
 0xc02   :  { %17006 = vmatprep.subr.mxu1 %v25609_v25  ;;  %16964 = vmatpush3.msra.mxu0 %v25520_v38 }
 0xc03   :  { %17007 = vmatpush3.msra.mxu1 %v25609_v25  ;;  %16965 = vmatprep.subr.mxu0 %v25522_v48  ;;  %v11312_v25 = vadd.f32 %v16392_v61, %v23409_v53 }
 0xc04   :  { %17008 = vmatprep.subr.mxu1 %v25610_v49  ;;  %16966 = vmatpush3.msra.mxu0 %v25522_v48 }
 0xc05   :  { %17009 = vmatpush3.msra.mxu1 %v25610_v49  ;;  %16967 = vmatprep.subr.mxu0 %v25524_v41 }
 0xc06   :  { %17010 = vmatprep.subr.mxu1 %v25611_v37  ;;  %16968 = vmatpush3.msra.mxu0 %v25524_v41 }
 0xc07   :  { %17011 = vmatpush3.msra.mxu1 %v25611_v37  ;;  %16969 = vmatprep.subr.mxu0 %v25526_v56  ;;  %v11306_v37 = vadd.f32 %v11305_v24, %v11144_v36  ;;  %v13796_v24 = vld [vmem:[#allocation16 + $0x8] sm:$0xff] }
 0xc08   :  { %17012 = vmatprep.subr.mxu1 %v25612_v11  ;;  %16970 = vmatpush3.msra.mxu0 %v25526_v56 }
 0xc09   :  { %17013 = vmatpush3.msra.mxu1 %v25612_v11  ;;  %16971 = vmatprep.subr.mxu0 %v25528_v62 }
 0xc0a   :  { %17014 = vmatprep.subr.mxu1 %v25613_v39  ;;  %16972 = vmatpush3.msra.mxu0 %v25528_v62 }
 0xc0b   :  { %17015 = vmatpush3.msra.mxu1 %v25613_v39  ;;  %16973 = vmatprep.subr.mxu0 %v25530_v3  ;;  %v25645_v39 = vld [vmem:[#allocation75_spill] sm:$0xff] }
 0xc0c   :  { %17016 = vmatprep.subr.mxu1 %v25614_v31  ;;  %16974 = vmatpush3.msra.mxu0 %v25530_v3 }
 0xc0d   :  { %17017 = vmatpush3.msra.mxu1 %v25614_v31  ;;  %16975 = vmatprep.subr.mxu0 %v25532_v54 }
 0xc0e   :  { %17018 = vmatprep.subr.mxu1 %v25615_v6  ;;  %16976 = vmatpush3.msra.mxu0 %v25532_v54 }
 0xc0f   :  { %17019 = vmatpush3.msra.mxu1 %v25615_v6  ;;  %16977 = vmatprep.subr.mxu0 %v25534_v15 }
 0xc10   :  { %17021 = vmatmul.mubr.f32.vlgmr.msra.gmra.mxu1 %v25616_v8  ;;  %17058 = vmatprep.subr.mxu1 %v25510_v63 }
 0xc11   :  { %16978 = vmatpush3.msra.mxu0 %v25534_v15  ;;  %17059 = vmatpush3.msra.mxu1 %v25510_v63 }
 0xc12   :  { %17090 = vmatprep.mubr.f32.mxu1 %v25617_v59  ;;  %16979 = vmatprep.subr.mxu0 %v25535_v19 }
 0xc13   :  { %17060 = vmatprep.subr.mxu1 %v25512_v30  ;;  %16980 = vmatpush3.msra.mxu0 %v25535_v19 }
 0xc14   :  { %17061 = vmatpush3.msra.mxu1 %v25512_v30  ;;  %16981 = vmatprep.subr.mxu0 %v25536_v34 }
 0xc15   :  { %17062 = vmatprep.subr.mxu1 %v25514_v9  ;;  %16982 = vmatpush3.msra.mxu0 %v25536_v34 }
 0xc16   :  { %17063 = vmatpush3.msra.mxu1 %v25514_v9  ;;  %16983 = vmatprep.subr.mxu0 %v25537_v13 }
 0xc17   :  { %17064 = vmatprep.subr.mxu1 %v25516_v50  ;;  %16984 = vmatpush3.msra.mxu0 %v25537_v13 }
 0xc18   :  { %17065 = vmatpush3.msra.mxu1 %v25516_v50  ;;  %16986 = vmatmul.mubr.f32.vlgmr.msra.gmra.mxu0 %v25618_v33 }
 0xc19   :  { %17023 = vmatprep.subr.mxu0 %v25619_v21  ;;  %17066 = vmatprep.subr.mxu1 %v25518_v10 }
 0xc1a   :  { %17024 = vmatpush3.msra.mxu0 %v25619_v21  ;;  %17055 = vmatprep.mubr.f32.mxu0 %v25620_v5  ;;  %v25646_v21 = vld [vmem:[#allocation79_spill] sm:$0xff] }
 0xc1b   :  { %17067 = vmatpush3.msra.mxu1 %v25518_v10  ;;  %17025 = vmatprep.subr.mxu0 %v25621_v51 }
 0xc1c   :  { %17068 = vmatprep.subr.mxu1 %v25520_v38  ;;  %17026 = vmatpush3.msra.mxu0 %v25621_v51 }
 0xc1d   :  { %17069 = vmatpush3.msra.mxu1 %v25520_v38  ;;  %17027 = vmatprep.subr.mxu0 %v25622_v44 }
 0xc1e   :  { %17070 = vmatprep.subr.mxu1 %v25522_v48  ;;  %17028 = vmatpush3.msra.mxu0 %v25622_v44 }
 0xc1f   :  { %17071 = vmatpush3.msra.mxu1 %v25522_v48  ;;  %17029 = vmatprep.subr.mxu0 %v25623_v32 }
 0xc20   :  { %17072 = vmatprep.subr.mxu1 %v25524_v41  ;;  %17030 = vmatpush3.msra.mxu0 %v25623_v32  ;;  %v25647_v32 = vld [vmem:[#allocation87_spill] sm:$0xff] }
 0xc21   :  { %17073 = vmatpush3.msra.mxu1 %v25524_v41  ;;  %17031 = vmatprep.subr.mxu0 %v25624_v57 }
 0xc22   :  { %17074 = vmatprep.subr.mxu1 %v25526_v56  ;;  %17032 = vmatpush3.msra.mxu0 %v25624_v57 }
 0xc23   :  { %17075 = vmatpush3.msra.mxu1 %v25526_v56  ;;  %17033 = vmatprep.subr.mxu0 %v25625_v52 }
 0xc24   :  { %17076 = vmatprep.subr.mxu1 %v25528_v62  ;;  %17034 = vmatpush3.msra.mxu0 %v25625_v52 }
 0xc25   :  { %17077 = vmatpush3.msra.mxu1 %v25528_v62  ;;  %17035 = vmatprep.subr.mxu0 %v25626_v55 }
 0xc26   :  { %17078 = vmatprep.subr.mxu1 %v25530_v3  ;;  %17036 = vmatpush3.msra.mxu0 %v25626_v55 }
 0xc27   :  { %17079 = vmatpush3.msra.mxu1 %v25530_v3  ;;  %17037 = vmatprep.subr.mxu0 %v25627_v20 }
 0xc28   :  { %17080 = vmatprep.subr.mxu1 %v25532_v54  ;;  %17038 = vmatpush3.msra.mxu0 %v25627_v20  ;;  %v25648_v20 = vld [vmem:[#allocation90_spill] sm:$0xff] }
 0xc29   :  { %17081 = vmatpush3.msra.mxu1 %v25532_v54  ;;  %17039 = vmatprep.subr.mxu0 %v25628_v28 }
 0xc2a   :  { %17082 = vmatprep.subr.mxu1 %v25534_v15  ;;  %17040 = vmatpush3.msra.mxu0 %v25628_v28 }
 0xc2b   :  { %17083 = vmatpush3.msra.mxu1 %v25534_v15  ;;  %17041 = vmatprep.subr.mxu0 %v25629_v47 }
 0xc2c   :  { %17084 = vmatprep.subr.mxu1 %v25535_v19  ;;  %17042 = vmatpush3.msra.mxu0 %v25629_v47 }
 0xc2d   :  { %17085 = vmatpush3.msra.mxu1 %v25535_v19  ;;  %17043 = vmatprep.subr.mxu0 %v25630_v0 }
 0xc2e   :  { %17086 = vmatprep.subr.mxu1 %v25536_v34  ;;  %17044 = vmatpush3.msra.mxu0 %v25630_v0  ;;  %v25649_v0 = vld [vmem:[#allocation95_spill] sm:$0xff] }
 0xc2f   :  { %17087 = vmatpush3.msra.mxu1 %v25536_v34  ;;  %17045 = vmatprep.subr.mxu0 %v25631_v16 }
 0xc30   :  { %17088 = vmatprep.subr.mxu1 %v25537_v13  ;;  %17046 = vmatpush3.msra.mxu0 %v25631_v16 }
 0xc31   :  { %17089 = vmatpush3.msra.mxu1 %v25537_v13  ;;  %17047 = vmatprep.subr.mxu0 %v25632_v43 }
 0xc32   :  { %17091 = vmatmul.mubr.f32.vlgmr.msra.gmra.mxu1 %v25633_v40  ;;  %17128 = vmatprep.subr.mxu1 %v25510_v63  ;;  %v17186_v40 = vld [vmem:[#allocation15 + $0x8] sm:$0xff] }
 0xc33   :  { %17048 = vmatpush3.msra.mxu0 %v25632_v43  ;;  %17129 = vmatpush3.msra.mxu1 %v25510_v63  ;;  %v11415_v63 = vpop.f32.mrf.mxu0 }
 0xc34   :  { %17160 = vmatprep.mubr.f32.mxu1 %v25596_v4  ;;  %17049 = vmatprep.subr.mxu0 %v25634_v17 }
 0xc35   :  { %17130 = vmatprep.subr.mxu1 %v25512_v30  ;;  %17050 = vmatpush3.msra.mxu0 %v25634_v17  ;;  %v23437_v60 = vpop.f32.mrf.mxu0 }
 0xc36   :  { %17131 = vmatpush3.msra.mxu1 %v25512_v30  ;;  %17051 = vmatprep.subr.mxu0 %v25635_v35  ;;  %v25637_v30 = vld [vmem:[#allocation243_spill] sm:$0xff] }
 0xc37   :  { %17132 = vmatprep.subr.mxu1 %v25514_v9  ;;  %17052 = vmatpush3.msra.mxu0 %v25635_v35  ;;  %v11638_v42 = vpop.f32.mrf.mxu0 }
 0xc38   :  { %17133 = vmatpush3.msra.mxu1 %v25514_v9  ;;  %17053 = vmatprep.subr.mxu0 %v25636_v12  ;;  %v25639_v9 = vld [vmem:[#allocation51_spill] sm:$0xff] }
 0xc39   :  { %17134 = vmatprep.subr.mxu1 %v25516_v50  ;;  %17054 = vmatpush3.msra.mxu0 %v25636_v12  ;;  %v16567_v22 = vpop.f32.mrf.mxu0  ;;  %v23517_v12 = vstv %s23545_s0 }
 0xc3a   :  { %17135 = vmatpush3.msra.mxu1 %v25516_v50  ;;  %17056 = vmatmul.mubr.f32.vlgmr.msra.gmra.mxu0 %v25637_v30  ;;  %v25640_v50 = vld [vmem:[#allocation55_spill] sm:$0xff] }
 0xc3b   :  { %17093 = vmatprep.subr.mxu0 %v25638_v27  ;;  %17136 = vmatprep.subr.mxu1 %v25518_v10  ;;  %v11828_v29 = vpop.f32.mrf.mxu0 }
 0xc3c   :  { %17094 = vmatpush3.msra.mxu0 %v25638_v27  ;;  %17125 = vmatprep.mubr.f32.mxu0 %v25596_v4  ;;  %v23457_v4 = vpop.f32.mrf.mxu1 }
 0xc3d   :  { %17137 = vmatpush3.msra.mxu1 %v25518_v10  ;;  %17095 = vmatprep.subr.mxu0 %v25639_v9  ;;  %v25641_v10 = vld [vmem:[#allocation59_spill] sm:$0xff]  ;;  %v16637_v18 = vpop.f32.mrf.mxu0 }
 0xc3e   :  { %17138 = vmatprep.subr.mxu1 %v25520_v38  ;;  %17096 = vmatpush3.msra.mxu0 %v25639_v9  ;;  %v16602_v45 = vpop.f32.mrf.mxu1 }
 0xc3f   :  { %17139 = vmatpush3.msra.mxu1 %v25520_v38  ;;  %17097 = vmatprep.subr.mxu0 %v25640_v50  ;;  %v25642_v38 = vld [vmem:[#allocation65_spill] sm:$0xff]  ;;  %v11996_v11 = vadd.f32 %v16602_v45, %v16567_v22  ;;  %v12099_v6 = vpop.f32.mrf.mxu0 }
 0xc40   :  { %17140 = vmatprep.subr.mxu1 %v25522_v48  ;;  %17098 = vmatpush3.msra.mxu0 %v25640_v50  ;;  %v11989_v49 = vpop.f32.mrf.mxu1 }
 0xc41   :  { %17141 = vmatpush3.msra.mxu1 %v25522_v48  ;;  %17099 = vmatprep.subr.mxu0 %v25641_v10  ;;  %v25643_v48 = vld [vmem:[#allocation67_spill] sm:$0xff]  ;;  %v11990_v59 = vadd.f32 %v11989_v49, %v11828_v29  ;;  %v12107_v33 = vadd.f32 %v16637_v18, %v11996_v11 }
 0xc42   :  { %17142 = vmatprep.subr.mxu1 %v25524_v41  ;;  %17100 = vmatpush3.msra.mxu0 %v25641_v10  ;;  %v16672_v31 = vpop.f32.mrf.mxu1 }
 0xc43   :  { %17143 = vmatpush3.msra.mxu1 %v25524_v41  ;;  %17101 = vmatprep.subr.mxu0 %v25642_v38  ;;  %v25644_v41 = vld [vmem:[#allocation70_spill] sm:$0xff]  ;;  %v12100_v5 = vadd.f32 %v12099_v6, %v11990_v59  ;;  %v12204_v57 = vadd.f32 %v16672_v31, %v12107_v33 }
 0xc44   :  { %17144 = vmatprep.subr.mxu1 %v25526_v56  ;;  %17102 = vmatpush3.msra.mxu0 %v25642_v38  ;;  %v12195_v51 = vpop.f32.mrf.mxu1 }
 0xc45   :  { %17145 = vmatpush3.msra.mxu1 %v25526_v56  ;;  %17103 = vmatprep.subr.mxu0 %v25643_v48  ;;  %v11423_v56 = vadd.f32 %v16427_v14, %v11312_v25  ;;  %v12196_v28 = vadd.f32 %v12195_v51, %v12100_v5 }
 0xc46   :  { %17146 = vmatprep.subr.mxu1 %v25528_v62  ;;  %17104 = vmatpush3.msra.mxu0 %v25643_v48 }
 0xc47   :  { %17147 = vmatpush3.msra.mxu1 %v25528_v62  ;;  %17105 = vmatprep.subr.mxu0 %v25644_v41  ;;  %v11416_v62 = vadd.f32 %v11415_v63, %v11306_v37 }
 0xc48   :  { %17148 = vmatprep.subr.mxu1 %v25530_v3  ;;  %17106 = vmatpush3.msra.mxu0 %v25644_v41 }
 0xc49   :  { %17149 = vmatpush3.msra.mxu1 %v25530_v3  ;;  %17107 = vmatprep.subr.mxu0 %v25645_v39  ;;  %v11520_v3 = vadd.f32 %v23431_v7, %v11423_v56  ;;  %v11512_v44 = vadd.f32 %v11511_v2, %v11416_v62  ;;  %v17187_v7 = vld [vmem:[#allocation15] sm:$0xff] }
 0xc4a   :  { %17150 = vmatprep.subr.mxu1 %v25532_v54  ;;  %17108 = vmatpush3.msra.mxu0 %v25645_v39 }
 0xc4b   :  { %17151 = vmatpush3.msra.mxu1 %v25532_v54  ;;  %17109 = vmatprep.subr.mxu0 %v25646_v21  ;;  %v11645_v54 = vadd.f32 %v23437_v60, %v11520_v3  ;;  %v11639_v55 = vadd.f32 %v11638_v42, %v11512_v44 }
 0xc4c   :  { %17152 = vmatprep.subr.mxu1 %v25534_v15  ;;  %17110 = vmatpush3.msra.mxu0 %v25646_v21 }
 0xc4d   :  { %17153 = vmatpush3.msra.mxu1 %v25534_v15  ;;  %17111 = vmatprep.subr.mxu0 %v25563_v46  ;;  %v16742_v15 = vpop.f32.mrf.mxu1  ;;  %v11738_v47 = vadd.f32 %v23447_v58, %v11645_v54  ;;  %v11732_v43 = vadd.f32 %v23457_v4, %v11639_v55 }
 0xc4e   :  { %17154 = vmatprep.subr.mxu1 %v25535_v19  ;;  %17112 = vmatpush3.msra.mxu0 %v25563_v46 }
 0xc4f   :  { %17155 = vmatpush3.msra.mxu1 %v25535_v19  ;;  %17113 = vmatprep.subr.mxu0 %v25647_v32 }
 0xc50   :  { %17156 = vmatprep.subr.mxu1 %v25536_v34  ;;  %17114 = vmatpush3.msra.mxu0 %v25647_v32  ;;  %v16707_v52 = vpop.f32.mrf.mxu0 }
 0xc51   :  { %17157 = vmatpush3.msra.mxu1 %v25536_v34  ;;  %17115 = vmatprep.subr.mxu0 %v25648_v20  ;;  %v12329_v46 = vadd.f32 %v16707_v52, %v12204_v57  ;;  %v12415_v34 = vpop.f32.mrf.mxu1 }
 0xc52   :  { %17158 = vmatprep.subr.mxu1 %v25537_v13  ;;  %17116 = vmatpush3.msra.mxu0 %v25648_v20  ;;  %v12322_v19 = vpop.f32.mrf.mxu0 }
 0xc53   :  { %17159 = vmatpush3.msra.mxu1 %v25537_v13  ;;  %17117 = vmatprep.subr.mxu0 %v25649_v0  ;;  %v12422_v53 = vadd.f32 %v16742_v15, %v12329_v46  ;;  %v12323_v16 = vadd.f32 %v12322_v19, %v12196_v28  ;;  %v23507_v13 = vstv %s23546_s1 }
 0xc54   :  { %17161 = vmatmul.mubr.f32.vlgmr.msra.gmra.mxu1 %v25616_v8  ;;  %17118 = vmatpush3.msra.mxu0 %v25649_v0 }
 0xc55   :  { %17119 = vmatprep.subr.mxu0 %v25567_v26  ;;  %v12426_v61 = vsub.f32 %v11738_v47, %v12422_v53  ;;  %v12416_v36 = vadd.f32 %v12415_v34, %v12323_v16 }
 0xc56   :  { %17120 = vmatpush3.msra.mxu0 %v25567_v26  ;;  %v13795_v26 = vld [vmem:[#allocation16] sm:$0xff] }
 0xc57   :  { %17121 = vmatprep.subr.mxu0 %v25568_v1  ;;  %v13798_v14 = vsub.f32 %v17186_v40, %v12426_v61  ;;  %v12425_v17 = vsub.f32 %v11732_v43, %v12416_v36 }
 0xc58   :  { %17122 = vmatpush3.msra.mxu0 %v25568_v1 }
 0xc59   :  { %17123 = vmatprep.subr.mxu0 %v25569_v23  ;;  %v13801_v35 = vmul.f32 %v23507_v13, %v13798_v14  ;;  %v13797_v63 = vsub.f32 %v17187_v7, %v12425_v17 }
 0xc5a   :  { %17124 = vmatpush3.msra.mxu0 %v25569_v23 }
 0xc5b   :  { %17126 = vmatmul.mubr.f32.vlgmr.msra.gmra.mxu0 %v25616_v8  ;;  %v13800_v60 = vmul.f32 %v23507_v13, %v13797_v63  ;;  %v13803_v1 = vadd.f32 %v13801_v35, %v13796_v24 }
 0xc5d   :  { %v13802_v30 = vadd.f32 %v13800_v60, %v13795_v26  ;;  %v13806_v27 = vmul.f32 %v23517_v12, %v13803_v1 }
 0xc5f   :  { %v13805_v2 = vmul.f32 %v23517_v12, %v13802_v30  ;;  %v13808_v9 = vsub.f32 %v17186_v40, %v13806_v27 }
 0xc61   :  { %v13807_v58 = vsub.f32 %v17187_v7, %v13805_v2  ;;  %13810 = vst [vmem:[#allocation19 + $0x8] sm:$0xff] %v13808_v9 }
 0xc63   :  { %13809 = vst [vmem:[#allocation19] sm:$0xff] %v13807_v58 }
 0xc64   :  { %17381 = shalt.err (!%p17378_p7)
}
 0xc65   :  { %13836 = dma.vmem_to_hbm [thread:$0]  %s13831_s26, 256, %s23557_s12, [#allocation6], %s17426_s30, %s17426_s30, %s17427_s14   ;;  %v13812_v14 = vld [vmem:[#allocation18 + $0x8] sm:$0xff]  ;;  %v13811_v7 = vld [vmem:[#allocation18] sm:$0xff] }
 0xc66   :  { %v17188_v61 = vld [vmem:[%s23554_s9 + $0x8] sm:$0xff]  ;;  %v17189_v24 = vld [vmem:[%s23554_s9] sm:$0xff]  ;;  %s17444_s29 = smov [#allocation20]  }
 0xc67   :  { %s13842_s15 = sshll.u32 %s17444_s29, 4  ;;  %s13843_s15 = int_to_ptr.vmem [resolvable:$true] %s13842_s15 }
 0xc68   :  { %s17390_s16 = scalar_lea.vmem %s13843_s15, 256  ;;  %p17395_p9 = scmp.lt.s32.totalorder %s13843_s15, %s13843_s15 }
 0xc69   :  { %p17391_p8 = scmp.ne.s32.totalorder %s13843_s15, %s17390_s16  ;;  %p17396_p10 = scmp.lt.s32.totalorder %s17390_s16, %s17390_s16 }
 0xc6a   :  { %v16812_v8 = vpop.f32.mrf.mxu1 }
 0xc6b   :  { %p17397_p11 = por %p17396_p10, %p17395_p9 }
 0xc6c   :  { %v12675_v22 = vpop.f32.mrf.mxu1 }
 0xc6d   :  { %p17398_p12 = pnand %p17397_p11, %p17391_p8 }
 0xc72   :  { %v16777_v23 = vpop.f32.mrf.mxu0 }
 0xc73   :  { %v12682_v10 = vadd.f32 %v16812_v8, %v16777_v23 }
 0xc74   :  { %v12514_v42 = vpop.f32.mrf.mxu0 }
 0xc75   :  { %v12676_v45 = vadd.f32 %v12675_v22, %v12514_v42 }
 0xc8c   :  { %v16882_v4 = vpop.f32.mrf.mxu1 }
 0xc8e   :  { %v12881_v25 = vpop.f32.mrf.mxu1 }
 0xc94   :  { %v16847_v50 = vpop.f32.mrf.mxu0 }
 0xc95   :  { %v12793_v29 = vadd.f32 %v16847_v50, %v12682_v10 }
 0xc96   :  { %v12785_v38 = vpop.f32.mrf.mxu0 }
 0xc97   :  { %v12786_v18 = vadd.f32 %v12785_v38, %v12676_v45  ;;  %v12890_v41 = vadd.f32 %v16882_v4, %v12793_v29 }
 0xc99   :  { %v12882_v11 = vadd.f32 %v12881_v25, %v12786_v18 }
 0xcae   :  { %v16952_v49 = vpop.f32.mrf.mxu1 }
 0xcb0   :  { %v13101_v6 = vpop.f32.mrf.mxu1 }
 0xcb6   :  { %v16917_v48 = vpop.f32.mrf.mxu0 }
 0xcb7   :  { %v13015_v56 = vadd.f32 %v16917_v48, %v12890_v41 }
 0xcb8   :  { %v13008_v37 = vpop.f32.mrf.mxu0 }
 0xcb9   :  { %v13009_v31 = vadd.f32 %v13008_v37, %v12882_v11  ;;  %v13108_v62 = vadd.f32 %v16952_v49, %v13015_v56 }
 0xcbb   :  { %v13102_v3 = vadd.f32 %v13101_v6, %v13009_v31 }
 0xcd0   :  { %v17022_v59 = vpop.f32.mrf.mxu1 }
 0xcd2   :  { %v13359_v54 = vpop.f32.mrf.mxu1 }
 0xcd8   :  { %v16987_v39 = vpop.f32.mrf.mxu0 }
 0xcd9   :  { %v13209_v21 = vadd.f32 %v16987_v39, %v13108_v62 }
 0xcda   :  { %v13198_v33 = vpop.f32.mrf.mxu0 }
 0xcdb   :  { %v13199_v51 = vadd.f32 %v13198_v33, %v13102_v3  ;;  %v13366_v44 = vadd.f32 %v17022_v59, %v13209_v21 }
 0xcdd   :  { %v13360_v52 = vadd.f32 %v13359_v54, %v13199_v51 }
 0xcf2   :  { %v17092_v32 = vpop.f32.mrf.mxu1 }
 0xcf4   :  { %v13565_v20 = vpop.f32.mrf.mxu1 }
 0xcfa   :  { %v17057_v5 = vpop.f32.mrf.mxu0 }
 0xcfb   :  { %v13477_v15 = vadd.f32 %v17057_v5, %v13366_v44 }
 0xcfc   :  { %v13469_v57 = vpop.f32.mrf.mxu0 }
 0xcfd   :  { %v13470_v55 = vadd.f32 %v13469_v57, %v13360_v52  ;;  %v13574_v46 = vadd.f32 %v17092_v32, %v13477_v15 }
 0xcff   :  { %v13566_v0 = vadd.f32 %v13565_v20, %v13470_v55 }
 0xd14   :  { %v17162_v28 = vpop.f32.mrf.mxu1 }
 0xd16   :  { %v13785_v43 = vpop.f32.mrf.mxu1 }
 0xd1b   :  { %v17127_v19 = vpop.f32.mrf.mxu0 }
 0xd1c   :  { %v13699_v47 = vadd.f32 %v17127_v19, %v13574_v46 }
 0xd1d   :  { %v13692_v53 = vpop.f32.mrf.mxu0 }
 0xd1e   :  { %v13792_v16 = vadd.f32 %v17162_v28, %v13699_v47  ;;  %v13693_v34 = vadd.f32 %v13692_v53, %v13566_v0 }
 0xd20   :  { %v13814_v36 = vsub.f32 %v17188_v61, %v13792_v16  ;;  %v13786_v40 = vadd.f32 %v13785_v43, %v13693_v34 }
 0xd22   :  { %v13816_v17 = vmul.f32 %v13814_v36, %v23507_v13  ;;  %v13813_v35 = vsub.f32 %v17189_v24, %v13786_v40 }
 0xd24   :  { %v13818_v63 = vadd.f32 %v13816_v17, %v13812_v14  ;;  %v13815_v26 = vmul.f32 %v13813_v35, %v23507_v13 }
 0xd26   :  { %v13817_v60 = vadd.f32 %v13815_v26, %v13811_v7  ;;  %v13820_v1 = vmul.f32 %v13818_v63, %v23517_v12 }
 0xd28   :  { %v13819_v30 = vmul.f32 %v13817_v60, %v23517_v12  ;;  %v13822_v27 = vsub.f32 %v17188_v61, %v13820_v1 }
 0xd2a   :  { %v13821_v2 = vsub.f32 %v17189_v24, %v13819_v30  ;;  %13824 = vst [vmem:[#allocation20 + $0x8] sm:$0xff] %v13822_v27 }
 0xd2c   :  { %13823 = vst [vmem:[#allocation20] sm:$0xff] %v13821_v2 }
 0xd2d   :  { %17401 = shalt.err (!%p17398_p12)
}
 0xd2e   :  { %13848 = dma.vmem_to_hbm [thread:$0]  %s13843_s15, 256, %s23558_s13, [#allocation21], %s17426_s30, %s17426_s30, %s17427_s14  }
 0xd2f   :  { %17420 = dma.done.wait [#allocation6], 256  }
 0xd30   :  { %17421 = vsyncadd [#allocation6], 4294967040 }
 0xd31   :  { %17422 = dma.done.wait [#allocation21], 256  }
 0xd32   :  { %17423 = vsyncadd [#allocation21], 4294967040 }
 0xd33   :  { %13855 = vsyncpa [#allocation5], 1 }
 0xd34   :  { %13856 = vsyncpa [#allocation8], 1 }
 0xd35   :  { %13857 = vsyncpa [#allocation11], 1 }
 0xd36   :  { %13858 = vsyncpa [#allocation14], 1 }
 0xd37   :  { %13859 = vsyncpa [#allocation17], 1 }
 0xd38   :  { %13860 = vsyncpa [#allocation6], 1 }
 0xd39   :  { %13861 = vsyncpa [#allocation21], 1 }

</bundles_post_ra>
